<compile_context>
chip_gen: v7x
topology: tpu7x:2x2x1
jax: 0.10.0
libtpu: 0.0.40
codegen_flags: <defaults>
</compile_context>

<pallas_src>
import numpy as np

import jax
import jax.numpy as jnp
from jax import lax
from jax.experimental import pallas as pl
from jax.experimental.pallas import tpu as pltpu


# -----------------------------------------------------------------------------
# Helpers (host-side, run once)
# -----------------------------------------------------------------------------
def _pool_bins(size, out):
    """AdaptiveAvgPool2d bin edges: [floor(i*size/out), ceil((i+1)*size/out))."""
    return [((i * size) // out, -((-(i + 1) * size) // out)) for i in range(out)]


def prepare_cnn(params, H, W, NB=8):
    """One-time host prep: weight relayouts + small constant operators.

    Returns device arrays only; everything here is hoisted out of the per-call
    path (review item: don't redo relayouts / O(N^2) Python loops per step).
    """
    C1, C2, F = 32, 64, 512
    H1, W1 = H + 2, W + 2              # conv1: k=3, s=1, pad=2
    S1 = H1 * W1
    S1p = ((S1 + 7) // 8) * 8          # pad per-sample rows to a sublane multiple
    O2 = 25                            # conv2 on the pooled 3x3 map, pad=2 -> 5x5

    w1 = np.asarray(params["w1"], np.float32)    # (32, 1, 3, 3)
    b1 = np.asarray(params["b1"], np.float32)
    w2 = np.asarray(params["w2"], np.float32)    # (64, 32, 3, 3)
    b2 = np.asarray(params["b2"], np.float32)
    wfc = np.asarray(params["wfc"], np.float32)  # (512, 576)
    bfc = np.asarray(params["bfc"], np.float32)

    # conv1 weights as a (9, C1) GEMM operand; tap order (kh, kw) row-major
    # matches the im2col tap order built in cnn_forward.
    W1m = np.ascontiguousarray(w1.reshape(C1, 9).T)

    # pool1 (AdaptiveAvgPool2d 3x3 over H1 x W1): per-sample (9, S1p) operator
    # (zero weight on the S1p-S1 pad rows) ...
    q1s = np.zeros((9, S1p), np.float32)
    for pi, (hs, he) in enumerate(_pool_bins(H1, 3)):
        for pj, (ws, we) in enumerate(_pool_bins(W1, 3)):
            wgt = 1.0 / float((he - hs) * (we - ws))
            for i in range(hs, he):
                for j in range(ws, we):
                    q1s[pi * 3 + pj, i * W1 + j] = wgt
    # ... replicated block-diagonally over the FIXED batch tile (rows ordered
    # (cell s, sample n) so every per-cell row block is 8-aligned for NB=8).
    # This is O(NB^2) with NB a compile-time tile size, i.e. O(N) overall.
    Q1blk = np.zeros((9 * NB, NB * S1p), np.float32)
    for n in range(NB):
        for s in range(9):
            Q1blk[s * NB + n, n * S1p:(n + 1) * S1p] = q1s[s]

    # conv2 (3x3, pad=2 on the 3x3 pooled map): padded gather + channel GEMM
    # folded into ONE (9*C1, C2*O2) operator.  Rows (s=(ii,jj), ci),
    # cols (co, o=(oi,oj)).  K = 288 -> full MXU contraction fill.
    W2eff = np.zeros((9 * C1, C2 * O2), np.float32)
    for ii in range(3):
        for jj in range(3):
            s = ii * 3 + jj
            for oi in range(5):
                di = ii - oi + 2
                if not 0 <= di < 3:
                    continue
                for oj in range(5):
                    dj = jj - oj + 2
                    if not 0 <= dj < 3:
                        continue
                    o = oi * 5 + oj
                    # [ci, co] block for this (input cell, output position)
                    W2eff[s * C1:(s + 1) * C1, o::O2] = w2[:, :, di, dj].T
    b2full = np.repeat(b2, O2)[None, :]                      # (1, C2*O2)

    # pool2 (AdaptiveAvgPool2d 3x3 over 5x5) and fc are consecutive linear ops:
    # fold into one (C2*O2, F) operator -> single K=1600 GEMM, no z2 relayout.
    q2s = np.zeros((9, O2), np.float32)
    for pi, (hs, he) in enumerate(_pool_bins(5, 3)):
        for pj, (ws, we) in enumerate(_pool_bins(5, 3)):
            wgt = 1.0 / float((he - hs) * (we - ws))
            for oi in range(hs, he):
                for oj in range(ws, we):
                    q2s[pi * 3 + pj, oi * 5 + oj] = wgt
    Wfc3 = wfc.reshape(F, C2, 9)                             # [f, co, p]  (torch flatten order)
    Wcomb = np.einsum("po,fcp->cof", q2s, Wfc3).reshape(C2 * O2, F)

    return {
        "w1m": jnp.asarray(W1m), "b1": jnp.asarray(b1[None, :]),
        "q1blk": jnp.asarray(Q1blk), "w2eff": jnp.asarray(W2eff),
        "b2full": jnp.asarray(b2full), "wcomb": jnp.asarray(Wcomb),
        "bfc": jnp.asarray(bfc[None, :]),
    }


# -----------------------------------------------------------------------------
# The fused Pallas kernel (one batch tile of NB samples per grid step)
# -----------------------------------------------------------------------------
def _make_kernel(NB, C1):
    def kernel(p1_ref, w1_ref, b1_ref, q1_ref, w2eff_ref, b2_ref,
               wcomb_ref, bfc_ref, out_ref, zflat_ref):
        f32 = jnp.float32

        # conv1 (im2col GEMM, K=9) + bias + ReLU                  (NB*S1p, C1)
        y1 = jnp.dot(p1_ref[...], w1_ref[...], preferred_element_type=f32)
        y1 = jnp.maximum(y1 + b1_ref[...], 0.0)

        # pool1 as ONE GEMM (K = NB*S1p), rows ordered (cell, sample)  (9*NB, C1)
        z1 = jnp.dot(q1_ref[...], y1, preferred_element_type=f32)

        # flatten (cell, sample, ch) -> (sample, 9*C1) for the conv2 GEMM:
        # 9 aligned row blocks (offsets multiples of NB=8) written as 9 tiny
        # 32-lane slices of a VMEM scratch (only unaligned stores in the kernel).
        for s in range(9):
            zflat_ref[:, s * C1:(s + 1) * C1] = z1[s * NB:(s + 1) * NB, :]

        # conv2: padded gather folded into the weights -> ONE K=288 GEMM,
        # + per-channel bias + ReLU                               (NB, C2*25)
        y2 = jnp.dot(zflat_ref[...], w2eff_ref[...], preferred_element_type=f32)
        y2 = jnp.maximum(y2 + b2_ref[...], 0.0)

        # pool2 + fc folded -> ONE K=1600 GEMM, lane-dense (NB, 512) store
        out_ref[...] = (jnp.dot(y2, wcomb_ref[...], preferred_element_type=f32)
                        + bfc_ref[...])

    return kernel


# -----------------------------------------------------------------------------
# Forward pass (mirrors the PyTorch module)
# -----------------------------------------------------------------------------
def cnn_forward(x, ops):
    # x: (N, H, W)  -> torch's x.unsqueeze(1): (N, 1, H, W)
    N, H, W = x.shape
    C1 = ops["w1m"].shape[1]
    F = ops["wcomb"].shape[1]
    NB = ops["q1blk"].shape[0] // 9
    S1p = ops["q1blk"].shape[1] // NB
    K2 = ops["w2eff"].shape[0]          # 9 * C1   (=288)
    K3 = ops["w2eff"].shape[1]          # C2 * 25  (=1600)
    H1, W1 = H + 2, W + 2
    S1 = H1 * W1
    assert S1p == ((S1 + 7) // 8) * 8, "ops were prepared for a different input size"

    T = -(-N // NB)                     # number of batch tiles (grid size)
    Npad = T * NB

    x = x.astype(jnp.float32)
    if Npad != N:
        x = jnp.pad(x, ((0, Npad - N), (0, 0), (0, 0)))

    # conv1 im2col patches: (Npad*S1p, 9), rows (n, i*W1+j), 4 zero pad rows per
    # sample (ignored by the pool operator).  Built by one fused XLA op.
    xp = jnp.pad(x, ((0, 0), (2, 2), (2, 2)))
    cols = [xp[:, di:di + H1, dj:dj + W1] for di in range(3) for dj in range(3)]
    P1 = jnp.stack(cols, axis=-1).reshape(Npad, S1, 9)
    if S1p != S1:
        P1 = jnp.pad(P1, ((0, 0), (0, S1p - S1), (0, 0)))
    P1 = P1.reshape(Npad * S1p, 9)

    args = (P1, ops["w1m"], ops["b1"], ops["q1blk"], ops["w2eff"],
            ops["b2full"], ops["wcomb"], ops["bfc"])

    in_specs = [
        pl.BlockSpec((NB * S1p, 9), lambda i: (i, 0)),        # batch-tiled patches
        pl.BlockSpec(ops["w1m"].shape, lambda i: (0, 0)),     # resident operands
        pl.BlockSpec(ops["b1"].shape, lambda i: (0, 0)),
        pl.BlockSpec(ops["q1blk"].shape, lambda i: (0, 0)),
        pl.BlockSpec(ops["w2eff"].shape, lambda i: (0, 0)),
        pl.BlockSpec(ops["b2full"].shape, lambda i: (0, 0)),
        pl.BlockSpec(ops["wcomb"].shape, lambda i: (0, 0)),
        pl.BlockSpec(ops["bfc"].shape, lambda i: (0, 0)),
    ]

    flops = 2 * T * (NB * S1p * 9 * C1              # conv1 GEMM
                     + (9 * NB) * (NB * S1p) * C1   # pool1 GEMM
                     + NB * K2 * K3                 # conv2 GEMM
                     + NB * K3 * F)                 # pool2+fc GEMM
    bytes_accessed = sum(int(np.prod(a.shape)) * 4 for a in args) + Npad * F * 4

    out = pl.pallas_call(
        _make_kernel(NB, C1),
        out_shape=jax.ShapeDtypeStruct((Npad, F), jnp.float32),
        grid=(T,),
        in_specs=in_specs,
        out_specs=pl.BlockSpec((NB, F), lambda i: (i, 0)),
        scratch_shapes=[pltpu.VMEM((NB, K2), jnp.float32)],
        compiler_params=pltpu.CompilerParams(
            dimension_semantics=("parallel",),       # batch tiles -> v7x megacore
            vmem_limit_bytes=32 * 1024 * 1024),
        cost_estimate=pl.CostEstimate(flops=int(flops), transcendentals=0,
                                      bytes_accessed=int(bytes_accessed)),
    )(*args)
    return out[:N]


# -----------------------------------------------------------------------------
# Pure-JAX reference (for the in-script correctness check)
# -----------------------------------------------------------------------------
def _adaptive_avg_pool_ref(x, out=3):
    N, C, H, W = x.shape
    rows = []
    for hs, he in _pool_bins(H, out):
        cols = []
        for ws, we in _pool_bins(W, out):
            cols.append(jnp.mean(x[:, :, hs:he, ws:we], axis=(2, 3)))
        rows.append(jnp.stack(cols, axis=-1))
    return jnp.stack(rows, axis=-2)          # (N, C, out, out)


def cnn_reference(x, params):
    y = lax.conv_general_dilated(
        x[:, None, :, :].astype(jnp.float32), params["w1"],
        window_strides=(1, 1), padding=[(2, 2), (2, 2)],
        dimension_numbers=("NCHW", "OIHW", "NCHW"))
    y = jax.nn.relu(y + params["b1"][None, :, None, None])
    y = _adaptive_avg_pool_ref(y)
    y = lax.conv_general_dilated(
        y, params["w2"], window_strides=(1, 1), padding=[(2, 2), (2, 2)],
        dimension_numbers=("NCHW", "OIHW", "NCHW"))
    y = jax.nn.relu(y + params["b2"][None, :, None, None])
    y = _adaptive_avg_pool_ref(y)
    flat = y.reshape(y.shape[0], -1)
    return flat @ params["wfc"].T + params["bfc"]


# -----------------------------------------------------------------------------
# Params + main
# -----------------------------------------------------------------------------
def init_params():
    key = jax.random.PRNGKey(42)
    k = jax.random.split(key, 6)
    return {
        "w1": jax.random.normal(k[0], (32, 1, 3, 3), jnp.float32) * 0.1,
        "b1": jax.random.normal(k[1], (32,), jnp.float32) * 0.1,
        "w2": jax.random.normal(k[2], (64, 32, 3, 3), jnp.float32) * 0.05,
        "b2": jax.random.normal(k[3], (64,), jnp.float32) * 0.05,
        "wfc": jax.random.normal(k[4], (512, 576), jnp.float32) * 0.02,
        "bfc": jax.random.normal(k[5], (512,), jnp.float32) * 0.02,
    }


if __name__ == "__main__":
    params = init_params()
    x = jax.random.normal(jax.random.PRNGKey(0), (2, 16, 16), jnp.float32)

    # One-time host-side prep (weight relayouts + constant operators), hoisted
    # out of the per-call path.
    ops = prepare_cnn(params, H=16, W=16, NB=8)

    fwd = jax.jit(cnn_forward)
    out = jax.block_until_ready(fwd(x, ops))

    assert out.shape == (2, 512), out.shape
    assert out.dtype == jnp.float32, out.dtype

    # Correctness check against a pure-JAX reference of the PyTorch module.
    ref = jax.block_until_ready(cnn_reference(x, params))
    np.testing.assert_allclose(np.asarray(out), np.asarray(ref),
                               rtol=2e-3, atol=2e-3)

    print("KERNEL_OK")
</pallas_src>

<mosaic_0001>
module attributes {stable_mosaic.version = 11 : i64} {
  func.func @kernel(%arg0: i32, %arg1: memref<2624x9xf32, #tpu.memory_space<vmem>>, %arg2: memref<9x32xf32, #tpu.memory_space<vmem>>, %arg3: memref<1x32xf32, #tpu.memory_space<vmem>>, %arg4: memref<72x2624xf32, #tpu.memory_space<vmem>>, %arg5: memref<288x1600xf32, #tpu.memory_space<vmem>>, %arg6: memref<1x1600xf32, #tpu.memory_space<vmem>>, %arg7: memref<1600x512xf32, #tpu.memory_space<vmem>>, %arg8: memref<1x512xf32, #tpu.memory_space<vmem>>, %arg9: memref<8x512xf32, #tpu.memory_space<vmem>>, %arg10: memref<8x288xf32, #tpu.memory_space<vmem>>) attributes {dimension_semantics = [#tpu.dimension_semantics<parallel>], iteration_bounds = array<i64: 1>, scalar_prefetch = 0 : i64, scratch_operands = 1 : i64, tpu.core_type = #tpu.core_type<tc>, window_params = [{transform_indices = @transform_0, window_bounds = array<i64: 2624, 9>}, {pipeline_mode = #tpu.pipeline_mode<synchronous>, transform_indices = @transform_1, window_bounds = array<i64: 9, 32>}, {pipeline_mode = #tpu.pipeline_mode<synchronous>, transform_indices = @transform_2, window_bounds = array<i64: 1, 32>}, {pipeline_mode = #tpu.pipeline_mode<synchronous>, transform_indices = @transform_3, window_bounds = array<i64: 72, 2624>}, {pipeline_mode = #tpu.pipeline_mode<synchronous>, transform_indices = @transform_4, window_bounds = array<i64: 288, 1600>}, {pipeline_mode = #tpu.pipeline_mode<synchronous>, transform_indices = @transform_5, window_bounds = array<i64: 1, 1600>}, {pipeline_mode = #tpu.pipeline_mode<synchronous>, transform_indices = @transform_6, window_bounds = array<i64: 1600, 512>}, {pipeline_mode = #tpu.pipeline_mode<synchronous>, transform_indices = @transform_7, window_bounds = array<i64: 1, 512>}, {transform_indices = @transform_8, window_bounds = array<i64: 8, 512>}]} {
    %c0 = arith.constant 0 : index
    %c0_0 = arith.constant 0 : index
    %0 = vector.load %arg1[%c0, %c0_0] : memref<2624x9xf32, #tpu.memory_space<vmem>>, vector<2624x9xf32>
    %c0_1 = arith.constant 0 : index
    %c0_2 = arith.constant 0 : index
    %1 = vector.load %arg2[%c0_1, %c0_2] : memref<9x32xf32, #tpu.memory_space<vmem>>, vector<9x32xf32>
    %cst = arith.constant dense<0.000000e+00> : vector<2624x32xf32>
    %2 = tpu.matmul %0, %1, %cst {dimension_numbers = #tpu.dot_dimension_numbers<[1], [0], [0], [1], [0, 0, 1, 1], [], []>} : vector<2624x9xf32>, vector<9x32xf32>, vector<2624x32xf32> -> vector<2624x32xf32>
    %c0_3 = arith.constant 0 : index
    %c0_4 = arith.constant 0 : index
    %3 = vector.load %arg3[%c0_3, %c0_4] : memref<1x32xf32, #tpu.memory_space<vmem>>, vector<1x32xf32>
    %4 = vector.broadcast %3 : vector<1x32xf32> to vector<2624x32xf32>
    %5 = arith.addf %2, %4 : vector<2624x32xf32>
    %cst_5 = arith.constant 0.000000e+00 : f32
    %6 = vector.broadcast %cst_5 : f32 to vector<2624x32xf32>
    %7 = arith.maximumf %5, %6 : vector<2624x32xf32>
    %c0_6 = arith.constant 0 : index
    %c0_7 = arith.constant 0 : index
    %8 = vector.load %arg4[%c0_6, %c0_7] : memref<72x2624xf32, #tpu.memory_space<vmem>>, vector<72x2624xf32>
    %cst_8 = arith.constant dense<0.000000e+00> : vector<72x32xf32>
    %9 = tpu.matmul %8, %7, %cst_8 {dimension_numbers = #tpu.dot_dimension_numbers<[1], [0], [0], [1], [0, 0, 1, 1], [], []>} : vector<72x2624xf32>, vector<2624x32xf32>, vector<72x32xf32> -> vector<72x32xf32>
    %10 = vector.extract_strided_slice %9 {offsets = [0, 0], sizes = [8, 32], strides = [1, 1]} : vector<72x32xf32> to vector<8x32xf32>
    %c0_9 = arith.constant 0 : index
    %c0_10 = arith.constant 0 : index
    %11 = vector.load %arg10[%c0_9, %c0_10] : memref<8x288xf32, #tpu.memory_space<vmem>>, vector<8x32xf32>
    tpu.vector_store %arg10[%c0_9, %c0_10], %10 {strides = array<i32>} : memref<8x288xf32, #tpu.memory_space<vmem>>, vector<8x32xf32>,
    %12 = vector.extract_strided_slice %9 {offsets = [8, 0], sizes = [8, 32], strides = [1, 1]} : vector<72x32xf32> to vector<8x32xf32>
    %c0_11 = arith.constant 0 : index
    %c32 = arith.constant 32 : index
    %13 = vector.load %arg10[%c0_11, %c32] : memref<8x288xf32, #tpu.memory_space<vmem>>, vector<8x32xf32>
    tpu.vector_store %arg10[%c0_11, %c32], %12 {strides = array<i32>} : memref<8x288xf32, #tpu.memory_space<vmem>>, vector<8x32xf32>,
    %14 = vector.extract_strided_slice %9 {offsets = [16, 0], sizes = [8, 32], strides = [1, 1]} : vector<72x32xf32> to vector<8x32xf32>
    %c0_12 = arith.constant 0 : index
    %c64 = arith.constant 64 : index
    %15 = vector.load %arg10[%c0_12, %c64] : memref<8x288xf32, #tpu.memory_space<vmem>>, vector<8x32xf32>
    tpu.vector_store %arg10[%c0_12, %c64], %14 {strides = array<i32>} : memref<8x288xf32, #tpu.memory_space<vmem>>, vector<8x32xf32>,
    %16 = vector.extract_strided_slice %9 {offsets = [24, 0], sizes = [8, 32], strides = [1, 1]} : vector<72x32xf32> to vector<8x32xf32>
    %c0_13 = arith.constant 0 : index
    %c96 = arith.constant 96 : index
    %17 = vector.load %arg10[%c0_13, %c96] : memref<8x288xf32, #tpu.memory_space<vmem>>, vector<8x32xf32>
    tpu.vector_store %arg10[%c0_13, %c96], %16 {strides = array<i32>} : memref<8x288xf32, #tpu.memory_space<vmem>>, vector<8x32xf32>,
    %18 = vector.extract_strided_slice %9 {offsets = [32, 0], sizes = [8, 32], strides = [1, 1]} : vector<72x32xf32> to vector<8x32xf32>
    %c0_14 = arith.constant 0 : index
    %c128 = arith.constant 128 : index
    %19 = vector.load %arg10[%c0_14, %c128] : memref<8x288xf32, #tpu.memory_space<vmem>>, vector<8x32xf32>
    tpu.vector_store %arg10[%c0_14, %c128], %18 {strides = array<i32>} : memref<8x288xf32, #tpu.memory_space<vmem>>, vector<8x32xf32>,
    %20 = vector.extract_strided_slice %9 {offsets = [40, 0], sizes = [8, 32], strides = [1, 1]} : vector<72x32xf32> to vector<8x32xf32>
    %c0_15 = arith.constant 0 : index
    %c160 = arith.constant 160 : index
    %21 = vector.load %arg10[%c0_15, %c160] : memref<8x288xf32, #tpu.memory_space<vmem>>, vector<8x32xf32>
    tpu.vector_store %arg10[%c0_15, %c160], %20 {strides = array<i32>} : memref<8x288xf32, #tpu.memory_space<vmem>>, vector<8x32xf32>,
    %22 = vector.extract_strided_slice %9 {offsets = [48, 0], sizes = [8, 32], strides = [1, 1]} : vector<72x32xf32> to vector<8x32xf32>
    %c0_16 = arith.constant 0 : index
    %c192 = arith.constant 192 : index
    %23 = vector.load %arg10[%c0_16, %c192] : memref<8x288xf32, #tpu.memory_space<vmem>>, vector<8x32xf32>
    tpu.vector_store %arg10[%c0_16, %c192], %22 {strides = array<i32>} : memref<8x288xf32, #tpu.memory_space<vmem>>, vector<8x32xf32>,
    %24 = vector.extract_strided_slice %9 {offsets = [56, 0], sizes = [8, 32], strides = [1, 1]} : vector<72x32xf32> to vector<8x32xf32>
    %c0_17 = arith.constant 0 : index
    %c224 = arith.constant 224 : index
    %25 = vector.load %arg10[%c0_17, %c224] : memref<8x288xf32, #tpu.memory_space<vmem>>, vector<8x32xf32>
    tpu.vector_store %arg10[%c0_17, %c224], %24 {strides = array<i32>} : memref<8x288xf32, #tpu.memory_space<vmem>>, vector<8x32xf32>,
    %26 = vector.extract_strided_slice %9 {offsets = [64, 0], sizes = [8, 32], strides = [1, 1]} : vector<72x32xf32> to vector<8x32xf32>
    %c0_18 = arith.constant 0 : index
    %c256 = arith.constant 256 : index
    %27 = vector.load %arg10[%c0_18, %c256] : memref<8x288xf32, #tpu.memory_space<vmem>>, vector<8x32xf32>
    tpu.vector_store %arg10[%c0_18, %c256], %26 {strides = array<i32>} : memref<8x288xf32, #tpu.memory_space<vmem>>, vector<8x32xf32>,
    %c0_19 = arith.constant 0 : index
    %c0_20 = arith.constant 0 : index
    %28 = vector.load %arg10[%c0_19, %c0_20] : memref<8x288xf32, #tpu.memory_space<vmem>>, vector<8x288xf32>
    %c0_21 = arith.constant 0 : index
    %c0_22 = arith.constant 0 : index
    %29 = vector.load %arg5[%c0_21, %c0_22] : memref<288x1600xf32, #tpu.memory_space<vmem>>, vector<288x1600xf32>
    %cst_23 = arith.constant dense<0.000000e+00> : vector<8x1600xf32>
    %30 = tpu.matmul %28, %29, %cst_23 {dimension_numbers = #tpu.dot_dimension_numbers<[1], [0], [0], [1], [0, 0, 1, 1], [], []>} : vector<8x288xf32>, vector<288x1600xf32>, vector<8x1600xf32> -> vector<8x1600xf32>
    %c0_24 = arith.constant 0 : index
    %c0_25 = arith.constant 0 : index
    %31 = vector.load %arg6[%c0_24, %c0_25] : memref<1x1600xf32, #tpu.memory_space<vmem>>, vector<1x1600xf32>
    %32 = vector.broadcast %31 : vector<1x1600xf32> to vector<8x1600xf32>
    %33 = arith.addf %30, %32 : vector<8x1600xf32>
    %cst_26 = arith.constant 0.000000e+00 : f32
    %34 = vector.broadcast %cst_26 : f32 to vector<8x1600xf32>
    %35 = arith.maximumf %33, %34 : vector<8x1600xf32>
    %c0_27 = arith.constant 0 : index
    %c0_28 = arith.constant 0 : index
    %36 = vector.load %arg7[%c0_27, %c0_28] : memref<1600x512xf32, #tpu.memory_space<vmem>>, vector<1600x512xf32>
    %cst_29 = arith.constant dense<0.000000e+00> : vector<8x512xf32>
    %37 = tpu.matmul %35, %36, %cst_29 {dimension_numbers = #tpu.dot_dimension_numbers<[1], [0], [0], [1], [0, 0, 1, 1], [], []>} : vector<8x1600xf32>, vector<1600x512xf32>, vector<8x512xf32> -> vector<8x512xf32>
    %c0_30 = arith.constant 0 : index
    %c0_31 = arith.constant 0 : index
    %38 = vector.load %arg8[%c0_30, %c0_31] : memref<1x512xf32, #tpu.memory_space<vmem>>, vector<1x512xf32>
    %39 = vector.broadcast %38 : vector<1x512xf32> to vector<8x512xf32>
    %40 = arith.addf %37, %39 : vector<8x512xf32>
    %c0_32 = arith.constant 0 : index
    %c0_33 = arith.constant 0 : index
    %41 = vector.load %arg9[%c0_32, %c0_33] : memref<8x512xf32, #tpu.memory_space<vmem>>, vector<8x512xf32>
    tpu.vector_store %arg9[%c0_32, %c0_33], %40 {strides = array<i32>} : memref<8x512xf32, #tpu.memory_space<vmem>>, vector<8x512xf32>,
    return
  }
  func.func @transform_0(%arg0: i32) -> (i32, i32) {
    %c0_i32 = arith.constant 0 : i32
    %c0_i32_0 = arith.constant 0 : i32
    return %arg0, %c0_i32 : i32, i32
  }
  func.func @transform_1(%arg0: i32) -> (i32, i32) {
    %c0_i32 = arith.constant 0 : i32
    %c0_i32_0 = arith.constant 0 : i32
    %c0_i32_1 = arith.constant 0 : i32
    return %c0_i32, %c0_i32_0 : i32, i32
  }
  func.func @transform_2(%arg0: i32) -> (i32, i32) {
    %c0_i32 = arith.constant 0 : i32
    %c0_i32_0 = arith.constant 0 : i32
    %c0_i32_1 = arith.constant 0 : i32
    return %c0_i32, %c0_i32_0 : i32, i32
  }
  func.func @transform_3(%arg0: i32) -> (i32, i32) {
    %c0_i32 = arith.constant 0 : i32
    %c0_i32_0 = arith.constant 0 : i32
    %c0_i32_1 = arith.constant 0 : i32
    return %c0_i32, %c0_i32_0 : i32, i32
  }
  func.func @transform_4(%arg0: i32) -> (i32, i32) {
    %c0_i32 = arith.constant 0 : i32
    %c0_i32_0 = arith.constant 0 : i32
    %c0_i32_1 = arith.constant 0 : i32
    return %c0_i32, %c0_i32_0 : i32, i32
  }
  func.func @transform_5(%arg0: i32) -> (i32, i32) {
    %c0_i32 = arith.constant 0 : i32
    %c0_i32_0 = arith.constant 0 : i32
    %c0_i32_1 = arith.constant 0 : i32
    return %c0_i32, %c0_i32_0 : i32, i32
  }
  func.func @transform_6(%arg0: i32) -> (i32, i32) {
    %c0_i32 = arith.constant 0 : i32
    %c0_i32_0 = arith.constant 0 : i32
    %c0_i32_1 = arith.constant 0 : i32
    return %c0_i32, %c0_i32_0 : i32, i32
  }
  func.func @transform_7(%arg0: i32) -> (i32, i32) {
    %c0_i32 = arith.constant 0 : i32
    %c0_i32_0 = arith.constant 0 : i32
    %c0_i32_1 = arith.constant 0 : i32
    return %c0_i32, %c0_i32_0 : i32, i32
  }
  func.func @transform_8(%arg0: i32) -> (i32, i32) {
    %c0_i32 = arith.constant 0 : i32
    %c0_i32_0 = arith.constant 0 : i32
    return %arg0, %c0_i32 : i32, i32
  }
}

</mosaic_0001>

<bundles_post_ra>
// kernel: cnn_forward.1
= control target key start
LH: loop header
LB: loop body
LE: loop exit
PB: predicated region body
PF: predicated region fallthrough
CT: control target
= control target key end

     0   :  { %vm1351_vm0 = vcmask 1040384   ;;  %vm366_vm1 = vcmask 72704   ;;  %vm11777_vm2 = vmmov 1   ;;  %vm11779_vm4 = vmmov 0   ;;  %s11782_s11 = smov 64   ;;  %s18635_s1 = inlined_call_operand.vmem [shape: f32[9,32], index: 1, kind: input, shape index: {}]   ;;  %s18636_s0 = inlined_call_operand.vmem [shape: f32[2624,9], index: 0, kind: input, shape index: {}]   ;;  %s18637_s3 = inlined_call_operand.vmem [shape: f32[72,2624], index: 3, kind: input, shape index: {}]   ;;  %s18638_s2 = inlined_call_operand.vmem [shape: f32[1,32], index: 2, kind: input, shape index: {}]   ;;  %s18639_s4 = inlined_call_operand.vmem [shape: f32[288,1600], index: 4, kind: input, shape index: {}]   ;;  %s18640_s6 = inlined_call_operand.vmem [shape: f32[1600,512], index: 6, kind: input, shape index: {}]   ;;  %s18641_s5 = inlined_call_operand.vmem [shape: f32[1,1600], index: 5, kind: input, shape index: {}]   ;;  %s18642_s7 = inlined_call_operand.vmem [shape: f32[1,512], index: 7, kind: input, shape index: {}]   ;;  %s18643_s8 = inlined_call_operand.vmem [shape: f32[8,512], index: 8, kind: output, shape index: {}]  }
   0x1   :  { %v357_v0 = vld [vmem:[%s18635_s1] sm:$0xff]  ;;  %v358_v1 = vld [vmem:[%s18635_s1 + $0x8] sm:$0x1]  ;;  %vm10103_vm3 = vmpackc.low %vm1351_vm0, %vm11777_vm2  ;;  %vm3577_vm5 = vcmask 523264   ;;  %vm4815_vm6 = vcmask 261120   ;;  %vm4821_vm7 = vcmask 523520  }
   0x2   :  { %v10102_v2 = vpack.c.bf16 %v358_v1, %v357_v0  ;;  %v29_v3 = vld [vmem:[%s18636_s0] sm:$0xff]  ;;  %v30_v4 = vld [vmem:[%s18636_s0 + $0x8] sm:$0xff]  ;;  %v31_v5 = vld [vmem:[%s18636_s0 + $0x10] sm:$0xff]  ;;  %vm4827_vm8 = vcmask 785920   ;;  %vm4833_vm9 = vcmask 1048320  }
   0x3   :  { %9556 = vmatprep.mubr.msk.f32.mxu0 %vm366_vm1, %v29_v3  ;;  %v32_v6 = vld [vmem:[%s18636_s0 + $0x18] sm:$0xff]  ;;  %v33_v7 = vld [vmem:[%s18636_s0 + $0x20] sm:$0xff]  ;;  %v34_v8 = vld [vmem:[%s18636_s0 + $0x28] sm:$0xff] }
   0x4   :  { %10104 = vmatprep.subr.msk.bf16.mxu0 %vm10103_vm3, %v10102_v2  ;;  %v35_v9 = vld [vmem:[%s18636_s0 + $0x30] sm:$0xff]  ;;  %v36_v10 = vld [vmem:[%s18636_s0 + $0x38] sm:$0xff]  ;;  %v37_v11 = vld [vmem:[%s18636_s0 + $0x40] sm:$0xff] }
   0x5   :  { %10107 = vmatpush3.bf16.msk.msra.mxu0 %vm10103_vm3, %v10102_v2  ;;  %v38_v12 = vld [vmem:[%s18636_s0 + $0x48] sm:$0xff]  ;;  %v39_v13 = vld [vmem:[%s18636_s0 + $0x50] sm:$0xff]  ;;  %v40_v14 = vld [vmem:[%s18636_s0 + $0x58] sm:$0xff] }
   0x6   :  { %v41_v15 = vld [vmem:[%s18636_s0 + $0x60] sm:$0xff]  ;;  %v42_v16 = vld [vmem:[%s18636_s0 + $0x68] sm:$0xff]  ;;  %v43_v17 = vld [vmem:[%s18636_s0 + $0x70] sm:$0xff] }
   0x7   :  { %v44_v18 = vld [vmem:[%s18636_s0 + $0x78] sm:$0xff]  ;;  %v45_v19 = vld [vmem:[%s18636_s0 + $0x80] sm:$0xff]  ;;  %v46_v20 = vld [vmem:[%s18636_s0 + $0x88] sm:$0xff] }
   0x8   :  { %9557 = vmatmul.mubr.msk.f32.vlgmr.msra.gmra.mrb[0].mxu0 %vm366_vm1, %v30_v4  ;;  %v47_v21 = vld [vmem:[%s18636_s0 + $0x90] sm:$0xff]  ;;  %v48_v22 = vld [vmem:[%s18636_s0 + $0x98] sm:$0xff]  ;;  %v49_v23 = vld [vmem:[%s18636_s0 + $0xa0] sm:$0xff] }
   0x9   :  { %9559 = vmatprep.mubr.msk.f32.mxu0 %vm366_vm1, %v31_v5  ;;  %v50_v24 = vld [vmem:[%s18636_s0 + $0xa8] sm:$0xff]  ;;  %v51_v25 = vld [vmem:[%s18636_s0 + $0xb0] sm:$0xff]  ;;  %v52_v26 = vld [vmem:[%s18636_s0 + $0xb8] sm:$0xff] }
   0xa   :  { %v53_v27 = vld [vmem:[%s18636_s0 + $0xc0] sm:$0xff]  ;;  %v54_v28 = vld [vmem:[%s18636_s0 + $0xc8] sm:$0xff]  ;;  %v55_v29 = vld [vmem:[%s18636_s0 + $0xd0] sm:$0xff] }
   0xb   :  { %v56_v30 = vld [vmem:[%s18636_s0 + $0xd8] sm:$0xff]  ;;  %v57_v31 = vld [vmem:[%s18636_s0 + $0xe0] sm:$0xff]  ;;  %v58_v32 = vld [vmem:[%s18636_s0 + $0xe8] sm:$0xff] }
   0xc   :  { %9560 = vmatmul.mubr.msk.f32.gmra.mrb[2].mxu0 %vm366_vm1, %v32_v6  ;;  %v59_v33 = vld [vmem:[%s18636_s0 + $0xf0] sm:$0xff]  ;;  %v60_v34 = vld [vmem:[%s18636_s0 + $0xf8] sm:$0xff]  ;;  %v61_v35 = vld [vmem:[%s18636_s0 + $0x100] sm:$0xff] }
   0xd   :  { %9562 = vmatprep.mubr.msk.f32.mxu0 %vm366_vm1, %v33_v7  ;;  %v62_v36 = vld [vmem:[%s18636_s0 + $0x108] sm:$0xff]  ;;  %v63_v37 = vld [vmem:[%s18636_s0 + $0x110] sm:$0xff]  ;;  %v64_v38 = vld [vmem:[%s18636_s0 + $0x118] sm:$0xff] }
   0xe   :  { %v65_v39 = vld [vmem:[%s18636_s0 + $0x120] sm:$0xff]  ;;  %v66_v40 = vld [vmem:[%s18636_s0 + $0x128] sm:$0xff]  ;;  %v67_v41 = vld [vmem:[%s18636_s0 + $0x130] sm:$0xff] }
   0xf   :  { %v68_v42 = vld [vmem:[%s18636_s0 + $0x138] sm:$0xff]  ;;  %v69_v43 = vld [vmem:[%s18636_s0 + $0x140] sm:$0xff]  ;;  %v70_v44 = vld [vmem:[%s18636_s0 + $0x148] sm:$0xff] }
  0x10   :  { %9563 = vmatmul.mubr.msk.f32.gmra.mrb[4].mxu0 %vm366_vm1, %v34_v8  ;;  %v71_v45 = vld [vmem:[%s18636_s0 + $0x150] sm:$0xff]  ;;  %v72_v46 = vld [vmem:[%s18636_s0 + $0x158] sm:$0xff]  ;;  %v73_v47 = vld [vmem:[%s18636_s0 + $0x160] sm:$0xff] }
  0x11   :  { %9565 = vmatprep.mubr.msk.f32.mxu0 %vm366_vm1, %v35_v9  ;;  %v74_v48 = vld [vmem:[%s18636_s0 + $0x168] sm:$0xff]  ;;  %v75_v49 = vld [vmem:[%s18636_s0 + $0x170] sm:$0xff]  ;;  %v76_v50 = vld [vmem:[%s18636_s0 + $0x178] sm:$0xff] }
  0x12   :  { %v77_v51 = vld [vmem:[%s18636_s0 + $0x180] sm:$0xff]  ;;  %v78_v52 = vld [vmem:[%s18636_s0 + $0x188] sm:$0xff]  ;;  %v79_v53 = vld [vmem:[%s18636_s0 + $0x190] sm:$0xff] }
  0x13   :  { %v80_v54 = vld [vmem:[%s18636_s0 + $0x198] sm:$0xff]  ;;  %v81_v55 = vld [vmem:[%s18636_s0 + $0x1a0] sm:$0xff]  ;;  %v82_v56 = vld [vmem:[%s18636_s0 + $0x1a8] sm:$0xff] }
  0x14   :  { %9566 = vmatmul.mubr.msk.f32.gmra.mrb[6].mxu0 %vm366_vm1, %v36_v10  ;;  %v83_v57 = vld [vmem:[%s18636_s0 + $0x1b0] sm:$0xff]  ;;  %v84_v58 = vld [vmem:[%s18636_s0 + $0x1b8] sm:$0xff]  ;;  %v85_v59 = vld [vmem:[%s18636_s0 + $0x1c0] sm:$0xff] }
  0x15   :  { %9568 = vmatprep.mubr.msk.f32.mxu0 %vm366_vm1, %v37_v11  ;;  %v86_v60 = vld [vmem:[%s18636_s0 + $0x1c8] sm:$0xff]  ;;  %v87_v61 = vld [vmem:[%s18636_s0 + $0x1d0] sm:$0xff]  ;;  %v88_v62 = vld [vmem:[%s18636_s0 + $0x1d8] sm:$0xff] }
  0x16   :  { %v89_v63 = vld [vmem:[%s18636_s0 + $0x1e0] sm:$0xff]  ;;  %v90_v0 = vld [vmem:[%s18636_s0 + $0x1e8] sm:$0xff]  ;;  %v91_v1 = vld [vmem:[%s18636_s0 + $0x1f0] sm:$0xff] }
  0x17   :  { %v92_v2 = vld [vmem:[%s18636_s0 + $0x1f8] sm:$0xff]  ;;  %v93_v3 = vld [vmem:[%s18636_s0 + $0x200] sm:$0xff]  ;;  %v94_v4 = vld [vmem:[%s18636_s0 + $0x208] sm:$0xff] }
  0x18   :  { %9569 = vmatmul.mubr.msk.f32.gmra.mrb[8].mxu0 %vm366_vm1, %v38_v12  ;;  %v95_v5 = vld [vmem:[%s18636_s0 + $0x210] sm:$0xff]  ;;  %v96_v6 = vld [vmem:[%s18636_s0 + $0x218] sm:$0xff]  ;;  %v97_v7 = vld [vmem:[%s18636_s0 + $0x220] sm:$0xff] }
  0x19   :  { %9571 = vmatprep.mubr.msk.f32.mxu0 %vm366_vm1, %v39_v13  ;;  %v98_v8 = vld [vmem:[%s18636_s0 + $0x228] sm:$0xff]  ;;  %v99_v9 = vld [vmem:[%s18636_s0 + $0x230] sm:$0xff]  ;;  %v100_v10 = vld [vmem:[%s18636_s0 + $0x238] sm:$0xff] }
  0x1a   :  { %v101_v11 = vld [vmem:[%s18636_s0 + $0x240] sm:$0xff]  ;;  %v102_v12 = vld [vmem:[%s18636_s0 + $0x248] sm:$0xff]  ;;  %v103_v13 = vld [vmem:[%s18636_s0 + $0x250] sm:$0xff] }
  0x1c   :  { %9572 = vmatmul.mubr.msk.f32.gmra.mrb[10].mxu0 %vm366_vm1, %v40_v14  ;;  %v104_v14 = vld [vmem:[%s18636_s0 + $0x258] sm:$0xff] }
  0x1d   :  { %9574 = vmatprep.mubr.msk.f32.mxu0 %vm366_vm1, %v41_v15  ;;  %v105_v15 = vld [vmem:[%s18636_s0 + $0x260] sm:$0xff] }
  0x20   :  { %9575 = vmatmul.mubr.msk.f32.gmra.mrb[12].mxu0 %vm366_vm1, %v42_v16  ;;  %v106_v16 = vld [vmem:[%s18636_s0 + $0x268] sm:$0xff] }
  0x21   :  { %9577 = vmatprep.mubr.msk.f32.mxu0 %vm366_vm1, %v43_v17  ;;  %v107_v17 = vld [vmem:[%s18636_s0 + $0x270] sm:$0xff] }
  0x24   :  { %9578 = vmatmul.mubr.msk.f32.gmra.mrb[14].mxu0 %vm366_vm1, %v44_v18  ;;  %v108_v18 = vld [vmem:[%s18636_s0 + $0x278] sm:$0xff] }
  0x25   :  { %9580 = vmatprep.mubr.msk.f32.mxu0 %vm366_vm1, %v45_v19  ;;  %v109_v19 = vld [vmem:[%s18636_s0 + $0x280] sm:$0xff] }
  0x28   :  { %9581 = vmatmul.mubr.msk.f32.gmra.mrb[16].mxu0 %vm366_vm1, %v46_v20  ;;  %v110_v20 = vld [vmem:[%s18636_s0 + $0x288] sm:$0xff] }
  0x29   :  { %9583 = vmatprep.mubr.msk.f32.mxu0 %vm366_vm1, %v47_v21  ;;  %v111_v21 = vld [vmem:[%s18636_s0 + $0x290] sm:$0xff] }
  0x2c   :  { %9584 = vmatmul.mubr.msk.f32.gmra.mrb[18].mxu0 %vm366_vm1, %v48_v22  ;;  %v112_v22 = vld [vmem:[%s18636_s0 + $0x298] sm:$0xff] }
  0x2d   :  { %9586 = vmatprep.mubr.msk.f32.mxu0 %vm366_vm1, %v49_v23  ;;  %v113_v23 = vld [vmem:[%s18636_s0 + $0x2a0] sm:$0xff] }
  0x30   :  { %9587 = vmatmul.mubr.msk.f32.gmra.mrb[20].mxu0 %vm366_vm1, %v50_v24  ;;  %v114_v24 = vld [vmem:[%s18636_s0 + $0x2a8] sm:$0xff] }
  0x31   :  { %9589 = vmatprep.mubr.msk.f32.mxu0 %vm366_vm1, %v51_v25  ;;  %v115_v25 = vld [vmem:[%s18636_s0 + $0x2b0] sm:$0xff] }
  0x34   :  { %9590 = vmatmul.mubr.msk.f32.gmra.mrb[22].mxu0 %vm366_vm1, %v52_v26  ;;  %v116_v26 = vld [vmem:[%s18636_s0 + $0x2b8] sm:$0xff] }
  0x35   :  { %9592 = vmatprep.mubr.msk.f32.mxu0 %vm366_vm1, %v53_v27  ;;  %v117_v27 = vld [vmem:[%s18636_s0 + $0x2c0] sm:$0xff] }
  0x38   :  { %9593 = vmatmul.mubr.msk.f32.gmra.mrb[24].mxu0 %vm366_vm1, %v54_v28  ;;  %v118_v28 = vld [vmem:[%s18636_s0 + $0x2c8] sm:$0xff] }
  0x39   :  { %9595 = vmatprep.mubr.msk.f32.mxu0 %vm366_vm1, %v55_v29  ;;  %v119_v29 = vld [vmem:[%s18636_s0 + $0x2d0] sm:$0xff] }
  0x3c   :  { %9596 = vmatmul.mubr.msk.f32.gmra.mrb[26].mxu0 %vm366_vm1, %v56_v30  ;;  %v120_v30 = vld [vmem:[%s18636_s0 + $0x2d8] sm:$0xff] }
  0x3d   :  { %9598 = vmatprep.mubr.msk.f32.mxu0 %vm366_vm1, %v57_v31  ;;  %v121_v31 = vld [vmem:[%s18636_s0 + $0x2e0] sm:$0xff] }
  0x40   :  { %9599 = vmatmul.mubr.msk.f32.gmra.mrb[28].mxu0 %vm366_vm1, %v58_v32  ;;  %v122_v32 = vld [vmem:[%s18636_s0 + $0x2e8] sm:$0xff] }
  0x41   :  { %9601 = vmatprep.mubr.msk.f32.mxu0 %vm366_vm1, %v59_v33  ;;  %v123_v33 = vld [vmem:[%s18636_s0 + $0x2f0] sm:$0xff] }
  0x44   :  { %9602 = vmatmul.mubr.msk.f32.gmra.mrb[30].mxu0 %vm366_vm1, %v60_v34  ;;  %v124_v34 = vld [vmem:[%s18636_s0 + $0x2f8] sm:$0xff] }
  0x45   :  { %9604 = vmatprep.mubr.msk.f32.mxu0 %vm366_vm1, %v61_v35  ;;  %v125_v35 = vld [vmem:[%s18636_s0 + $0x300] sm:$0xff] }
  0x48   :  { %9605 = vmatmul.mubr.msk.f32.gmra.mrb[32].mxu0 %vm366_vm1, %v62_v36  ;;  %v3389_v36 = vld [vmem:[%s18637_s3 + $0x8] sm:$0xff] }
  0x49   :  { %9607 = vmatprep.mubr.msk.f32.mxu0 %vm366_vm1, %v63_v37  ;;  %3669 = vmatprep.mubr.f32.mxu1 %v3389_v36  ;;  %v126_v37 = vld [vmem:[%s18636_s0 + $0x308] sm:$0xff] }
  0x4c   :  { %9608 = vmatmul.mubr.msk.f32.gmra.mrb[34].mxu0 %vm366_vm1, %v64_v38  ;;  %v127_v38 = vld [vmem:[%s18636_s0 + $0x310] sm:$0xff] }
  0x4d   :  { %9610 = vmatprep.mubr.msk.f32.mxu0 %vm366_vm1, %v65_v39  ;;  %v128_v39 = vld [vmem:[%s18636_s0 + $0x318] sm:$0xff] }
  0x50   :  { %9611 = vmatmul.mubr.msk.f32.gmra.mrb[36].mxu0 %vm366_vm1, %v66_v40  ;;  %v129_v40 = vld [vmem:[%s18636_s0 + $0x320] sm:$0xff] }
  0x51   :  { %9613 = vmatprep.mubr.msk.f32.mxu0 %vm366_vm1, %v67_v41  ;;  %v130_v41 = vld [vmem:[%s18636_s0 + $0x328] sm:$0xff] }
  0x54   :  { %9614 = vmatmul.mubr.msk.f32.gmra.mrb[38].mxu0 %vm366_vm1, %v68_v42  ;;  %v131_v42 = vld [vmem:[%s18636_s0 + $0x330] sm:$0xff] }
  0x55   :  { %9616 = vmatprep.mubr.msk.f32.mxu0 %vm366_vm1, %v69_v43  ;;  %v132_v43 = vld [vmem:[%s18636_s0 + $0x338] sm:$0xff] }
  0x58   :  { %9617 = vmatmul.mubr.msk.f32.gmra.mrb[40].mxu0 %vm366_vm1, %v70_v44  ;;  %v133_v44 = vld [vmem:[%s18636_s0 + $0x340] sm:$0xff] }
  0x59   :  { %9619 = vmatprep.mubr.msk.f32.mxu0 %vm366_vm1, %v71_v45  ;;  %v134_v45 = vld [vmem:[%s18636_s0 + $0x348] sm:$0xff] }
  0x5c   :  { %9620 = vmatmul.mubr.msk.f32.gmra.mrb[42].mxu0 %vm366_vm1, %v72_v46  ;;  %v135_v46 = vld [vmem:[%s18636_s0 + $0x350] sm:$0xff] }
  0x5d   :  { %9622 = vmatprep.mubr.msk.f32.mxu0 %vm366_vm1, %v73_v47  ;;  %v12268_v47 = vld [vmem:[%s18638_s2] ss:$0 sm:$0xff] }
  0x60   :  { %9623 = vmatmul.mubr.msk.f32.gmra.mrb[44].mxu0 %vm366_vm1, %v74_v48  ;;  %v136_v48 = vld [vmem:[%s18636_s0 + $0x358] sm:$0xff] }
  0x61   :  { %9625 = vmatprep.mubr.msk.f32.mxu0 %vm366_vm1, %v75_v49  ;;  %v137_v49 = vld [vmem:[%s18636_s0 + $0x360] sm:$0xff] }
  0x64   :  { %9626 = vmatmul.mubr.msk.f32.gmra.mrb[46].mxu0 %vm366_vm1, %v76_v50 }
  0x65   :  { %9628 = vmatprep.mubr.msk.f32.mxu0 %vm366_vm1, %v77_v51 }
  0x68   :  { %9629 = vmatmul.mubr.msk.f32.gmra.mrb[48].mxu0 %vm366_vm1, %v78_v52 }
  0x69   :  { %9631 = vmatprep.mubr.msk.f32.mxu0 %vm366_vm1, %v79_v53 }
  0x6c   :  { %9632 = vmatmul.mubr.msk.f32.gmra.mrb[50].mxu0 %vm366_vm1, %v80_v54  ;;  %v138_v54 = vld [vmem:[%s18636_s0 + $0x368] sm:$0xff] }
  0x6d   :  { %9634 = vmatprep.mubr.msk.f32.mxu0 %vm366_vm1, %v81_v55  ;;  %v139_v55 = vld [vmem:[%s18636_s0 + $0x370] sm:$0xff] }
  0x70   :  { %9635 = vmatmul.mubr.msk.f32.gmra.mrb[52].mxu0 %vm366_vm1, %v82_v56 }
  0x71   :  { %9637 = vmatprep.mubr.msk.f32.mxu0 %vm366_vm1, %v83_v57 }
  0x74   :  { %9638 = vmatmul.mubr.msk.f32.gmra.mrb[54].mxu0 %vm366_vm1, %v84_v58 }
  0x75   :  { %9640 = vmatprep.mubr.msk.f32.mxu0 %vm366_vm1, %v85_v59 }
  0x78   :  { %9641 = vmatmul.mubr.msk.f32.gmra.mrb[56].mxu0 %vm366_vm1, %v86_v60 }
  0x79   :  { %9643 = vmatprep.mubr.msk.f32.mxu0 %vm366_vm1, %v87_v61 }
  0x7c   :  { %9644 = vmatmul.mubr.msk.f32.gmra.mrb[58].mxu0 %vm366_vm1, %v88_v62  ;;  %v140_v62 = vld [vmem:[%s18636_s0 + $0x378] sm:$0xff] }
  0x7d   :  { %9646 = vmatprep.mubr.msk.f32.mxu0 %vm366_vm1, %v89_v63 }
  0x80   :  { %9647 = vmatmul.mubr.msk.f32.gmra.mrb[60].mxu0 %vm366_vm1, %v90_v0 }
  0x81   :  { %9649 = vmatprep.mubr.msk.f32.mxu0 %vm366_vm1, %v91_v1  ;;  %v141_v1 = vld [vmem:[%s18636_s0 + $0x380] sm:$0xff] }
  0x84   :  { %9650 = vmatmul.mubr.msk.f32.gmra.mrb[62].mxu0 %vm366_vm1, %v92_v2 }
  0x85   :  { %9652 = vmatprep.mubr.msk.f32.mxu0 %vm366_vm1, %v93_v3 }
  0x88   :  { %9653 = vmatmul.mubr.msk.f32.gmra.mrb[64].mxu0 %vm366_vm1, %v94_v4 }
  0x89   :  { %9655 = vmatprep.mubr.msk.f32.mxu0 %vm366_vm1, %v95_v5 }
  0x8c   :  { %9656 = vmatmul.mubr.msk.f32.gmra.mrb[66].mxu0 %vm366_vm1, %v96_v6 }
  0x8d   :  { %9658 = vmatprep.mubr.msk.f32.mxu0 %vm366_vm1, %v97_v7  ;;  %v142_v7 = vld [vmem:[%s18636_s0 + $0x388] sm:$0xff] }
  0x90   :  { %9659 = vmatmul.mubr.msk.f32.gmra.mrb[68].mxu0 %vm366_vm1, %v98_v8 }
  0x91   :  { %9661 = vmatprep.mubr.msk.f32.mxu0 %vm366_vm1, %v99_v9 }
  0x94   :  { %9662 = vmatmul.mubr.msk.f32.gmra.mrb[70].mxu0 %vm366_vm1, %v100_v10  ;;  %v143_v10 = vld [vmem:[%s18636_s0 + $0x390] sm:$0xff] }
  0x95   :  { %9664 = vmatprep.mubr.msk.f32.mxu0 %vm366_vm1, %v101_v11 }
  0x98   :  { %9665 = vmatmul.mubr.msk.f32.gmra.mrb[72].mxu0 %vm366_vm1, %v102_v12 }
  0x99   :  { %9667 = vmatprep.mubr.msk.f32.mxu0 %vm366_vm1, %v103_v13 }
  0x9c   :  { %9668 = vmatmul.mubr.msk.f32.gmra.mrb[74].mxu0 %vm366_vm1, %v104_v14 }
  0x9d   :  { %9670 = vmatprep.mubr.msk.f32.mxu0 %vm366_vm1, %v105_v15 }
  0xa0   :  { %9671 = vmatmul.mubr.msk.f32.gmra.mrb[76].mxu0 %vm366_vm1, %v106_v16  ;;  %v144_v16 = vld [vmem:[%s18636_s0 + $0x398] sm:$0xff] }
  0xa1   :  { %9673 = vmatprep.mubr.msk.f32.mxu0 %vm366_vm1, %v107_v17 }
  0xa4   :  { %9674 = vmatmul.mubr.msk.f32.gmra.mrb[78].mxu0 %vm366_vm1, %v108_v18 }
  0xa5   :  { %9676 = vmatprep.mubr.msk.f32.mxu0 %vm366_vm1, %v109_v19  ;;  %v145_v19 = vld [vmem:[%s18636_s0 + $0x3a0] sm:$0xff] }
  0xa8   :  { %9677 = vmatmul.mubr.msk.f32.gmra.mrb[80].mxu0 %vm366_vm1, %v110_v20 }
  0xa9   :  { %9679 = vmatprep.mubr.msk.f32.mxu0 %vm366_vm1, %v111_v21 }
  0xac   :  { %9680 = vmatmul.mubr.msk.f32.gmra.mrb[82].mxu0 %vm366_vm1, %v112_v22 }
  0xad   :  { %9682 = vmatprep.mubr.msk.f32.mxu0 %vm366_vm1, %v113_v23 }
  0xb0   :  { %9683 = vmatmul.mubr.msk.f32.gmra.mrb[84].mxu0 %vm366_vm1, %v114_v24 }
  0xb1   :  { %9685 = vmatprep.mubr.msk.f32.mxu0 %vm366_vm1, %v115_v25  ;;  %v146_v25 = vld [vmem:[%s18636_s0 + $0x3a8] sm:$0xff] }
  0xb4   :  { %9686 = vmatmul.mubr.msk.f32.gmra.mrb[86].mxu0 %vm366_vm1, %v116_v26 }
  0xb5   :  { %9688 = vmatprep.mubr.msk.f32.mxu0 %vm366_vm1, %v117_v27 }
  0xb8   :  { %9689 = vmatmul.mubr.msk.f32.gmra.mrb[88].mxu0 %vm366_vm1, %v118_v28  ;;  %v147_v28 = vld [vmem:[%s18636_s0 + $0x3b0] sm:$0xff] }
  0xb9   :  { %9691 = vmatprep.mubr.msk.f32.mxu0 %vm366_vm1, %v119_v29 }
  0xbc   :  { %9692 = vmatmul.mubr.msk.f32.gmra.mrb[90].mxu0 %vm366_vm1, %v120_v30 }
  0xbd   :  { %9694 = vmatprep.mubr.msk.f32.mxu0 %vm366_vm1, %v121_v31 }
  0xc0   :  { %9695 = vmatmul.mubr.msk.f32.gmra.mrb[92].mxu0 %vm366_vm1, %v122_v32 }
  0xc1   :  { %9697 = vmatprep.mubr.msk.f32.mxu0 %vm366_vm1, %v123_v33 }
  0xc4   :  { %9698 = vmatmul.mubr.msk.f32.gmra.mrb[94].mxu0 %vm366_vm1, %v124_v34  ;;  %v148_v34 = vld [vmem:[%s18636_s0 + $0x3b8] sm:$0xff] }
  0xc5   :  { %9700 = vmatprep.mubr.msk.f32.mxu0 %vm366_vm1, %v125_v35 }
  0xc8   :  { %9701 = vmatmul.mubr.msk.f32.gmra.mrb[96].mxu0 %vm366_vm1, %v126_v37  ;;  %v149_v37 = vld [vmem:[%s18636_s0 + $0x3c0] sm:$0xff] }
  0xc9   :  { %9703 = vmatprep.mubr.msk.f32.mxu0 %vm366_vm1, %v127_v38 }
  0xcc   :  { %9704 = vmatmul.mubr.msk.f32.gmra.mrb[98].mxu0 %vm366_vm1, %v128_v39 }
  0xcd   :  { %9706 = vmatprep.mubr.msk.f32.mxu0 %vm366_vm1, %v129_v40 }
  0xd0   :  { %9707 = vmatmul.mubr.msk.f32.gmra.mrb[100].mxu0 %vm366_vm1, %v130_v41 }
  0xd1   :  { %9709 = vmatprep.mubr.msk.f32.mxu0 %vm366_vm1, %v131_v42 }
  0xd4   :  { %9710 = vmatmul.mubr.msk.f32.gmra.mrb[102].mxu0 %vm366_vm1, %v132_v43  ;;  %v150_v43 = vld [vmem:[%s18636_s0 + $0x3c8] sm:$0xff] }
  0xd5   :  { %9712 = vmatprep.mubr.msk.f32.mxu0 %vm366_vm1, %v133_v44 }
  0xd8   :  { %9713 = vmatmul.mubr.msk.f32.gmra.mrb[104].mxu0 %vm366_vm1, %v134_v45 }
  0xd9   :  { %9715 = vmatprep.mubr.msk.f32.mxu0 %vm366_vm1, %v135_v46  ;;  %v151_v46 = vld [vmem:[%s18636_s0 + $0x3d0] sm:$0xff] }
  0xdb   :  { %v9558_v50 = vpop.f32.mrb[0].mxu0 }
  0xdc   :  { %v1427_v51 = vadd.f32 %v9558_v50, %v12268_v47  ;;  %v1421_v52 = vpop.f32.mrb[1].mxu0  ;;  %9716 = vmatmul.mubr.msk.f32.gmra.mrb[106].mxu0 %vm366_vm1, %v136_v48 }
  0xdd   :  { %v1422_v53 = vadd.f32 %v12268_v47, %v1421_v52  ;;  %9718 = vmatprep.mubr.msk.f32.mxu0 %vm366_vm1, %v137_v49 }
  0xde   :  { %v3061_v56 = vmax.f32 %v1427_v51, 0.0 }
  0xdf   :  { %v9561_v57 = vpop.f32.mrb[2].mxu0  ;;  %v3060_v58 = vmax.f32 %v1422_v53, 0.0  ;;  %v152_v53 = vld [vmem:[%s18636_s0 + $0x3d8] sm:$0xff] }
  0xe0   :  { %v1437_v59 = vadd.f32 %v9561_v57, %v12268_v47  ;;  %v1431_v60 = vpop.f32.mrb[3].mxu0  ;;  %9719 = vmatmul.mubr.msk.f32.gmra.mrb[108].mxu0 %vm366_vm1, %v138_v54 }
  0xe1   :  { %v1432_v61 = vadd.f32 %v12268_v47, %v1431_v60  ;;  %9721 = vmatprep.mubr.msk.f32.mxu0 %vm366_vm1, %v139_v55  ;;  %v12294_v63 = vpack.c.bf16 %v3061_v56, %v3060_v58  ;;  %v153_v56 = vld [vmem:[%s18636_s0 + $0x3e0] sm:$0xff] }
  0xe2   :  { %v3063_v0 = vmax.f32 %v1437_v59, 0.0 }
  0xe3   :  { %v3062_v2 = vmax.f32 %v1432_v61, 0.0  ;;  %v9564_v3 = vpop.f32.mrb[4].mxu0  ;;  %v154_v61 = vld [vmem:[%s18636_s0 + $0x3e8] sm:$0xff] }
  0xe4   :  { %v1447_v4 = vadd.f32 %v9564_v3, %v12268_v47  ;;  %v1441_v5 = vpop.f32.mrb[5].mxu0  ;;  %9722 = vmatmul.mubr.msk.f32.gmra.mrb[110].mxu0 %vm366_vm1, %v140_v62 }
  0xe5   :  { %v1442_v6 = vadd.f32 %v12268_v47, %v1441_v5  ;;  %9724 = vmatprep.mubr.msk.f32.mxu0 %vm366_vm1, %v141_v1  ;;  %v12306_v8 = vpack.c.bf16 %v3063_v0, %v3062_v2  ;;  %v155_v1 = vld [vmem:[%s18636_s0 + $0x3f0] sm:$0xff] }
  0xe6   :  { %v3065_v9 = vmax.f32 %v1447_v4, 0.0 }
  0xe7   :  { %v3064_v11 = vmax.f32 %v1442_v6, 0.0  ;;  %v9567_v12 = vpop.f32.mrb[6].mxu0 }
  0xe8   :  { %v1457_v13 = vadd.f32 %v9567_v12, %v12268_v47  ;;  %v1451_v14 = vpop.f32.mrb[7].mxu0  ;;  %9725 = vmatmul.mubr.msk.f32.gmra.mrb[112].mxu0 %vm366_vm1, %v142_v7  ;;  %v157_v12 = vld [vmem:[%s18636_s0 + $0x400] sm:$0xff] }
  0xe9   :  { %v1452_v15 = vadd.f32 %v12268_v47, %v1451_v14  ;;  %9727 = vmatprep.mubr.msk.f32.mxu0 %vm366_vm1, %v143_v10  ;;  %v12318_v17 = vpack.c.bf16 %v3065_v9, %v3064_v11  ;;  %v156_v10 = vld [vmem:[%s18636_s0 + $0x3f8] sm:$0xff] }
  0xea   :  { %v3067_v18 = vmax.f32 %v1457_v13, 0.0 }
  0xeb   :  { %v3066_v20 = vmax.f32 %v1452_v15, 0.0  ;;  %v9570_v21 = vpop.f32.mrb[8].mxu0 }
  0xec   :  { %v1467_v22 = vadd.f32 %v9570_v21, %v12268_v47  ;;  %v1461_v23 = vpop.f32.mrb[9].mxu0  ;;  %9728 = vmatmul.mubr.msk.f32.gmra.mrb[114].mxu0 %vm366_vm1, %v144_v16 }
  0xed   :  { %v1462_v24 = vadd.f32 %v12268_v47, %v1461_v23  ;;  %9730 = vmatprep.mubr.msk.f32.mxu0 %vm366_vm1, %v145_v19  ;;  %v12330_v26 = vpack.c.bf16 %v3067_v18, %v3066_v20  ;;  %v158_v20 = vld [vmem:[%s18636_s0 + $0x408] sm:$0xff] }
  0xee   :  { %v3069_v27 = vmax.f32 %v1467_v22, 0.0  ;;  %v159_v22 = vld [vmem:[%s18636_s0 + $0x410] sm:$0xff] }
  0xef   :  { %v3068_v29 = vmax.f32 %v1462_v24, 0.0  ;;  %v9573_v30 = vpop.f32.mrb[10].mxu0 }
  0xf0   :  { %v1477_v31 = vadd.f32 %v9573_v30, %v12268_v47  ;;  %v1471_v32 = vpop.f32.mrb[11].mxu0  ;;  %9731 = vmatmul.mubr.msk.f32.gmra.mrb[116].mxu0 %vm366_vm1, %v146_v25 }
  0xf1   :  { %v1472_v33 = vadd.f32 %v12268_v47, %v1471_v32  ;;  %9733 = vmatprep.mubr.msk.f32.mxu0 %vm366_vm1, %v147_v28  ;;  %v12342_v35 = vpack.c.bf16 %v3069_v27, %v3068_v29  ;;  %v160_v29 = vld [vmem:[%s18636_s0 + $0x418] sm:$0xff] }
  0xf2   :  { %v3071_v36 = vmax.f32 %v1477_v31, 0.0  ;;  %v161_v31 = vld [vmem:[%s18636_s0 + $0x420] sm:$0xff] }
  0xf3   :  { %v3070_v38 = vmax.f32 %v1472_v33, 0.0  ;;  %v9576_v39 = vpop.f32.mrb[12].mxu0 }
  0xf4   :  { %v1487_v40 = vadd.f32 %v9576_v39, %v12268_v47  ;;  %v1481_v41 = vpop.f32.mrb[13].mxu0  ;;  %9734 = vmatmul.mubr.msk.f32.gmra.mrb[118].mxu0 %vm366_vm1, %v148_v34 }
  0xf5   :  { %v1482_v42 = vadd.f32 %v12268_v47, %v1481_v41  ;;  %9736 = vmatprep.mubr.msk.f32.mxu0 %vm366_vm1, %v149_v37  ;;  %v12354_v44 = vpack.c.bf16 %v3071_v36, %v3070_v38  ;;  %v162_v38 = vld [vmem:[%s18636_s0 + $0x428] sm:$0xff] }
  0xf6   :  { %v3073_v45 = vmax.f32 %v1487_v40, 0.0  ;;  %v163_v40 = vld [vmem:[%s18636_s0 + $0x430] sm:$0xff] }
  0xf7   :  { %v3072_v48 = vmax.f32 %v1482_v42, 0.0  ;;  %v9579_v49 = vpop.f32.mrb[14].mxu0 }
  0xf8   :  { %v1497_v50 = vadd.f32 %v9579_v49, %v12268_v47  ;;  %v1491_v51 = vpop.f32.mrb[15].mxu0  ;;  %9737 = vmatmul.mubr.msk.f32.gmra.mrb[120].mxu0 %vm366_vm1, %v150_v43 }
  0xf9   :  { %v1492_v52 = vadd.f32 %v12268_v47, %v1491_v51  ;;  %9739 = vmatprep.mubr.msk.f32.mxu0 %vm366_vm1, %v151_v46  ;;  %v12366_v54 = vpack.c.bf16 %v3073_v45, %v3072_v48  ;;  %v164_v48 = vld [vmem:[%s18636_s0 + $0x438] sm:$0xff] }
  0xfa   :  { %v3075_v55 = vmax.f32 %v1497_v50, 0.0  ;;  %v165_v50 = vld [vmem:[%s18636_s0 + $0x440] sm:$0xff] }
  0xfb   :  { %v3074_v57 = vmax.f32 %v1492_v52, 0.0  ;;  %v9582_v58 = vpop.f32.mrb[16].mxu0 }
  0xfc   :  { %v1501_v59 = vpop.f32.mrb[17].mxu0  ;;  %9740 = vmatmul.mubr.msk.f32.gmra.mrb[122].mxu0 %vm366_vm1, %v152_v53  ;;  %v1507_v60 = vadd.f32 %v9582_v58, %v12268_v47 }
  0xfd   :  { %9742 = vmatprep.mubr.msk.f32.mxu0 %vm366_vm1, %v153_v56  ;;  %v1502_v62 = vadd.f32 %v12268_v47, %v1501_v59  ;;  %v12378_v0 = vpack.c.bf16 %v3075_v55, %v3074_v57  ;;  %v166_v57 = vld [vmem:[%s18636_s0 + $0x448] sm:$0xff]  ;;  %v167_v59 = vld [vmem:[%s18636_s0 + $0x450] sm:$0xff] }
  0xfe   :  { %v3077_v2 = vmax.f32 %v1507_v60, 0.0 }
  0xff   :  { %v9585_v3 = vpop.f32.mrb[18].mxu0  ;;  %v3076_v4 = vmax.f32 %v1502_v62, 0.0 }
 0x100   :  { %v1517_v5 = vadd.f32 %v9585_v3, %v12268_v47  ;;  %v1511_v6 = vpop.f32.mrb[19].mxu0  ;;  %9743 = vmatmul.mubr.msk.f32.gmra.mrb[124].mxu0 %vm366_vm1, %v154_v61  ;;  %v168_v3 = vld [vmem:[%s18636_s0 + $0x458] sm:$0xff] }
 0x101   :  { %v1512_v7 = vadd.f32 %v12268_v47, %v1511_v6  ;;  %9745 = vmatprep.mubr.msk.f32.mxu0 %vm366_vm1, %v155_v1  ;;  %v10108_v9 = vpack.c.bf16 %v3077_v2, %v3076_v4 }
 0x102   :  { %v3079_v11 = vmax.f32 %v1517_v5, 0.0  ;;  %v169_v5 = vld [vmem:[%s18636_s0 + $0x460] sm:$0xff] }
 0x103   :  { %v3078_v13 = vmax.f32 %v1512_v7, 0.0  ;;  %v9588_v14 = vpop.f32.mrb[20].mxu0  ;;  %10109 = vmatprep.subr.bf16.mxu1 %v10108_v9 }
 0x104   :  { %v1527_v15 = vadd.f32 %v9588_v14, %v12268_v47  ;;  %v1521_v16 = vpop.f32.mrb[21].mxu0  ;;  %9746 = vmatmul.mubr.msk.f32.gmra.mrb[126].mxu0 %vm366_vm1, %v156_v10  ;;  %10111 = vmatpush3.bf16.msra.mxu1 %v12294_v63  ;;  %v171_v14 = vld [vmem:[%s18636_s0 + $0x470] sm:$0xff] }
 0x105   :  { %v1522_v18 = vadd.f32 %v12268_v47, %v1521_v16  ;;  %9748 = vmatprep.mubr.msk.f32.mxu0 %vm366_vm1, %v157_v12  ;;  %v10112_v19 = vpack.c.bf16 %v3079_v11, %v3078_v13  ;;  %v170_v12 = vld [vmem:[%s18636_s0 + $0x468] sm:$0xff] }
 0x106   :  { %v3081_v21 = vmax.f32 %v1527_v15, 0.0 }
 0x107   :  { %v3080_v23 = vmax.f32 %v1522_v18, 0.0  ;;  %v9591_v24 = vpop.f32.mrb[22].mxu0  ;;  %10113 = vmatprep.subr.bf16.mxu1 %v10112_v19  ;;  %v3388_v19 = vld [vmem:[%s18637_s3] sm:$0xff] }
 0x108   :  { %v1537_v25 = vadd.f32 %v9591_v24, %v12268_v47  ;;  %v1531_v63 = vpop.f32.mrb[23].mxu0  ;;  %9749 = vmatmul.mubr.msk.f32.gmra.mrb[128].mxu0 %vm366_vm1, %v158_v20  ;;  %10115 = vmatpush3.bf16.msra.mxu1 %v12306_v8 }
 0x109   :  { %v1532_v27 = vadd.f32 %v12268_v47, %v1531_v63  ;;  %9751 = vmatprep.mubr.msk.f32.mxu0 %vm366_vm1, %v159_v22  ;;  %v10116_v28 = vpack.c.bf16 %v3081_v21, %v3080_v23  ;;  %v172_v22 = vld [vmem:[%s18636_s0 + $0x478] sm:$0xff]  ;;  %v3410_v23 = vld [vmem:[%s18637_s3 + $0xb0] sm:$0xff] }
 0x10a   :  { %v3083_v30 = vmax.f32 %v1537_v25, 0.0 }
 0x10b   :  { %v3082_v32 = vmax.f32 %v1532_v27, 0.0  ;;  %v9594_v33 = vpop.f32.mrb[24].mxu0  ;;  %10117 = vmatprep.subr.bf16.mxu1 %v10116_v28 }
 0x10c   :  { %v1547_v34 = vadd.f32 %v9594_v33, %v12268_v47  ;;  %v1541_v8 = vpop.f32.mrb[25].mxu0  ;;  %9752 = vmatmul.mubr.msk.f32.gmra.mrb[130].mxu0 %vm366_vm1, %v160_v29  ;;  %10119 = vmatpush3.bf16.msra.mxu1 %v12318_v17  ;;  %v3409_v29 = vld [vmem:[%s18637_s3 + $0xa8] sm:$0xff]  ;;  %v3431_v33 = vld [vmem:[%s18637_s3 + $0x158] sm:$0xff] }
 0x10d   :  { %v1542_v36 = vadd.f32 %v12268_v47, %v1541_v8  ;;  %9754 = vmatprep.mubr.msk.f32.mxu0 %vm366_vm1, %v161_v31  ;;  %v10120_v37 = vpack.c.bf16 %v3083_v30, %v3082_v32  ;;  %v174_v32 = vld [vmem:[%s18636_s0 + $0x488] sm:$0xff]  ;;  %v175_v8 = vld [vmem:[%s18636_s0 + $0x490] sm:$0xff] }
 0x10e   :  { %v3085_v39 = vmax.f32 %v1547_v34, 0.0 }
 0x10f   :  { %v3084_v41 = vmax.f32 %v1542_v36, 0.0  ;;  %v9597_v42 = vpop.f32.mrb[26].mxu0  ;;  %10121 = vmatprep.subr.bf16.mxu1 %v10120_v37 }
 0x110   :  { %v1557_v43 = vadd.f32 %v9597_v42, %v12268_v47  ;;  %v1551_v17 = vpop.f32.mrb[27].mxu0  ;;  %9755 = vmatmul.mubr.msk.f32.gmra.mrb[132].mxu0 %vm366_vm1, %v162_v38  ;;  %10123 = vmatpush3.bf16.msra.mxu1 %v12330_v26 }
 0x111   :  { %v1552_v45 = vadd.f32 %v12268_v47, %v1551_v17  ;;  %9757 = vmatprep.mubr.msk.f32.mxu0 %vm366_vm1, %v163_v40  ;;  %v10124_v46 = vpack.c.bf16 %v3085_v39, %v3084_v41  ;;  %v3430_v40 = vld [vmem:[%s18637_s3 + $0x150] sm:$0xff]  ;;  %v3452_v17 = vld [vmem:[%s18637_s3 + $0x200] sm:$0xff] }
 0x112   :  { %v3087_v49 = vmax.f32 %v1557_v43, 0.0  ;;  %v176_v43 = vld [vmem:[%s18636_s0 + $0x498] sm:$0xff] }
 0x113   :  { %v3086_v51 = vmax.f32 %v1552_v45, 0.0  ;;  %v9600_v52 = vpop.f32.mrb[28].mxu0  ;;  %10125 = vmatprep.subr.bf16.mxu1 %v10124_v46  ;;  %v177_v46 = vld [vmem:[%s18636_s0 + $0x4a0] sm:$0xff] }
 0x114   :  { %v1567_v53 = vadd.f32 %v9600_v52, %v12268_v47  ;;  %v1561_v26 = vpop.f32.mrb[29].mxu0  ;;  %9758 = vmatmul.mubr.msk.f32.gmra.mrb[134].mxu0 %vm366_vm1, %v164_v48  ;;  %10127 = vmatpush3.bf16.msra.mxu1 %v12342_v35  ;;  %v3451_v52 = vld [vmem:[%s18637_s3 + $0x1f8] sm:$0xff] }
 0x115   :  { %v1562_v55 = vadd.f32 %v12268_v47, %v1561_v26  ;;  %9760 = vmatprep.mubr.msk.f32.mxu0 %vm366_vm1, %v165_v50  ;;  %v10128_v56 = vpack.c.bf16 %v3087_v49, %v3086_v51 }
 0x116   :  { %v3089_v58 = vmax.f32 %v1567_v53, 0.0 }
 0x117   :  { %v3088_v60 = vmax.f32 %v1562_v55, 0.0  ;;  %v9603_v61 = vpop.f32.mrb[30].mxu0  ;;  %10129 = vmatprep.subr.bf16.mxu1 %v10128_v56  ;;  %v178_v55 = vld [vmem:[%s18636_s0 + $0x4a8] sm:$0xff] }
 0x118   :  { %v1577_v62 = vadd.f32 %v9603_v61, %v12268_v47  ;;  %v1571_v35 = vpop.f32.mrb[31].mxu0  ;;  %9761 = vmatmul.mubr.msk.f32.gmra.mrb[136].mxu0 %vm366_vm1, %v166_v57  ;;  %10131 = vmatpush3.bf16.msra.mxu1 %v12354_v44  ;;  %v3473_v56 = vld [vmem:[%s18637_s3 + $0x2a8] sm:$0xff] }
 0x119   :  { %v1572_v1 = vadd.f32 %v12268_v47, %v1571_v35  ;;  %9763 = vmatprep.mubr.msk.f32.mxu0 %vm366_vm1, %v167_v59  ;;  %v10132_v2 = vpack.c.bf16 %v3089_v58, %v3088_v60  ;;  %v179_v58 = vld [vmem:[%s18636_s0 + $0x4b0] sm:$0xff]  ;;  %v3472_v35 = vld [vmem:[%s18637_s3 + $0x2a0] sm:$0xff] }
 0x11a   :  { %v3091_v4 = vmax.f32 %v1577_v62, 0.0 }
 0x11b   :  { %v3090_v6 = vmax.f32 %v1572_v1, 0.0  ;;  %v9606_v7 = vpop.f32.mrb[32].mxu0  ;;  %10133 = vmatprep.subr.bf16.mxu1 %v10132_v2 }
 0x11c   :  { %v1587_v9 = vadd.f32 %v9606_v7, %v12268_v47  ;;  %v1581_v44 = vpop.f32.mrb[33].mxu0  ;;  %9764 = vmatmul.mubr.msk.f32.gmra.mrb[138].mxu0 %vm366_vm1, %v168_v3  ;;  %10135 = vmatpush3.bf16.msra.mxu1 %v12366_v54  ;;  %v180_v3 = vld [vmem:[%s18636_s0 + $0x4b8] sm:$0xff] }
 0x11d   :  { %v1582_v10 = vadd.f32 %v12268_v47, %v1581_v44  ;;  %9766 = vmatprep.mubr.msk.f32.mxu0 %vm366_vm1, %v169_v5  ;;  %v10136_v11 = vpack.c.bf16 %v3091_v4, %v3090_v6  ;;  %v3494_v4 = vld [vmem:[%s18637_s3 + $0x350] sm:$0xff]  ;;  %v181_v6 = vld [vmem:[%s18636_s0 + $0x4c0] sm:$0xff] }
 0x11e   :  { %v3093_v13 = vmax.f32 %v1587_v9, 0.0 }
 0x11f   :  { %v3092_v15 = vmax.f32 %v1582_v10, 0.0  ;;  %v9609_v16 = vpop.f32.mrb[34].mxu0  ;;  %10137 = vmatprep.subr.bf16.mxu1 %v10136_v11  ;;  %v3493_v11 = vld [vmem:[%s18637_s3 + $0x348] sm:$0xff] }
 0x120   :  { %v1597_v18 = vadd.f32 %v9609_v16, %v12268_v47  ;;  %v1591_v54 = vpop.f32.mrb[35].mxu0  ;;  %9767 = vmatmul.mubr.msk.f32.gmra.mrb[140].mxu0 %vm366_vm1, %v170_v12  ;;  %10139 = vmatpush3.bf16.msra.mxu1 %v12378_v0  ;;  %v173_v0 = vld [vmem:[%s18636_s0 + $0x480] sm:$0xff] }
 0x121   :  { %v12476_v20 = vpack.c.bf16 %v3093_v13, %v3092_v15  ;;  %v1592_v21 = vadd.f32 %v12268_v47, %v1591_v54  ;;  %9769 = vmatprep.mubr.msk.f32.mxu0 %vm366_vm1, %v171_v14  ;;  %v182_v14 = vld [vmem:[%s18636_s0 + $0x4c8] sm:$0xff]  ;;  %v3515_v15 = vld [vmem:[%s18637_s3 + $0x3f8] sm:$0xff] }
 0x122   :  { %v3095_v24 = vmax.f32 %v1597_v18, 0.0  ;;  %v183_v18 = vld [vmem:[%s18636_s0 + $0x4d0] sm:$0xff] }
 0x123   :  { %v3094_v25 = vmax.f32 %v1592_v21, 0.0  ;;  %v9612_v63 = vpop.f32.mrb[36].mxu0  ;;  %3670 = vmatmul.mubr.f32.vlgmr.msra.gmra.mrb[0].mxu1 %v3388_v19 }
 0x124   :  { %v1607_v27 = vadd.f32 %v9612_v63, %v12268_v47  ;;  %v1601_v28 = vpop.f32.mrb[37].mxu0  ;;  %9770 = vmatmul.mubr.msk.f32.gmra.mrb[142].mxu0 %vm366_vm1, %v172_v22  ;;  %3674 = vmatprep.mubr.f32.mxu1 %v3410_v23  ;;  %v3514_v23 = vld [vmem:[%s18637_s3 + $0x3f0] sm:$0xff]  ;;  %v3536_v63 = vld [vmem:[%s18637_s3 + $0x4a0] sm:$0xff] }
 0x125   :  { %v12494_v30 = vpack.c.bf16 %v3095_v24, %v3094_v25  ;;  %v1602_v31 = vadd.f32 %v12268_v47, %v1601_v28  ;;  %9772 = vmatprep.mubr.msk.f32.mxu0 %vm366_vm1, %v173_v0  ;;  %v184_v25 = vld [vmem:[%s18636_s0 + $0x4d8] sm:$0xff]  ;;  %v185_v28 = vld [vmem:[%s18636_s0 + $0x4e0] sm:$0xff] }
 0x126   :  { %v3097_v34 = vmax.f32 %v1607_v27, 0.0 }
 0x127   :  { %v3096_v36 = vmax.f32 %v1602_v31, 0.0  ;;  %v9615_v37 = vpop.f32.mrb[38].mxu0  ;;  %3675 = vmatmul.mubr.f32.gmra.mrb[2].mxu1 %v3409_v29 }
 0x128   :  { %v1617_v38 = vadd.f32 %v9615_v37, %v12268_v47  ;;  %v1611_v39 = vpop.f32.mrb[39].mxu0  ;;  %9773 = vmatmul.mubr.msk.f32.gmra.mrb[144].mxu0 %vm366_vm1, %v174_v32  ;;  %3679 = vmatprep.mubr.f32.mxu1 %v3431_v33  ;;  %v186_v37 = vld [vmem:[%s18636_s0 + $0x4e8] sm:$0xff] }
 0x129   :  { %v12512_v41 = vpack.c.bf16 %v3097_v34, %v3096_v36  ;;  %v1612_v42 = vadd.f32 %v12268_v47, %v1611_v39  ;;  %9775 = vmatprep.mubr.msk.f32.mxu0 %vm366_vm1, %v175_v8  ;;  %v3535_v34 = vld [vmem:[%s18637_s3 + $0x498] sm:$0xff] }
 0x12a   :  { %v3099_v45 = vmax.f32 %v1617_v38, 0.0  ;;  %v3557_v38 = vld [vmem:[%s18637_s3 + $0x548] sm:$0xff] }
 0x12b   :  { %v3098_v48 = vmax.f32 %v1612_v42, 0.0  ;;  %v9618_v49 = vpop.f32.mrb[40].mxu0  ;;  %3680 = vmatmul.mubr.f32.gmra.mrb[4].mxu1 %v3430_v40  ;;  %v187_v40 = vld [vmem:[%s18636_s0 + $0x4f0] sm:$0xff] }
 0x12c   :  { %v1627_v50 = vadd.f32 %v9618_v49, %v12268_v47  ;;  %v1621_v51 = vpop.f32.mrb[41].mxu0  ;;  %9776 = vmatmul.mubr.msk.f32.gmra.mrb[146].mxu0 %vm366_vm1, %v176_v43  ;;  %3684 = vmatprep.mubr.f32.mxu1 %v3452_v17 }
 0x12d   :  { %v12530_v53 = vpack.c.bf16 %v3099_v45, %v3098_v48  ;;  %v1622_v26 = vadd.f32 %v12268_v47, %v1621_v51  ;;  %9778 = vmatprep.mubr.msk.f32.mxu0 %vm366_vm1, %v177_v46  ;;  %v3556_v46 = vld [vmem:[%s18637_s3 + $0x540] sm:$0xff] }
 0x12e   :  { %v3101_v57 = vmax.f32 %v1627_v50, 0.0  ;;  %v188_v50 = vld [vmem:[%s18636_s0 + $0x4f8] sm:$0xff] }
 0x12f   :  { %v3100_v59 = vmax.f32 %v1622_v26, 0.0  ;;  %v9621_v60 = vpop.f32.mrb[42].mxu0  ;;  %3685 = vmatmul.mubr.f32.gmra.mrb[6].mxu1 %v3451_v52  ;;  %v189_v52 = vld [vmem:[%s18636_s0 + $0x500] sm:$0xff]  ;;  %v3391_v26 = vld [vmem:[%s18637_s3 + $0x18] sm:$0xff] }
 0x130   :  { %v1637_v61 = vadd.f32 %v9621_v60, %v12268_v47  ;;  %v1631_v62 = vpop.f32.mrb[43].mxu0  ;;  %9779 = vmatmul.mubr.msk.f32.gmra.mrb[148].mxu0 %vm366_vm1, %v178_v55  ;;  %3689 = vmatprep.mubr.f32.mxu1 %v3473_v56 }
 0x131   :  { %v12548_v1 = vpack.c.bf16 %v3101_v57, %v3100_v59  ;;  %v1632_v2 = vadd.f32 %v12268_v47, %v1631_v62  ;;  %9781 = vmatprep.mubr.msk.f32.mxu0 %vm366_vm1, %v179_v58 }
 0x132   :  { %v3103_v5 = vmax.f32 %v1637_v61, 0.0  ;;  %v190_v61 = vld [vmem:[%s18636_s0 + $0x508] sm:$0xff] }
 0x133   :  { %v3102_v7 = vmax.f32 %v1632_v2, 0.0  ;;  %v9624_v9 = vpop.f32.mrb[44].mxu0  ;;  %3690 = vmatmul.mubr.f32.gmra.mrb[8].mxu1 %v3472_v35  ;;  %v191_v35 = vld [vmem:[%s18636_s0 + $0x510] sm:$0xff] }
 0x134   :  { %v1647_v44 = vadd.f32 %v9624_v9, %v12268_v47  ;;  %v1641_v10 = vpop.f32.mrb[45].mxu0  ;;  %9782 = vmatmul.mubr.msk.f32.gmra.mrb[150].mxu0 %vm366_vm1, %v180_v3  ;;  %3694 = vmatprep.mubr.f32.mxu1 %v3494_v4 }
 0x135   :  { %v12566_v12 = vpack.c.bf16 %v3103_v5, %v3102_v7  ;;  %v1642_v13 = vadd.f32 %v12268_v47, %v1641_v10  ;;  %9784 = vmatprep.mubr.msk.f32.mxu0 %vm366_vm1, %v181_v6  ;;  %v192_v7 = vld [vmem:[%s18636_s0 + $0x518] sm:$0xff] }
 0x136   :  { %v3105_v16 = vmax.f32 %v1647_v44, 0.0  ;;  %v193_v44 = vld [vmem:[%s18636_s0 + $0x520] sm:$0xff] }
 0x137   :  { %v3104_v54 = vmax.f32 %v1642_v13, 0.0  ;;  %v9627_v19 = vpop.f32.mrb[46].mxu0  ;;  %3695 = vmatmul.mubr.f32.gmra.mrb[10].mxu1 %v3493_v11 }
 0x138   :  { %v1657_v21 = vadd.f32 %v9627_v19, %v12268_v47  ;;  %v1651_v22 = vpop.f32.mrb[47].mxu0  ;;  %9785 = vmatmul.mubr.msk.f32.gmra.mrb[152].mxu0 %vm366_vm1, %v182_v14  ;;  %3699 = vmatprep.mubr.f32.mxu1 %v3515_v15 }
 0x139   :  { %v12584_v24 = vpack.c.bf16 %v3105_v16, %v3104_v54  ;;  %v1652_v0 = vadd.f32 %v12268_v47, %v1651_v22  ;;  %9787 = vmatprep.mubr.msk.f32.mxu0 %vm366_vm1, %v183_v18  ;;  %v194_v16 = vld [vmem:[%s18636_s0 + $0x528] sm:$0xff]  ;;  %v195_v54 = vld [vmem:[%s18636_s0 + $0x530] sm:$0xff] }
 0x13a   :  { %v3107_v27 = vmax.f32 %v1657_v21, 0.0 }
 0x13b   :  { %v3106_v29 = vmax.f32 %v1652_v0, 0.0  ;;  %v9630_v31 = vpop.f32.mrb[48].mxu0  ;;  %3700 = vmatmul.mubr.f32.gmra.mrb[12].mxu1 %v3514_v23 }
 0x13c   :  { %v1667_v32 = vadd.f32 %v9630_v31, %v12268_v47  ;;  %v1661_v33 = vpop.f32.mrb[49].mxu0  ;;  %9788 = vmatmul.mubr.msk.f32.gmra.mrb[154].mxu0 %vm366_vm1, %v184_v25  ;;  %3704 = vmatprep.mubr.f32.mxu1 %v3536_v63  ;;  %v196_v25 = vld [vmem:[%s18636_s0 + $0x538] sm:$0xff] }
 0x13d   :  { %v12602_v8 = vpack.c.bf16 %v3107_v27, %v3106_v29  ;;  %v1662_v36 = vadd.f32 %v12268_v47, %v1661_v33  ;;  %9790 = vmatprep.mubr.msk.f32.mxu0 %vm366_vm1, %v185_v28  ;;  %v197_v27 = vld [vmem:[%s18636_s0 + $0x540] sm:$0xff] }
 0x13e   :  { %v3109_v39 = vmax.f32 %v1667_v32, 0.0 }
 0x13f   :  { %v3108_v42 = vmax.f32 %v1662_v36, 0.0  ;;  %v9633_v43 = vpop.f32.mrb[50].mxu0  ;;  %3705 = vmatmul.mubr.f32.gmra.mrb[14].mxu1 %v3535_v34  ;;  %v198_v34 = vld [vmem:[%s18636_s0 + $0x548] sm:$0xff] }
 0x140   :  { %v1677_v17 = vadd.f32 %v9633_v43, %v12268_v47  ;;  %v1671_v45 = vpop.f32.mrb[51].mxu0  ;;  %9791 = vmatmul.mubr.msk.f32.gmra.mrb[156].mxu0 %vm366_vm1, %v186_v37  ;;  %3709 = vmatprep.mubr.f32.mxu1 %v3557_v38  ;;  %v199_v37 = vld [vmem:[%s18636_s0 + $0x550] sm:$0xff] }
 0x141   :  { %v1672_v48 = vadd.f32 %v12268_v47, %v1671_v45  ;;  %9793 = vmatprep.mubr.msk.f32.mxu0 %vm366_vm1, %v187_v40  ;;  %v10140_v49 = vpack.c.bf16 %v3109_v39, %v3108_v42 }
 0x142   :  { %v3111_v51 = vmax.f32 %v1677_v17, 0.0  ;;  %v200_v17 = vld [vmem:[%s18636_s0 + $0x558] sm:$0xff] }
 0x143   :  { %v3110_v55 = vmax.f32 %v1672_v48, 0.0  ;;  %v9636_v56 = vpop.f32.mrb[52].mxu0  ;;  %10141 = vmatprep.subr.bf16.mxu1 %v10140_v49  ;;  %3710 = vmatmul.mubr.f32.gmra.mrb[16].mxu1 %v3556_v46  ;;  %v201_v46 = vld [vmem:[%s18636_s0 + $0x560] sm:$0xff] }
 0x144   :  { %v1687_v57 = vadd.f32 %v9636_v56, %v12268_v47  ;;  %v1681_v58 = vpop.f32.mrb[53].mxu0  ;;  %9794 = vmatmul.mubr.msk.f32.gmra.mrb[158].mxu0 %vm366_vm1, %v188_v50  ;;  %10143 = vmatpush3.bf16.msra.mxu1 %v12476_v20  ;;  %v203_v56 = vld [vmem:[%s18636_s0 + $0x570] sm:$0xff] }
 0x145   :  { %v1682_v59 = vadd.f32 %v12268_v47, %v1681_v58  ;;  %9796 = vmatprep.mubr.msk.f32.mxu0 %vm366_vm1, %v189_v52  ;;  %v10144_v60 = vpack.c.bf16 %v3111_v51, %v3110_v55  ;;  %3779 = vmatprep.mubr.f32.mxu1 %v3391_v26  ;;  %v202_v26 = vld [vmem:[%s18636_s0 + $0x568] sm:$0xff] }
 0x146   :  { %v3113_v62 = vmax.f32 %v1687_v57, 0.0 }
 0x147   :  { %v3112_v2 = vmax.f32 %v1682_v59, 0.0  ;;  %v9639_v3 = vpop.f32.mrb[54].mxu0  ;;  %10145 = vmatprep.subr.bf16.mxu1 %v10144_v60  ;;  %v3390_v60 = vld [vmem:[%s18637_s3 + $0x10] sm:$0xff] }
 0x148   :  { %v1697_v20 = vadd.f32 %v9639_v3, %v12268_v47  ;;  %v1691_v4 = vpop.f32.mrb[55].mxu0  ;;  %9797 = vmatmul.mubr.msk.f32.gmra.mrb[160].mxu0 %vm366_vm1, %v190_v61  ;;  %10147 = vmatpush3.bf16.msra.mxu1 %v12494_v30 }
 0x149   :  { %v1692_v5 = vadd.f32 %v12268_v47, %v1691_v4  ;;  %9799 = vmatprep.mubr.msk.f32.mxu0 %vm366_vm1, %v191_v35  ;;  %v10148_v6 = vpack.c.bf16 %v3113_v62, %v3112_v2  ;;  %v204_v35 = vld [vmem:[%s18636_s0 + $0x578] sm:$0xff]  ;;  %v3412_v2 = vld [vmem:[%s18637_s3 + $0xc0] sm:$0xff] }
 0x14a   :  { %v3115_v9 = vmax.f32 %v1697_v20, 0.0 }
 0x14b   :  { %v3114_v10 = vmax.f32 %v1692_v5, 0.0  ;;  %v9642_v11 = vpop.f32.mrb[56].mxu0  ;;  %10149 = vmatprep.subr.bf16.mxu1 %v10148_v6 }
 0x14c   :  { %v1707_v13 = vadd.f32 %v9642_v11, %v12268_v47  ;;  %v1701_v30 = vpop.f32.mrb[57].mxu0  ;;  %9800 = vmatmul.mubr.msk.f32.gmra.mrb[162].mxu0 %vm366_vm1, %v192_v7  ;;  %10151 = vmatpush3.bf16.msra.mxu1 %v12512_v41  ;;  %v3411_v7 = vld [vmem:[%s18637_s3 + $0xb8] sm:$0xff]  ;;  %v3433_v11 = vld [vmem:[%s18637_s3 + $0x168] sm:$0xff] }
 0x14d   :  { %v1702_v14 = vadd.f32 %v12268_v47, %v1701_v30  ;;  %9802 = vmatprep.mubr.msk.f32.mxu0 %vm366_vm1, %v193_v44  ;;  %v10152_v15 = vpack.c.bf16 %v3115_v9, %v3114_v10  ;;  %v206_v10 = vld [vmem:[%s18636_s0 + $0x588] sm:$0xff]  ;;  %v207_v30 = vld [vmem:[%s18636_s0 + $0x590] sm:$0xff] }
 0x14e   :  { %v3117_v18 = vmax.f32 %v1707_v13, 0.0 }
 0x14f   :  { %v3116_v19 = vmax.f32 %v1702_v14, 0.0  ;;  %v9645_v21 = vpop.f32.mrb[58].mxu0  ;;  %10153 = vmatprep.subr.bf16.mxu1 %v10152_v15 }
 0x150   :  { %v1717_v22 = vadd.f32 %v9645_v21, %v12268_v47  ;;  %v1711_v41 = vpop.f32.mrb[59].mxu0  ;;  %9803 = vmatmul.mubr.msk.f32.gmra.mrb[164].mxu0 %vm366_vm1, %v194_v16  ;;  %10155 = vmatpush3.bf16.msra.mxu1 %v12530_v53 }
 0x151   :  { %v1712_v23 = vadd.f32 %v12268_v47, %v1711_v41  ;;  %9805 = vmatprep.mubr.msk.f32.mxu0 %vm366_vm1, %v195_v54  ;;  %v10156_v0 = vpack.c.bf16 %v3117_v18, %v3116_v19  ;;  %v3432_v54 = vld [vmem:[%s18637_s3 + $0x160] sm:$0xff]  ;;  %v3454_v41 = vld [vmem:[%s18637_s3 + $0x210] sm:$0xff] }
 0x152   :  { %v3119_v63 = vmax.f32 %v1717_v22, 0.0  ;;  %v208_v22 = vld [vmem:[%s18636_s0 + $0x598] sm:$0xff] }
 0x153   :  { %v3118_v28 = vmax.f32 %v1712_v23, 0.0  ;;  %v9648_v29 = vpop.f32.mrb[60].mxu0  ;;  %10157 = vmatprep.subr.bf16.mxu1 %v10156_v0  ;;  %v209_v0 = vld [vmem:[%s18636_s0 + $0x5a0] sm:$0xff] }
 0x154   :  { %v1727_v31 = vadd.f32 %v9648_v29, %v12268_v47  ;;  %v1721_v53 = vpop.f32.mrb[61].mxu0  ;;  %9806 = vmatmul.mubr.msk.f32.gmra.mrb[166].mxu0 %vm366_vm1, %v196_v25  ;;  %10159 = vmatpush3.bf16.msra.mxu1 %v12548_v1  ;;  %v3453_v29 = vld [vmem:[%s18637_s3 + $0x208] sm:$0xff] }
 0x155   :  { %v1722_v32 = vadd.f32 %v12268_v47, %v1721_v53  ;;  %9808 = vmatprep.mubr.msk.f32.mxu0 %vm366_vm1, %v197_v27  ;;  %v10160_v33 = vpack.c.bf16 %v3119_v63, %v3118_v28 }
 0x156   :  { %v3121_v36 = vmax.f32 %v1727_v31, 0.0 }
 0x157   :  { %v3120_v38 = vmax.f32 %v1722_v32, 0.0  ;;  %v9651_v39 = vpop.f32.mrb[62].mxu0  ;;  %10161 = vmatprep.subr.bf16.mxu1 %v10160_v33  ;;  %v210_v32 = vld [vmem:[%s18636_s0 + $0x5a8] sm:$0xff]  ;;  %v3475_v33 = vld [vmem:[%s18637_s3 + $0x2b8] sm:$0xff] }
 0x158   :  { %v1737_v40 = vadd.f32 %v9651_v39, %v12268_v47  ;;  %v1731_v1 = vpop.f32.mrb[63].mxu0  ;;  %9809 = vmatmul.mubr.msk.f32.gmra.mrb[168].mxu0 %vm366_vm1, %v198_v34  ;;  %10163 = vmatpush3.bf16.msra.mxu1 %v12566_v12 }
 0x159   :  { %v1732_v42 = vadd.f32 %v12268_v47, %v1731_v1  ;;  %9811 = vmatprep.mubr.msk.f32.mxu0 %vm366_vm1, %v199_v37  ;;  %v10164_v43 = vpack.c.bf16 %v3121_v36, %v3120_v38  ;;  %v211_v36 = vld [vmem:[%s18636_s0 + $0x5b0] sm:$0xff] }
 0x15a   :  { %v3123_v45 = vmax.f32 %v1737_v40, 0.0  ;;  %v3474_v1 = vld [vmem:[%s18637_s3 + $0x2b0] sm:$0xff] }
 0x15b   :  { %v3122_v48 = vmax.f32 %v1732_v42, 0.0  ;;  %v9654_v49 = vpop.f32.mrb[64].mxu0  ;;  %10165 = vmatprep.subr.bf16.mxu1 %v10164_v43 }
 0x15c   :  { %v1747_v50 = vadd.f32 %v9654_v49, %v12268_v47  ;;  %v1741_v12 = vpop.f32.mrb[65].mxu0  ;;  %9812 = vmatmul.mubr.msk.f32.gmra.mrb[170].mxu0 %vm366_vm1, %v200_v17  ;;  %10167 = vmatpush3.bf16.msra.mxu1 %v12584_v24  ;;  %v212_v17 = vld [vmem:[%s18636_s0 + $0x5b8] sm:$0xff] }
 0x15d   :  { %v1742_v51 = vadd.f32 %v12268_v47, %v1741_v12  ;;  %9814 = vmatprep.mubr.msk.f32.mxu0 %vm366_vm1, %v201_v46  ;;  %v10168_v52 = vpack.c.bf16 %v3123_v45, %v3122_v48  ;;  %v3496_v45 = vld [vmem:[%s18637_s3 + $0x360] sm:$0xff] }
 0x15e   :  { %v3125_v55 = vmax.f32 %v1747_v50, 0.0  ;;  %v213_v48 = vld [vmem:[%s18636_s0 + $0x5c0] sm:$0xff] }
 0x15f   :  { %v3124_v57 = vmax.f32 %v1742_v51, 0.0  ;;  %v9657_v58 = vpop.f32.mrb[66].mxu0  ;;  %10169 = vmatprep.subr.bf16.mxu1 %v10168_v52  ;;  %v3495_v52 = vld [vmem:[%s18637_s3 + $0x358] sm:$0xff] }
 0x160   :  { %v1757_v59 = vadd.f32 %v9657_v58, %v12268_v47  ;;  %v1751_v24 = vpop.f32.mrb[67].mxu0  ;;  %9815 = vmatmul.mubr.msk.f32.gmra.mrb[172].mxu0 %vm366_vm1, %v202_v26  ;;  %10171 = vmatpush3.bf16.msra.mxu1 %v12602_v8  ;;  %v205_v8 = vld [vmem:[%s18636_s0 + $0x580] sm:$0xff]  ;;  %v214_v26 = vld [vmem:[%s18636_s0 + $0x5c8] sm:$0xff]  ;;  %v215_v58 = vld [vmem:[%s18636_s0 + $0x5d0] sm:$0xff] }
 0x161   :  { %v12714_v61 = vpack.c.bf16 %v3125_v55, %v3124_v57  ;;  %v1752_v62 = vadd.f32 %v12268_v47, %v1751_v24  ;;  %9817 = vmatprep.mubr.msk.f32.mxu0 %vm366_vm1, %v203_v56  ;;  %v12813_v56 = vld [vmem:[%s18638_s2] ss:$0 sm:$0xff]  ;;  %v3517_v57 = vld [vmem:[%s18637_s3 + $0x408] sm:$0xff] }
 0x162   :  { %v3127_v3 = vmax.f32 %v1757_v59, 0.0 }
 0x163   :  { %v3126_v20 = vmax.f32 %v1752_v62, 0.0  ;;  %v9660_v4 = vpop.f32.mrb[68].mxu0  ;;  %3780 = vmatmul.mubr.f32.vlgmr.msra.gmra.mrb[18].mxu1 %v3390_v60 }
 0x164   :  { %v1767_v5 = vadd.f32 %v9660_v4, %v12268_v47  ;;  %v1761_v6 = vpop.f32.mrb[69].mxu0  ;;  %9818 = vmatmul.mubr.msk.f32.gmra.mrb[174].mxu0 %vm366_vm1, %v204_v35  ;;  %3784 = vmatprep.mubr.f32.mxu1 %v3412_v2  ;;  %v3516_v2 = vld [vmem:[%s18637_s3 + $0x400] sm:$0xff]  ;;  %v3538_v4 = vld [vmem:[%s18637_s3 + $0x4b0] sm:$0xff] }
 0x165   :  { %v12732_v9 = vpack.c.bf16 %v3127_v3, %v3126_v20  ;;  %v1762_v44 = vadd.f32 %v12268_v47, %v1761_v6  ;;  %9820 = vmatprep.mubr.msk.f32.mxu0 %vm366_vm1, %v205_v8  ;;  %v216_v8 = vld [vmem:[%s18636_s0 + $0x5d8] sm:$0xff]  ;;  %v217_v6 = vld [vmem:[%s18636_s0 + $0x5e0] sm:$0xff] }
 0x166   :  { %v3129_v13 = vmax.f32 %v1767_v5, 0.0 }
 0x167   :  { %v3128_v14 = vmax.f32 %v1762_v44, 0.0  ;;  %v9663_v15 = vpop.f32.mrb[70].mxu0  ;;  %3785 = vmatmul.mubr.f32.gmra.mrb[20].mxu1 %v3411_v7 }
 0x168   :  { %v1777_v16 = vadd.f32 %v9663_v15, %v12268_v47  ;;  %v1771_v18 = vpop.f32.mrb[71].mxu0  ;;  %9821 = vmatmul.mubr.msk.f32.gmra.mrb[176].mxu0 %vm366_vm1, %v206_v10  ;;  %3789 = vmatprep.mubr.f32.mxu1 %v3433_v11  ;;  %v218_v15 = vld [vmem:[%s18636_s0 + $0x5e8] sm:$0xff] }
 0x169   :  { %v12750_v19 = vpack.c.bf16 %v3129_v13, %v3128_v14  ;;  %v1772_v21 = vadd.f32 %v12268_v47, %v1771_v18  ;;  %9823 = vmatprep.mubr.msk.f32.mxu0 %vm366_vm1, %v207_v30  ;;  %v3537_v13 = vld [vmem:[%s18637_s3 + $0x4a8] sm:$0xff] }
 0x16a   :  { %v3131_v23 = vmax.f32 %v1777_v16, 0.0  ;;  %v3559_v16 = vld [vmem:[%s18637_s3 + $0x558] sm:$0xff] }
 0x16b   :  { %v3130_v25 = vmax.f32 %v1772_v21, 0.0  ;;  %v9666_v63 = vpop.f32.mrb[72].mxu0  ;;  %3790 = vmatmul.mubr.f32.gmra.mrb[22].mxu1 %v3432_v54  ;;  %v219_v54 = vld [vmem:[%s18636_s0 + $0x5f0] sm:$0xff] }
 0x16c   :  { %v1787_v27 = vadd.f32 %v9666_v63, %v12268_v47  ;;  %v1781_v28 = vpop.f32.mrb[73].mxu0  ;;  %9824 = vmatmul.mubr.msk.f32.gmra.mrb[178].mxu0 %vm366_vm1, %v208_v22  ;;  %3794 = vmatprep.mubr.f32.mxu1 %v3454_v41 }
 0x16d   :  { %v12768_v31 = vpack.c.bf16 %v3131_v23, %v3130_v25  ;;  %v1782_v53 = vadd.f32 %v12268_v47, %v1781_v28  ;;  %9826 = vmatprep.mubr.msk.f32.mxu0 %vm366_vm1, %v209_v0  ;;  %v3558_v0 = vld [vmem:[%s18637_s3 + $0x550] sm:$0xff] }
 0x16e   :  { %v3133_v34 = vmax.f32 %v1787_v27, 0.0  ;;  %v220_v27 = vld [vmem:[%s18636_s0 + $0x5f8] sm:$0xff] }
 0x16f   :  { %v3132_v37 = vmax.f32 %v1782_v53, 0.0  ;;  %v9669_v38 = vpop.f32.mrb[74].mxu0  ;;  %3795 = vmatmul.mubr.f32.gmra.mrb[24].mxu1 %v3453_v29  ;;  %v221_v29 = vld [vmem:[%s18636_s0 + $0x600] sm:$0xff]  ;;  %v3393_v53 = vld [vmem:[%s18637_s3 + $0x28] sm:$0xff] }
 0x170   :  { %v1797_v39 = vadd.f32 %v9669_v38, %v12268_v47  ;;  %v1791_v40 = vpop.f32.mrb[75].mxu0  ;;  %9827 = vmatmul.mubr.msk.f32.gmra.mrb[180].mxu0 %vm366_vm1, %v210_v32  ;;  %3799 = vmatprep.mubr.f32.mxu1 %v3475_v33 }
 0x171   :  { %v12786_v42 = vpack.c.bf16 %v3133_v34, %v3132_v37  ;;  %v1792_v43 = vadd.f32 %v12268_v47, %v1791_v40  ;;  %9829 = vmatprep.mubr.msk.f32.mxu0 %vm366_vm1, %v211_v36 }
 0x172   :  { %v3135_v46 = vmax.f32 %v1797_v39, 0.0  ;;  %v222_v39 = vld [vmem:[%s18636_s0 + $0x608] sm:$0xff] }
 0x173   :  { %v3134_v49 = vmax.f32 %v1792_v43, 0.0  ;;  %v9672_v50 = vpop.f32.mrb[76].mxu0  ;;  %3800 = vmatmul.mubr.f32.gmra.mrb[26].mxu1 %v3474_v1  ;;  %v223_v1 = vld [vmem:[%s18636_s0 + $0x610] sm:$0xff] }
 0x174   :  { %v1801_v12 = vpop.f32.mrb[77].mxu0  ;;  %9830 = vmatmul.mubr.msk.f32.gmra.mrb[182].mxu0 %vm366_vm1, %v212_v17  ;;  %v1807_v51 = vadd.f32 %v9672_v50, %v12268_v47  ;;  %3804 = vmatprep.mubr.f32.mxu1 %v3496_v45 }
 0x175   :  { %9832 = vmatprep.mubr.msk.f32.mxu0 %vm366_vm1, %v213_v48  ;;  %v12808_v55 = vpack.c.bf16 %v3135_v46, %v3134_v49  ;;  %v1802_v47 = vadd.f32 %v12813_v56, %v1801_v12  ;;  %v224_v49 = vld [vmem:[%s18636_s0 + $0x618] sm:$0xff]  ;;  %v225_v12 = vld [vmem:[%s18636_s0 + $0x620] sm:$0xff] }
 0x176   :  { %v3137_v59 = vmax.f32 %v1807_v51, 0.0 }
 0x177   :  { %v9675_v24 = vpop.f32.mrb[78].mxu0  ;;  %v3136_v60 = vmax.f32 %v1802_v47, 0.0  ;;  %3805 = vmatmul.mubr.f32.gmra.mrb[28].mxu1 %v3495_v52 }
 0x178   :  { %v1817_v62 = vadd.f32 %v12813_v56, %v9675_v24  ;;  %v1811_v35 = vpop.f32.mrb[79].mxu0  ;;  %9833 = vmatmul.mubr.msk.f32.gmra.mrb[184].mxu0 %vm366_vm1, %v214_v26  ;;  %3809 = vmatprep.mubr.f32.mxu1 %v3517_v57  ;;  %v227_v24 = vld [vmem:[%s18636_s0 + $0x630] sm:$0xff] }
 0x179   :  { %v1812_v3 = vadd.f32 %v12813_v56, %v1811_v35  ;;  %9835 = vmatprep.mubr.msk.f32.mxu0 %vm366_vm1, %v215_v58  ;;  %v12832_v20 = vpack.c.bf16 %v3137_v59, %v3136_v60  ;;  %v226_v58 = vld [vmem:[%s18636_s0 + $0x628] sm:$0xff] }
 0x17a   :  { %v3139_v5 = vmax.f32 %v1817_v62, 0.0 }
 0x17b   :  { %v3138_v7 = vmax.f32 %v1812_v3, 0.0  ;;  %v9678_v44 = vpop.f32.mrb[80].mxu0  ;;  %3810 = vmatmul.mubr.f32.gmra.mrb[30].mxu1 %v3516_v2 }
 0x17c   :  { %v1827_v10 = vadd.f32 %v12813_v56, %v9678_v44  ;;  %v1821_v11 = vpop.f32.mrb[81].mxu0  ;;  %9836 = vmatmul.mubr.msk.f32.gmra.mrb[186].mxu0 %vm366_vm1, %v216_v8  ;;  %3814 = vmatprep.mubr.f32.mxu1 %v3538_v4  ;;  %v228_v8 = vld [vmem:[%s18636_s0 + $0x638] sm:$0xff] }
 0x17d   :  { %v12845_v30 = vpack.c.bf16 %v3139_v5, %v3138_v7  ;;  %v1822_v14 = vadd.f32 %v12813_v56, %v1821_v11  ;;  %9838 = vmatprep.mubr.msk.f32.mxu0 %vm366_vm1, %v217_v6  ;;  %v229_v5 = vld [vmem:[%s18636_s0 + $0x640] sm:$0xff] }
 0x17e   :  { %v3141_v18 = vmax.f32 %v1827_v10, 0.0 }
 0x17f   :  { %v3140_v21 = vmax.f32 %v1822_v14, 0.0  ;;  %v9681_v22 = vpop.f32.mrb[82].mxu0  ;;  %3815 = vmatmul.mubr.f32.gmra.mrb[32].mxu1 %v3537_v13  ;;  %v230_v13 = vld [vmem:[%s18636_s0 + $0x648] sm:$0xff] }
 0x180   :  { %v1837_v41 = vadd.f32 %v12813_v56, %v9681_v22  ;;  %v1831_v23 = vpop.f32.mrb[83].mxu0  ;;  %9839 = vmatmul.mubr.msk.f32.gmra.mrb[188].mxu0 %vm366_vm1, %v218_v15  ;;  %3819 = vmatprep.mubr.f32.mxu1 %v3559_v16  ;;  %v231_v15 = vld [vmem:[%s18636_s0 + $0x650] sm:$0xff] }
 0x181   :  { %v10172_v25 = vpack.c.bf16 %v3141_v18, %v3140_v21  ;;  %v1832_v63 = vadd.f32 %v12813_v56, %v1831_v23  ;;  %9841 = vmatprep.mubr.msk.f32.mxu0 %vm366_vm1, %v219_v54 }
 0x182   :  { %v3143_v28 = vmax.f32 %v1837_v41, 0.0  ;;  %v232_v41 = vld [vmem:[%s18636_s0 + $0x658] sm:$0xff] }
 0x183   :  { %v3142_v32 = vmax.f32 %v1832_v63, 0.0  ;;  %v9684_v33 = vpop.f32.mrb[84].mxu0  ;;  %10173 = vmatprep.subr.bf16.mxu1 %v10172_v25  ;;  %3820 = vmatmul.mubr.f32.gmra.mrb[34].mxu1 %v3558_v0  ;;  %v233_v0 = vld [vmem:[%s18636_s0 + $0x660] sm:$0xff] }
 0x184   :  { %v1847_v34 = vadd.f32 %v12813_v56, %v9684_v33  ;;  %v1841_v36 = vpop.f32.mrb[85].mxu0  ;;  %9842 = vmatmul.mubr.msk.f32.gmra.mrb[190].mxu0 %vm366_vm1, %v220_v27  ;;  %10175 = vmatpush3.bf16.msra.mxu1 %v12714_v61  ;;  %v235_v33 = vld [vmem:[%s18636_s0 + $0x670] sm:$0xff] }
 0x185   :  { %v10176_v37 = vpack.c.bf16 %v3143_v28, %v3142_v32  ;;  %v1842_v38 = vadd.f32 %v12813_v56, %v1841_v36  ;;  %9844 = vmatprep.mubr.msk.f32.mxu0 %vm366_vm1, %v221_v29  ;;  %3889 = vmatprep.mubr.f32.mxu1 %v3393_v53  ;;  %v234_v53 = vld [vmem:[%s18636_s0 + $0x668] sm:$0xff] }
 0x186   :  { %v3145_v40 = vmax.f32 %v1847_v34, 0.0 }
 0x187   :  { %v3144_v43 = vmax.f32 %v1842_v38, 0.0  ;;  %v9687_v17 = vpop.f32.mrb[86].mxu0  ;;  %10177 = vmatprep.subr.bf16.mxu1 %v10176_v37  ;;  %v3392_v38 = vld [vmem:[%s18637_s3 + $0x20] sm:$0xff] }
 0x188   :  { %v1857_v61 = vadd.f32 %v12813_v56, %v9687_v17  ;;  %v1851_v45 = vpop.f32.mrb[87].mxu0  ;;  %9845 = vmatmul.mubr.msk.f32.gmra.mrb[192].mxu0 %vm366_vm1, %v222_v39  ;;  %10179 = vmatpush3.bf16.msra.mxu1 %v12732_v9 }
 0x189   :  { %v10180_v46 = vpack.c.bf16 %v3145_v40, %v3144_v43  ;;  %v1852_v48 = vadd.f32 %v12813_v56, %v1851_v45  ;;  %9847 = vmatprep.mubr.msk.f32.mxu0 %vm366_vm1, %v223_v1  ;;  %v236_v1 = vld [vmem:[%s18636_s0 + $0x678] sm:$0xff]  ;;  %v3414_v43 = vld [vmem:[%s18637_s3 + $0xd0] sm:$0xff] }
 0x18a   :  { %v3147_v50 = vmax.f32 %v1857_v61, 0.0 }
 0x18b   :  { %v3146_v51 = vmax.f32 %v1852_v48, 0.0  ;;  %v9690_v52 = vpop.f32.mrb[88].mxu0  ;;  %10181 = vmatprep.subr.bf16.mxu1 %v10180_v46 }
 0x18c   :  { %v1867_v26 = vadd.f32 %v12813_v56, %v9690_v52  ;;  %v1861_v9 = vpop.f32.mrb[89].mxu0  ;;  %9848 = vmatmul.mubr.msk.f32.gmra.mrb[194].mxu0 %vm366_vm1, %v224_v49  ;;  %10183 = vmatpush3.bf16.msra.mxu1 %v12750_v19  ;;  %v3413_v49 = vld [vmem:[%s18637_s3 + $0xc8] sm:$0xff]  ;;  %v3435_v52 = vld [vmem:[%s18637_s3 + $0x178] sm:$0xff] }
 0x18d   :  { %v10184_v47 = vpack.c.bf16 %v3147_v50, %v3146_v51  ;;  %v1862_v57 = vadd.f32 %v12813_v56, %v1861_v9  ;;  %9850 = vmatprep.mubr.msk.f32.mxu0 %vm366_vm1, %v225_v12  ;;  %v238_v51 = vld [vmem:[%s18636_s0 + $0x688] sm:$0xff]  ;;  %v239_v9 = vld [vmem:[%s18636_s0 + $0x690] sm:$0xff] }
 0x18e   :  { %v3149_v59 = vmax.f32 %v1867_v26, 0.0 }
 0x18f   :  { %v3148_v60 = vmax.f32 %v1862_v57, 0.0  ;;  %v9693_v62 = vpop.f32.mrb[90].mxu0  ;;  %10185 = vmatprep.subr.bf16.mxu1 %v10184_v47 }
 0x190   :  { %v1877_v35 = vadd.f32 %v12813_v56, %v9693_v62  ;;  %v1871_v19 = vpop.f32.mrb[91].mxu0  ;;  %9851 = vmatmul.mubr.msk.f32.gmra.mrb[196].mxu0 %vm366_vm1, %v226_v58  ;;  %10187 = vmatpush3.bf16.msra.mxu1 %v12768_v31 }
 0x191   :  { %v10188_v2 = vpack.c.bf16 %v3149_v59, %v3148_v60  ;;  %v1872_v3 = vadd.f32 %v12813_v56, %v1871_v19  ;;  %9853 = vmatprep.mubr.msk.f32.mxu0 %vm366_vm1, %v227_v24  ;;  %v3434_v24 = vld [vmem:[%s18637_s3 + $0x170] sm:$0xff]  ;;  %v3456_v19 = vld [vmem:[%s18637_s3 + $0x220] sm:$0xff] }
 0x192   :  { %v3151_v4 = vmax.f32 %v1877_v35, 0.0  ;;  %v240_v35 = vld [vmem:[%s18636_s0 + $0x698] sm:$0xff] }
 0x193   :  { %v3150_v6 = vmax.f32 %v1872_v3, 0.0  ;;  %v9696_v7 = vpop.f32.mrb[92].mxu0  ;;  %10189 = vmatprep.subr.bf16.mxu1 %v10188_v2  ;;  %v241_v3 = vld [vmem:[%s18636_s0 + $0x6a0] sm:$0xff] }
 0x194   :  { %v1887_v44 = vadd.f32 %v12813_v56, %v9696_v7  ;;  %v1881_v31 = vpop.f32.mrb[93].mxu0  ;;  %9854 = vmatmul.mubr.msk.f32.gmra.mrb[198].mxu0 %vm366_vm1, %v228_v8  ;;  %10191 = vmatpush3.bf16.msra.mxu1 %v12786_v42  ;;  %v3455_v7 = vld [vmem:[%s18637_s3 + $0x218] sm:$0xff] }
 0x195   :  { %v10192_v10 = vpack.c.bf16 %v3151_v4, %v3150_v6  ;;  %v1882_v11 = vadd.f32 %v12813_v56, %v1881_v31  ;;  %9856 = vmatprep.mubr.msk.f32.mxu0 %vm366_vm1, %v229_v5 }
 0x196   :  { %v3153_v14 = vmax.f32 %v1887_v44, 0.0 }
 0x197   :  { %v3152_v16 = vmax.f32 %v1882_v11, 0.0  ;;  %v9699_v18 = vpop.f32.mrb[94].mxu0  ;;  %10193 = vmatprep.subr.bf16.mxu1 %v10192_v10  ;;  %v242_v10 = vld [vmem:[%s18636_s0 + $0x6a8] sm:$0xff] }
 0x198   :  { %v1897_v54 = vadd.f32 %v12813_v56, %v9699_v18  ;;  %v1891_v42 = vpop.f32.mrb[95].mxu0  ;;  %9857 = vmatmul.mubr.msk.f32.gmra.mrb[200].mxu0 %vm366_vm1, %v230_v13  ;;  %10195 = vmatpush3.bf16.msra.mxu1 %v12808_v55  ;;  %v3477_v11 = vld [vmem:[%s18637_s3 + $0x2c8] sm:$0xff] }
 0x199   :  { %v10196_v21 = vpack.c.bf16 %v3153_v14, %v3152_v16  ;;  %v1892_v22 = vadd.f32 %v12813_v56, %v1891_v42  ;;  %9859 = vmatprep.mubr.msk.f32.mxu0 %vm366_vm1, %v231_v15  ;;  %v243_v14 = vld [vmem:[%s18636_s0 + $0x6b0] sm:$0xff]  ;;  %v3476_v42 = vld [vmem:[%s18637_s3 + $0x2c0] sm:$0xff] }
 0x19a   :  { %v3155_v23 = vmax.f32 %v1897_v54, 0.0 }
 0x19b   :  { %v3154_v25 = vmax.f32 %v1892_v22, 0.0  ;;  %v9702_v63 = vpop.f32.mrb[96].mxu0  ;;  %10197 = vmatprep.subr.bf16.mxu1 %v10196_v21 }
 0x19c   :  { %v1907_v27 = vadd.f32 %v12813_v56, %v9702_v63  ;;  %v1901_v55 = vpop.f32.mrb[97].mxu0  ;;  %9860 = vmatmul.mubr.msk.f32.gmra.mrb[202].mxu0 %vm366_vm1, %v232_v41  ;;  %10199 = vmatpush3.bf16.msra.mxu1 %v12832_v20  ;;  %v244_v41 = vld [vmem:[%s18636_s0 + $0x6b8] sm:$0xff] }
 0x19d   :  { %v10200_v28 = vpack.c.bf16 %v3155_v23, %v3154_v25  ;;  %v1902_v29 = vadd.f32 %v12813_v56, %v1901_v55  ;;  %9862 = vmatprep.mubr.msk.f32.mxu0 %vm366_vm1, %v233_v0  ;;  %v3498_v23 = vld [vmem:[%s18637_s3 + $0x370] sm:$0xff]  ;;  %v245_v25 = vld [vmem:[%s18636_s0 + $0x6c0] sm:$0xff] }
 0x19e   :  { %v3157_v32 = vmax.f32 %v1907_v27, 0.0 }
 0x19f   :  { %v3156_v34 = vmax.f32 %v1902_v29, 0.0  ;;  %v9705_v36 = vpop.f32.mrb[98].mxu0  ;;  %10201 = vmatprep.subr.bf16.mxu1 %v10200_v28  ;;  %v3497_v29 = vld [vmem:[%s18637_s3 + $0x368] sm:$0xff] }
 0x1a0   :  { %v1917_v37 = vadd.f32 %v12813_v56, %v9705_v36  ;;  %v1911_v20 = vpop.f32.mrb[99].mxu0  ;;  %9863 = vmatmul.mubr.msk.f32.gmra.mrb[204].mxu0 %vm366_vm1, %v234_v53  ;;  %10203 = vmatpush3.bf16.msra.mxu1 %v12845_v30  ;;  %v237_v30 = vld [vmem:[%s18636_s0 + $0x680] sm:$0xff] }
 0x1a1   :  { %v12957_v39 = vpack.c.bf16 %v3157_v32, %v3156_v34  ;;  %v1912_v40 = vadd.f32 %v12813_v56, %v1911_v20  ;;  %9865 = vmatprep.mubr.msk.f32.mxu0 %vm366_vm1, %v235_v33  ;;  %v246_v33 = vld [vmem:[%s18636_s0 + $0x6c8] sm:$0xff]  ;;  %v3519_v34 = vld [vmem:[%s18637_s3 + $0x418] sm:$0xff] }
 0x1a2   :  { %v3159_v17 = vmax.f32 %v1917_v37, 0.0  ;;  %v247_v37 = vld [vmem:[%s18636_s0 + $0x6d0] sm:$0xff] }
 0x1a3   :  { %v3158_v61 = vmax.f32 %v1912_v40, 0.0  ;;  %v9708_v45 = vpop.f32.mrb[100].mxu0  ;;  %3890 = vmatmul.mubr.f32.vlgmr.msra.gmra.mrb[36].mxu1 %v3392_v38 }
 0x1a4   :  { %v1927_v46 = vadd.f32 %v12813_v56, %v9708_v45  ;;  %v1921_v48 = vpop.f32.mrb[101].mxu0  ;;  %9866 = vmatmul.mubr.msk.f32.gmra.mrb[206].mxu0 %vm366_vm1, %v236_v1  ;;  %3894 = vmatprep.mubr.f32.mxu1 %v3414_v43  ;;  %v3518_v43 = vld [vmem:[%s18637_s3 + $0x410] sm:$0xff]  ;;  %v3540_v45 = vld [vmem:[%s18637_s3 + $0x4c0] sm:$0xff] }
 0x1a5   :  { %v12975_v50 = vpack.c.bf16 %v3159_v17, %v3158_v61  ;;  %v1922_v12 = vadd.f32 %v12813_v56, %v1921_v48  ;;  %9868 = vmatprep.mubr.msk.f32.mxu0 %vm366_vm1, %v237_v30  ;;  %v248_v61 = vld [vmem:[%s18636_s0 + $0x6d8] sm:$0xff]  ;;  %v249_v48 = vld [vmem:[%s18636_s0 + $0x6e0] sm:$0xff] }
 0x1a6   :  { %v3161_v26 = vmax.f32 %v1927_v46, 0.0 }
 0x1a7   :  { %v3160_v47 = vmax.f32 %v1922_v12, 0.0  ;;  %v9711_v57 = vpop.f32.mrb[102].mxu0  ;;  %3895 = vmatmul.mubr.f32.gmra.mrb[38].mxu1 %v3413_v49 }
 0x1a8   :  { %v1937_v58 = vadd.f32 %v12813_v56, %v9711_v57  ;;  %v1931_v59 = vpop.f32.mrb[103].mxu0  ;;  %9869 = vmatmul.mubr.msk.f32.gmra.mrb[208].mxu0 %vm366_vm1, %v238_v51  ;;  %3899 = vmatprep.mubr.f32.mxu1 %v3435_v52  ;;  %v250_v57 = vld [vmem:[%s18636_s0 + $0x6e8] sm:$0xff] }
 0x1a9   :  { %v12993_v60 = vpack.c.bf16 %v3161_v26, %v3160_v47  ;;  %v1932_v62 = vadd.f32 %v12813_v56, %v1931_v59  ;;  %9871 = vmatprep.mubr.msk.f32.mxu0 %vm366_vm1, %v239_v9  ;;  %v3539_v26 = vld [vmem:[%s18637_s3 + $0x4b8] sm:$0xff] }
 0x1aa   :  { %v3163_v2 = vmax.f32 %v1937_v58, 0.0  ;;  %v3561_v58 = vld [vmem:[%s18637_s3 + $0x568] sm:$0xff] }
 0x1ab   :  { %v3162_v8 = vmax.f32 %v1932_v62, 0.0  ;;  %v9714_v4 = vpop.f32.mrb[104].mxu0  ;;  %3900 = vmatmul.mubr.f32.gmra.mrb[40].mxu1 %v3434_v24  ;;  %v251_v24 = vld [vmem:[%s18636_s0 + $0x6f0] sm:$0xff] }
 0x1ac   :  { %v1947_v5 = vadd.f32 %v12813_v56, %v9714_v4  ;;  %v1941_v6 = vpop.f32.mrb[105].mxu0  ;;  %9872 = vmatmul.mubr.msk.f32.gmra.mrb[210].mxu0 %vm366_vm1, %v240_v35  ;;  %3904 = vmatprep.mubr.f32.mxu1 %v3456_v19 }
 0x1ad   :  { %v13011_v44 = vpack.c.bf16 %v3163_v2, %v3162_v8  ;;  %v1942_v31 = vadd.f32 %v12813_v56, %v1941_v6  ;;  %9874 = vmatprep.mubr.msk.f32.mxu0 %vm366_vm1, %v241_v3  ;;  %v3560_v3 = vld [vmem:[%s18637_s3 + $0x560] sm:$0xff] }
 0x1ae   :  { %v3165_v13 = vmax.f32 %v1947_v5, 0.0  ;;  %v252_v5 = vld [vmem:[%s18636_s0 + $0x6f8] sm:$0xff] }
 0x1af   :  { %v3164_v15 = vmax.f32 %v1942_v31, 0.0  ;;  %v9717_v16 = vpop.f32.mrb[106].mxu0  ;;  %3905 = vmatmul.mubr.f32.gmra.mrb[42].mxu1 %v3455_v7  ;;  %v253_v7 = vld [vmem:[%s18636_s0 + $0x700] sm:$0xff]  ;;  %v3395_v31 = vld [vmem:[%s18637_s3 + $0x38] sm:$0xff] }
 0x1b0   :  { %v1957_v18 = vadd.f32 %v12813_v56, %v9717_v16  ;;  %v1951_v54 = vpop.f32.mrb[107].mxu0  ;;  %9875 = vmatmul.mubr.msk.f32.gmra.mrb[212].mxu0 %vm366_vm1, %v242_v10  ;;  %3909 = vmatprep.mubr.f32.mxu1 %v3477_v11 }
 0x1b1   :  { %v13029_v21 = vpack.c.bf16 %v3165_v13, %v3164_v15  ;;  %v1952_v22 = vadd.f32 %v12813_v56, %v1951_v54  ;;  %9877 = vmatprep.mubr.msk.f32.mxu0 %vm366_vm1, %v243_v14 }
 0x1b2   :  { %v3167_v0 = vmax.f32 %v1957_v18, 0.0  ;;  %v254_v18 = vld [vmem:[%s18636_s0 + $0x708] sm:$0xff] }
 0x1b3   :  { %v3166_v63 = vmax.f32 %v1952_v22, 0.0  ;;  %v9720_v27 = vpop.f32.mrb[108].mxu0  ;;  %3910 = vmatmul.mubr.f32.gmra.mrb[44].mxu1 %v3476_v42  ;;  %v255_v42 = vld [vmem:[%s18636_s0 + $0x710] sm:$0xff] }
 0x1b4   :  { %v1967_v55 = vadd.f32 %v12813_v56, %v9720_v27  ;;  %v1961_v28 = vpop.f32.mrb[109].mxu0  ;;  %9878 = vmatmul.mubr.msk.f32.gmra.mrb[214].mxu0 %vm366_vm1, %v244_v41  ;;  %3914 = vmatprep.mubr.f32.mxu1 %v3498_v23 }
 0x1b5   :  { %v13047_v53 = vpack.c.bf16 %v3167_v0, %v3166_v63  ;;  %v1962_v32 = vadd.f32 %v12813_v56, %v1961_v28  ;;  %9880 = vmatprep.mubr.msk.f32.mxu0 %vm366_vm1, %v245_v25  ;;  %v256_v63 = vld [vmem:[%s18636_s0 + $0x718] sm:$0xff] }
 0x1b6   :  { %v3169_v36 = vmax.f32 %v1967_v55, 0.0  ;;  %v257_v55 = vld [vmem:[%s18636_s0 + $0x720] sm:$0xff] }
 0x1b7   :  { %v3168_v20 = vmax.f32 %v1962_v32, 0.0  ;;  %v9723_v38 = vpop.f32.mrb[110].mxu0  ;;  %3915 = vmatmul.mubr.f32.gmra.mrb[46].mxu1 %v3497_v29 }
 0x1b8   :  { %v1977_v40 = vadd.f32 %v12813_v56, %v9723_v38  ;;  %v1971_v1 = vpop.f32.mrb[111].mxu0  ;;  %9881 = vmatmul.mubr.msk.f32.gmra.mrb[216].mxu0 %vm366_vm1, %v246_v33  ;;  %3919 = vmatprep.mubr.f32.mxu1 %v3519_v34 }
 0x1b9   :  { %v13065_v17 = vpack.c.bf16 %v3169_v36, %v3168_v20  ;;  %v1972_v30 = vadd.f32 %v12813_v56, %v1971_v1  ;;  %9883 = vmatprep.mubr.msk.f32.mxu0 %vm366_vm1, %v247_v37  ;;  %v258_v36 = vld [vmem:[%s18636_s0 + $0x728] sm:$0xff]  ;;  %v259_v20 = vld [vmem:[%s18636_s0 + $0x730] sm:$0xff] }
 0x1ba   :  { %v3171_v46 = vmax.f32 %v1977_v40, 0.0 }
 0x1bb   :  { %v3170_v49 = vmax.f32 %v1972_v30, 0.0  ;;  %v9726_v12 = vpop.f32.mrb[112].mxu0  ;;  %3920 = vmatmul.mubr.f32.gmra.mrb[48].mxu1 %v3518_v43 }
 0x1bc   :  { %v1987_v51 = vadd.f32 %v12813_v56, %v9726_v12  ;;  %v1981_v52 = vpop.f32.mrb[113].mxu0  ;;  %9884 = vmatmul.mubr.msk.f32.gmra.mrb[218].mxu0 %vm366_vm1, %v248_v61  ;;  %3924 = vmatprep.mubr.f32.mxu1 %v3540_v45  ;;  %v260_v61 = vld [vmem:[%s18636_s0 + $0x738] sm:$0xff] }
 0x1bd   :  { %v13083_v9 = vpack.c.bf16 %v3171_v46, %v3170_v49  ;;  %v1982_v47 = vadd.f32 %v12813_v56, %v1981_v52  ;;  %9886 = vmatprep.mubr.msk.f32.mxu0 %vm366_vm1, %v249_v48  ;;  %v261_v46 = vld [vmem:[%s18636_s0 + $0x740] sm:$0xff] }
 0x1be   :  { %v3173_v59 = vmax.f32 %v1987_v51, 0.0 }
 0x1bf   :  { %v3172_v62 = vmax.f32 %v1982_v47, 0.0  ;;  %v9729_v35 = vpop.f32.mrb[114].mxu0  ;;  %3925 = vmatmul.mubr.f32.gmra.mrb[50].mxu1 %v3539_v26  ;;  %v262_v26 = vld [vmem:[%s18636_s0 + $0x748] sm:$0xff] }
 0x1c0   :  { %v1997_v19 = vadd.f32 %v12813_v56, %v9729_v35  ;;  %v1991_v2 = vpop.f32.mrb[115].mxu0  ;;  %9887 = vmatmul.mubr.msk.f32.gmra.mrb[220].mxu0 %vm366_vm1, %v250_v57  ;;  %3929 = vmatprep.mubr.f32.mxu1 %v3561_v58  ;;  %v263_v57 = vld [vmem:[%s18636_s0 + $0x750] sm:$0xff] }
 0x1c1   :  { %v10204_v8 = vpack.c.bf16 %v3173_v59, %v3172_v62  ;;  %v1992_v4 = vadd.f32 %v12813_v56, %v1991_v2  ;;  %9889 = vmatprep.mubr.msk.f32.mxu0 %vm366_vm1, %v251_v24 }
 0x1c2   :  { %v3175_v6 = vmax.f32 %v1997_v19, 0.0  ;;  %v264_v19 = vld [vmem:[%s18636_s0 + $0x758] sm:$0xff] }
 0x1c3   :  { %v3174_v10 = vmax.f32 %v1992_v4, 0.0  ;;  %v9732_v11 = vpop.f32.mrb[116].mxu0  ;;  %10205 = vmatprep.subr.bf16.mxu1 %v10204_v8  ;;  %3930 = vmatmul.mubr.f32.gmra.mrb[52].mxu1 %v3560_v3  ;;  %v265_v3 = vld [vmem:[%s18636_s0 + $0x760] sm:$0xff] }
 0x1c4   :  { %v2007_v13 = vadd.f32 %v12813_v56, %v9732_v11  ;;  %v2001_v14 = vpop.f32.mrb[117].mxu0  ;;  %9890 = vmatmul.mubr.msk.f32.gmra.mrb[222].mxu0 %vm366_vm1, %v252_v5  ;;  %10207 = vmatpush3.bf16.msra.mxu1 %v12957_v39  ;;  %v267_v11 = vld [vmem:[%s18636_s0 + $0x770] sm:$0xff] }
 0x1c5   :  { %v10208_v15 = vpack.c.bf16 %v3175_v6, %v3174_v10  ;;  %v2002_v16 = vadd.f32 %v12813_v56, %v2001_v14  ;;  %9892 = vmatprep.mubr.msk.f32.mxu0 %vm366_vm1, %v253_v7  ;;  %3999 = vmatprep.mubr.f32.mxu1 %v3395_v31  ;;  %v266_v31 = vld [vmem:[%s18636_s0 + $0x768] sm:$0xff] }
 0x1c6   :  { %v3177_v54 = vmax.f32 %v2007_v13, 0.0 }
 0x1c7   :  { %v3176_v22 = vmax.f32 %v2002_v16, 0.0  ;;  %v9735_v41 = vpop.f32.mrb[118].mxu0  ;;  %10209 = vmatprep.subr.bf16.mxu1 %v10208_v15  ;;  %v3394_v16 = vld [vmem:[%s18637_s3 + $0x30] sm:$0xff] }
 0x1c8   :  { %v2017_v39 = vadd.f32 %v12813_v56, %v9735_v41  ;;  %v2011_v23 = vpop.f32.mrb[119].mxu0  ;;  %9893 = vmatmul.mubr.msk.f32.gmra.mrb[224].mxu0 %vm366_vm1, %v254_v18  ;;  %10211 = vmatpush3.bf16.msra.mxu1 %v12975_v50 }
 0x1c9   :  { %v10212_v0 = vpack.c.bf16 %v3177_v54, %v3176_v22  ;;  %v2012_v25 = vadd.f32 %v12813_v56, %v2011_v23  ;;  %9895 = vmatprep.mubr.msk.f32.mxu0 %vm366_vm1, %v255_v42  ;;  %v268_v42 = vld [vmem:[%s18636_s0 + $0x778] sm:$0xff]  ;;  %v3416_v22 = vld [vmem:[%s18637_s3 + $0xe0] sm:$0xff] }
 0x1ca   :  { %v3179_v27 = vmax.f32 %v2017_v39, 0.0 }
 0x1cb   :  { %v3178_v28 = vmax.f32 %v2012_v25, 0.0  ;;  %v9738_v29 = vpop.f32.mrb[120].mxu0  ;;  %10213 = vmatprep.subr.bf16.mxu1 %v10212_v0 }
 0x1cc   :  { %v2027_v32 = vadd.f32 %v12813_v56, %v9738_v29  ;;  %v2021_v50 = vpop.f32.mrb[121].mxu0  ;;  %9896 = vmatmul.mubr.msk.f32.gmra.mrb[226].mxu0 %vm366_vm1, %v256_v63  ;;  %10215 = vmatpush3.bf16.msra.mxu1 %v12993_v60  ;;  %v3415_v63 = vld [vmem:[%s18637_s3 + $0xd8] sm:$0xff]  ;;  %v3437_v29 = vld [vmem:[%s18637_s3 + $0x188] sm:$0xff] }
 0x1cd   :  { %v10216_v33 = vpack.c.bf16 %v3179_v27, %v3178_v28  ;;  %v2022_v34 = vadd.f32 %v12813_v56, %v2021_v50  ;;  %9898 = vmatprep.mubr.msk.f32.mxu0 %vm366_vm1, %v257_v55  ;;  %v270_v28 = vld [vmem:[%s18636_s0 + $0x788] sm:$0xff]  ;;  %v271_v50 = vld [vmem:[%s18636_s0 + $0x790] sm:$0xff] }
 0x1ce   :  { %v3181_v37 = vmax.f32 %v2027_v32, 0.0 }
 0x1cf   :  { %v3180_v38 = vmax.f32 %v2022_v34, 0.0  ;;  %v9741_v40 = vpop.f32.mrb[122].mxu0  ;;  %10217 = vmatprep.subr.bf16.mxu1 %v10216_v33 }
 0x1d0   :  { %v2037_v1 = vadd.f32 %v12813_v56, %v9741_v40  ;;  %v2031_v60 = vpop.f32.mrb[123].mxu0  ;;  %9899 = vmatmul.mubr.msk.f32.gmra.mrb[228].mxu0 %vm366_vm1, %v258_v36  ;;  %10219 = vmatpush3.bf16.msra.mxu1 %v13011_v44 }
 0x1d1   :  { %v10220_v43 = vpack.c.bf16 %v3181_v37, %v3180_v38  ;;  %v2032_v30 = vadd.f32 %v12813_v56, %v2031_v60  ;;  %9901 = vmatprep.mubr.msk.f32.mxu0 %vm366_vm1, %v259_v20  ;;  %v3436_v20 = vld [vmem:[%s18637_s3 + $0x180] sm:$0xff]  ;;  %v3458_v60 = vld [vmem:[%s18637_s3 + $0x230] sm:$0xff] }
 0x1d2   :  { %v3183_v45 = vmax.f32 %v2037_v1, 0.0  ;;  %v272_v1 = vld [vmem:[%s18636_s0 + $0x798] sm:$0xff] }
 0x1d3   :  { %v3182_v48 = vmax.f32 %v2032_v30, 0.0  ;;  %v9744_v49 = vpop.f32.mrb[124].mxu0  ;;  %10221 = vmatprep.subr.bf16.mxu1 %v10220_v43  ;;  %v273_v30 = vld [vmem:[%s18636_s0 + $0x7a0] sm:$0xff] }
 0x1d4   :  { %v2047_v12 = vadd.f32 %v12813_v56, %v9744_v49  ;;  %v2041_v44 = vpop.f32.mrb[125].mxu0  ;;  %9902 = vmatmul.mubr.msk.f32.gmra.mrb[230].mxu0 %vm366_vm1, %v260_v61  ;;  %10223 = vmatpush3.bf16.msra.mxu1 %v13029_v21  ;;  %v3457_v49 = vld [vmem:[%s18637_s3 + $0x228] sm:$0xff] }
 0x1d5   :  { %v10224_v51 = vpack.c.bf16 %v3183_v45, %v3182_v48  ;;  %v2042_v52 = vadd.f32 %v12813_v56, %v2041_v44  ;;  %9904 = vmatprep.mubr.msk.f32.mxu0 %vm366_vm1, %v261_v46 }
 0x1d6   :  { %v3185_v47 = vmax.f32 %v2047_v12, 0.0 }
 0x1d7   :  { %v3184_v58 = vmax.f32 %v2042_v52, 0.0  ;;  %v9747_v59 = vpop.f32.mrb[126].mxu0  ;;  %10225 = vmatprep.subr.bf16.mxu1 %v10224_v51  ;;  %v274_v51 = vld [vmem:[%s18636_s0 + $0x7a8] sm:$0xff]  ;;  %v3479_v52 = vld [vmem:[%s18637_s3 + $0x2d8] sm:$0xff] }
 0x1d8   :  { %v2057_v24 = vadd.f32 %v12813_v56, %v9747_v59  ;;  %v2051_v21 = vpop.f32.mrb[127].mxu0  ;;  %9905 = vmatmul.mubr.msk.f32.gmra.mrb[232].mxu0 %vm366_vm1, %v262_v26  ;;  %10227 = vmatpush3.bf16.msra.mxu1 %v13047_v53 }
 0x1d9   :  { %v10228_v62 = vpack.c.bf16 %v3185_v47, %v3184_v58  ;;  %v2052_v35 = vadd.f32 %v12813_v56, %v2051_v21  ;;  %9907 = vmatprep.mubr.msk.f32.mxu0 %vm366_vm1, %v263_v57  ;;  %v275_v47 = vld [vmem:[%s18636_s0 + $0x7b0] sm:$0xff] }
 0x1da   :  { %v3187_v2 = vmax.f32 %v2057_v24, 0.0  ;;  %v3478_v21 = vld [vmem:[%s18637_s3 + $0x2d0] sm:$0xff] }
 0x1db   :  { %v3186_v8 = vmax.f32 %v2052_v35, 0.0  ;;  %v9750_v4 = vpop.f32.mrb[128].mxu0  ;;  %10229 = vmatprep.subr.bf16.mxu1 %v10228_v62 }
 0x1dc   :  { %v2067_v5 = vadd.f32 %v12813_v56, %v9750_v4  ;;  %v2061_v53 = vpop.f32.mrb[129].mxu0  ;;  %9908 = vmatmul.mubr.msk.f32.gmra.mrb[234].mxu0 %vm366_vm1, %v264_v19  ;;  %10231 = vmatpush3.bf16.msra.mxu1 %v13065_v17  ;;  %v276_v19 = vld [vmem:[%s18636_s0 + $0x7b8] sm:$0xff] }
 0x1dd   :  { %v10232_v6 = vpack.c.bf16 %v3187_v2, %v3186_v8  ;;  %v2062_v7 = vadd.f32 %v12813_v56, %v2061_v53  ;;  %9910 = vmatprep.mubr.msk.f32.mxu0 %vm366_vm1, %v265_v3  ;;  %v3500_v2 = vld [vmem:[%s18637_s3 + $0x380] sm:$0xff] }
 0x1de   :  { %v3189_v10 = vmax.f32 %v2067_v5, 0.0  ;;  %v277_v8 = vld [vmem:[%s18636_s0 + $0x7c0] sm:$0xff] }
 0x1df   :  { %v3188_v13 = vmax.f32 %v2062_v7, 0.0  ;;  %v9753_v14 = vpop.f32.mrb[130].mxu0  ;;  %10233 = vmatprep.subr.bf16.mxu1 %v10232_v6  ;;  %v3499_v7 = vld [vmem:[%s18637_s3 + $0x378] sm:$0xff] }
 0x1e0   :  { %v2077_v15 = vadd.f32 %v12813_v56, %v9753_v14  ;;  %v2071_v17 = vpop.f32.mrb[131].mxu0  ;;  %9911 = vmatmul.mubr.msk.f32.gmra.mrb[236].mxu0 %vm366_vm1, %v266_v31  ;;  %10235 = vmatpush3.bf16.msra.mxu1 %v13083_v9  ;;  %v269_v9 = vld [vmem:[%s18636_s0 + $0x780] sm:$0xff] }
 0x1e1   :  { %v13195_v18 = vpack.c.bf16 %v3189_v10, %v3188_v13  ;;  %v2072_v54 = vadd.f32 %v12813_v56, %v2071_v17  ;;  %9913 = vmatprep.mubr.msk.f32.mxu0 %vm366_vm1, %v267_v11  ;;  %v278_v11 = vld [vmem:[%s18636_s0 + $0x7c8] sm:$0xff] }
 0x1e2   :  { %v3191_v41 = vmax.f32 %v2077_v15, 0.0  ;;  %v3521_v13 = vld [vmem:[%s18637_s3 + $0x428] sm:$0xff]  ;;  %v279_v15 = vld [vmem:[%s18636_s0 + $0x7d0] sm:$0xff] }
 0x1e3   :  { %v3190_v39 = vmax.f32 %v2072_v54, 0.0  ;;  %v9756_v23 = vpop.f32.mrb[132].mxu0  ;;  %4000 = vmatmul.mubr.f32.vlgmr.msra.gmra.mrb[54].mxu1 %v3394_v16 }
 0x1e4   :  { %v2087_v0 = vadd.f32 %v12813_v56, %v9756_v23  ;;  %v2081_v25 = vpop.f32.mrb[133].mxu0  ;;  %9914 = vmatmul.mubr.msk.f32.gmra.mrb[238].mxu0 %vm366_vm1, %v268_v42  ;;  %4004 = vmatprep.mubr.f32.mxu1 %v3416_v22  ;;  %v3520_v22 = vld [vmem:[%s18637_s3 + $0x420] sm:$0xff]  ;;  %v3542_v23 = vld [vmem:[%s18637_s3 + $0x4d0] sm:$0xff] }
 0x1e5   :  { %v13213_v27 = vpack.c.bf16 %v3191_v41, %v3190_v39  ;;  %v2082_v55 = vadd.f32 %v12813_v56, %v2081_v25  ;;  %9916 = vmatprep.mubr.msk.f32.mxu0 %vm366_vm1, %v269_v9  ;;  %v280_v39 = vld [vmem:[%s18636_s0 + $0x7d8] sm:$0xff]  ;;  %v281_v25 = vld [vmem:[%s18636_s0 + $0x7e0] sm:$0xff] }
 0x1e6   :  { %v3193_v32 = vmax.f32 %v2087_v0, 0.0 }
 0x1e7   :  { %v3192_v33 = vmax.f32 %v2082_v55, 0.0  ;;  %v9759_v34 = vpop.f32.mrb[134].mxu0  ;;  %4005 = vmatmul.mubr.f32.gmra.mrb[56].mxu1 %v3415_v63 }
 0x1e8   :  { %v2097_v36 = vadd.f32 %v12813_v56, %v9759_v34  ;;  %v2091_v37 = vpop.f32.mrb[135].mxu0  ;;  %9917 = vmatmul.mubr.msk.f32.gmra.mrb[240].mxu0 %vm366_vm1, %v270_v28  ;;  %4009 = vmatprep.mubr.f32.mxu1 %v3437_v29  ;;  %v282_v34 = vld [vmem:[%s18636_s0 + $0x7e8] sm:$0xff] }
 0x1e9   :  { %v13231_v38 = vpack.c.bf16 %v3193_v32, %v3192_v33  ;;  %v2092_v40 = vadd.f32 %v12813_v56, %v2091_v37  ;;  %9919 = vmatprep.mubr.msk.f32.mxu0 %vm366_vm1, %v271_v50  ;;  %v3541_v32 = vld [vmem:[%s18637_s3 + $0x4c8] sm:$0xff] }
 0x1ea   :  { %v3195_v43 = vmax.f32 %v2097_v36, 0.0  ;;  %v3563_v36 = vld [vmem:[%s18637_s3 + $0x578] sm:$0xff] }
 0x1eb   :  { %v3194_v61 = vmax.f32 %v2092_v40, 0.0  ;;  %v9762_v45 = vpop.f32.mrb[136].mxu0  ;;  %4010 = vmatmul.mubr.f32.gmra.mrb[58].mxu1 %v3436_v20  ;;  %v283_v20 = vld [vmem:[%s18636_s0 + $0x7f0] sm:$0xff] }
 0x1ec   :  { %v2107_v46 = vadd.f32 %v12813_v56, %v9762_v45  ;;  %v2101_v48 = vpop.f32.mrb[137].mxu0  ;;  %9920 = vmatmul.mubr.msk.f32.gmra.mrb[242].mxu0 %vm366_vm1, %v272_v1  ;;  %4014 = vmatprep.mubr.f32.mxu1 %v3458_v60 }
 0x1ed   :  { %v13249_v12 = vpack.c.bf16 %v3195_v43, %v3194_v61  ;;  %v2102_v44 = vadd.f32 %v12813_v56, %v2101_v48  ;;  %9922 = vmatprep.mubr.msk.f32.mxu0 %vm366_vm1, %v273_v30  ;;  %v3562_v30 = vld [vmem:[%s18637_s3 + $0x570] sm:$0xff] }
 0x1ee   :  { %v3197_v26 = vmax.f32 %v2107_v46, 0.0  ;;  %v284_v46 = vld [vmem:[%s18636_s0 + $0x7f8] sm:$0xff] }
 0x1ef   :  { %v3196_v57 = vmax.f32 %v2102_v44, 0.0  ;;  %v9765_v58 = vpop.f32.mrb[138].mxu0  ;;  %4015 = vmatmul.mubr.f32.gmra.mrb[60].mxu1 %v3457_v49  ;;  %v285_v49 = vld [vmem:[%s18636_s0 + $0x800] sm:$0xff]  ;;  %v3397_v44 = vld [vmem:[%s18637_s3 + $0x48] sm:$0xff] }
 0x1f0   :  { %v2117_v59 = vadd.f32 %v12813_v56, %v9765_v58  ;;  %v2111_v24 = vpop.f32.mrb[139].mxu0  ;;  %9923 = vmatmul.mubr.msk.f32.gmra.mrb[244].mxu0 %vm366_vm1, %v274_v51  ;;  %4019 = vmatprep.mubr.f32.mxu1 %v3479_v52  ;;  %v13356_v58 = vld [vmem:[%s18638_s2] ss:$0 sm:$0xff] }
 0x1f1   :  { %v13267_v62 = vpack.c.bf16 %v3197_v26, %v3196_v57  ;;  %v2112_v35 = vadd.f32 %v12813_v56, %v2111_v24  ;;  %9925 = vmatprep.mubr.msk.f32.mxu0 %vm366_vm1, %v275_v47  ;;  %v286_v24 = vld [vmem:[%s18636_s0 + $0x808] sm:$0xff] }
 0x1f2   :  { %v3199_v3 = vmax.f32 %v2117_v59, 0.0 }
 0x1f3   :  { %v3198_v4 = vmax.f32 %v2112_v35, 0.0  ;;  %v9768_v5 = vpop.f32.mrb[140].mxu0  ;;  %4020 = vmatmul.mubr.f32.gmra.mrb[62].mxu1 %v3478_v21 }
 0x1f4   :  { %v2127_v53 = vadd.f32 %v12813_v56, %v9768_v5  ;;  %v2121_v6 = vpop.f32.mrb[141].mxu0  ;;  %9926 = vmatmul.mubr.msk.f32.gmra.mrb[246].mxu0 %vm366_vm1, %v276_v19  ;;  %4024 = vmatprep.mubr.f32.mxu1 %v3500_v2 }
 0x1f5   :  { %v13285_v31 = vpack.c.bf16 %v3199_v3, %v3198_v4  ;;  %v2122_v10 = vadd.f32 %v12813_v56, %v2121_v6  ;;  %9928 = vmatprep.mubr.msk.f32.mxu0 %vm366_vm1, %v277_v8  ;;  %v288_v4 = vld [vmem:[%s18636_s0 + $0x818] sm:$0xff] }
 0x1f6   :  { %v3201_v14 = vmax.f32 %v2127_v53, 0.0  ;;  %v289_v53 = vld [vmem:[%s18636_s0 + $0x820] sm:$0xff] }
 0x1f7   :  { %v3200_v17 = vmax.f32 %v2122_v10, 0.0  ;;  %v9771_v16 = vpop.f32.mrb[142].mxu0  ;;  %4025 = vmatmul.mubr.f32.gmra.mrb[64].mxu1 %v3499_v7 }
 0x1f8   :  { %v2137_v54 = vadd.f32 %v12813_v56, %v9771_v16  ;;  %v2131_v42 = vpop.f32.mrb[143].mxu0  ;;  %9929 = vmatmul.mubr.msk.f32.gmra.mrb[248].mxu0 %vm366_vm1, %v278_v11  ;;  %4029 = vmatprep.mubr.f32.mxu1 %v3521_v13 }
 0x1f9   :  { %v13303_v41 = vpack.c.bf16 %v3201_v14, %v3200_v17  ;;  %v2132_v9 = vadd.f32 %v12813_v56, %v2131_v42  ;;  %9931 = vmatprep.mubr.msk.f32.mxu0 %vm366_vm1, %v279_v15  ;;  %v290_v14 = vld [vmem:[%s18636_s0 + $0x828] sm:$0xff]  ;;  %v291_v17 = vld [vmem:[%s18636_s0 + $0x830] sm:$0xff] }
 0x1fa   :  { %v3203_v0 = vmax.f32 %v2137_v54, 0.0 }
 0x1fb   :  { %v3202_v63 = vmax.f32 %v2132_v9, 0.0  ;;  %v9774_v55 = vpop.f32.mrb[144].mxu0  ;;  %4030 = vmatmul.mubr.f32.gmra.mrb[66].mxu1 %v3520_v22 }
 0x1fc   :  { %v2147_v28 = vadd.f32 %v12813_v56, %v9774_v55  ;;  %v2141_v29 = vpop.f32.mrb[145].mxu0  ;;  %9932 = vmatmul.mubr.msk.f32.gmra.mrb[250].mxu0 %vm366_vm1, %v280_v39  ;;  %4034 = vmatprep.mubr.f32.mxu1 %v3542_v23  ;;  %v292_v39 = vld [vmem:[%s18636_s0 + $0x838] sm:$0xff] }
 0x1fd   :  { %v13321_v50 = vpack.c.bf16 %v3203_v0, %v3202_v63  ;;  %v2142_v33 = vadd.f32 %v12813_v56, %v2141_v29  ;;  %9934 = vmatprep.mubr.msk.f32.mxu0 %vm366_vm1, %v281_v25  ;;  %v293_v0 = vld [vmem:[%s18636_s0 + $0x840] sm:$0xff] }
 0x1fe   :  { %v3205_v37 = vmax.f32 %v2147_v28, 0.0 }
 0x1ff   :  { %v3204_v40 = vmax.f32 %v2142_v33, 0.0  ;;  %v9777_v1 = vpop.f32.mrb[146].mxu0  ;;  %4035 = vmatmul.mubr.f32.gmra.mrb[68].mxu1 %v3541_v32  ;;  %v294_v32 = vld [vmem:[%s18636_s0 + $0x848] sm:$0xff] }
 0x200   :  { %v2157_v60 = vadd.f32 %v12813_v56, %v9777_v1  ;;  %v2151_v43 = vpop.f32.mrb[147].mxu0  ;;  %9935 = vmatmul.mubr.msk.f32.gmra.mrb[252].mxu0 %vm366_vm1, %v282_v34  ;;  %4039 = vmatprep.mubr.f32.mxu1 %v3563_v36  ;;  %v295_v34 = vld [vmem:[%s18636_s0 + $0x850] sm:$0xff] }
 0x201   :  { %v10236_v61 = vpack.c.bf16 %v3205_v37, %v3204_v40  ;;  %v2152_v45 = vadd.f32 %v12813_v56, %v2151_v43  ;;  %9937 = vmatprep.mubr.msk.f32.mxu0 %vm366_vm1, %v283_v20 }
 0x202   :  { %v3207_v48 = vmax.f32 %v2157_v60, 0.0  ;;  %v296_v60 = vld [vmem:[%s18636_s0 + $0x858] sm:$0xff] }
 0x203   :  { %v3206_v51 = vmax.f32 %v2152_v45, 0.0  ;;  %v9780_v52 = vpop.f32.mrb[148].mxu0  ;;  %10237 = vmatprep.subr.bf16.mxu1 %v10236_v61  ;;  %4040 = vmatmul.mubr.f32.gmra.mrb[70].mxu1 %v3562_v30  ;;  %v297_v30 = vld [vmem:[%s18636_s0 + $0x860] sm:$0xff] }
 0x204   :  { %v2167_v26 = vadd.f32 %v12813_v56, %v9780_v52  ;;  %v2161_v47 = vpop.f32.mrb[149].mxu0  ;;  %9938 = vmatmul.mubr.msk.f32.gmra.mrb[254].mxu0 %vm366_vm1, %v284_v46  ;;  %10239 = vmatpush3.bf16.msra.mxu1 %v13195_v18  ;;  %v287_v18 = vld [vmem:[%s18636_s0 + $0x810] sm:$0xff] }
 0x205   :  { %v10240_v57 = vpack.c.bf16 %v3207_v48, %v3206_v51  ;;  %v2162_v59 = vadd.f32 %v13356_v58, %v2161_v47  ;;  %9940 = vmatprep.mubr.msk.f32.mxu0 %vm366_vm1, %v285_v49  ;;  %4109 = vmatprep.mubr.f32.mxu1 %v3397_v44  ;;  %v298_v44 = vld [vmem:[%s18636_s0 + $0x868] sm:$0xff]  ;;  %v299_v52 = vld [vmem:[%s18636_s0 + $0x870] sm:$0xff] }
 0x206   :  { %v3209_v56 = vmax.f32 %v2167_v26, 0.0 }
 0x207   :  { %v3208_v21 = vmax.f32 %v2162_v59, 0.0  ;;  %v9783_v35 = vpop.f32.mrb[150].mxu0  ;;  %10241 = vmatprep.subr.bf16.mxu1 %v10240_v57  ;;  %v3396_v59 = vld [vmem:[%s18637_s3 + $0x40] sm:$0xff] }
 0x208   :  { %v2177_v19 = vadd.f32 %v13356_v58, %v9783_v35  ;;  %v2171_v2 = vpop.f32.mrb[151].mxu0  ;;  %9941 = vmatmul.mubr.msk.f32.gmra.mrb[0].mxu0 %vm366_vm1, %v286_v24  ;;  %10243 = vmatpush3.bf16.msra.mxu1 %v13213_v27 }
 0x209   :  { %v10244_v3 = vpack.c.bf16 %v3209_v56, %v3208_v21  ;;  %v2172_v8 = vadd.f32 %v13356_v58, %v2171_v2  ;;  %9943 = vmatprep.mubr.msk.f32.mxu0 %vm366_vm1, %v287_v18  ;;  %v300_v18 = vld [vmem:[%s18636_s0 + $0x878] sm:$0xff]  ;;  %v3418_v21 = vld [vmem:[%s18637_s3 + $0xf0] sm:$0xff] }
 0x20a   :  { %v3211_v5 = vmax.f32 %v2177_v19, 0.0 }
 0x20b   :  { %v3210_v6 = vmax.f32 %v2172_v8, 0.0  ;;  %v9786_v7 = vpop.f32.mrb[152].mxu0  ;;  %10245 = vmatprep.subr.bf16.mxu1 %v10244_v3 }
 0x20c   :  { %v2187_v10 = vadd.f32 %v13356_v58, %v9786_v7  ;;  %v2181_v27 = vpop.f32.mrb[153].mxu0  ;;  %9944 = vmatmul.mubr.msk.f32.gmra.mrb[2].mxu0 %vm366_vm1, %v288_v4  ;;  %10247 = vmatpush3.bf16.msra.mxu1 %v13231_v38  ;;  %v3417_v4 = vld [vmem:[%s18637_s3 + $0xe8] sm:$0xff]  ;;  %v3439_v7 = vld [vmem:[%s18637_s3 + $0x198] sm:$0xff] }
 0x20d   :  { %v10248_v11 = vpack.c.bf16 %v3211_v5, %v3210_v6  ;;  %v2182_v13 = vadd.f32 %v13356_v58, %v2181_v27  ;;  %9946 = vmatprep.mubr.msk.f32.mxu0 %vm366_vm1, %v289_v53  ;;  %v302_v6 = vld [vmem:[%s18636_s0 + $0x888] sm:$0xff]  ;;  %v303_v27 = vld [vmem:[%s18636_s0 + $0x890] sm:$0xff] }
 0x20e   :  { %v3213_v15 = vmax.f32 %v2187_v10, 0.0 }
 0x20f   :  { %v3212_v16 = vmax.f32 %v2182_v13, 0.0  ;;  %v9789_v54 = vpop.f32.mrb[154].mxu0  ;;  %10249 = vmatprep.subr.bf16.mxu1 %v10248_v11 }
 0x210   :  { %v2197_v42 = vadd.f32 %v13356_v58, %v9789_v54  ;;  %v2191_v38 = vpop.f32.mrb[155].mxu0  ;;  %9947 = vmatmul.mubr.msk.f32.gmra.mrb[4].mxu0 %vm366_vm1, %v290_v14  ;;  %10251 = vmatpush3.bf16.msra.mxu1 %v13249_v12 }
 0x211   :  { %v10252_v22 = vpack.c.bf16 %v3213_v15, %v3212_v16  ;;  %v2192_v9 = vadd.f32 %v13356_v58, %v2191_v38  ;;  %9949 = vmatprep.mubr.msk.f32.mxu0 %vm366_vm1, %v291_v17  ;;  %v3438_v17 = vld [vmem:[%s18637_s3 + $0x190] sm:$0xff]  ;;  %v3460_v38 = vld [vmem:[%s18637_s3 + $0x240] sm:$0xff] }
 0x212   :  { %v3215_v23 = vmax.f32 %v2197_v42, 0.0  ;;  %v304_v42 = vld [vmem:[%s18636_s0 + $0x898] sm:$0xff] }
 0x213   :  { %v3214_v25 = vmax.f32 %v2192_v9, 0.0  ;;  %v9792_v63 = vpop.f32.mrb[156].mxu0  ;;  %10253 = vmatprep.subr.bf16.mxu1 %v10252_v22  ;;  %v305_v9 = vld [vmem:[%s18636_s0 + $0x8a0] sm:$0xff] }
 0x214   :  { %v2207_v55 = vadd.f32 %v13356_v58, %v9792_v63  ;;  %v2201_v12 = vpop.f32.mrb[157].mxu0  ;;  %9950 = vmatmul.mubr.msk.f32.gmra.mrb[6].mxu0 %vm366_vm1, %v292_v39  ;;  %10255 = vmatpush3.bf16.msra.mxu1 %v13267_v62  ;;  %v3459_v63 = vld [vmem:[%s18637_s3 + $0x238] sm:$0xff] }
 0x215   :  { %v10256_v28 = vpack.c.bf16 %v3215_v23, %v3214_v25  ;;  %v2202_v29 = vadd.f32 %v13356_v58, %v2201_v12  ;;  %9952 = vmatprep.mubr.msk.f32.mxu0 %vm366_vm1, %v293_v0 }
 0x216   :  { %v3217_v33 = vmax.f32 %v2207_v55, 0.0 }
 0x217   :  { %v3216_v36 = vmax.f32 %v2202_v29, 0.0  ;;  %v9795_v37 = vpop.f32.mrb[158].mxu0  ;;  %10257 = vmatprep.subr.bf16.mxu1 %v10256_v28  ;;  %v306_v28 = vld [vmem:[%s18636_s0 + $0x8a8] sm:$0xff] }
 0x218   :  { %v2217_v20 = vadd.f32 %v13356_v58, %v9795_v37  ;;  %v2211_v62 = vpop.f32.mrb[159].mxu0  ;;  %9953 = vmatmul.mubr.msk.f32.gmra.mrb[8].mxu0 %vm366_vm1, %v294_v32  ;;  %10259 = vmatpush3.bf16.msra.mxu1 %v13285_v31  ;;  %v3481_v29 = vld [vmem:[%s18637_s3 + $0x2e8] sm:$0xff]  ;;  %v8937_v37 = vpop.f32.mrb[0].mxu1 }
 0x219   :  { %v10260_v40 = vpack.c.bf16 %v3217_v33, %v3216_v36  ;;  %v2212_v1 = vadd.f32 %v13356_v58, %v2211_v62  ;;  %9955 = vmatprep.mubr.msk.f32.mxu0 %vm366_vm1, %v295_v34  ;;  %v307_v33 = vld [vmem:[%s18636_s0 + $0x8b0] sm:$0xff] }
 0x21a   :  { %v3219_v43 = vmax.f32 %v2217_v20, 0.0 }
 0x21b   :  { %v3218_v61 = vmax.f32 %v2212_v1, 0.0  ;;  %v9798_v45 = vpop.f32.mrb[160].mxu0  ;;  %10261 = vmatprep.subr.bf16.mxu1 %v10260_v40  ;;  %v3480_v40 = vld [vmem:[%s18637_s3 + $0x2e0] sm:$0xff]  ;;  %v8938_v1 = vpop.f32.mrb[1].mxu1 }
 0x21c   :  { %v2227_v46 = vadd.f32 %v13356_v58, %v9798_v45  ;;  %v2221_v31 = vpop.f32.mrb[161].mxu0  ;;  %9956 = vmatmul.mubr.msk.f32.gmra.mrb[10].mxu0 %vm366_vm1, %v296_v60  ;;  %10263 = vmatpush3.bf16.msra.mxu1 %v13303_v41  ;;  %v8940_v45 = vpop.f32.mrb[2].mxu1 }
 0x21d   :  { %v10264_v48 = vpack.c.bf16 %v3219_v43, %v3218_v61  ;;  %v2222_v49 = vadd.f32 %v13356_v58, %v2221_v31  ;;  %9958 = vmatprep.mubr.msk.f32.mxu0 %vm366_vm1, %v297_v30  ;;  %v308_v30 = vld [vmem:[%s18636_s0 + $0x8b8] sm:$0xff]  ;;  %v3502_v61 = vld [vmem:[%s18637_s3 + $0x390] sm:$0xff]  ;;  %v309_v31 = vld [vmem:[%s18636_s0 + $0x8c0] sm:$0xff] }
 0x21e   :  { %v3221_v51 = vmax.f32 %v2227_v46, 0.0 }
 0x21f   :  { %v3220_v26 = vmax.f32 %v2222_v49, 0.0  ;;  %v9801_v47 = vpop.f32.mrb[162].mxu0  ;;  %10265 = vmatprep.subr.bf16.mxu1 %v10264_v48  ;;  %v8941_v48 = vpop.f32.mrb[3].mxu1 }
 0x220   :  { %v2237_v57 = vadd.f32 %v13356_v58, %v9801_v47  ;;  %v2231_v41 = vpop.f32.mrb[163].mxu0  ;;  %9959 = vmatmul.mubr.msk.f32.gmra.mrb[12].mxu0 %vm366_vm1, %v298_v44  ;;  %10267 = vmatpush3.bf16.msra.mxu1 %v13321_v50  ;;  %v301_v50 = vld [vmem:[%s18636_s0 + $0x880] sm:$0xff]  ;;  %v3501_v47 = vld [vmem:[%s18637_s3 + $0x388] sm:$0xff] }
 0x221   :  { %v13438_v24 = vpack.c.bf16 %v3221_v51, %v3220_v26  ;;  %v2232_v56 = vadd.f32 %v13356_v58, %v2231_v41  ;;  %9961 = vmatprep.mubr.msk.f32.mxu0 %vm366_vm1, %v299_v52  ;;  %v8943_v51 = vpop.f32.mrb[4].mxu1 }
 0x222   :  { %v3223_v35 = vmax.f32 %v2237_v57, 0.0  ;;  %v8944_v57 = vpop.f32.mrb[5].mxu1 }
 0x223   :  { %v3222_v19 = vmax.f32 %v2232_v56, 0.0  ;;  %v9804_v2 = vpop.f32.mrb[164].mxu0  ;;  %4110 = vmatmul.mubr.f32.vlgmr.msra.gmra.mrb[72].mxu1 %v3396_v59  ;;  %v310_v56 = vld [vmem:[%s18636_s0 + $0x8c8] sm:$0xff] }
 0x224   :  { %v2247_v3 = vadd.f32 %v13356_v58, %v9804_v2  ;;  %v2241_v8 = vpop.f32.mrb[165].mxu0  ;;  %9962 = vmatmul.mubr.msk.f32.gmra.mrb[14].mxu0 %vm366_vm1, %v300_v18  ;;  %4114 = vmatprep.mubr.f32.mxu1 %v3418_v21  ;;  %v3523_v18 = vld [vmem:[%s18637_s3 + $0x438] sm:$0xff]  ;;  %v8946_v21 = vpop.f32.mrb[6].mxu1 }
 0x225   :  { %v13456_v5 = vpack.c.bf16 %v3223_v35, %v3222_v19  ;;  %v2242_v53 = vadd.f32 %v13356_v58, %v2241_v8  ;;  %9964 = vmatprep.mubr.msk.f32.mxu0 %vm366_vm1, %v301_v50  ;;  %v311_v50 = vld [vmem:[%s18636_s0 + $0x8d0] sm:$0xff]  ;;  %v8947_v19 = vpop.f32.mrb[7].mxu1 }
 0x226   :  { %v3225_v10 = vmax.f32 %v2247_v3, 0.0  ;;  %v8949_v8 = vpop.f32.mrb[8].mxu1 }
 0x227   :  { %v3224_v11 = vmax.f32 %v2242_v53, 0.0  ;;  %v9807_v13 = vpop.f32.mrb[166].mxu0  ;;  %4115 = vmatmul.mubr.f32.gmra.mrb[74].mxu1 %v3417_v4 }
 0x228   :  { %v2257_v14 = vadd.f32 %v13356_v58, %v9807_v13  ;;  %v2251_v15 = vpop.f32.mrb[167].mxu0  ;;  %9965 = vmatmul.mubr.msk.f32.gmra.mrb[16].mxu0 %vm366_vm1, %v302_v6  ;;  %4119 = vmatprep.mubr.f32.mxu1 %v3439_v7  ;;  %v3522_v6 = vld [vmem:[%s18637_s3 + $0x430] sm:$0xff]  ;;  %v8950_v7 = vpop.f32.mrb[9].mxu1  ;;  %v3544_v13 = vld [vmem:[%s18637_s3 + $0x4e0] sm:$0xff] }
 0x229   :  { %v13474_v16 = vpack.c.bf16 %v3225_v10, %v3224_v11  ;;  %v2252_v54 = vadd.f32 %v13356_v58, %v2251_v15  ;;  %9967 = vmatprep.mubr.msk.f32.mxu0 %vm366_vm1, %v303_v27  ;;  %v312_v11 = vld [vmem:[%s18636_s0 + $0x8d8] sm:$0xff]  ;;  %v8952_v15 = vpop.f32.mrb[10].mxu1 }
 0x22a   :  { %v3227_v22 = vmax.f32 %v2257_v14, 0.0  ;;  %v13556_v14 = vadd.f32 %v8938_v1, %v8937_v37  ;;  %v315_v37 = vld [vmem:[%s18636_s0 + $0x8f0] sm:$0xff] }
 0x22b   :  { %v3226_v39 = vmax.f32 %v2252_v54, 0.0  ;;  %v9810_v23 = vpop.f32.mrb[168].mxu0  ;;  %4120 = vmatmul.mubr.f32.gmra.mrb[76].mxu1 %v3438_v17  ;;  %v313_v54 = vld [vmem:[%s18636_s0 + $0x8e0] sm:$0xff] }
 0x22c   :  { %v2267_v0 = vadd.f32 %v13356_v58, %v9810_v23  ;;  %v2261_v25 = vpop.f32.mrb[169].mxu0  ;;  %9968 = vmatmul.mubr.msk.f32.gmra.mrb[18].mxu0 %vm366_vm1, %v304_v42  ;;  %4124 = vmatprep.mubr.f32.mxu1 %v3460_v38  ;;  %v13561_v42 = vadd.f32 %v8941_v48, %v8940_v45  ;;  %v8953_v38 = vpop.f32.mrb[11].mxu1  ;;  %v3564_v45 = vld [vmem:[%s18637_s3 + $0x580] sm:$0xff] }
 0x22d   :  { %v13492_v55 = vpack.c.bf16 %v3227_v22, %v3226_v39  ;;  %v2262_v12 = vadd.f32 %v13356_v58, %v2261_v25  ;;  %9970 = vmatprep.mubr.msk.f32.mxu0 %vm366_vm1, %v305_v9  ;;  %v8955_v39 = vpop.f32.mrb[12].mxu1  ;;  %v3543_v25 = vld [vmem:[%s18637_s3 + $0x4d8] sm:$0xff] }
 0x22e   :  { %v3229_v32 = vmax.f32 %v2267_v0, 0.0 }
 0x22f   :  { %v3228_v34 = vmax.f32 %v2262_v12, 0.0  ;;  %v9813_v36 = vpop.f32.mrb[170].mxu0  ;;  %4125 = vmatmul.mubr.f32.gmra.mrb[78].mxu1 %v3459_v63  ;;  %v8956_v63 = vpop.f32.mrb[13].mxu1 }
 0x230   :  { %v2277_v20 = vadd.f32 %v13356_v58, %v9813_v36  ;;  %v2271_v62 = vpop.f32.mrb[171].mxu0  ;;  %9971 = vmatmul.mubr.msk.f32.gmra.mrb[20].mxu0 %vm366_vm1, %v306_v28  ;;  %4129 = vmatprep.mubr.f32.mxu1 %v3481_v29  ;;  %v314_v29 = vld [vmem:[%s18636_s0 + $0x8e8] sm:$0xff] }
 0x231   :  { %v13510_v60 = vpack.c.bf16 %v3229_v32, %v3228_v34  ;;  %v2272_v43 = vadd.f32 %v13356_v58, %v2271_v62  ;;  %9973 = vmatprep.mubr.msk.f32.mxu0 %vm366_vm1, %v307_v33  ;;  %v3565_v32 = vld [vmem:[%s18637_s3 + $0x588] sm:$0xff]  ;;  %v13578_v33 = vadd.f32 %v8944_v57, %v8943_v51  ;;  %v8958_v34 = vpop.f32.mrb[14].mxu1  ;;  %v13603_v57 = vadd.f32 %v8953_v38, %v8952_v15 }
 0x232   :  { %v3231_v46 = vmax.f32 %v2277_v20, 0.0  ;;  %v13583_v20 = vadd.f32 %v8947_v19, %v8946_v21  ;;  %v8959_v62 = vpop.f32.mrb[15].mxu1 }
 0x233   :  { %v3230_v49 = vmax.f32 %v2272_v43, 0.0  ;;  %v9816_v44 = vpop.f32.mrb[172].mxu0  ;;  %4130 = vmatmul.mubr.f32.gmra.mrb[80].mxu1 %v3480_v40  ;;  %v8961_v43 = vpop.f32.mrb[16].mxu1 }
 0x234   :  { %v2287_v52 = vadd.f32 %v13356_v58, %v9816_v44  ;;  %v2281_v26 = vpop.f32.mrb[173].mxu0  ;;  %9974 = vmatmul.mubr.msk.f32.gmra.mrb[22].mxu0 %vm366_vm1, %v308_v30  ;;  %4134 = vmatprep.mubr.f32.mxu1 %v3502_v61  ;;  %v13595_v44 = vadd.f32 %v8950_v7, %v8949_v8  ;;  %v318_v8 = vld [vmem:[%s18636_s0 + $0x908] sm:$0xff]  ;;  %v319_v7 = vld [vmem:[%s18636_s0 + $0x910] sm:$0xff] }
 0x235   :  { %v13528_v41 = vpack.c.bf16 %v3231_v46, %v3230_v49  ;;  %v2282_v59 = vadd.f32 %v13356_v58, %v2281_v26  ;;  %9976 = vmatprep.mubr.msk.f32.mxu0 %vm366_vm1, %v309_v31  ;;  %v8962_v46 = vpop.f32.mrb[17].mxu1  ;;  %v316_v49 = vld [vmem:[%s18636_s0 + $0x8f8] sm:$0xff]  ;;  %v317_v26 = vld [vmem:[%s18636_s0 + $0x900] sm:$0xff] }
 0x236   :  { %v3233_v35 = vmax.f32 %v2287_v52, 0.0  ;;  %v8996_v51 = vpop.f32.mrb[18].mxu1 }
 0x237   :  { %v3232_v2 = vmax.f32 %v2282_v59, 0.0  ;;  %v9819_v3 = vpop.f32.mrb[174].mxu0  ;;  %4135 = vmatmul.mubr.f32.gmra.mrb[82].mxu1 %v3501_v47  ;;  %v3399_v47 = vld [vmem:[%s18637_s3 + $0x58] sm:$0xff]  ;;  %v8997_v59 = vpop.f32.mrb[19].mxu1 }
 0x238   :  { %v2297_v4 = vadd.f32 %v13356_v58, %v9819_v3  ;;  %v2291_v53 = vpop.f32.mrb[175].mxu0  ;;  %9977 = vmatmul.mubr.msk.f32.gmra.mrb[24].mxu0 %vm366_vm1, %v310_v56  ;;  %4139 = vmatprep.mubr.f32.mxu1 %v3523_v18 }
 0x239   :  { %v13546_v10 = vpack.c.bf16 %v3233_v35, %v3232_v2  ;;  %v2292_v27 = vadd.f32 %v13356_v58, %v2291_v53  ;;  %9979 = vmatprep.mubr.msk.f32.mxu0 %vm366_vm1, %v311_v50 }
 0x23a   :  { %v3235_v17 = vmax.f32 %v2297_v4, 0.0  ;;  %v8999_v21 = vpop.f32.mrb[20].mxu1  ;;  %v13613_v4 = vadd.f32 %v8956_v63, %v8955_v39  ;;  %v320_v39 = vld [vmem:[%s18636_s0 + $0x918] sm:$0xff]  ;;  %v321_v63 = vld [vmem:[%s18636_s0 + $0x920] sm:$0xff] }
 0x23b   :  { %v3234_v22 = vmax.f32 %v2292_v27, 0.0  ;;  %v9822_v9 = vpop.f32.mrb[176].mxu0  ;;  %4140 = vmatmul.mubr.f32.gmra.mrb[84].mxu1 %v3522_v6  ;;  %v9000_v19 = vpop.f32.mrb[21].mxu1 }
 0x23c   :  { %v2307_v23 = vadd.f32 %v13356_v58, %v9822_v9  ;;  %v2301_v0 = vpop.f32.mrb[177].mxu0  ;;  %9980 = vmatmul.mubr.msk.f32.gmra.mrb[26].mxu0 %vm366_vm1, %v312_v11  ;;  %4144 = vmatprep.mubr.f32.mxu1 %v3544_v13 }
 0x23d   :  { %v13568_v12 = vpack.c.bf16 %v3235_v17, %v3234_v22  ;;  %v2302_v28 = vadd.f32 %v13356_v58, %v2301_v0  ;;  %9982 = vmatprep.mubr.msk.f32.mxu0 %vm366_vm1, %v313_v54 }
 0x23e   :  { %v3237_v36 = vmax.f32 %v2307_v23, 0.0  ;;  %v9002_v53 = vpop.f32.mrb[22].mxu1  ;;  %v13628_v23 = vadd.f32 %v8962_v46, %v8961_v43  ;;  %v323_v46 = vld [vmem:[%s18636_s0 + $0x930] sm:$0xff] }
 0x23f   :  { %v3236_v40 = vmax.f32 %v2302_v28, 0.0  ;;  %v9825_v1 = vpop.f32.mrb[178].mxu0  ;;  %4145 = vmatmul.mubr.f32.gmra.mrb[86].mxu1 %v3543_v25  ;;  %v9003_v27 = vpop.f32.mrb[23].mxu1  ;;  %v8998_v28 = vadd.f32 %v8997_v59, %v8996_v51 }
 0x240   :  { %v2317_v30 = vadd.f32 %v13356_v58, %v9825_v1  ;;  %v2311_v61 = vpop.f32.mrb[179].mxu0  ;;  %9983 = vmatmul.mubr.msk.f32.gmra.mrb[28].mxu0 %vm366_vm1, %v314_v29  ;;  %4149 = vmatprep.mubr.f32.mxu1 %v3565_v32 }
 0x241   :  { %v10268_v31 = vpack.c.bf16 %v3237_v36, %v3236_v40  ;;  %v2312_v48 = vadd.f32 %v13356_v58, %v2311_v61  ;;  %9985 = vmatprep.mubr.msk.f32.mxu0 %vm366_vm1, %v315_v37  ;;  %v9001_v61 = vadd.f32 %v9000_v19, %v8999_v21 }
 0x242   :  { %v3239_v52 = vmax.f32 %v2317_v30, 0.0  ;;  %v9005_v15 = vpop.f32.mrb[24].mxu1  ;;  %v322_v30 = vld [vmem:[%s18636_s0 + $0x928] sm:$0xff] }
 0x243   :  { %v3238_v56 = vmax.f32 %v2312_v48, 0.0  ;;  %v9828_v18 = vpop.f32.mrb[180].mxu0  ;;  %10269 = vmatprep.subr.bf16.mxu1 %v10268_v31  ;;  %4150 = vmatmul.mubr.f32.gmra.mrb[88].mxu1 %v3564_v45  ;;  %v9006_v38 = vpop.f32.mrb[25].mxu1 }
 0x244   :  { %v2327_v35 = vadd.f32 %v13356_v58, %v9828_v18  ;;  %v2321_v50 = vpop.f32.mrb[181].mxu0  ;;  %9986 = vmatmul.mubr.msk.f32.gmra.mrb[30].mxu0 %vm366_vm1, %v316_v49  ;;  %10271 = vmatpush3.bf16.msra.mxu1 %v13438_v24  ;;  %v13618_v24 = vadd.f32 %v8959_v62, %v8958_v34  ;;  %v13637_v62 = vadd.f32 %v8998_v28, %v13556_v14 }
 0x245   :  { %v10272_v2 = vpack.c.bf16 %v3239_v52, %v3238_v56  ;;  %v2322_v3 = vadd.f32 %v13356_v58, %v2321_v50  ;;  %9988 = vmatprep.mubr.msk.f32.mxu0 %vm366_vm1, %v317_v26  ;;  %4219 = vmatprep.mubr.f32.mxu1 %v3399_v47  ;;  %v13648_v49 = vadd.f32 %v9001_v61, %v13561_v42  ;;  %v324_v42 = vld [vmem:[%s18636_s0 + $0x938] sm:$0xff]  ;;  %v331_v61 = vld [vmem:[%s18636_s0 + $0x970] sm:$0xff] }
 0x246   :  { %v3241_v6 = vmax.f32 %v2327_v35, 0.0  ;;  %v9008_v0 = vpop.f32.mrb[26].mxu1  ;;  %v9007_v18 = vadd.f32 %v9006_v38, %v9005_v15  ;;  %v325_v35 = vld [vmem:[%s18636_s0 + $0x940] sm:$0xff]  ;;  %v327_v15 = vld [vmem:[%s18636_s0 + $0x950] sm:$0xff] }
 0x247   :  { %v3240_v11 = vmax.f32 %v2322_v3, 0.0  ;;  %v9831_v13 = vpop.f32.mrb[182].mxu0  ;;  %10273 = vmatprep.subr.bf16.mxu1 %v10272_v2 }
 0x248   :  { %v2337_v17 = vadd.f32 %v13356_v58, %v9831_v13  ;;  %v2331_v54 = vpop.f32.mrb[183].mxu0  ;;  %9989 = vmatmul.mubr.msk.f32.gmra.mrb[32].mxu0 %vm366_vm1, %v318_v8  ;;  %10275 = vmatpush3.bf16.msra.mxu1 %v13456_v5  ;;  %v9009_v5 = vpop.f32.mrb[27].mxu1  ;;  %v13665_v2 = vadd.f32 %v9007_v18, %v13583_v20  ;;  %v326_v20 = vld [vmem:[%s18636_s0 + $0x948] sm:$0xff]  ;;  %v3419_v18 = vld [vmem:[%s18637_s3 + $0xf8] sm:$0xff] }
 0x249   :  { %v10276_v22 = vpack.c.bf16 %v3241_v6, %v3240_v11  ;;  %v2332_v9 = vadd.f32 %v13356_v58, %v2331_v54  ;;  %9991 = vmatprep.mubr.msk.f32.mxu0 %vm366_vm1, %v319_v7  ;;  %v9010_v50 = vadd.f32 %v9009_v5, %v9008_v0 }
 0x24a   :  { %v3243_v25 = vmax.f32 %v2337_v17, 0.0  ;;  %v9011_v34 = vpop.f32.mrb[28].mxu1 }
 0x24b   :  { %v3242_v29 = vmax.f32 %v2332_v9, 0.0  ;;  %v9834_v32 = vpop.f32.mrb[184].mxu0  ;;  %10277 = vmatprep.subr.bf16.mxu1 %v10276_v22  ;;  %v9012_v40 = vpop.f32.mrb[29].mxu1  ;;  %v13671_v6 = vadd.f32 %v9010_v50, %v13595_v44  ;;  %v334_v50 = vld [vmem:[%s18636_s0 + $0x988] sm:$0xff] }
 0x24c   :  { %v2347_v36 = vadd.f32 %v13356_v58, %v9834_v32  ;;  %v2341_v37 = vpop.f32.mrb[185].mxu0  ;;  %9992 = vmatmul.mubr.msk.f32.gmra.mrb[34].mxu0 %vm366_vm1, %v320_v39  ;;  %10279 = vmatpush3.bf16.msra.mxu1 %v13474_v16  ;;  %v9004_v16 = vadd.f32 %v9003_v27, %v9002_v53  ;;  %v9013_v11 = vadd.f32 %v9012_v40, %v9011_v34 }
 0x24d   :  { %v10280_v1 = vpack.c.bf16 %v3243_v25, %v3242_v29  ;;  %v2342_v43 = vadd.f32 %v13356_v58, %v2341_v37  ;;  %9994 = vmatprep.mubr.msk.f32.mxu0 %vm366_vm1, %v321_v63  ;;  %v329_v29 = vld [vmem:[%s18636_s0 + $0x960] sm:$0xff] }
 0x24e   :  { %v3245_v45 = vmax.f32 %v2347_v36, 0.0  ;;  %v9014_v31 = vpop.f32.mrb[30].mxu1  ;;  %v13654_v47 = vadd.f32 %v9004_v16, %v13578_v33  ;;  %v13682_v38 = vadd.f32 %v9013_v11, %v13603_v57  ;;  %v328_v57 = vld [vmem:[%s18636_s0 + $0x958] sm:$0xff]  ;;  %v3398_v16 = vld [vmem:[%s18637_s3 + $0x50] sm:$0xff] }
 0x24f   :  { %v3244_v14 = vmax.f32 %v2342_v43, 0.0  ;;  %v9837_v48 = vpop.f32.mrb[186].mxu0  ;;  %10281 = vmatprep.subr.bf16.mxu1 %v10280_v1  ;;  %v9015_v51 = vpop.f32.mrb[31].mxu1 }
 0x250   :  { %v2357_v52 = vadd.f32 %v13356_v58, %v9837_v48  ;;  %v2351_v26 = vpop.f32.mrb[187].mxu0  ;;  %9995 = vmatmul.mubr.msk.f32.gmra.mrb[36].mxu0 %vm366_vm1, %v322_v30  ;;  %10283 = vmatpush3.bf16.msra.mxu1 %v13492_v55  ;;  %v9016_v17 = vadd.f32 %v9015_v51, %v9014_v31  ;;  %v332_v48 = vld [vmem:[%s18636_s0 + $0x978] sm:$0xff]  ;;  %v3420_v51 = vld [vmem:[%s18637_s3 + $0x100] sm:$0xff] }
 0x251   :  { %v10284_v59 = vpack.c.bf16 %v3245_v45, %v3244_v14  ;;  %v2352_v56 = vadd.f32 %v13356_v58, %v2351_v26  ;;  %9997 = vmatprep.mubr.msk.f32.mxu0 %vm366_vm1, %v323_v46 }
 0x252   :  { %v3247_v21 = vmax.f32 %v2357_v52, 0.0  ;;  %v9017_v55 = vpop.f32.mrb[32].mxu1  ;;  %v13688_v0 = vadd.f32 %v9016_v17, %v13613_v4 }
 0x253   :  { %v3246_v19 = vmax.f32 %v2352_v56, 0.0  ;;  %v9840_v33 = vpop.f32.mrb[188].mxu0  ;;  %10285 = vmatprep.subr.bf16.mxu1 %v10284_v59  ;;  %v9018_v3 = vpop.f32.mrb[33].mxu1 }
 0x254   :  { %v2367_v8 = vadd.f32 %v13356_v58, %v9840_v33  ;;  %v2361_v53 = vpop.f32.mrb[189].mxu0  ;;  %9998 = vmatmul.mubr.msk.f32.gmra.mrb[38].mxu0 %vm366_vm1, %v324_v42  ;;  %10287 = vmatpush3.bf16.msra.mxu1 %v13510_v60  ;;  %v9019_v28 = vadd.f32 %v9018_v3, %v9017_v55  ;;  %v3441_v55 = vld [vmem:[%s18637_s3 + $0x1a8] sm:$0xff]  ;;  %v335_v33 = vld [vmem:[%s18636_s0 + $0x990] sm:$0xff] }
 0x255   :  { %v10288_v7 = vpack.c.bf16 %v3247_v21, %v3246_v19  ;;  %v2362_v27 = vadd.f32 %v13356_v58, %v2361_v53  ;;  %10000 = vmatprep.mubr.msk.f32.mxu0 %vm366_vm1, %v325_v35 }
 0x256   :  { %v3249_v13 = vmax.f32 %v2367_v8, 0.0  ;;  %v9020_v60 = vpop.f32.mrb[34].mxu1  ;;  %v13699_v4 = vadd.f32 %v9019_v28, %v13618_v24  ;;  %v330_v24 = vld [vmem:[%s18636_s0 + $0x968] sm:$0xff]  ;;  %v3483_v28 = vld [vmem:[%s18637_s3 + $0x2f8] sm:$0xff] }
 0x257   :  { %v3248_v54 = vmax.f32 %v2362_v27, 0.0  ;;  %v9843_v44 = vpop.f32.mrb[190].mxu0  ;;  %10289 = vmatprep.subr.bf16.mxu1 %v10288_v7  ;;  %v9021_v22 = vpop.f32.mrb[35].mxu1  ;;  %v3440_v27 = vld [vmem:[%s18637_s3 + $0x1a0] sm:$0xff] }
 0x258   :  { %v2377_v9 = vadd.f32 %v13356_v58, %v9843_v44  ;;  %v2371_v39 = vpop.f32.mrb[191].mxu0  ;;  %10001 = vmatmul.mubr.msk.f32.gmra.mrb[40].mxu0 %vm366_vm1, %v326_v20  ;;  %10291 = vmatpush3.bf16.msra.mxu1 %v13528_v41  ;;  %v9022_v32 = vadd.f32 %v9021_v22, %v9020_v60  ;;  %v337_v60 = vld [vmem:[%s18636_s0 + $0x9a0] sm:$0xff] }
 0x259   :  { %v10292_v25 = vpack.c.bf16 %v3249_v13, %v3248_v54  ;;  %v2372_v63 = vadd.f32 %v13356_v58, %v2371_v39  ;;  %10003 = vmatprep.mubr.msk.f32.mxu0 %vm366_vm1, %v327_v15  ;;  %v336_v13 = vld [vmem:[%s18636_s0 + $0x998] sm:$0xff]  ;;  %v3462_v15 = vld [vmem:[%s18637_s3 + $0x250] sm:$0xff]  ;;  %v3461_v39 = vld [vmem:[%s18637_s3 + $0x248] sm:$0xff] }
 0x25a   :  { %v3251_v5 = vmax.f32 %v2377_v9, 0.0  ;;  %v13705_v40 = vadd.f32 %v9022_v32, %v13628_v23 }
 0x25b   :  { %v3250_v41 = vmax.f32 %v2372_v63, 0.0  ;;  %v9846_v34 = vpop.f32.mrb[192].mxu0  ;;  %10293 = vmatprep.subr.bf16.mxu1 %v10292_v25 }
 0x25c   :  { %v2387_v36 = vadd.f32 %v13356_v58, %v9846_v34  ;;  %v2381_v37 = vpop.f32.mrb[193].mxu0  ;;  %10004 = vmatmul.mubr.msk.f32.gmra.mrb[42].mxu0 %vm366_vm1, %v328_v57  ;;  %10295 = vmatpush3.bf16.msra.mxu1 %v13546_v10  ;;  %v338_v57 = vld [vmem:[%s18636_s0 + $0x9a8] sm:$0xff] }
 0x25d   :  { %v10296_v1 = vpack.c.bf16 %v3251_v5, %v3250_v41  ;;  %v2382_v43 = vadd.f32 %v13356_v58, %v2381_v37  ;;  %10006 = vmatprep.mubr.msk.f32.mxu0 %vm366_vm1, %v329_v29  ;;  %v339_v29 = vld [vmem:[%s18636_s0 + $0x9b0] sm:$0xff] }
 0x25e   :  { %v3253_v30 = vmax.f32 %v2387_v36, 0.0  ;;  %v3482_v37 = vld [vmem:[%s18637_s3 + $0x2f0] sm:$0xff] }
 0x25f   :  { %v3252_v45 = vmax.f32 %v2382_v43, 0.0  ;;  %v9849_v46 = vpop.f32.mrb[194].mxu0  ;;  %10297 = vmatprep.subr.bf16.mxu1 %v10296_v1 }
 0x260   :  { %v2397_v10 = vadd.f32 %v13356_v58, %v9849_v46  ;;  %v2391_v23 = vpop.f32.mrb[195].mxu0  ;;  %10007 = vmatmul.mubr.msk.f32.gmra.mrb[44].mxu0 %vm366_vm1, %v330_v24  ;;  %10299 = vmatpush3.bf16.msra.mxu1 %v13568_v12  ;;  %v333_v12 = vld [vmem:[%s18636_s0 + $0x980] sm:$0xff]  ;;  %v340_v24 = vld [vmem:[%s18636_s0 + $0x9b8] sm:$0xff] }
 0x261   :  { %v13721_v31 = vpack.c.bf16 %v3253_v30, %v3252_v45  ;;  %v2392_v14 = vadd.f32 %v13356_v58, %v2391_v23  ;;  %10009 = vmatprep.mubr.msk.f32.mxu0 %vm366_vm1, %v331_v61  ;;  %v3504_v30 = vld [vmem:[%s18637_s3 + $0x3a0] sm:$0xff] }
 0x262   :  { %v3255_v52 = vmax.f32 %v2397_v10, 0.0  ;;  %v341_v45 = vld [vmem:[%s18636_s0 + $0x9c0] sm:$0xff] }
 0x263   :  { %v3254_v26 = vmax.f32 %v2392_v14, 0.0  ;;  %v9852_v59 = vpop.f32.mrb[196].mxu0  ;;  %4220 = vmatmul.mubr.f32.vlgmr.msra.gmra.mrb[90].mxu1 %v3398_v16  ;;  %v3503_v14 = vld [vmem:[%s18637_s3 + $0x398] sm:$0xff] }
 0x264   :  { %v2407_v56 = vadd.f32 %v13356_v58, %v9852_v59  ;;  %v2401_v42 = vpop.f32.mrb[197].mxu0  ;;  %10010 = vmatmul.mubr.msk.f32.gmra.mrb[46].mxu0 %vm366_vm1, %v332_v48  ;;  %4224 = vmatprep.mubr.f32.mxu1 %v3420_v51  ;;  %v343_v59 = vld [vmem:[%s18636_s0 + $0x9d0] sm:$0xff] }
 0x265   :  { %v13739_v21 = vpack.c.bf16 %v3255_v52, %v3254_v26  ;;  %v2402_v35 = vadd.f32 %v13356_v58, %v2401_v42  ;;  %10012 = vmatprep.mubr.msk.f32.mxu0 %vm366_vm1, %v333_v12  ;;  %v342_v52 = vld [vmem:[%s18636_s0 + $0x9c8] sm:$0xff] }
 0x266   :  { %v3257_v19 = vmax.f32 %v2407_v56, 0.0  ;;  %v3525_v12 = vld [vmem:[%s18637_s3 + $0x448] sm:$0xff] }
 0x267   :  { %v3256_v3 = vmax.f32 %v2402_v35, 0.0  ;;  %v9855_v8 = vpop.f32.mrb[198].mxu0  ;;  %4225 = vmatmul.mubr.f32.gmra.mrb[92].mxu1 %v3419_v18 }
 0x268   :  { %v2417_v53 = vadd.f32 %v13356_v58, %v9855_v8  ;;  %v2411_v7 = vpop.f32.mrb[199].mxu0  ;;  %10013 = vmatmul.mubr.msk.f32.gmra.mrb[48].mxu0 %vm366_vm1, %v334_v50  ;;  %4229 = vmatprep.mubr.f32.mxu1 %v3441_v55 }
 0x269   :  { %v13757_v20 = vpack.c.bf16 %v3257_v19, %v3256_v3  ;;  %v2412_v11 = vadd.f32 %v13356_v58, %v2411_v7  ;;  %10015 = vmatprep.mubr.msk.f32.mxu0 %vm366_vm1, %v335_v33  ;;  %v3524_v19 = vld [vmem:[%s18637_s3 + $0x440] sm:$0xff]  ;;  %v3546_v7 = vld [vmem:[%s18637_s3 + $0x4f0] sm:$0xff] }
 0x26a   :  { %v3259_v17 = vmax.f32 %v2417_v53, 0.0  ;;  %v344_v53 = vld [vmem:[%s18636_s0 + $0x9d8] sm:$0xff] }
 0x26b   :  { %v3258_v54 = vmax.f32 %v2412_v11, 0.0  ;;  %v9858_v44 = vpop.f32.mrb[200].mxu0  ;;  %4230 = vmatmul.mubr.f32.gmra.mrb[94].mxu1 %v3440_v27  ;;  %v345_v11 = vld [vmem:[%s18636_s0 + $0x9e0] sm:$0xff] }
 0x26c   :  { %v2427_v22 = vadd.f32 %v13356_v58, %v9858_v44  ;;  %v2421_v9 = vpop.f32.mrb[201].mxu0  ;;  %10016 = vmatmul.mubr.msk.f32.gmra.mrb[50].mxu0 %vm366_vm1, %v336_v13  ;;  %4234 = vmatprep.mubr.f32.mxu1 %v3462_v15 }
 0x26d   :  { %v13775_v25 = vpack.c.bf16 %v3259_v17, %v3258_v54  ;;  %v2422_v63 = vadd.f32 %v13356_v58, %v2421_v9  ;;  %10018 = vmatprep.mubr.msk.f32.mxu0 %vm366_vm1, %v337_v60  ;;  %v3545_v9 = vld [vmem:[%s18637_s3 + $0x4e8] sm:$0xff] }
 0x26e   :  { %v3261_v5 = vmax.f32 %v2427_v22, 0.0 }
 0x26f   :  { %v3260_v32 = vmax.f32 %v2422_v63, 0.0  ;;  %v9861_v41 = vpop.f32.mrb[202].mxu0  ;;  %4235 = vmatmul.mubr.f32.gmra.mrb[96].mxu1 %v3461_v39 }
 0x270   :  { %v2437_v34 = vadd.f32 %v13356_v58, %v9861_v41  ;;  %v2431_v36 = vpop.f32.mrb[203].mxu0  ;;  %10019 = vmatmul.mubr.msk.f32.gmra.mrb[52].mxu0 %vm366_vm1, %v338_v57  ;;  %4239 = vmatprep.mubr.f32.mxu1 %v3483_v28  ;;  %v346_v57 = vld [vmem:[%s18636_s0 + $0x9e8] sm:$0xff]  ;;  %v3567_v28 = vld [vmem:[%s18637_s3 + $0x598] sm:$0xff] }
 0x271   :  { %v13793_v1 = vpack.c.bf16 %v3261_v5, %v3260_v32  ;;  %v2432_v43 = vadd.f32 %v13356_v58, %v2431_v36  ;;  %10021 = vmatprep.mubr.msk.f32.mxu0 %vm366_vm1, %v339_v29  ;;  %v347_v29 = vld [vmem:[%s18636_s0 + $0x9f0] sm:$0xff] }
 0x272   :  { %v3263_v61 = vmax.f32 %v2437_v34, 0.0 }
 0x273   :  { %v3262_v46 = vmax.f32 %v2432_v43, 0.0  ;;  %v9864_v10 = vpop.f32.mrb[204].mxu0  ;;  %4240 = vmatmul.mubr.f32.gmra.mrb[98].mxu1 %v3482_v37 }
 0x274   :  { %v2447_v23 = vadd.f32 %v13356_v58, %v9864_v10  ;;  %v2441_v16 = vpop.f32.mrb[205].mxu0  ;;  %10022 = vmatmul.mubr.msk.f32.gmra.mrb[54].mxu0 %vm366_vm1, %v340_v24  ;;  %4244 = vmatprep.mubr.f32.mxu1 %v3504_v30  ;;  %v3566_v30 = vld [vmem:[%s18637_s3 + $0x590] sm:$0xff] }
 0x275   :  { %v13811_v48 = vpack.c.bf16 %v3263_v61, %v3262_v46  ;;  %v2442_v51 = vadd.f32 %v13356_v58, %v2441_v16  ;;  %10024 = vmatprep.mubr.msk.f32.mxu0 %vm366_vm1, %v341_v45  ;;  %v3401_v16 = vld [vmem:[%s18637_s3 + $0x68] sm:$0xff] }
 0x276   :  { %v3265_v26 = vmax.f32 %v2447_v23, 0.0  ;;  %v9055_v56 = vpop.f32.mrb[36].mxu1  ;;  %v349_v23 = vld [vmem:[%s18636_s0 + $0xa00] sm:$0xff] }
 0x277   :  { %v3264_v42 = vmax.f32 %v2442_v51, 0.0  ;;  %v9867_v18 = vpop.f32.mrb[206].mxu0  ;;  %4245 = vmatmul.mubr.f32.gmra.mrb[100].mxu1 %v3503_v14  ;;  %v9056_v35 = vpop.f32.mrb[37].mxu1 }
 0x278   :  { %v2457_v50 = vadd.f32 %v13356_v58, %v9867_v18  ;;  %v2451_v55 = vpop.f32.mrb[207].mxu0  ;;  %10025 = vmatmul.mubr.msk.f32.gmra.mrb[56].mxu0 %vm366_vm1, %v342_v52  ;;  %4249 = vmatprep.mubr.f32.mxu1 %v3525_v12  ;;  %v9057_v33 = vadd.f32 %v9056_v35, %v9055_v56 }
 0x279   :  { %v13829_v3 = vpack.c.bf16 %v3265_v26, %v3264_v42  ;;  %v2452_v8 = vadd.f32 %v13356_v58, %v2451_v55  ;;  %10027 = vmatprep.mubr.msk.f32.mxu0 %vm366_vm1, %v343_v59  ;;  %v351_v55 = vld [vmem:[%s18636_s0 + $0xa10] sm:$0xff] }
 0x27a   :  { %v3267_v27 = vmax.f32 %v2457_v50, 0.0  ;;  %v13843_v13 = vadd.f32 %v9057_v33, %v13637_v62  ;;  %v9058_v15 = vpop.f32.mrb[38].mxu1 }
 0x27b   :  { %v3266_v17 = vmax.f32 %v2452_v8, 0.0  ;;  %v9870_v60 = vpop.f32.mrb[208].mxu0  ;;  %4250 = vmatmul.mubr.f32.gmra.mrb[102].mxu1 %v3524_v19  ;;  %v9059_v54 = vpop.f32.mrb[39].mxu1 }
 0x27c   :  { %v2467_v44 = vadd.f32 %v13356_v58, %v9870_v60  ;;  %v2461_v22 = vpop.f32.mrb[209].mxu0  ;;  %10028 = vmatmul.mubr.msk.f32.gmra.mrb[58].mxu0 %vm366_vm1, %v344_v53  ;;  %4254 = vmatprep.mubr.f32.mxu1 %v3546_v7  ;;  %v9060_v39 = vadd.f32 %v9059_v54, %v9058_v15  ;;  %v353_v54 = vld [vmem:[%s18636_s0 + $0xa20] sm:$0xff] }
 0x27d   :  { %v13850_v63 = vpack.c.bf16 %v3267_v27, %v3266_v17  ;;  %v2462_v62 = vadd.f32 %v13356_v58, %v2461_v22  ;;  %10030 = vmatprep.mubr.msk.f32.mxu0 %vm366_vm1, %v345_v11 }
 0x27e   :  { %v3269_v5 = vmax.f32 %v2467_v44, 0.0  ;;  %v13864_v32 = vadd.f32 %v9060_v39, %v13648_v49  ;;  %v9061_v41 = vpop.f32.mrb[40].mxu1  ;;  %v13874_v49 = vld [vmem:[%s18638_s2] ss:$0 sm:$0xff] }
 0x27f   :  { %v3268_v34 = vmax.f32 %v2462_v62, 0.0  ;;  %v9873_v36 = vpop.f32.mrb[210].mxu0  ;;  %4255 = vmatmul.mubr.f32.gmra.mrb[104].mxu1 %v3545_v9  ;;  %v9062_v37 = vpop.f32.mrb[41].mxu1 }
 0x280   :  { %v2477_v43 = vadd.f32 %v13356_v58, %v9873_v36  ;;  %v2471_v24 = vpop.f32.mrb[211].mxu0  ;;  %10031 = vmatmul.mubr.msk.f32.gmra.mrb[60].mxu0 %vm366_vm1, %v346_v57  ;;  %4259 = vmatprep.mubr.f32.mxu1 %v3567_v28  ;;  %v9063_v61 = vadd.f32 %v9062_v37, %v9061_v41  ;;  %v348_v58 = vld [vmem:[%s18636_s0 + $0x9f8] sm:$0xff] }
 0x281   :  { %v10300_v45 = vpack.c.bf16 %v3269_v5, %v3268_v34  ;;  %v2472_v46 = vadd.f32 %v13874_v49, %v2471_v24  ;;  %10033 = vmatprep.mubr.msk.f32.mxu0 %vm366_vm1, %v347_v29  ;;  %v355_v34 = vld [vmem:[%s18636_s0 + $0xa30] sm:$0xff] }
 0x282   :  { %v3271_v10 = vmax.f32 %v2477_v43, 0.0  ;;  %v13888_v14 = vadd.f32 %v9063_v61, %v13654_v47  ;;  %v9064_v51 = vpop.f32.mrb[42].mxu1  ;;  %v350_v47 = vld [vmem:[%s18636_s0 + $0xa08] sm:$0xff] }
 0x283   :  { %v3270_v52 = vmax.f32 %v2472_v46, 0.0  ;;  %v9876_v12 = vpop.f32.mrb[212].mxu0  ;;  %4260 = vmatmul.mubr.f32.gmra.mrb[106].mxu1 %v3566_v30  ;;  %10301 = vmatprep.subr.bf16.mxu1 %v10300_v45  ;;  %v9065_v26 = vpop.f32.mrb[43].mxu1 }
 0x284   :  { %v2487_v59 = vadd.f32 %v13874_v49, %v9876_v12  ;;  %v2481_v56 = vpop.f32.mrb[213].mxu0  ;;  %10034 = vmatmul.mubr.msk.f32.gmra.mrb[62].mxu0 %vm366_vm1, %v348_v58  ;;  %10303 = vmatpush3.bf16.msra.mxu1 %v13721_v31  ;;  %v9066_v42 = vadd.f32 %v9065_v26, %v9064_v51 }
 0x285   :  { %v10304_v18 = vpack.c.bf16 %v3271_v10, %v3270_v52  ;;  %v2482_v35 = vadd.f32 %v13874_v49, %v2481_v56  ;;  %10036 = vmatprep.mubr.msk.f32.mxu0 %vm366_vm1, %v349_v23  ;;  %4329 = vmatprep.mubr.f32.mxu1 %v3401_v16 }
 0x286   :  { %v3273_v50 = vmax.f32 %v2487_v59, 0.0  ;;  %v13902_v19 = vadd.f32 %v9066_v42, %v13665_v2  ;;  %v9067_v31 = vpop.f32.mrb[44].mxu1  ;;  %v352_v2 = vld [vmem:[%s18636_s0 + $0xa18] sm:$0xff] }
 0x287   :  { %v3272_v33 = vmax.f32 %v2482_v35, 0.0  ;;  %v9879_v8 = vpop.f32.mrb[214].mxu0  ;;  %10305 = vmatprep.subr.bf16.mxu1 %v10304_v18  ;;  %v9068_v53 = vpop.f32.mrb[45].mxu1 }
 0x288   :  { %v2497_v7 = vadd.f32 %v13874_v49, %v9879_v8  ;;  %v2491_v27 = vpop.f32.mrb[215].mxu0  ;;  %10307 = vmatpush3.bf16.msra.mxu1 %v13739_v21  ;;  %10037 = vmatmul.mubr.msk.f32.gmra.mrb[64].mxu0 %vm366_vm1, %v350_v47  ;;  %v9069_v11 = vadd.f32 %v9068_v53, %v9067_v31 }
 0x289   :  { %v10308_v15 = vpack.c.bf16 %v3273_v50, %v3272_v33  ;;  %v2492_v17 = vadd.f32 %v13874_v49, %v2491_v27  ;;  %10039 = vmatprep.mubr.msk.f32.mxu0 %vm366_vm1, %v351_v55 }
 0x28a   :  { %v3275_v60 = vmax.f32 %v2497_v7, 0.0  ;;  %v13916_v44 = vadd.f32 %v9069_v11, %v13671_v6  ;;  %v9070_v21 = vpop.f32.mrb[46].mxu1  ;;  %v354_v6 = vld [vmem:[%s18636_s0 + $0xa28] sm:$0xff] }
 0x28b   :  { %v3274_v22 = vmax.f32 %v2492_v17, 0.0  ;;  %v9882_v9 = vpop.f32.mrb[216].mxu0  ;;  %10309 = vmatprep.subr.bf16.mxu1 %v10308_v15  ;;  %v9071_v39 = vpop.f32.mrb[47].mxu1 }
 0x28c   :  { %v2507_v62 = vadd.f32 %v13874_v49, %v9882_v9  ;;  %v2501_v57 = vpop.f32.mrb[217].mxu0  ;;  %10311 = vmatpush3.bf16.msra.mxu1 %v13757_v20  ;;  %10040 = vmatmul.mubr.msk.f32.gmra.mrb[66].mxu0 %vm366_vm1, %v352_v2  ;;  %v9072_v28 = vadd.f32 %v9071_v39, %v9070_v21 }
 0x28d   :  { %v10312_v5 = vpack.c.bf16 %v3275_v60, %v3274_v22  ;;  %v2502_v29 = vadd.f32 %v13874_v49, %v2501_v57  ;;  %10042 = vmatprep.mubr.msk.f32.mxu0 %vm366_vm1, %v353_v54 }
 0x28e   :  { %v3277_v41 = vmax.f32 %v2507_v62, 0.0  ;;  %v13930_v36 = vadd.f32 %v9072_v28, %v13682_v38  ;;  %v9073_v20 = vpop.f32.mrb[48].mxu1  ;;  %v356_v38 = vld [vmem:[%s18636_s0 + $0xa38] sm:$0xff]  ;;  %v3422_v62 = vld [vmem:[%s18637_s3 + $0x110] sm:$0xff] }
 0x28f   :  { %v3276_v37 = vmax.f32 %v2502_v29, 0.0  ;;  %v9885_v43 = vpop.f32.mrb[218].mxu0  ;;  %10313 = vmatprep.subr.bf16.mxu1 %v10312_v5  ;;  %v9074_v24 = vpop.f32.mrb[49].mxu1 }
 0x290   :  { %v2517_v30 = vadd.f32 %v13874_v49, %v9885_v43  ;;  %v2511_v61 = vpop.f32.mrb[219].mxu0  ;;  %10315 = vmatpush3.bf16.msra.mxu1 %v13775_v25  ;;  %10043 = vmatmul.mubr.msk.f32.gmra.mrb[68].mxu0 %vm366_vm1, %v354_v6  ;;  %v9075_v45 = vadd.f32 %v9074_v24, %v9073_v20  ;;  %v3443_v20 = vld [vmem:[%s18637_s3 + $0x1b8] sm:$0xff] }
 0x291   :  { %v10316_v46 = vpack.c.bf16 %v3277_v41, %v3276_v37  ;;  %v2512_v58 = vadd.f32 %v13874_v49, %v2511_v61  ;;  %10045 = vmatprep.mubr.msk.f32.mxu0 %vm366_vm1, %v355_v34 }
 0x292   :  { %v3279_v10 = vmax.f32 %v2517_v30, 0.0  ;;  %v13941_v23 = vadd.f32 %v9075_v45, %v13688_v0  ;;  %v9076_v16 = vpop.f32.mrb[50].mxu1  ;;  %v3442_v45 = vld [vmem:[%s18637_s3 + $0x1b0] sm:$0xff] }
 0x293   :  { %v3278_v51 = vmax.f32 %v2512_v58, 0.0  ;;  %v9888_v52 = vpop.f32.mrb[220].mxu0  ;;  %10317 = vmatprep.subr.bf16.mxu1 %v10316_v46  ;;  %v9077_v25 = vpop.f32.mrb[51].mxu1 }
 0x294   :  { %v2527_v12 = vadd.f32 %v13874_v49, %v9888_v52  ;;  %v2521_v26 = vpop.f32.mrb[221].mxu0  ;;  %10319 = vmatpush3.bf16.msra.mxu1 %v13793_v1  ;;  %10046 = vmatmul.mubr.msk.f32.gmra.mrb[70].mxu0 %vm366_vm1, %v356_v38  ;;  %v9078_v59 = vadd.f32 %v9077_v25, %v9076_v16  ;;  %v3464_v38 = vld [vmem:[%s18637_s3 + $0x260] sm:$0xff] }
 0x295   :  { %v10320_v56 = vpack.c.bf16 %v3279_v10, %v3278_v51  ;;  %v2522_v42 = vadd.f32 %v13874_v49, %v2521_v26 }
 0x296   :  { %v3281_v18 = vmax.f32 %v2527_v12, 0.0  ;;  %v13948_v0 = vadd.f32 %v9078_v59, %v13699_v4  ;;  %v9079_v35 = vpop.f32.mrb[52].mxu1  ;;  %v3463_v12 = vld [vmem:[%s18637_s3 + $0x258] sm:$0xff] }
 0x297   :  { %v3280_v47 = vmax.f32 %v2522_v42, 0.0  ;;  %v9891_v50 = vpop.f32.mrb[222].mxu0  ;;  %10321 = vmatprep.subr.bf16.mxu1 %v10320_v56  ;;  %v9080_v55 = vpop.f32.mrb[53].mxu1  ;;  %v3485_v56 = vld [vmem:[%s18637_s3 + $0x308] sm:$0xff] }
 0x298   :  { %v2537_v31 = vadd.f32 %v13874_v49, %v9891_v50  ;;  %v2531_v33 = vpop.f32.mrb[223].mxu0  ;;  %10323 = vmatpush3.bf16.msra.mxu1 %v13811_v48  ;;  %v9081_v1 = vadd.f32 %v9080_v55, %v9079_v35  ;;  %v3484_v55 = vld [vmem:[%s18637_s3 + $0x300] sm:$0xff] }
 0x299   :  { %v10324_v8 = vpack.c.bf16 %v3281_v18, %v3280_v47  ;;  %v2532_v53 = vadd.f32 %v13874_v49, %v2531_v33 }
 0x29a   :  { %v3283_v7 = vmax.f32 %v2537_v31, 0.0  ;;  %v13954_v27 = vadd.f32 %v9081_v1, %v13705_v40  ;;  %v3400_v40 = vld [vmem:[%s18637_s3 + $0x60] sm:$0xff]  ;;  %v3506_v1 = vld [vmem:[%s18637_s3 + $0x3b0] sm:$0xff] }
 0x29b   :  { %v3282_v4 = vmax.f32 %v2532_v53, 0.0  ;;  %v9894_v11 = vpop.f32.mrb[224].mxu0  ;;  %10325 = vmatprep.subr.bf16.mxu1 %v10324_v8 }
 0x29c   :  { %v2547_v15 = vadd.f32 %v13874_v49, %v9894_v11  ;;  %v2541_v17 = vpop.f32.mrb[225].mxu0  ;;  %10327 = vmatpush3.bf16.msra.mxu1 %v13829_v3 }
 0x29d   :  { %v10328_v2 = vpack.c.bf16 %v3283_v7, %v3282_v4  ;;  %v2542_v60 = vadd.f32 %v13874_v49, %v2541_v17 }
 0x29e   :  { %v3285_v48 = vmax.f32 %v2547_v15, 0.0  ;;  %v3505_v15 = vld [vmem:[%s18637_s3 + $0x3a8] sm:$0xff] }
 0x29f   :  { %v3284_v54 = vmax.f32 %v2542_v60, 0.0  ;;  %v9897_v21 = vpop.f32.mrb[226].mxu0  ;;  %10329 = vmatprep.subr.bf16.mxu1 %v10328_v2  ;;  %v3527_v60 = vld [vmem:[%s18637_s3 + $0x458] sm:$0xff] }
 0x2a0   :  { %v2557_v22 = vadd.f32 %v13874_v49, %v9897_v21  ;;  %v2551_v9 = vpop.f32.mrb[227].mxu0  ;;  %10331 = vmatpush3.bf16.msra.mxu1 %v13850_v63  ;;  %v3421_v63 = vld [vmem:[%s18637_s3 + $0x108] sm:$0xff]  ;;  %v4862_v21 = vld [vmem:[%s18639_s4 + $0x38] sm:$0xff] }
 0x2a1   :  { %v13964_v39 = vpack.c.bf16 %v3285_v48, %v3284_v54  ;;  %v2552_v3 = vadd.f32 %v13874_v49, %v2551_v9  ;;  %v4861_v9 = vld [vmem:[%s18639_s4 + $0x30] sm:$0xff] }
 0x2a2   :  { %v3287_v57 = vmax.f32 %v2557_v22, 0.0  ;;  %v4875_v22 = vld [vmem:[%s18639_s4 + $0xa0] sm:$0xff] }
 0x2a3   :  { %v3286_v28 = vmax.f32 %v2552_v3, 0.0  ;;  %v9900_v5 = vpop.f32.mrb[228].mxu0  ;;  %4330 = vmatmul.mubr.f32.vlgmr.msra.gmra.mrb[108].mxu1 %v3400_v40 }
 0x2a4   :  { %v2567_v29 = vadd.f32 %v13874_v49, %v9900_v5  ;;  %v2561_v6 = vpop.f32.mrb[229].mxu0  ;;  %4334 = vmatprep.mubr.f32.mxu1 %v3422_v62 }
 0x2a5   :  { %v13974_v41 = vpack.c.bf16 %v3287_v57, %v3286_v28  ;;  %v2562_v34 = vadd.f32 %v13874_v49, %v2561_v6  ;;  %v10656_v57 = vpack.c.bf16 %v4875_v22, %v4862_v21  ;;  %v4874_v28 = vld [vmem:[%s18639_s4 + $0x98] sm:$0xff]  ;;  %v3526_v6 = vld [vmem:[%s18637_s3 + $0x450] sm:$0xff] }
 0x2a6   :  { %v3289_v37 = vmax.f32 %v2567_v29, 0.0 }
 0x2a7   :  { %v3288_v43 = vmax.f32 %v2562_v34, 0.0  ;;  %v9903_v24 = vpop.f32.mrb[230].mxu0  ;;  %4335 = vmatmul.mubr.f32.gmra.mrb[110].mxu1 %v3421_v63  ;;  %v10658_v34 = vpack.c.bf16 %v4874_v28, %v4861_v9  ;;  %10657 = vmatprep.subr.bf16.mxu0 %v10656_v57 }
 0x2a8   :  { %v2577_v30 = vadd.f32 %v13874_v49, %v9903_v24  ;;  %v2571_v61 = vpop.f32.mrb[231].mxu0  ;;  %4339 = vmatprep.mubr.f32.mxu1 %v3443_v20 }
 0x2a9   :  { %v13984_v46 = vpack.c.bf16 %v3289_v37, %v3288_v43  ;;  %v2572_v58 = vadd.f32 %v13874_v49, %v2571_v61  ;;  %v3548_v43 = vld [vmem:[%s18637_s3 + $0x500] sm:$0xff]  ;;  %10659 = vmatpush1.bf16.msra.mxu0 %v10658_v34 }
 0x2aa   :  { %v3291_v10 = vmax.f32 %v2577_v30, 0.0 }
 0x2ab   :  { %v3290_v16 = vmax.f32 %v2572_v58, 0.0  ;;  %v9906_v51 = vpop.f32.mrb[232].mxu0  ;;  %4340 = vmatmul.mubr.f32.gmra.mrb[112].mxu1 %v3442_v45 }
 0x2ac   :  { %v2587_v52 = vadd.f32 %v13874_v49, %v9906_v51  ;;  %v2581_v25 = vpop.f32.mrb[233].mxu0  ;;  %4344 = vmatprep.mubr.f32.mxu1 %v3464_v38  ;;  %v3547_v51 = vld [vmem:[%s18637_s3 + $0x4f8] sm:$0xff] }
 0x2ad   :  { %v13994_v26 = vpack.c.bf16 %v3291_v10, %v3290_v16  ;;  %v2582_v59 = vadd.f32 %v13874_v49, %v2581_v25 }
 0x2ae   :  { %v3293_v42 = vmax.f32 %v2587_v52, 0.0 }
 0x2af   :  { %v3292_v18 = vmax.f32 %v2582_v59, 0.0  ;;  %v9909_v35 = vpop.f32.mrb[234].mxu0  ;;  %4345 = vmatmul.mubr.f32.gmra.mrb[114].mxu1 %v3463_v12  ;;  %v3569_v12 = vld [vmem:[%s18637_s3 + $0x5a8] sm:$0xff] }
 0x2b0   :  { %v2597_v47 = vadd.f32 %v13874_v49, %v9909_v35  ;;  %v2591_v50 = vpop.f32.mrb[235].mxu0  ;;  %4349 = vmatprep.mubr.f32.mxu1 %v3485_v56 }
 0x2b1   :  { %v14004_v31 = vpack.c.bf16 %v3293_v42, %v3292_v18  ;;  %v2592_v33 = vadd.f32 %v13874_v49, %v2591_v50 }
 0x2b2   :  { %v3295_v8 = vmax.f32 %v2597_v47, 0.0 }
 0x2b3   :  { %v3294_v53 = vmax.f32 %v2592_v33, 0.0  ;;  %v9912_v7 = vpop.f32.mrb[236].mxu0  ;;  %4350 = vmatmul.mubr.f32.gmra.mrb[116].mxu1 %v3484_v55  ;;  %v3568_v33 = vld [vmem:[%s18637_s3 + $0x5a0] sm:$0xff] }
 0x2b4   :  { %v2607_v4 = vadd.f32 %v13874_v49, %v9912_v7  ;;  %v2601_v11 = vpop.f32.mrb[237].mxu0  ;;  %4354 = vmatprep.mubr.f32.mxu1 %v3506_v1 }
 0x2b5   :  { %v14014_v17 = vpack.c.bf16 %v3295_v8, %v3294_v53  ;;  %v2602_v2 = vadd.f32 %v13874_v49, %v2601_v11 }
 0x2b6   :  { %v3297_v48 = vmax.f32 %v2607_v4, 0.0  ;;  %v9114_v54 = vpop.f32.mrb[54].mxu1 }
 0x2b7   :  { %v3296_v40 = vmax.f32 %v2602_v2, 0.0  ;;  %v9915_v3 = vpop.f32.mrb[238].mxu0  ;;  %4355 = vmatmul.mubr.f32.gmra.mrb[118].mxu1 %v3505_v15  ;;  %v9115_v62 = vpop.f32.mrb[55].mxu1 }
 0x2b8   :  { %v2617_v5 = vadd.f32 %v13874_v49, %v9915_v3  ;;  %v2611_v29 = vpop.f32.mrb[239].mxu0  ;;  %4359 = vmatprep.mubr.f32.mxu1 %v3527_v60  ;;  %v9116_v63 = vadd.f32 %v9115_v62, %v9114_v54 }
 0x2b9   :  { %v14036_v20 = vpack.c.bf16 %v3297_v48, %v3296_v40  ;;  %v2612_v37 = vadd.f32 %v13874_v49, %v2611_v29 }
 0x2ba   :  { %v3299_v24 = vmax.f32 %v2617_v5, 0.0  ;;  %v14043_v30 = vadd.f32 %v9116_v63, %v13843_v13  ;;  %v9117_v61 = vpop.f32.mrb[56].mxu1 }
 0x2bb   :  { %v3298_v45 = vmax.f32 %v2612_v37, 0.0  ;;  %v9918_v58 = vpop.f32.mrb[240].mxu0  ;;  %4360 = vmatmul.mubr.f32.gmra.mrb[120].mxu1 %v3526_v6  ;;  %v9118_v38 = vpop.f32.mrb[57].mxu1 }
 0x2bc   :  { %v2627_v10 = vadd.f32 %v13874_v49, %v9918_v58  ;;  %v2621_v16 = vpop.f32.mrb[241].mxu0  ;;  %4364 = vmatprep.mubr.f32.mxu1 %v3548_v43  ;;  %v9119_v52 = vadd.f32 %v9118_v38, %v9117_v61 }
 0x2bd   :  { %v14049_v25 = vpack.c.bf16 %v3299_v24, %v3298_v45  ;;  %v2622_v13 = vadd.f32 %v13874_v49, %v2621_v16 }
 0x2be   :  { %v3301_v59 = vmax.f32 %v2627_v10, 0.0  ;;  %v14056_v56 = vadd.f32 %v9119_v52, %v13864_v32  ;;  %v9120_v42 = vpop.f32.mrb[58].mxu1  ;;  %v3403_v32 = vld [vmem:[%s18637_s3 + $0x78] sm:$0xff] }
 0x2bf   :  { %v3300_v18 = vmax.f32 %v2622_v13, 0.0  ;;  %v9921_v35 = vpop.f32.mrb[242].mxu0  ;;  %4365 = vmatmul.mubr.f32.gmra.mrb[122].mxu1 %v3547_v51  ;;  %v9121_v47 = vpop.f32.mrb[59].mxu1 }
 0x2c0   :  { %v2637_v50 = vadd.f32 %v13874_v49, %v9921_v35  ;;  %v2631_v55 = vpop.f32.mrb[243].mxu0  ;;  %4369 = vmatprep.mubr.f32.mxu1 %v3569_v12  ;;  %v9122_v1 = vadd.f32 %v9121_v47, %v9120_v42 }
 0x2c1   :  { %v10332_v8 = vpack.c.bf16 %v3301_v59, %v3300_v18  ;;  %v2632_v53 = vadd.f32 %v13874_v49, %v2631_v55 }
 0x2c2   :  { %v3303_v7 = vmax.f32 %v2637_v50, 0.0  ;;  %v14067_v4 = vadd.f32 %v9122_v1, %v13888_v14  ;;  %v9123_v11 = vpop.f32.mrb[60].mxu1 }
 0x2c3   :  { %v3302_v15 = vmax.f32 %v2632_v53, 0.0  ;;  %v9924_v2 = vpop.f32.mrb[244].mxu0  ;;  %4370 = vmatmul.mubr.f32.gmra.mrb[124].mxu1 %v3568_v33  ;;  %10333 = vmatprep.subr.bf16.mxu1 %v10332_v8  ;;  %v9124_v60 = vpop.f32.mrb[61].mxu1 }
 0x2c4   :  { %v2647_v48 = vadd.f32 %v13874_v49, %v9924_v2  ;;  %v2641_v54 = vpop.f32.mrb[245].mxu0  ;;  %10335 = vmatpush3.bf16.msra.mxu1 %v13964_v39  ;;  %4439 = vmatprep.mubr.f32.mxu1 %v3403_v32  ;;  %v9125_v21 = vadd.f32 %v9124_v60, %v9123_v11 }
 0x2c5   :  { %v10336_v22 = vpack.c.bf16 %v3303_v7, %v3302_v15  ;;  %v2642_v9 = vadd.f32 %v13874_v49, %v2641_v54 }
 0x2c6   :  { %v3305_v40 = vmax.f32 %v2647_v48, 0.0  ;;  %v14073_v14 = vadd.f32 %v9125_v21, %v13902_v19  ;;  %v9126_v3 = vpop.f32.mrb[62].mxu1 }
 0x2c7   :  { %v3304_v62 = vmax.f32 %v2642_v9, 0.0  ;;  %v9927_v57 = vpop.f32.mrb[246].mxu0  ;;  %10337 = vmatprep.subr.bf16.mxu1 %v10336_v22  ;;  %v9127_v28 = vpop.f32.mrb[63].mxu1 }
 0x2c8   :  { %v2657_v5 = vadd.f32 %v13874_v49, %v9927_v57  ;;  %v2651_v29 = vpop.f32.mrb[247].mxu0  ;;  %10339 = vmatpush3.bf16.msra.mxu1 %v13974_v41  ;;  %v9128_v39 = vadd.f32 %v9127_v28, %v9126_v3 }
 0x2c9   :  { %v10340_v6 = vpack.c.bf16 %v3305_v40, %v3304_v62  ;;  %v2652_v63 = vadd.f32 %v13874_v49, %v2651_v29 }
 0x2ca   :  { %v3307_v34 = vmax.f32 %v2657_v5, 0.0  ;;  %v14079_v37 = vadd.f32 %v9128_v39, %v13916_v44  ;;  %v9129_v19 = vpop.f32.mrb[64].mxu1  ;;  %v4887_v39 = vld [vmem:[%s18639_s4 + $0x100] sm:$0xff] }
 0x2cb   :  { %v3306_v43 = vmax.f32 %v2652_v63, 0.0  ;;  %v9930_v24 = vpop.f32.mrb[248].mxu0  ;;  %10341 = vmatprep.subr.bf16.mxu1 %v10340_v6  ;;  %v9130_v61 = vpop.f32.mrb[65].mxu1 }
 0x2cc   :  { %v2667_v45 = vadd.f32 %v13874_v49, %v9930_v24  ;;  %v2661_v58 = vpop.f32.mrb[249].mxu0  ;;  %10343 = vmatpush3.bf16.msra.mxu1 %v13984_v46  ;;  %v9131_v38 = vadd.f32 %v9130_v61, %v9129_v19 }
 0x2cd   :  { %v10344_v41 = vpack.c.bf16 %v3307_v34, %v3306_v43  ;;  %v2662_v10 = vadd.f32 %v13874_v49, %v2661_v58 }
 0x2ce   :  { %v3309_v16 = vmax.f32 %v2667_v45, 0.0  ;;  %v14085_v51 = vadd.f32 %v9131_v38, %v13930_v36  ;;  %v9132_v44 = vpop.f32.mrb[66].mxu1  ;;  %v3402_v45 = vld [vmem:[%s18637_s3 + $0x70] sm:$0xff] }
 0x2cf   :  { %v3308_v52 = vmax.f32 %v2662_v10, 0.0  ;;  %v9933_v13 = vpop.f32.mrb[250].mxu0  ;;  %10345 = vmatprep.subr.bf16.mxu1 %v10344_v41  ;;  %v9133_v12 = vpop.f32.mrb[67].mxu1  ;;  %v3424_v41 = vld [vmem:[%s18637_s3 + $0x120] sm:$0xff] }
 0x2d0   :  { %v2677_v59 = vadd.f32 %v13874_v49, %v9933_v13  ;;  %v2671_v42 = vpop.f32.mrb[251].mxu0  ;;  %10347 = vmatpush3.bf16.msra.mxu1 %v13994_v26  ;;  %v9134_v18 = vadd.f32 %v9133_v12, %v9132_v44  ;;  %v3423_v13 = vld [vmem:[%s18637_s3 + $0x118] sm:$0xff] }
 0x2d1   :  { %v10348_v46 = vpack.c.bf16 %v3309_v16, %v3308_v52  ;;  %v2672_v35 = vadd.f32 %v13874_v49, %v2671_v42  ;;  %v3445_v42 = vld [vmem:[%s18637_s3 + $0x1c8] sm:$0xff] }
 0x2d2   :  { %v3311_v47 = vmax.f32 %v2677_v59, 0.0  ;;  %v14091_v50 = vadd.f32 %v9134_v18, %v13941_v23  ;;  %v9135_v36 = vpop.f32.mrb[68].mxu1 }
 0x2d3   :  { %v3310_v55 = vmax.f32 %v2672_v35, 0.0  ;;  %v9936_v33 = vpop.f32.mrb[252].mxu0  ;;  %10349 = vmatprep.subr.bf16.mxu1 %v10348_v46  ;;  %v9136_v1 = vpop.f32.mrb[69].mxu1 }
 0x2d4   :  { %v2687_v8 = vadd.f32 %v13874_v49, %v9936_v33  ;;  %v2681_v53 = vpop.f32.mrb[253].mxu0  ;;  %10351 = vmatpush3.bf16.msra.mxu1 %v14004_v31  ;;  %v9137_v32 = vadd.f32 %v9136_v1, %v9135_v36 }
 0x2d5   :  { %v10352_v26 = vpack.c.bf16 %v3311_v47, %v3310_v55  ;;  %v2682_v7 = vadd.f32 %v13874_v49, %v2681_v53  ;;  %v3444_v55 = vld [vmem:[%s18637_s3 + $0x1c0] sm:$0xff] }
 0x2d6   :  { %v3313_v11 = vmax.f32 %v2687_v8, 0.0  ;;  %v14097_v15 = vadd.f32 %v9137_v32, %v13948_v0  ;;  %v9138_v23 = vpop.f32.mrb[70].mxu1  ;;  %v3466_v8 = vld [vmem:[%s18637_s3 + $0x270] sm:$0xff] }
 0x2d7   :  { %v3312_v2 = vmax.f32 %v2682_v7, 0.0  ;;  %v9939_v60 = vpop.f32.mrb[254].mxu0  ;;  %10353 = vmatprep.subr.bf16.mxu1 %v10352_v26  ;;  %v9139_v48 = vpop.f32.mrb[71].mxu1 }
 0x2d8   :  { %v2697_v54 = vadd.f32 %v13874_v49, %v9939_v60  ;;  %v2691_v21 = vpop.f32.mrb[255].mxu0  ;;  %10355 = vmatpush3.bf16.msra.mxu1 %v14014_v17  ;;  %v9140_v22 = vadd.f32 %v9139_v48, %v9138_v23  ;;  %v4888_v17 = vld [vmem:[%s18639_s4 + $0x108] sm:$0xff]  ;;  %v3487_v48 = vld [vmem:[%s18637_s3 + $0x318] sm:$0xff] }
 0x2d9   :  { %v10356_v31 = vpack.c.bf16 %v3313_v11, %v3312_v2  ;;  %v2692_v9 = vadd.f32 %v13874_v49, %v2691_v21  ;;  %v3465_v23 = vld [vmem:[%s18637_s3 + $0x268] sm:$0xff] }
 0x2da   :  { %v3315_v40 = vmax.f32 %v2697_v54, 0.0  ;;  %v14103_v3 = vadd.f32 %v9140_v22, %v13954_v27  ;;  %v4901_v27 = vld [vmem:[%s18639_s4 + $0x170] sm:$0xff] }
 0x2db   :  { %v3314_v0 = vmax.f32 %v2692_v9, 0.0  ;;  %v9942_v62 = vpop.f32.mrb[0].mxu0  ;;  %10357 = vmatprep.subr.bf16.mxu1 %v10356_v31  ;;  %v10660_v63 = vpack.c.bf16 %v4901_v27, %v4888_v17 }
 0x2dc   :  { %v2707_v57 = vadd.f32 %v13874_v49, %v9942_v62  ;;  %v2701_v28 = vpop.f32.mrb[1].mxu0  ;;  %10359 = vmatpush3.bf16.msra.mxu1 %v14036_v20  ;;  %v4900_v20 = vld [vmem:[%s18639_s4 + $0x168] sm:$0xff] }
 0x2dd   :  { %v10360_v5 = vpack.c.bf16 %v3315_v40, %v3314_v0  ;;  %v2702_v29 = vadd.f32 %v13874_v49, %v2701_v28  ;;  %v10662_v43 = vpack.c.bf16 %v4900_v20, %v4887_v39  ;;  %10661 = vmatprep.subr.bf16.mxu0 %v10660_v63  ;;  %v3486_v40 = vld [vmem:[%s18637_s3 + $0x310] sm:$0xff]  ;;  %v3507_v39 = vld [vmem:[%s18637_s3 + $0x3b8] sm:$0xff]  ;;  %v3529_v20 = vld [vmem:[%s18637_s3 + $0x468] sm:$0xff] }
 0x2de   :  { %v3317_v6 = vmax.f32 %v2707_v57, 0.0  ;;  %v3508_v57 = vld [vmem:[%s18637_s3 + $0x3c0] sm:$0xff] }
 0x2df   :  { %v3316_v34 = vmax.f32 %v2702_v29, 0.0  ;;  %v9945_v19 = vpop.f32.mrb[2].mxu0  ;;  %10361 = vmatprep.subr.bf16.mxu1 %v10360_v5  ;;  %10663 = vmatpush1.bf16.msra.mxu0 %v10662_v43 }
 0x2e0   :  { %v2717_v24 = vadd.f32 %v13874_v49, %v9945_v19  ;;  %v2711_v61 = vpop.f32.mrb[3].mxu0  ;;  %10363 = vmatpush3.bf16.msra.mxu1 %v14049_v25 }
 0x2e1   :  { %v14125_v58 = vpack.c.bf16 %v3317_v6, %v3316_v34  ;;  %v2712_v38 = vadd.f32 %v13874_v49, %v2711_v61 }
 0x2e2   :  { %v3319_v10 = vmax.f32 %v2717_v24, 0.0 }
 0x2e3   :  { %v3318_v16 = vmax.f32 %v2712_v38, 0.0  ;;  %v9948_v44 = vpop.f32.mrb[4].mxu0  ;;  %4440 = vmatmul.mubr.f32.vlgmr.msra.gmra.mrb[126].mxu1 %v3402_v45 }
 0x2e4   :  { %v2727_v25 = vadd.f32 %v13874_v49, %v9948_v44  ;;  %v2721_v52 = vpop.f32.mrb[5].mxu0  ;;  %4444 = vmatprep.mubr.f32.mxu1 %v3424_v41  ;;  %v3528_v41 = vld [vmem:[%s18637_s3 + $0x460] sm:$0xff] }
 0x2e5   :  { %v14135_v12 = vpack.c.bf16 %v3319_v10, %v3318_v16  ;;  %v2722_v59 = vadd.f32 %v13874_v49, %v2721_v52 }
 0x2e6   :  { %v3321_v18 = vmax.f32 %v2727_v25, 0.0  ;;  %v3550_v25 = vld [vmem:[%s18637_s3 + $0x510] sm:$0xff] }
 0x2e7   :  { %v3320_v46 = vmax.f32 %v2722_v59, 0.0  ;;  %v9951_v35 = vpop.f32.mrb[6].mxu0  ;;  %4445 = vmatmul.mubr.f32.gmra.mrb[128].mxu1 %v3423_v13 }
 0x2e8   :  { %v2737_v47 = vadd.f32 %v13874_v49, %v9951_v35  ;;  %v2731_v36 = vpop.f32.mrb[7].mxu0  ;;  %4449 = vmatprep.mubr.f32.mxu1 %v3445_v42 }
 0x2e9   :  { %v14145_v33 = vpack.c.bf16 %v3321_v18, %v3320_v46  ;;  %v2732_v1 = vadd.f32 %v13874_v49, %v2731_v36  ;;  %v3549_v36 = vld [vmem:[%s18637_s3 + $0x508] sm:$0xff] }
 0x2ea   :  { %v3323_v53 = vmax.f32 %v2737_v47, 0.0 }
 0x2eb   :  { %v3322_v32 = vmax.f32 %v2732_v1, 0.0  ;;  %v9954_v26 = vpop.f32.mrb[8].mxu0  ;;  %4450 = vmatmul.mubr.f32.gmra.mrb[130].mxu1 %v3444_v55 }
 0x2ec   :  { %v2747_v7 = vadd.f32 %v13874_v49, %v9954_v26  ;;  %v2741_v11 = vpop.f32.mrb[9].mxu0  ;;  %4454 = vmatprep.mubr.f32.mxu1 %v3466_v8 }
 0x2ed   :  { %v14155_v2 = vpack.c.bf16 %v3323_v53, %v3322_v32  ;;  %v2742_v60 = vadd.f32 %v13874_v49, %v2741_v11 }
 0x2ee   :  { %v3325_v54 = vmax.f32 %v2747_v7, 0.0 }
 0x2ef   :  { %v3324_v21 = vmax.f32 %v2742_v60, 0.0  ;;  %v9957_v22 = vpop.f32.mrb[10].mxu0  ;;  %4455 = vmatmul.mubr.f32.gmra.mrb[132].mxu1 %v3465_v23 }
 0x2f0   :  { %v2757_v31 = vadd.f32 %v13874_v49, %v9957_v22  ;;  %v2751_v9 = vpop.f32.mrb[11].mxu0  ;;  %4459 = vmatprep.mubr.f32.mxu1 %v3487_v48 }
 0x2f1   :  { %v14165_v0 = vpack.c.bf16 %v3325_v54, %v3324_v21  ;;  %v2752_v62 = vadd.f32 %v13874_v49, %v2751_v9  ;;  %v3570_v54 = vld [vmem:[%s18637_s3 + $0x5b0] sm:$0xff] }
 0x2f2   :  { %v3327_v28 = vmax.f32 %v2757_v31, 0.0 }
 0x2f3   :  { %v3326_v5 = vmax.f32 %v2752_v62, 0.0  ;;  %v9960_v29 = vpop.f32.mrb[12].mxu0  ;;  %4460 = vmatmul.mubr.f32.gmra.mrb[134].mxu1 %v3486_v40 }
 0x2f4   :  { %v2767_v17 = vadd.f32 %v13874_v49, %v9960_v29  ;;  %v2761_v27 = vpop.f32.mrb[13].mxu0  ;;  %4464 = vmatprep.mubr.f32.mxu1 %v3508_v57 }
 0x2f5   :  { %v14175_v6 = vpack.c.bf16 %v3327_v28, %v3326_v5  ;;  %v2762_v63 = vadd.f32 %v13874_v49, %v2761_v27 }
 0x2f6   :  { %v3329_v34 = vmax.f32 %v2767_v17, 0.0  ;;  %v9173_v19 = vpop.f32.mrb[72].mxu1 }
 0x2f7   :  { %v3328_v43 = vmax.f32 %v2762_v63, 0.0  ;;  %v9963_v24 = vpop.f32.mrb[14].mxu0  ;;  %4465 = vmatmul.mubr.f32.gmra.mrb[136].mxu1 %v3507_v39  ;;  %v9174_v61 = vpop.f32.mrb[73].mxu1 }
 0x2f8   :  { %v2777_v45 = vadd.f32 %v13874_v49, %v9963_v24  ;;  %v2771_v38 = vpop.f32.mrb[15].mxu0  ;;  %4469 = vmatprep.mubr.f32.mxu1 %v3529_v20  ;;  %v9175_v10 = vadd.f32 %v9174_v61, %v9173_v19  ;;  %v4914_v19 = vld [vmem:[%s18639_s4 + $0x1d8] sm:$0xff] }
 0x2f9   :  { %v14185_v16 = vpack.c.bf16 %v3329_v34, %v3328_v43  ;;  %v2772_v44 = vadd.f32 %v13874_v49, %v2771_v38  ;;  %v4927_v43 = vld [vmem:[%s18639_s4 + $0x240] sm:$0xff] }
 0x2fa   :  { %v3331_v52 = vmax.f32 %v2777_v45, 0.0  ;;  %v14192_v13 = vadd.f32 %v9175_v10, %v14043_v30  ;;  %v9176_v59 = vpop.f32.mrb[74].mxu1  ;;  %v3571_v30 = vld [vmem:[%s18637_s3 + $0x5b8] sm:$0xff]  ;;  %v10664_v38 = vpack.c.bf16 %v4927_v43, %v4914_v19 }
 0x2fb   :  { %v3330_v42 = vmax.f32 %v2772_v44, 0.0  ;;  %v9966_v18 = vpop.f32.mrb[16].mxu0  ;;  %4470 = vmatmul.mubr.f32.gmra.mrb[138].mxu1 %v3528_v41  ;;  %v9177_v46 = vpop.f32.mrb[75].mxu1 }
 0x2fc   :  { %v2787_v35 = vadd.f32 %v13874_v49, %v9966_v18  ;;  %v2781_v47 = vpop.f32.mrb[17].mxu0  ;;  %4474 = vmatprep.mubr.f32.mxu1 %v3550_v25  ;;  %v9178_v55 = vadd.f32 %v9177_v46, %v9176_v59  ;;  %10665 = vmatprep.subr.bf16.mxu0 %v10664_v38 }
 0x2fd   :  { %v14198_v1 = vpack.c.bf16 %v3331_v52, %v3330_v42  ;;  %v2782_v8 = vadd.f32 %v13874_v49, %v2781_v47 }
 0x2fe   :  { %v3333_v53 = vmax.f32 %v2787_v35, 0.0  ;;  %v14205_v32 = vadd.f32 %v9178_v55, %v14056_v56  ;;  %v9179_v26 = vpop.f32.mrb[76].mxu1  ;;  %v3405_v56 = vld [vmem:[%s18637_s3 + $0x88] sm:$0xff] }
 0x2ff   :  { %v3332_v7 = vmax.f32 %v2782_v8, 0.0  ;;  %v9969_v11 = vpop.f32.mrb[18].mxu0  ;;  %4475 = vmatmul.mubr.f32.gmra.mrb[140].mxu1 %v3549_v36  ;;  %v9180_v23 = vpop.f32.mrb[77].mxu1 }
 0x300   :  { %v2797_v60 = vadd.f32 %v13874_v49, %v9969_v11  ;;  %v2791_v48 = vpop.f32.mrb[19].mxu0  ;;  %4479 = vmatprep.mubr.f32.mxu1 %v3571_v30  ;;  %v9181_v21 = vadd.f32 %v9180_v23, %v9179_v26 }
 0x301   :  { %v10364_v22 = vpack.c.bf16 %v3333_v53, %v3332_v7  ;;  %v2792_v31 = vadd.f32 %v13874_v49, %v2791_v48 }
 0x302   :  { %v3335_v9 = vmax.f32 %v2797_v60, 0.0  ;;  %v14216_v40 = vadd.f32 %v9181_v21, %v14067_v4  ;;  %v9182_v62 = vpop.f32.mrb[78].mxu1 }
 0x303   :  { %v3334_v57 = vmax.f32 %v2792_v31, 0.0  ;;  %v9972_v28 = vpop.f32.mrb[20].mxu0  ;;  %4480 = vmatmul.mubr.f32.gmra.mrb[142].mxu1 %v3570_v54  ;;  %10365 = vmatprep.subr.bf16.mxu1 %v10364_v22  ;;  %v9183_v5 = vpop.f32.mrb[79].mxu1 }
 0x304   :  { %v2807_v29 = vadd.f32 %v13874_v49, %v9972_v28  ;;  %v2801_v17 = vpop.f32.mrb[21].mxu0  ;;  %10367 = vmatpush3.bf16.msra.mxu1 %v14125_v58  ;;  %v9184_v27 = vadd.f32 %v9183_v5, %v9182_v62  ;;  %4549 = vmatprep.mubr.f32.mxu1 %v3405_v56  ;;  %v4913_v58 = vld [vmem:[%s18639_s4 + $0x1d0] sm:$0xff] }
 0x305   :  { %v10368_v39 = vpack.c.bf16 %v3335_v9, %v3334_v57  ;;  %v2802_v63 = vadd.f32 %v13874_v49, %v2801_v17  ;;  %v14259_v17 = vld [vmem:[%s18638_s2] ss:$0 sm:$0xff]  ;;  %s11781_s2 = smov 32  }
 0x306   :  { %v3337_v20 = vmax.f32 %v2807_v29, 0.0  ;;  %v14222_v4 = vadd.f32 %v9184_v27, %v14073_v14  ;;  %v9185_v34 = vpop.f32.mrb[80].mxu1  ;;  %v4926_v14 = vld [vmem:[%s18639_s4 + $0x238] sm:$0xff] }
 0x307   :  { %v3336_v24 = vmax.f32 %v2802_v63, 0.0  ;;  %v9975_v61 = vpop.f32.mrb[22].mxu0  ;;  %10369 = vmatprep.subr.bf16.mxu1 %v10368_v39  ;;  %v9186_v45 = vpop.f32.mrb[81].mxu1  ;;  %v10666_v25 = vpack.c.bf16 %v4926_v14, %v4913_v58 }
 0x308   :  { %v2817_v41 = vadd.f32 %v13874_v49, %v9975_v61  ;;  %v2811_v10 = vpop.f32.mrb[23].mxu0  ;;  %10371 = vmatpush3.bf16.msra.mxu1 %v14135_v12  ;;  %v9187_v44 = vadd.f32 %v9186_v45, %v9185_v34 }
 0x309   :  { %v10372_v52 = vpack.c.bf16 %v3337_v20, %v3336_v24  ;;  %v2812_v59 = vadd.f32 %v13874_v49, %v2811_v10  ;;  %10667 = vmatpush1.bf16.msra.mxu0 %v10666_v25 }
 0x30a   :  { %v3339_v42 = vmax.f32 %v2817_v41, 0.0  ;;  %v14240_v18 = vadd.f32 %v9187_v44, %v14079_v37  ;;  %v9188_v46 = vpop.f32.mrb[82].mxu1 }
 0x30b   :  { %v3338_v35 = vmax.f32 %v2812_v59, 0.0  ;;  %v9978_v47 = vpop.f32.mrb[24].mxu0  ;;  %10373 = vmatprep.subr.bf16.mxu1 %v10372_v52  ;;  %v9189_v36 = vpop.f32.mrb[83].mxu1 }
 0x30c   :  { %v2827_v55 = vadd.f32 %v13874_v49, %v9978_v47  ;;  %v2821_v8 = vpop.f32.mrb[25].mxu0  ;;  %10375 = vmatpush3.bf16.msra.mxu1 %v14145_v33  ;;  %v9190_v12 = vadd.f32 %v9189_v36, %v9188_v46 }
 0x30d   :  { %v10376_v30 = vpack.c.bf16 %v3339_v42, %v3338_v35  ;;  %v2822_v53 = vadd.f32 %v13874_v49, %v2821_v8  ;;  %v3426_v35 = vld [vmem:[%s18637_s3 + $0x130] sm:$0xff] }
 0x30e   :  { %v3341_v26 = vmax.f32 %v2827_v55, 0.0  ;;  %v14246_v7 = vadd.f32 %v9190_v12, %v14085_v51  ;;  %v9191_v37 = vpop.f32.mrb[84].mxu1 }
 0x30f   :  { %v3340_v11 = vmax.f32 %v2822_v53, 0.0  ;;  %v9981_v23 = vpop.f32.mrb[26].mxu0  ;;  %10377 = vmatprep.subr.bf16.mxu1 %v10376_v30  ;;  %v9192_v60 = vpop.f32.mrb[85].mxu1 }
 0x310   :  { %v2837_v48 = vadd.f32 %v13874_v49, %v9981_v23  ;;  %v2831_v54 = vpop.f32.mrb[27].mxu0  ;;  %10379 = vmatpush3.bf16.msra.mxu1 %v14155_v2  ;;  %v9193_v21 = vadd.f32 %v9192_v60, %v9191_v37  ;;  %v4940_v60 = vld [vmem:[%s18639_s4 + $0x2a8] sm:$0xff] }
 0x311   :  { %v10380_v33 = vpack.c.bf16 %v3341_v26, %v3340_v11  ;;  %v2832_v22 = vadd.f32 %v13874_v49, %v2831_v54  ;;  %v3447_v26 = vld [vmem:[%s18637_s3 + $0x1d8] sm:$0xff]  ;;  %v4939_v54 = vld [vmem:[%s18639_s4 + $0x2a0] sm:$0xff] }
 0x312   :  { %v3343_v31 = vmax.f32 %v2837_v48, 0.0  ;;  %v14252_v56 = vadd.f32 %v9193_v21, %v14091_v50  ;;  %v9194_v51 = vpop.f32.mrb[86].mxu1  ;;  %v4953_v48 = vld [vmem:[%s18639_s4 + $0x310] sm:$0xff] }
 0x313   :  { %v3342_v9 = vmax.f32 %v2832_v22, 0.0  ;;  %v9984_v62 = vpop.f32.mrb[28].mxu0  ;;  %10381 = vmatprep.subr.bf16.mxu1 %v10380_v33  ;;  %v9195_v57 = vpop.f32.mrb[87].mxu1  ;;  %v3446_v22 = vld [vmem:[%s18637_s3 + $0x1d0] sm:$0xff] }
 0x314   :  { %v2847_v28 = vadd.f32 %v13874_v49, %v9984_v62  ;;  %v2841_v5 = vpop.f32.mrb[29].mxu0  ;;  %10383 = vmatpush3.bf16.msra.mxu1 %v14165_v0  ;;  %v9196_v29 = vadd.f32 %v9195_v57, %v9194_v51  ;;  %v4952_v51 = vld [vmem:[%s18639_s4 + $0x308] sm:$0xff]  ;;  %v3468_v57 = vld [vmem:[%s18637_s3 + $0x280] sm:$0xff] }
 0x315   :  { %v10384_v2 = vpack.c.bf16 %v3343_v31, %v3342_v9  ;;  %v2842_v50 = vadd.f32 %v14259_v17, %v2841_v5  ;;  %v10668_v31 = vpack.c.bf16 %v4953_v48, %v4940_v60 }
 0x316   :  { %v3345_v27 = vmax.f32 %v2847_v28, 0.0  ;;  %v14263_v39 = vadd.f32 %v9196_v29, %v14097_v15  ;;  %v9197_v63 = vpop.f32.mrb[88].mxu1  ;;  %v10670_v28 = vpack.c.bf16 %v4952_v51, %v4939_v54 }
 0x317   :  { %v3344_v20 = vmax.f32 %v2842_v50, 0.0  ;;  %v9987_v34 = vpop.f32.mrb[30].mxu0  ;;  %10385 = vmatprep.subr.bf16.mxu1 %v10384_v2  ;;  %v9198_v49 = vpop.f32.mrb[89].mxu1  ;;  %10669 = vmatprep.subr.bf16.mxu0 %v10668_v31 }
 0x318   :  { %v2857_v0 = vadd.f32 %v14259_v17, %v9987_v34  ;;  %v2851_v19 = vpop.f32.mrb[31].mxu0  ;;  %10387 = vmatpush3.bf16.msra.mxu1 %v14175_v6  ;;  %v9199_v43 = vadd.f32 %v9198_v49, %v9197_v63  ;;  %10671 = vmatpush1.bf16.msra.mxu0 %v10670_v28  ;;  %v3467_v63 = vld [vmem:[%s18637_s3 + $0x278] sm:$0xff]  ;;  %v3489_v49 = vld [vmem:[%s18637_s3 + $0x328] sm:$0xff] }
 0x319   :  { %v10388_v58 = vpack.c.bf16 %v3345_v27, %v3344_v20  ;;  %v2852_v24 = vadd.f32 %v14259_v17, %v2851_v19 }
 0x31a   :  { %v3347_v61 = vmax.f32 %v2857_v0, 0.0  ;;  %v14269_v45 = vadd.f32 %v9199_v43, %v14103_v3  ;;  %v3404_v3 = vld [vmem:[%s18637_s3 + $0x80] sm:$0xff] }
 0x31b   :  { %v3346_v15 = vmax.f32 %v2852_v24, 0.0  ;;  %v9990_v38 = vpop.f32.mrb[32].mxu0  ;;  %10389 = vmatprep.subr.bf16.mxu1 %v10388_v58 }
 0x31c   :  { %v2867_v14 = vadd.f32 %v14259_v17, %v9990_v38  ;;  %v2861_v41 = vpop.f32.mrb[33].mxu0  ;;  %10391 = vmatpush3.bf16.msra.mxu1 %v14185_v16 }
 0x31d   :  { %v10392_v10 = vpack.c.bf16 %v3347_v61, %v3346_v15  ;;  %v2862_v44 = vadd.f32 %v14259_v17, %v2861_v41  ;;  %v3488_v61 = vld [vmem:[%s18637_s3 + $0x320] sm:$0xff] }
 0x31e   :  { %v3349_v6 = vmax.f32 %v2867_v14, 0.0  ;;  %v3510_v14 = vld [vmem:[%s18637_s3 + $0x3d0] sm:$0xff] }
 0x31f   :  { %v3348_v25 = vmax.f32 %v2862_v44, 0.0  ;;  %v9993_v52 = vpop.f32.mrb[34].mxu0  ;;  %10393 = vmatprep.subr.bf16.mxu1 %v10392_v10 }
 0x320   :  { %v2877_v59 = vadd.f32 %v14259_v17, %v9993_v52  ;;  %v2871_v42 = vpop.f32.mrb[35].mxu0  ;;  %10395 = vmatpush3.bf16.msra.mxu1 %v14198_v1  ;;  %v3425_v1 = vld [vmem:[%s18637_s3 + $0x128] sm:$0xff] }
 0x321   :  { %v14279_v46 = vpack.c.bf16 %v3349_v6, %v3348_v25  ;;  %v2872_v16 = vadd.f32 %v14259_v17, %v2871_v42  ;;  %v3509_v52 = vld [vmem:[%s18637_s3 + $0x3c8] sm:$0xff] }
 0x322   :  { %v3351_v47 = vmax.f32 %v2877_v59, 0.0 }
 0x323   :  { %v3350_v36 = vmax.f32 %v2872_v16, 0.0  ;;  %v9996_v55 = vpop.f32.mrb[36].mxu0  ;;  %4550 = vmatmul.mubr.f32.vlgmr.msra.gmra.mrb[144].mxu1 %v3404_v3  ;;  %v3531_v3 = vld [vmem:[%s18637_s3 + $0x478] sm:$0xff] }
 0x324   :  { %v2887_v8 = vadd.f32 %v14259_v17, %v9996_v55  ;;  %v2881_v12 = vpop.f32.mrb[37].mxu0  ;;  %4554 = vmatprep.mubr.f32.mxu1 %v3426_v35 }
 0x325   :  { %v14289_v30 = vpack.c.bf16 %v3351_v47, %v3350_v36  ;;  %v2882_v53 = vadd.f32 %v14259_v17, %v2881_v12 }
 0x326   :  { %v3353_v37 = vmax.f32 %v2887_v8, 0.0 }
 0x327   :  { %v3352_v11 = vmax.f32 %v2882_v53, 0.0  ;;  %v9999_v23 = vpop.f32.mrb[38].mxu0  ;;  %4555 = vmatmul.mubr.f32.gmra.mrb[146].mxu1 %v3425_v1  ;;  %v3530_v53 = vld [vmem:[%s18637_s3 + $0x470] sm:$0xff] }
 0x328   :  { %v2897_v21 = vadd.f32 %v14259_v17, %v9999_v23  ;;  %v2891_v33 = vpop.f32.mrb[39].mxu0  ;;  %4559 = vmatprep.mubr.f32.mxu1 %v3447_v26 }
 0x329   :  { %v14311_v9 = vpack.c.bf16 %v3353_v37, %v3352_v11  ;;  %v2892_v62 = vadd.f32 %v14259_v17, %v2891_v33  ;;  %v3552_v11 = vld [vmem:[%s18637_s3 + $0x520] sm:$0xff] }
 0x32a   :  { %v3355_v5 = vmax.f32 %v2897_v21, 0.0 }
 0x32b   :  { %v3354_v29 = vmax.f32 %v2892_v62, 0.0  ;;  %v10002_v2 = vpop.f32.mrb[40].mxu0  ;;  %4560 = vmatmul.mubr.f32.gmra.mrb[148].mxu1 %v3446_v22  ;;  %v3551_v62 = vld [vmem:[%s18637_s3 + $0x518] sm:$0xff] }
 0x32c   :  { %v2907_v50 = vadd.f32 %v14259_v17, %v10002_v2  ;;  %v2901_v27 = vpop.f32.mrb[41].mxu0  ;;  %4564 = vmatprep.mubr.f32.mxu1 %v3468_v57 }
 0x32d   :  { %v14321_v20 = vpack.c.bf16 %v3355_v5, %v3354_v29  ;;  %v2902_v34 = vadd.f32 %v14259_v17, %v2901_v27 }
 0x32e   :  { %v3357_v0 = vmax.f32 %v2907_v50, 0.0 }
 0x32f   :  { %v3356_v19 = vmax.f32 %v2902_v34, 0.0  ;;  %v10005_v43 = vpop.f32.mrb[42].mxu0  ;;  %4565 = vmatmul.mubr.f32.gmra.mrb[150].mxu1 %v3467_v63 }
 0x330   :  { %v2917_v58 = vadd.f32 %v14259_v17, %v10005_v43  ;;  %v2911_v24 = vpop.f32.mrb[43].mxu0  ;;  %4569 = vmatprep.mubr.f32.mxu1 %v3489_v49 }
 0x331   :  { %v14331_v15 = vpack.c.bf16 %v3357_v0, %v3356_v19  ;;  %v2912_v38 = vadd.f32 %v14259_v17, %v2911_v24  ;;  %v3572_v19 = vld [vmem:[%s18637_s3 + $0x5c0] sm:$0xff] }
 0x332   :  { %v3359_v41 = vmax.f32 %v2917_v58, 0.0 }
 0x333   :  { %v3358_v10 = vmax.f32 %v2912_v38, 0.0  ;;  %v10008_v44 = vpop.f32.mrb[44].mxu0  ;;  %4570 = vmatmul.mubr.f32.gmra.mrb[152].mxu1 %v3488_v61 }
 0x334   :  { %v2927_v6 = vadd.f32 %v14259_v17, %v10008_v44  ;;  %v2921_v25 = vpop.f32.mrb[45].mxu0  ;;  %4574 = vmatprep.mubr.f32.mxu1 %v3510_v14 }
 0x335   :  { %v14341_v59 = vpack.c.bf16 %v3359_v41, %v3358_v10  ;;  %v2922_v42 = vadd.f32 %v14259_v17, %v2921_v25 }
 0x336   :  { %v3361_v16 = vmax.f32 %v2927_v6, 0.0  ;;  %v9232_v35 = vpop.f32.mrb[90].mxu1 }
 0x337   :  { %v3360_v47 = vmax.f32 %v2922_v42, 0.0  ;;  %v10011_v36 = vpop.f32.mrb[46].mxu0  ;;  %v9233_v55 = vpop.f32.mrb[91].mxu1  ;;  %4575 = vmatmul.mubr.f32.gmra.mrb[154].mxu1 %v3509_v52 }
 0x338   :  { %v2937_v8 = vadd.f32 %v14259_v17, %v10011_v36  ;;  %v9234_v12 = vadd.f32 %v9233_v55, %v9232_v35  ;;  %v2931_v1 = vpop.f32.mrb[47].mxu0  ;;  %4579 = vmatprep.mubr.f32.mxu1 %v3531_v3 }
 0x339   :  { %v14351_v26 = vpack.c.bf16 %v3361_v16, %v3360_v47  ;;  %v2932_v37 = vadd.f32 %v14259_v17, %v2931_v1 }
 0x33a   :  { %v3363_v23 = vmax.f32 %v2937_v8, 0.0  ;;  %v14358_v60 = vadd.f32 %v9234_v12, %v14192_v13  ;;  %v9235_v48 = vpop.f32.mrb[92].mxu1  ;;  %v3573_v13 = vld [vmem:[%s18637_s3 + $0x5c8] sm:$0xff] }
 0x33b   :  { %v3362_v54 = vmax.f32 %v2932_v37, 0.0  ;;  %v10014_v21 = vpop.f32.mrb[48].mxu0  ;;  %v9236_v33 = vpop.f32.mrb[93].mxu1  ;;  %4580 = vmatmul.mubr.f32.gmra.mrb[156].mxu1 %v3530_v53 }
 0x33c   :  { %v2947_v22 = vadd.f32 %v14259_v17, %v10014_v21  ;;  %v9237_v31 = vadd.f32 %v9236_v33, %v9235_v48  ;;  %v2941_v51 = vpop.f32.mrb[49].mxu0  ;;  %4584 = vmatprep.mubr.f32.mxu1 %v3552_v11 }
 0x33d   :  { %v14364_v57 = vpack.c.bf16 %v3363_v23, %v3362_v54  ;;  %v2942_v28 = vadd.f32 %v14259_v17, %v2941_v51 }
 0x33e   :  { %v3365_v5 = vmax.f32 %v2947_v22, 0.0  ;;  %v14371_v29 = vadd.f32 %v9237_v31, %v14205_v32  ;;  %v9238_v2 = vpop.f32.mrb[94].mxu1  ;;  %v3407_v32 = vld [vmem:[%s18637_s3 + $0x98] sm:$0xff] }
 0x33f   :  { %v3364_v50 = vmax.f32 %v2942_v28, 0.0  ;;  %v10017_v27 = vpop.f32.mrb[50].mxu0  ;;  %v9239_v63 = vpop.f32.mrb[95].mxu1  ;;  %4585 = vmatmul.mubr.f32.gmra.mrb[158].mxu1 %v3551_v62 }
 0x340   :  { %v2957_v34 = vadd.f32 %v14259_v17, %v10017_v27  ;;  %v9240_v49 = vadd.f32 %v9239_v63, %v9238_v2  ;;  %v2951_v0 = vpop.f32.mrb[51].mxu0  ;;  %4589 = vmatprep.mubr.f32.mxu1 %v3573_v13 }
 0x341   :  { %v10396_v43 = vpack.c.bf16 %v3365_v5, %v3364_v50  ;;  %v2952_v58 = vadd.f32 %v14259_v17, %v2951_v0 }
 0x342   :  { %v3367_v24 = vmax.f32 %v2957_v34, 0.0  ;;  %v14382_v61 = vadd.f32 %v9240_v49, %v14216_v40  ;;  %v9241_v38 = vpop.f32.mrb[96].mxu1 }
 0x343   :  { %v3366_v14 = vmax.f32 %v2952_v58, 0.0  ;;  %v10020_v41 = vpop.f32.mrb[52].mxu0  ;;  %v9242_v10 = vpop.f32.mrb[97].mxu1  ;;  %4590 = vmatmul.mubr.f32.gmra.mrb[160].mxu1 %v3572_v19  ;;  %10397 = vmatprep.subr.bf16.mxu1 %v10396_v43 }
 0x344   :  { %v2967_v44 = vadd.f32 %v14259_v17, %v10020_v41  ;;  %v9243_v6 = vadd.f32 %v9242_v10, %v9241_v38  ;;  %v2961_v25 = vpop.f32.mrb[53].mxu0  ;;  %10399 = vmatpush3.bf16.msra.mxu1 %v14279_v46  ;;  %4659 = vmatprep.mubr.f32.mxu1 %v3407_v32  ;;  %v4966_v41 = vld [vmem:[%s18639_s4 + $0x378] sm:$0xff]  ;;  %v4979_v10 = vld [vmem:[%s18639_s4 + $0x3e0] sm:$0xff] }
 0x345   :  { %v10400_v52 = vpack.c.bf16 %v3367_v24, %v3366_v14  ;;  %v2962_v42 = vadd.f32 %v14259_v17, %v2961_v25 }
 0x346   :  { %v3369_v3 = vmax.f32 %v2967_v44, 0.0  ;;  %v14388_v40 = vadd.f32 %v9243_v6, %v14222_v4  ;;  %v9244_v16 = vpop.f32.mrb[98].mxu1 }
 0x347   :  { %v3368_v35 = vmax.f32 %v2962_v42, 0.0  ;;  %v10023_v47 = vpop.f32.mrb[54].mxu0  ;;  %v9245_v36 = vpop.f32.mrb[99].mxu1  ;;  %10401 = vmatprep.subr.bf16.mxu1 %v10400_v52  ;;  %v10672_v52 = vpack.c.bf16 %v4979_v10, %v4966_v41  ;;  %v3512_v41 = vld [vmem:[%s18637_s3 + $0x3e0] sm:$0xff]  ;;  %v3511_v10 = vld [vmem:[%s18637_s3 + $0x3d8] sm:$0xff] }
 0x348   :  { %v2977_v55 = vadd.f32 %v14259_v17, %v10023_v47  ;;  %v9246_v8 = vadd.f32 %v9245_v36, %v9244_v16  ;;  %v2971_v12 = vpop.f32.mrb[55].mxu0  ;;  %10403 = vmatpush3.bf16.msra.mxu1 %v14289_v30 }
 0x349   :  { %v10404_v46 = vpack.c.bf16 %v3369_v3, %v3368_v35  ;;  %v2972_v1 = vadd.f32 %v14259_v17, %v2971_v12  ;;  %10673 = vmatprep.subr.bf16.mxu0 %v10672_v52  ;;  %v3532_v52 = vld [vmem:[%s18637_s3 + $0x480] sm:$0xff] }
 0x34a   :  { %v3371_v53 = vmax.f32 %v2977_v55, 0.0  ;;  %v14394_v37 = vadd.f32 %v9246_v8, %v14240_v18  ;;  %v9247_v4 = vpop.f32.mrb[100].mxu1 }
 0x34b   :  { %v3370_v11 = vmax.f32 %v2972_v1, 0.0  ;;  %v10026_v23 = vpop.f32.mrb[56].mxu0  ;;  %v9248_v48 = vpop.f32.mrb[101].mxu1  ;;  %10405 = vmatprep.subr.bf16.mxu1 %v10404_v46 }
 0x34c   :  { %v2987_v54 = vadd.f32 %v14259_v17, %v10026_v23  ;;  %v9249_v21 = vadd.f32 %v9248_v48, %v9247_v4  ;;  %v2981_v33 = vpop.f32.mrb[57].mxu0  ;;  %10407 = vmatpush3.bf16.msra.mxu1 %v14311_v9 }
 0x34d   :  { %v10408_v22 = vpack.c.bf16 %v3371_v53, %v3370_v11  ;;  %v2982_v30 = vadd.f32 %v14259_v17, %v2981_v33  ;;  %v3428_v33 = vld [vmem:[%s18637_s3 + $0x140] sm:$0xff] }
 0x34e   :  { %v3373_v31 = vmax.f32 %v2987_v54, 0.0  ;;  %v14400_v51 = vadd.f32 %v9249_v21, %v14246_v7  ;;  %v9250_v18 = vpop.f32.mrb[102].mxu1 }
 0x34f   :  { %v3372_v62 = vmax.f32 %v2982_v30, 0.0  ;;  %v10029_v28 = vpop.f32.mrb[58].mxu0  ;;  %v9251_v13 = vpop.f32.mrb[103].mxu1  ;;  %10409 = vmatprep.subr.bf16.mxu1 %v10408_v22  ;;  %v11778_v22 = vmov 0.0|0.0  }
 0x350   :  { %v2997_v5 = vadd.f32 %v14259_v17, %v10029_v28  ;;  %v9252_v2 = vadd.f32 %v9251_v13, %v9250_v18  ;;  %v2991_v50 = vpop.f32.mrb[59].mxu0  ;;  %10411 = vmatpush3.bf16.msra.mxu1 %v14321_v20 }
 0x351   :  { %v10412_v27 = vpack.c.bf16 %v3373_v31, %v3372_v62  ;;  %v2992_v9 = vadd.f32 %v14259_v17, %v2991_v50  ;;  %v3427_v62 = vld [vmem:[%s18637_s3 + $0x138] sm:$0xff] }
 0x352   :  { %v3375_v63 = vmax.f32 %v2997_v5, 0.0  ;;  %v14406_v34 = vadd.f32 %v9252_v2, %v14252_v56  ;;  %v9253_v7 = vpop.f32.mrb[104].mxu1  ;;  %v3449_v2 = vld [vmem:[%s18637_s3 + $0x1e8] sm:$0xff] }
 0x353   :  { %v3374_v49 = vmax.f32 %v2992_v9, 0.0  ;;  %v10032_v0 = vpop.f32.mrb[60].mxu0  ;;  %v9254_v19 = vpop.f32.mrb[105].mxu1  ;;  %10413 = vmatprep.subr.bf16.mxu1 %v10412_v27 }
 0x354   :  { %v3007_v43 = vadd.f32 %v14259_v17, %v10032_v0  ;;  %v9255_v58 = vadd.f32 %v9254_v19, %v9253_v7  ;;  %v3001_v32 = vpop.f32.mrb[61].mxu0  ;;  %10415 = vmatpush3.bf16.msra.mxu1 %v14331_v15  ;;  %v4965_v15 = vld [vmem:[%s18639_s4 + $0x370] sm:$0xff]  ;;  %v3448_v7 = vld [vmem:[%s18637_s3 + $0x1e0] sm:$0xff] }
 0x355   :  { %v10416_v24 = vpack.c.bf16 %v3375_v63, %v3374_v49  ;;  %v3002_v20 = vadd.f32 %v14259_v17, %v3001_v32  ;;  %v3470_v19 = vld [vmem:[%s18637_s3 + $0x290] sm:$0xff] }
 0x356   :  { %v3377_v38 = vmax.f32 %v3007_v43, 0.0  ;;  %v14412_v14 = vadd.f32 %v9255_v58, %v14263_v39  ;;  %v9256_v56 = vpop.f32.mrb[106].mxu1  ;;  %v4978_v39 = vld [vmem:[%s18639_s4 + $0x3d8] sm:$0xff] }
 0x357   :  { %v3376_v44 = vmax.f32 %v3002_v20, 0.0  ;;  %v10035_v6 = vpop.f32.mrb[62].mxu0  ;;  %v9257_v25 = vpop.f32.mrb[107].mxu1  ;;  %10417 = vmatprep.subr.bf16.mxu1 %v10416_v24  ;;  %v10674_v35 = vpack.c.bf16 %v4978_v39, %v4965_v15  ;;  %v3469_v20 = vld [vmem:[%s18637_s3 + $0x288] sm:$0xff]  ;;  %v3554_v39 = vld [vmem:[%s18637_s3 + $0x530] sm:$0xff] }
 0x358   :  { %v3017_v42 = vadd.f32 %v14259_v17, %v10035_v6  ;;  %v9258_v3 = vadd.f32 %v9257_v25, %v9256_v56  ;;  %v3011_v16 = vpop.f32.mrb[63].mxu0  ;;  %10419 = vmatpush3.bf16.msra.mxu1 %v14341_v59  ;;  %v3533_v15 = vld [vmem:[%s18637_s3 + $0x488] sm:$0xff] }
 0x359   :  { %v10420_v47 = vpack.c.bf16 %v3377_v38, %v3376_v44  ;;  %v3012_v36 = vadd.f32 %v14259_v17, %v3011_v16  ;;  %10675 = vmatpush1.bf16.msra.mxu0 %v10674_v35  ;;  %v3491_v38 = vld [vmem:[%s18637_s3 + $0x338] sm:$0xff] }
 0x35a   :  { %v3379_v55 = vmax.f32 %v3017_v42, 0.0  ;;  %v14430_v8 = vadd.f32 %v9258_v3, %v14269_v45  ;;  %v3406_v45 = vld [vmem:[%s18637_s3 + $0x90] sm:$0xff] }
 0x35b   :  { %v3378_v12 = vmax.f32 %v3012_v36, 0.0  ;;  %10421 = vmatprep.subr.bf16.mxu1 %v10420_v47  ;;  %v10038_v46 = vpop.f32.mrb[64].mxu0  ;;  %v3553_v47 = vld [vmem:[%s18637_s3 + $0x528] sm:$0xff]  ;;  %v3575_v36 = vld [vmem:[%s18637_s3 + $0x5d8] sm:$0xff] }
 0x35c   :  { %10423 = vmatpush3.bf16.msra.mxu1 %v14351_v26  ;;  %v3027_v1 = vadd.f32 %v14259_v17, %v10038_v46  ;;  %v3021_v53 = vpop.f32.mrb[65].mxu0  ;;  %v5005_v46 = vld [vmem:[%s18639_s4 + $0x4b0] sm:$0xff] }
 0x35d   :  { %v10424_v4 = vpack.c.bf16 %v3379_v55, %v3378_v12  ;;  %v3022_v59 = vadd.f32 %v14259_v17, %v3021_v53 }
 0x35e   :  { %v3381_v11 = vmax.f32 %v3027_v1, 0.0 }
 0x35f   :  { %10425 = vmatprep.subr.bf16.mxu1 %v10424_v4  ;;  %v3380_v23 = vmax.f32 %v3022_v59, 0.0  ;;  %v10041_v48 = vpop.f32.mrb[66].mxu0  ;;  %v3574_v59 = vld [vmem:[%s18637_s3 + $0x5d0] sm:$0xff] }
 0x360   :  { %10427 = vmatpush3.bf16.msra.mxu1 %v14364_v57  ;;  %v3037_v54 = vadd.f32 %v14259_v17, %v10041_v48  ;;  %v3031_v21 = vpop.f32.mrb[67].mxu0  ;;  %v5004_v48 = vld [vmem:[%s18639_s4 + $0x4a8] sm:$0xff] }
 0x361   :  { %v10429_v26 = vpack.c.bf16 %v3381_v11, %v3380_v23  ;;  %10428 = vmatprep.subr.bf16.mxu1 %v11778_v22  ;;  %v3032_v30 = vadd.f32 %v14259_v17, %v3031_v21  ;;  %v4991_v23 = vld [vmem:[%s18639_s4 + $0x440] sm:$0xff] }
 0x362   :  { %v3383_v31 = vmax.f32 %v3037_v54, 0.0  ;;  %v10678_v54 = vpack.c.bf16 %v5004_v48, %v4991_v23 }
 0x363   :  { %4660 = vmatmul.mubr.f32.vlgmr.msra.gmra.mrb[162].mxu1 %v3406_v45  ;;  %v3382_v57 = vmax.f32 %v3032_v30, 0.0  ;;  %v10044_v18 = vpop.f32.mrb[68].mxu0 }
 0x364   :  { %4664 = vmatprep.mubr.f32.mxu1 %v3428_v33  ;;  %10430 = vmatpush3.bf16.msra.mxu1 %v10429_v26  ;;  %v3047_v28 = vadd.f32 %v14259_v17, %v10044_v18  ;;  %v3041_v13 = vpop.f32.mrb[69].mxu0  ;;  %v11780_v26 = vmov 0.0   ;;  %v3429_v18 = vld [vmem:[%s18637_s3 + $0x148] sm:$0xff] }
 0x365   :  { %v10432_v5 = vpack.c.bf16 %v3383_v31, %v3382_v57  ;;  %10431 = vmatprep.subr.bf16.mxu1 %v11778_v22  ;;  %v3042_v50 = vadd.f32 %v14259_v17, %v3041_v13 }
 0x366   :  { %v3385_v27 = vmax.f32 %v3047_v28, 0.0 }
 0x367   :  { %4665 = vmatmul.mubr.f32.gmra.mrb[164].mxu1 %v3427_v62  ;;  %v3384_v9 = vmax.f32 %v3042_v50, 0.0  ;;  %v10047_v63 = vpop.f32.mrb[70].mxu0 }
 0x368   :  { %4669 = vmatprep.mubr.f32.mxu1 %v3449_v2  ;;  %10433 = vmatpush3.bf16.msra.mxu1 %v10432_v5  ;;  %v3057_v49 = vadd.f32 %v14259_v17, %v10047_v63  ;;  %v3051_v0 = vpop.f32.mrb[71].mxu0  ;;  %v3450_v5 = vld [vmem:[%s18637_s3 + $0x1f0] sm:$0xff] }
 0x369   :  { %v10435_v43 = vpack.c.bf16 %v3385_v27, %v3384_v9  ;;  %10434 = vmatprep.subr.bf16.mxu1 %v11778_v22  ;;  %v3052_v58 = vadd.f32 %v14259_v17, %v3051_v0  ;;  %v3490_v17 = vld [vmem:[%s18637_s3 + $0x330] sm:$0xff]  ;;  %v3471_v9 = vld [vmem:[%s18637_s3 + $0x298] sm:$0xff]  ;;  %v3492_v0 = vld [vmem:[%s18637_s3 + $0x340] sm:$0xff] }
 0x36a   :  { %v3387_v32 = vmax.f32 %v3057_v49, 0.0 }
 0x36b   :  { %4670 = vmatmul.mubr.f32.gmra.mrb[166].mxu1 %v3448_v7  ;;  %v3386_v24 = vmax.f32 %v3052_v58, 0.0 }
 0x36c   :  { %4674 = vmatprep.mubr.f32.mxu1 %v3470_v19  ;;  %10436 = vmatpush3.bf16.msra.mxu1 %v10435_v43 }
 0x36d   :  { %v10438_v56 = vpack.c.bf16 %v3387_v32, %v3386_v24  ;;  %10437 = vmatprep.subr.bf16.mxu1 %v11778_v22  ;;  %v3513_v32 = vld [vmem:[%s18637_s3 + $0x3e8] sm:$0xff] }
 0x36f   :  { %4675 = vmatmul.mubr.f32.gmra.mrb[168].mxu1 %v3469_v20  ;;  %v5018_v20 = vld [vmem:[%s18639_s4 + $0x518] sm:$0xff] }
 0x370   :  { %4679 = vmatprep.mubr.f32.mxu1 %v3491_v38  ;;  %10439 = vmatpush3.bf16.msra.mxu1 %v10438_v56  ;;  %v5017_v38 = vld [vmem:[%s18639_s4 + $0x510] sm:$0xff] }
 0x373   :  { %4680 = vmatmul.mubr.f32.gmra.mrb[170].mxu1 %v3490_v17  ;;  %v5030_v17 = vld [vmem:[%s18639_s4 + $0x578] sm:$0xff] }
 0x374   :  { %4684 = vmatprep.mubr.f32.mxu1 %v3512_v41  ;;  %v10682_v41 = vpack.c.bf16 %v5030_v17, %v5017_v38 }
 0x376   :  { %v9291_v44 = vpop.f32.mrb[108].mxu1 }
 0x377   :  { %v9292_v6 = vpop.f32.mrb[109].mxu1  ;;  %4685 = vmatmul.mubr.f32.gmra.mrb[172].mxu1 %v3511_v10  ;;  %v3555_v10 = vld [vmem:[%s18637_s3 + $0x538] sm:$0xff] }
 0x378   :  { %v9293_v25 = vadd.f32 %v9292_v6, %v9291_v44  ;;  %4689 = vmatprep.mubr.f32.mxu1 %v3533_v15  ;;  %v3576_v15 = vld [vmem:[%s18637_s3 + $0x5e0] sm:$0xff] }
 0x37a   :  { %v14489_v42 = vadd.f32 %v9293_v25, %v14358_v60  ;;  %v9294_v3 = vpop.f32.mrb[110].mxu1  ;;  %v4992_v60 = vld [vmem:[%s18639_s4 + $0x448] sm:$0xff] }
 0x37b   :  { %v9295_v16 = vpop.f32.mrb[111].mxu1  ;;  %4690 = vmatmul.mubr.f32.gmra.mrb[174].mxu1 %v3532_v52  ;;  %v10676_v53 = vpack.c.bf16 %v5005_v46, %v4992_v60 }
 0x37c   :  { %v9296_v35 = vadd.f32 %v9295_v16, %v9294_v3  ;;  %4694 = vmatprep.mubr.f32.mxu1 %v3554_v39 }
 0x37d   :  { %10677 = vmatprep.subr.bf16.mxu0 %v10676_v53 }
 0x37e   :  { %v14498_v55 = vadd.f32 %v9296_v35, %v14371_v29  ;;  %v9297_v12 = vpop.f32.mrb[112].mxu1  ;;  %10679 = vmatpush1.bf16.msra.mxu0 %v10678_v54 }
 0x37f   :  { %v9298_v1 = vpop.f32.mrb[113].mxu1  ;;  %4695 = vmatmul.mubr.f32.gmra.mrb[176].mxu1 %v3553_v47 }
 0x380   :  { %v9299_v4 = vadd.f32 %v9298_v1, %v9297_v12  ;;  %4699 = vmatprep.mubr.f32.mxu1 %v3575_v36 }
 0x382   :  { %v14510_v29 = vadd.f32 %v9299_v4, %v14382_v61  ;;  %v9300_v11 = vpop.f32.mrb[114].mxu1  ;;  %v3408_v61 = vld [vmem:[%s18637_s3 + $0xa0] sm:$0xff] }
 0x383   :  { %v9301_v45 = vpop.f32.mrb[115].mxu1  ;;  %4700 = vmatmul.mubr.f32.gmra.mrb[178].mxu1 %v3574_v59 }
 0x384   :  { %v9302_v21 = vadd.f32 %v9301_v45, %v9300_v11  ;;  %10064 = vmatprep.mubr.msk.f32.mxu1 %vm11779_vm4, %v11780_v26 }
 0x386   :  { %v14524_v33 = vadd.f32 %v9302_v21, %v14388_v40  ;;  %v9303_v30 = vpop.f32.mrb[116].mxu1 }
 0x387   :  { %v9304_v31 = vpop.f32.mrb[117].mxu1  ;;  %10065 = vmatmul.mubr.msk.f32.vlgmr.msra.gmra.mrb[180].mxu1 %vm3577_vm5, %v3408_v61 }
 0x388   :  { %v9305_v57 = vadd.f32 %v9304_v31, %v9303_v30  ;;  %10067 = vmatprep.mubr.msk.f32.mxu1 %vm11779_vm4, %v11780_v26  ;;  %v5057_v30 = vld [vmem:[%s18639_s4 + $0x650] sm:$0xff]  ;;  %v5043_v31 = vld [vmem:[%s18639_s4 + $0x5e0] sm:$0xff] }
 0x38a   :  { %v14533_v62 = vadd.f32 %v9305_v57, %v14394_v37  ;;  %v9306_v28 = vpop.f32.mrb[118].mxu1 }
 0x38b   :  { %v9307_v13 = vpop.f32.mrb[119].mxu1  ;;  %10068 = vmatmul.mubr.msk.f32.gmra.mrb[182].mxu1 %vm3577_vm5, %v3429_v18  ;;  %v5056_v18 = vld [vmem:[%s18639_s4 + $0x648] sm:$0xff] }
 0x38c   :  { %v9308_v40 = vadd.f32 %v9307_v13, %v9306_v28  ;;  %10070 = vmatprep.mubr.msk.f32.mxu1 %vm11779_vm4, %v11780_v26  ;;  %v10686_v13 = vpack.c.bf16 %v5056_v18, %v5043_v31 }
 0x38e   :  { %v14542_v2 = vadd.f32 %v9308_v40, %v14400_v51  ;;  %v9309_v50 = vpop.f32.mrb[120].mxu1 }
 0x38f   :  { %v9310_v27 = vpop.f32.mrb[121].mxu1  ;;  %10071 = vmatmul.mubr.msk.f32.gmra.mrb[184].mxu1 %vm3577_vm5, %v3450_v5 }
 0x390   :  { %v9311_v37 = vadd.f32 %v9310_v27, %v9309_v50  ;;  %10073 = vmatprep.mubr.msk.f32.mxu1 %vm11779_vm4, %v11780_v26 }
 0x392   :  { %v14551_v63 = vadd.f32 %v9311_v37, %v14406_v34  ;;  %v9312_v7 = vpop.f32.mrb[122].mxu1 }
 0x393   :  { %v9313_v49 = vpop.f32.mrb[123].mxu1  ;;  %10074 = vmatmul.mubr.msk.f32.gmra.mrb[186].mxu1 %vm3577_vm5, %v3471_v9 }
 0x394   :  { %v9314_v51 = vadd.f32 %v9313_v49, %v9312_v7  ;;  %10076 = vmatprep.mubr.msk.f32.mxu1 %vm11779_vm4, %v11780_v26 }
 0x396   :  { %v14560_v19 = vadd.f32 %v9314_v51, %v14412_v14  ;;  %v9315_v43 = vpop.f32.mrb[124].mxu1  ;;  %v5031_v14 = vld [vmem:[%s18639_s4 + $0x580] sm:$0xff] }
 0x397   :  { %v9316_v58 = vpop.f32.mrb[125].mxu1  ;;  %10077 = vmatmul.mubr.msk.f32.gmra.mrb[188].mxu1 %vm3577_vm5, %v3492_v0  ;;  %v10680_v56 = vpack.c.bf16 %v5031_v14, %v5018_v20  ;;  %v5083_v51 = vld [vmem:[%s18639_s4 + $0x720] sm:$0xff]  ;;  %v5082_v20 = vld [vmem:[%s18639_s4 + $0x718] sm:$0xff]  ;;  %v5096_v14 = vld [vmem:[%s18639_s4 + $0x788] sm:$0xff] }
 0x398   :  { %v9317_v34 = vadd.f32 %v9316_v58, %v9315_v43  ;;  %10079 = vmatprep.mubr.msk.f32.mxu1 %vm11779_vm4, %v11780_v26 }
 0x399   :  { %10681 = vmatprep.subr.bf16.mxu0 %v10680_v56 }
 0x39a   :  { %v4372_v24 = vadd.f32 %v9317_v34, %v14430_v8  ;;  %v3534_v8 = vld [vmem:[%s18637_s3 + $0x490] sm:$0xff]  ;;  %10683 = vmatpush1.bf16.msra.mxu0 %v10682_v41  ;;  %v5095_v41 = vld [vmem:[%s18639_s4 + $0x780] sm:$0xff] }
 0x39b   :  { %10080 = vmatmul.mubr.msk.f32.gmra.mrb[190].mxu1 %vm3577_vm5, %v3513_v32 }
 0x39c   :  { %10082 = vmatprep.mubr.msk.f32.mxu1 %vm11779_vm4, %v11780_v26 }
 0x39f   :  { %10083 = vmatmul.mubr.msk.f32.gmra.mrb[192].mxu1 %vm3577_vm5, %v3534_v8  ;;  %v5109_v8 = vld [vmem:[%s18639_s4 + $0x7f0] sm:$0xff] }
 0x3a0   :  { %10085 = vmatprep.mubr.msk.f32.mxu1 %vm11779_vm4, %v11780_v26 }
 0x3a3   :  { %10086 = vmatmul.mubr.msk.f32.gmra.mrb[194].mxu1 %vm3577_vm5, %v3555_v10  ;;  %v5108_v10 = vld [vmem:[%s18639_s4 + $0x7e8] sm:$0xff] }
 0x3a4   :  { %10088 = vmatprep.mubr.msk.f32.mxu1 %vm11779_vm4, %v11780_v26 }
 0x3a7   :  { %10089 = vmatmul.mubr.msk.f32.gmra.mrb[196].mxu1 %vm3577_vm5, %v3576_v15 }
 0x3b6   :  { %v9350_v44 = vpop.f32.mrb[126].mxu1 }
 0x3b7   :  { %v9351_v6 = vpop.f32.mrb[127].mxu1 }
 0x3b8   :  { %v9352_v25 = vadd.f32 %v9351_v6, %v9350_v44  ;;  %v10692_v44 = vpack.c.bf16 %v5109_v8, %v5096_v14  ;;  %v4856_v6 = vld [vmem:[%s18639_s4 + $0x8] sm:$0xff]  ;;  %v4959_v14 = vld [vmem:[%s18639_s4 + $0x340] sm:$0xff] }
 0x3ba   :  { %v4442_v52 = vadd.f32 %v9352_v25, %v14489_v42  ;;  %v9353_v39 = vpop.f32.mrb[128].mxu1  ;;  %v4869_v25 = vld [vmem:[%s18639_s4 + $0x70] sm:$0xff] }
 0x3bb   :  { %v9354_v3 = vpop.f32.mrb[129].mxu1 }
 0x3bc   :  { %v9355_v16 = vadd.f32 %v9354_v3, %v9353_v39  ;;  %v10694_v3 = vpack.c.bf16 %v5108_v10, %v5095_v41 }
 0x3be   :  { %v4447_v35 = vadd.f32 %v9355_v16, %v14498_v55  ;;  %v9356_v47 = vpop.f32.mrb[130].mxu1  ;;  %v10440_v16 = vpack.c.bf16 %v4869_v25, %v4856_v6  ;;  %v4985_v25 = vld [vmem:[%s18639_s4 + $0x410] sm:$0xff] }
 0x3bf   :  { %v9357_v36 = vpop.f32.mrb[131].mxu1 }
 0x3c0   :  { %v9358_v12 = vadd.f32 %v9357_v36, %v9356_v47  ;;  %v4882_v47 = vld [vmem:[%s18639_s4 + $0xd8] sm:$0xff]  ;;  %v4895_v36 = vld [vmem:[%s18639_s4 + $0x140] sm:$0xff]  ;;  %10441 = vmatprep.subr.bf16.mxu1 %v10440_v16 }
 0x3c2   :  { %v14603_v60 = vadd.f32 %v9358_v12, %v14510_v29  ;;  %v9359_v46 = vpop.f32.mrb[132].mxu1 }
 0x3c3   :  { %v9360_v1 = vpop.f32.mrb[133].mxu1 }
 0x3c4   :  { %v9361_v53 = vadd.f32 %v9360_v1, %v9359_v46  ;;  %v10444_v46 = vpack.c.bf16 %v4895_v36, %v4882_v47  ;;  %v4881_v1 = vld [vmem:[%s18639_s4 + $0xd0] sm:$0xff] }
 0x3c6   :  { %v14606_v4 = vadd.f32 %v9361_v53, %v14524_v33  ;;  %v9362_v59 = vpop.f32.mrb[134].mxu1  ;;  %v5044_v33 = vld [vmem:[%s18639_s4 + $0x5e8] sm:$0xff]  ;;  %v4894_v53 = vld [vmem:[%s18639_s4 + $0x138] sm:$0xff] }
 0x3c7   :  { %v9363_v11 = vpop.f32.mrb[135].mxu1  ;;  %v10684_v57 = vpack.c.bf16 %v5057_v30, %v5044_v33  ;;  %v4934_v33 = vld [vmem:[%s18639_s4 + $0x278] sm:$0xff]  ;;  %v4947_v30 = vld [vmem:[%s18639_s4 + $0x2e0] sm:$0xff] }
 0x3c8   :  { %v9364_v42 = vadd.f32 %v9363_v11, %v9362_v59  ;;  %v4908_v59 = vld [vmem:[%s18639_s4 + $0x1a8] sm:$0xff] }
 0x3c9   :  { %10685 = vmatprep.subr.bf16.mxu0 %v10684_v57 }
 0x3ca   :  { %v14609_v23 = vadd.f32 %v9364_v42, %v14533_v62  ;;  %v9365_v48 = vpop.f32.mrb[136].mxu1  ;;  %10687 = vmatpush1.bf16.msra.mxu0 %v10686_v13  ;;  %v4933_v13 = vld [vmem:[%s18639_s4 + $0x270] sm:$0xff] }
 0x3cb   :  { %v9366_v55 = vpop.f32.mrb[137].mxu1 }
 0x3cc   :  { %v9367_v45 = vadd.f32 %v9366_v55, %v9365_v48  ;;  %v4921_v48 = vld [vmem:[%s18639_s4 + $0x210] sm:$0xff] }
 0x3ce   :  { %v14612_v54 = vadd.f32 %v9367_v45, %v14542_v2  ;;  %v9368_v29 = vpop.f32.mrb[138].mxu1  ;;  %v10446_v45 = vpack.c.bf16 %v4894_v53, %v4881_v1  ;;  %v5024_v1 = vld [vmem:[%s18639_s4 + $0x548] sm:$0xff]  ;;  %v5038_v53 = vld [vmem:[%s18639_s4 + $0x5b8] sm:$0xff] }
 0x3cf   :  { %v9369_v21 = vpop.f32.mrb[139].mxu1 }
 0x3d0   :  { %v9370_v61 = vadd.f32 %v9369_v21, %v9368_v29  ;;  %v10448_v21 = vpack.c.bf16 %v4921_v48, %v4908_v59 }
 0x3d2   :  { %v14627_v62 = vadd.f32 %v9370_v61, %v14551_v63  ;;  %v9371_v28 = vpop.f32.mrb[140].mxu1  ;;  %v5070_v63 = vld [vmem:[%s18639_s4 + $0x6b8] sm:$0xff]  ;;  %v4907_v61 = vld [vmem:[%s18639_s4 + $0x1a0] sm:$0xff] }
 0x3d3   :  { %v9372_v40 = vpop.f32.mrb[141].mxu1  ;;  %v10688_v43 = vpack.c.bf16 %v5083_v51, %v5070_v63  ;;  %v4960_v63 = vld [vmem:[%s18639_s4 + $0x348] sm:$0xff]  ;;  %v4973_v51 = vld [vmem:[%s18639_s4 + $0x3b0] sm:$0xff] }
 0x3d4   :  { %v9373_v5 = vadd.f32 %v9372_v40, %v9371_v28  ;;  %v5122_v40 = vld [vmem:[%s18639_s4 + $0x858] sm:$0xff] }
 0x3d5   :  { %10689 = vmatprep.subr.bf16.mxu0 %v10688_v43 }
 0x3d6   :  { %v14630_v2 = vadd.f32 %v9373_v5, %v14560_v19  ;;  %v9374_v50 = vpop.f32.mrb[142].mxu1  ;;  %v5135_v5 = vld [vmem:[%s18639_s4 + $0x8c0] sm:$0xff] }
 0x3d7   :  { %v9375_v27 = vpop.f32.mrb[143].mxu1 }
 0x3d8   :  { %v9376_v37 = vadd.f32 %v9375_v27, %v9374_v50  ;;  %v4946_v27 = vld [vmem:[%s18639_s4 + $0x2d8] sm:$0xff] }
 0x3da   :  { %v14632_v9 = vadd.f32 %v9376_v37, %v4372_v24  ;;  %v5069_v24 = vld [vmem:[%s18639_s4 + $0x6b0] sm:$0xff]  ;;  %v10696_v37 = vpack.c.bf16 %v5135_v5, %v5122_v40 }
 0x3db   :  { %v10690_v17 = vpack.c.bf16 %v5082_v20, %v5069_v24  ;;  %v10456_v20 = vpack.c.bf16 %v4973_v51, %v4960_v63 }
 0x3dd   :  { %10691 = vmatpush1.bf16.msra.mxu0 %v10690_v17  ;;  %v4999_v17 = vld [vmem:[%s18639_s4 + $0x480] sm:$0xff] }
 0x3de   :  { %10693 = vmatprep.subr.bf16.mxu0 %v10692_v44 }
 0x3e1   :  { %10695 = vmatpush1.bf16.msra.mxu0 %v10694_v3 }
 0x3e2   :  { %10697 = vmatprep.subr.bf16.mxu0 %v10696_v37 }
 0x3f6   :  { %v9409_v7 = vpop.f32.mrb[144].mxu1 }
 0x3f7   :  { %v9410_v49 = vpop.f32.mrb[145].mxu1 }
 0x3f8   :  { %v9411_v0 = vadd.f32 %v9410_v49, %v9409_v7  ;;  %v5121_v7 = vld [vmem:[%s18639_s4 + $0x850] sm:$0xff]  ;;  %v5134_v49 = vld [vmem:[%s18639_s4 + $0x8b8] sm:$0xff] }
 0x3fa   :  { %v14640_v58 = vadd.f32 %v9411_v0, %v4442_v52  ;;  %v9412_v19 = vpop.f32.mrb[146].mxu1  ;;  %v4855_v52 = vld [vmem:[%s18639_s4] sm:$0xff]  ;;  %v10698_v0 = vpack.c.bf16 %v5134_v49, %v5121_v7 }
 0x3fb   :  { %v9413_v34 = vpop.f32.mrb[147].mxu1 }
 0x3fc   :  { %v9414_v32 = vadd.f32 %v9413_v34, %v9412_v19  ;;  %10699 = vmatpush1.bf16.msra.mxu0 %v10698_v0 }
 0x3fe   :  { %v14651_v38 = vadd.f32 %v9414_v32, %v4447_v35  ;;  %v9415_v56 = vpop.f32.mrb[148].mxu1  ;;  %v4868_v35 = vld [vmem:[%s18639_s4 + $0x68] sm:$0xff]  ;;  %v10454_v32 = vpack.c.bf16 %v4946_v27, %v4933_v13 }
 0x3ff   :  { %v9416_v15 = vpop.f32.mrb[149].mxu1  ;;  %v10442_v12 = vpack.c.bf16 %v4868_v35, %v4855_v52  ;;  %v4998_v52 = vld [vmem:[%s18639_s4 + $0x478] sm:$0xff] }
 0x400   :  { %v9417_v39 = vadd.f32 %v9416_v15, %v9415_v56  ;;  %v4972_v56 = vld [vmem:[%s18639_s4 + $0x3a8] sm:$0xff]  ;;  %v10462_v47 = vpack.c.bf16 %v4998_v52, %v4985_v25  ;;  %v5103_v25 = vld [vmem:[%s18639_s4 + $0x7c0] sm:$0xff] }
 0x401   :  { %10443 = vmatpush1.bf16.msra.mxu1 %v10442_v12  ;;  %v10458_v15 = vpack.c.bf16 %v4972_v56, %v4959_v14  ;;  %v5064_v56 = vld [vmem:[%s18639_s4 + $0x688] sm:$0xff] }
 0x402   :  { %v14690_v11 = vadd.f32 %v9417_v39, %v14603_v60  ;;  %v9418_v42 = vpop.f32.mrb[150].mxu1  ;;  %10445 = vmatprep.subr.bf16.mxu1 %v10444_v46  ;;  %v4920_v60 = vld [vmem:[%s18639_s4 + $0x208] sm:$0xff]  ;;  %v5025_v39 = vld [vmem:[%s18639_s4 + $0x550] sm:$0xff]  ;;  %v5011_v46 = vld [vmem:[%s18639_s4 + $0x4e0] sm:$0xff] }
 0x403   :  { %v9419_v55 = vpop.f32.mrb[151].mxu1  ;;  %v10450_v28 = vpack.c.bf16 %v4920_v60, %v4907_v61  ;;  %v5050_v61 = vld [vmem:[%s18639_s4 + $0x618] sm:$0xff] }
 0x404   :  { %v9420_v29 = vadd.f32 %v9419_v55, %v9418_v42  ;;  %v10466_v55 = vpack.c.bf16 %v5024_v1, %v5011_v46  ;;  %v5129_v46 = vld [vmem:[%s18639_s4 + $0x890] sm:$0xff]  ;;  %v5115_v1 = vld [vmem:[%s18639_s4 + $0x820] sm:$0xff] }
 0x405   :  { %10447 = vmatpush1.bf16.msra.mxu1 %v10446_v45 }
 0x406   :  { %v14708_v31 = vadd.f32 %v9420_v29, %v14606_v4  ;;  %v9421_v57 = vpop.f32.mrb[152].mxu1  ;;  %10449 = vmatprep.subr.bf16.mxu1 %v10448_v21  ;;  %v10452_v4 = vpack.c.bf16 %v4947_v30, %v4934_v33  ;;  %v5037_v21 = vld [vmem:[%s18639_s4 + $0x5b0] sm:$0xff] }
 0x407   :  { %v9422_v18 = vpop.f32.mrb[153].mxu1 }
 0x408   :  { %v9423_v50 = vadd.f32 %v9422_v18, %v9421_v57 }
 0x409   :  { %10451 = vmatpush1.bf16.msra.mxu1 %v10450_v28 }
 0x40a   :  { %v14735_v43 = vadd.f32 %v9423_v50, %v14609_v23  ;;  %v9424_v19 = vpop.f32.mrb[154].mxu1  ;;  %10453 = vmatprep.subr.bf16.mxu1 %v10452_v4  ;;  %v4986_v23 = vld [vmem:[%s18639_s4 + $0x418] sm:$0xff] }
 0x40b   :  { %v9425_v34 = vpop.f32.mrb[155].mxu1  ;;  %v10460_v6 = vpack.c.bf16 %v4999_v17, %v4986_v23 }
 0x40c   :  { %v9426_v24 = vadd.f32 %v9425_v34, %v9424_v19 }
 0x40d   :  { %10455 = vmatpush1.bf16.msra.mxu1 %v10454_v32 }
 0x40e   :  { %v14750_v8 = vadd.f32 %v9426_v24, %v14612_v54  ;;  %v9427_v41 = vpop.f32.mrb[156].mxu1  ;;  %10457 = vmatprep.subr.bf16.mxu1 %v10456_v20  ;;  %v5012_v54 = vld [vmem:[%s18639_s4 + $0x4e8] sm:$0xff] }
 0x40f   :  { %v9428_v10 = vpop.f32.mrb[157].mxu1  ;;  %v10464_v12 = vpack.c.bf16 %v5025_v39, %v5012_v54 }
 0x410   :  { %v9429_v44 = vadd.f32 %v9428_v10, %v9427_v41  ;;  %v5063_v41 = vld [vmem:[%s18639_s4 + $0x680] sm:$0xff] }
 0x411   :  { %10459 = vmatpush1.bf16.msra.mxu1 %v10458_v15 }
 0x412   :  { %v4582_v3 = vadd.f32 %v9429_v44, %v14627_v62  ;;  %v9430_v16 = vpop.f32.mrb[158].mxu1  ;;  %10461 = vmatprep.subr.bf16.mxu1 %v10460_v6  ;;  %v5051_v62 = vld [vmem:[%s18639_s4 + $0x620] sm:$0xff]  ;;  %v5090_v6 = vld [vmem:[%s18639_s4 + $0x758] sm:$0xff] }
 0x413   :  { %v9431_v35 = vpop.f32.mrb[159].mxu1  ;;  %v10468_v29 = vpack.c.bf16 %v5051_v62, %v5038_v53  ;;  %v10476_v39 = vpack.c.bf16 %v5103_v25, %v5090_v6  ;;  %v5128_v62 = vld [vmem:[%s18639_s4 + $0x888] sm:$0xff] }
 0x414   :  { %v9432_v36 = vadd.f32 %v9431_v35, %v9430_v16  ;;  %v5102_v16 = vld [vmem:[%s18639_s4 + $0x7b8] sm:$0xff] }
 0x415   :  { %10463 = vmatpush1.bf16.msra.mxu1 %v10462_v47 }
 0x416   :  { %v4587_v59 = vadd.f32 %v9432_v36, %v14630_v2  ;;  %v9433_v42 = vpop.f32.mrb[160].mxu1  ;;  %10465 = vmatprep.subr.bf16.mxu1 %v10464_v12  ;;  %v10470_v2 = vpack.c.bf16 %v5050_v61, %v5037_v21  ;;  %v5116_v12 = vld [vmem:[%s18639_s4 + $0x828] sm:$0xff]  ;;  %v5161_v61 = vld [vmem:[%s18639_s4 + $0x990] sm:$0xff] }
 0x417   :  { %v9434_v48 = vpop.f32.mrb[161].mxu1  ;;  %v10480_v53 = vpack.c.bf16 %v5129_v46, %v5116_v12  ;;  %v5148_v21 = vld [vmem:[%s18639_s4 + $0x928] sm:$0xff] }
 0x418   :  { %v9435_v45 = vadd.f32 %v9434_v48, %v9433_v42  ;;  %v5155_v42 = vld [vmem:[%s18639_s4 + $0x960] sm:$0xff] }
 0x419   :  { %10467 = vmatpush1.bf16.msra.mxu1 %v10466_v55 }
 0x41a   :  { %v14785_v60 = vadd.f32 %v9435_v45, %v14632_v9  ;;  %10469 = vmatprep.subr.bf16.mxu1 %v10468_v29  ;;  %v10482_v45 = vpack.c.bf16 %v5128_v62, %v5115_v1  ;;  %v5239_v1 = vld [vmem:[%s18639_s4 + $0xc00] sm:$0xff]  ;;  %v5232_v62 = vld [vmem:[%s18639_s4 + $0xbc8] sm:$0xff] }
 0x41d   :  { %10471 = vmatpush1.bf16.msra.mxu1 %v10470_v2  ;;  %v5141_v2 = vld [vmem:[%s18639_s4 + $0x8f0] sm:$0xff] }
 0x436   :  { %v9468_v33 = vpop.f32.mrb[162].mxu1 }
 0x437   :  { %v9469_v30 = vpop.f32.mrb[163].mxu1 }
 0x438   :  { %v9470_v57 = vadd.f32 %v9469_v30, %v9468_v33 }
 0x43a   :  { %v9471_v18 = vpop.f32.mrb[164].mxu1  ;;  %v4662_v28 = vadd.f32 %v9470_v57, %v14640_v58  ;;  %v10700_v57 = vpack.c.bf16 %v5161_v61, %v5148_v21  ;;  %v5238_v21 = vld [vmem:[%s18639_s4 + $0xbf8] sm:$0xff] }
 0x43b   :  { %v9472_v13 = vpop.f32.mrb[165].mxu1 }
 0x43c   :  { %v9473_v40 = vadd.f32 %v9472_v13, %v9471_v18  ;;  %v5147_v18 = vld [vmem:[%s18639_s4 + $0x920] sm:$0xff]  ;;  %v5160_v13 = vld [vmem:[%s18639_s4 + $0x988] sm:$0xff]  ;;  %10701 = vmatprep.subr.bf16.mxu0 %v10700_v57  ;;  %v5265_v57 = vld [vmem:[%s18639_s4 + $0xcd0] sm:$0xff] }
 0x43e   :  { %v9474_v5 = vpop.f32.mrb[166].mxu1  ;;  %v14789_v50 = vadd.f32 %v9473_v40, %v14651_v38  ;;  %v10702_v40 = vpack.c.bf16 %v5160_v13, %v5147_v18  ;;  %v5258_v18 = vld [vmem:[%s18639_s4 + $0xc98] sm:$0xff] }
 0x43f   :  { %v9475_v4 = vpop.f32.mrb[167].mxu1 }
 0x440   :  { %v9476_v27 = vadd.f32 %v9475_v4, %v9474_v5  ;;  %10703 = vmatpush1.bf16.msra.mxu0 %v10702_v40 }
 0x442   :  { %v9477_v9 = vpop.f32.mrb[168].mxu1  ;;  %v14792_v37 = vadd.f32 %v9476_v27, %v14690_v11 }
 0x443   :  { %v9478_v7 = vpop.f32.mrb[169].mxu1 }
 0x444   :  { %v9479_v49 = vadd.f32 %v9478_v7, %v9477_v9  ;;  %v5168_v9 = vld [vmem:[%s18639_s4 + $0x9c8] sm:$0xff]  ;;  %v5181_v7 = vld [vmem:[%s18639_s4 + $0xa30] sm:$0xff] }
 0x446   :  { %v9480_v63 = vpop.f32.mrb[170].mxu1  ;;  %v14795_v51 = vadd.f32 %v9479_v49, %v14708_v31  ;;  %v5077_v31 = vld [vmem:[%s18639_s4 + $0x6f0] sm:$0xff]  ;;  %v5174_v49 = vld [vmem:[%s18639_s4 + $0x9f8] sm:$0xff] }
 0x447   :  { %v9481_v0 = vpop.f32.mrb[171].mxu1 }
 0x448   :  { %v9482_v58 = vadd.f32 %v9481_v0, %v9480_v63  ;;  %v10488_v0 = vpack.c.bf16 %v5181_v7, %v5168_v9 }
 0x44a   :  { %v9483_v19 = vpop.f32.mrb[172].mxu1  ;;  %v14798_v34 = vadd.f32 %v9482_v58, %v14735_v43  ;;  %v10472_v43 = vpack.c.bf16 %v5077_v31, %v5064_v56  ;;  %v5167_v58 = vld [vmem:[%s18639_s4 + $0x9c0] sm:$0xff]  ;;  %v5186_v56 = vld [vmem:[%s18639_s4 + $0xa58] sm:$0xff] }
 0x44b   :  { %v9484_v38 = vpop.f32.mrb[173].mxu1 }
 0x44c   :  { %v9485_v32 = vadd.f32 %v9484_v38, %v9483_v19  ;;  %10473 = vmatprep.subr.bf16.mxu1 %v10472_v43  ;;  %v5180_v19 = vld [vmem:[%s18639_s4 + $0xa28] sm:$0xff] }
 0x44d   :  { %v5200_v43 = vld [vmem:[%s18639_s4 + $0xac8] sm:$0xff] }
 0x44e   :  { %v9486_v24 = vpop.f32.mrb[174].mxu1  ;;  %v14801_v20 = vadd.f32 %v9485_v32, %v14750_v8  ;;  %v5076_v8 = vld [vmem:[%s18639_s4 + $0x6e8] sm:$0xff] }
 0x44f   :  { %v9487_v11 = vpop.f32.mrb[175].mxu1  ;;  %v10474_v15 = vpack.c.bf16 %v5076_v8, %v5063_v41 }
 0x450   :  { %v9488_v14 = vadd.f32 %v9487_v11, %v9486_v24  ;;  %v10490_v11 = vpack.c.bf16 %v5180_v19, %v5167_v58  ;;  %v4879_v58 = vld [vmem:[%s18639_s4 + $0xc0] sm:$0xff] }
 0x451   :  { %10475 = vmatpush1.bf16.msra.mxu1 %v10474_v15  ;;  %v5193_v15 = vld [vmem:[%s18639_s4 + $0xa90] sm:$0xff] }
 0x452   :  { %v9489_v23 = vpop.f32.mrb[176].mxu1  ;;  %v14809_v17 = vadd.f32 %v9488_v14, %v4582_v3  ;;  %v5089_v3 = vld [vmem:[%s18639_s4 + $0x750] sm:$0xff]  ;;  %10477 = vmatprep.subr.bf16.mxu1 %v10476_v39 }
 0x453   :  { %v9490_v10 = vpop.f32.mrb[177].mxu1  ;;  %v10478_v47 = vpack.c.bf16 %v5102_v16, %v5089_v3  ;;  %v5173_v14 = vld [vmem:[%s18639_s4 + $0x9f0] sm:$0xff]  ;;  %v5199_v3 = vld [vmem:[%s18639_s4 + $0xac0] sm:$0xff]  ;;  %v5212_v16 = vld [vmem:[%s18639_s4 + $0xb28] sm:$0xff] }
 0x454   :  { %v9491_v44 = vadd.f32 %v9490_v10, %v9489_v23  ;;  %v10706_v31 = vpack.c.bf16 %v5186_v56, %v5173_v14  ;;  %v5207_v23 = vld [vmem:[%s18639_s4 + $0xb00] sm:$0xff]  ;;  %v5213_v10 = vld [vmem:[%s18639_s4 + $0xb30] sm:$0xff] }
 0x455   :  { %10479 = vmatpush1.bf16.msra.mxu1 %v10478_v47  ;;  %v5220_v47 = vld [vmem:[%s18639_s4 + $0xb68] sm:$0xff] }
 0x456   :  { %v9492_v52 = vpop.f32.mrb[178].mxu1  ;;  %v14823_v54 = vadd.f32 %v9491_v44, %v4587_v59  ;;  %v5142_v59 = vld [vmem:[%s18639_s4 + $0x8f8] sm:$0xff]  ;;  %10481 = vmatprep.subr.bf16.mxu1 %v10480_v53  ;;  %v5219_v53 = vld [vmem:[%s18639_s4 + $0xb60] sm:$0xff] }
 0x457   :  { %v9493_v35 = vpop.f32.mrb[179].mxu1  ;;  %v10484_v29 = vpack.c.bf16 %v5155_v42, %v5142_v59  ;;  %v5206_v44 = vld [vmem:[%s18639_s4 + $0xaf8] sm:$0xff] }
 0x458   :  { %v9494_v36 = vadd.f32 %v9493_v35, %v9492_v52  ;;  %v10708_v52 = vpack.c.bf16 %v5213_v10, %v5200_v43  ;;  %v10494_v39 = vpack.c.bf16 %v5206_v44, %v5193_v15  ;;  %v10710_v35 = vpack.c.bf16 %v5212_v16, %v5199_v3  ;;  %v5284_v10 = vld [vmem:[%s18639_s4 + $0xd68] sm:$0xff]  ;;  %v4865_v15 = vld [vmem:[%s18639_s4 + $0x50] sm:$0xff]  ;;  %v4878_v44 = vld [vmem:[%s18639_s4 + $0xb8] sm:$0xff] }
 0x459   :  { %10483 = vmatpush1.bf16.msra.mxu1 %v10482_v45  ;;  %v10498_v45 = vpack.c.bf16 %v5232_v62, %v5219_v53  ;;  %v5297_v3 = vld [vmem:[%s18639_s4 + $0xdd0] sm:$0xff]  ;;  %v4858_v53 = vld [vmem:[%s18639_s4 + $0x18] sm:$0xff] }
 0x45a   :  { %v4771_v48 = vpop.f32.mrb[180].mxu1  ;;  %v14850_v55 = vadd.f32 %v9494_v36, %v14785_v60  ;;  %v5154_v60 = vld [vmem:[%s18639_s4 + $0x958] sm:$0xff]  ;;  %10485 = vmatprep.subr.bf16.mxu1 %v10484_v29  ;;  %v5225_v29 = vld [vmem:[%s18639_s4 + $0xb90] sm:$0xff] }
 0x45b   :  { %v4772_v33 = vadd.f32 %v4771_v48, %v4662_v28  ;;  %v10066_v30 = vpop.f32.mrb[181].mxu1  ;;  %v10486_v28 = vpack.c.bf16 %v5154_v60, %v5141_v2  ;;  %v5226_v36 = vld [vmem:[%s18639_s4 + $0xb98] sm:$0xff]  ;;  %v10714_v61 = vpack.c.bf16 %v5238_v21, %v5225_v29  ;;  %v5245_v60 = vld [vmem:[%s18639_s4 + $0xc30] sm:$0xff] }
 0x45c   :  { %v10712_v48 = vpack.c.bf16 %v5239_v1, %v5226_v36  ;;  %v5246_v2 = vld [vmem:[%s18639_s4 + $0xc38] sm:$0xff]  ;;  %v4904_v36 = vld [vmem:[%s18639_s4 + $0x188] sm:$0xff]  ;;  %v4857_v21 = vld [vmem:[%s18639_s4 + $0x10] sm:$0xff] }
 0x45d   :  { %4816 = vst.msk [vmem:[#allocation2] sm:$0xff] %vm4815_vm6, %v4772_v33  ;;  %10487 = vmatpush1.bf16.msra.mxu1 %v10486_v28  ;;  %v5252_v33 = vld [vmem:[%s18639_s4 + $0xc68] sm:$0xff]  ;;  %v10502_v28 = vpack.c.bf16 %v5258_v18, %v5245_v60  ;;  %v4897_v60 = vld [vmem:[%s18639_s4 + $0x150] sm:$0xff] }
 0x45e   :  { %v4776_v5 = vpop.f32.mrb[182].mxu1  ;;  %10489 = vmatprep.subr.bf16.mxu1 %v10488_v0  ;;  %v10716_v40 = vpack.c.bf16 %v5265_v57, %v5252_v33  ;;  %v4866_v0 = vld [vmem:[%s18639_s4 + $0x58] sm:$0xff]  ;;  %v4917_v33 = vld [vmem:[%s18639_s4 + $0x1f0] sm:$0xff]  ;;  %v4884_v57 = vld [vmem:[%s18639_s4 + $0xe8] sm:$0xff] }
 0x45f   :  { %v4777_v4 = vadd.f32 %v4776_v5, %v14789_v50  ;;  %v10069_v27 = vpop.f32.mrb[183].mxu1  ;;  %v5187_v50 = vld [vmem:[%s18639_s4 + $0xa60] sm:$0xff]  ;;  %v4944_v18 = vld [vmem:[%s18639_s4 + $0x2c8] sm:$0xff] }
 0x460   :  { %v10704_v24 = vpack.c.bf16 %v5187_v50, %v5174_v49  ;;  %v5251_v5 = vld [vmem:[%s18639_s4 + $0xc60] sm:$0xff]  ;;  %v5272_v49 = vld [vmem:[%s18639_s4 + $0xd08] sm:$0xff] }
 0x461   :  { %4818 = vrot.lane.b32.xlu0 %v4777_v4, %s11781_s2  ;;  %10491 = vmatpush1.bf16.msra.mxu1 %v10490_v11  ;;  %v5264_v4 = vld [vmem:[%s18639_s4 + $0xcc8] sm:$0xff] }
 0x462   :  { %v4781_v63 = vpop.f32.mrb[184].mxu1  ;;  %10705 = vmatprep.subr.bf16.mxu0 %v10704_v24  ;;  %v10718_v7 = vpack.c.bf16 %v5264_v4, %v5251_v5  ;;  %v4883_v5 = vld [vmem:[%s18639_s4 + $0xe0] sm:$0xff]  ;;  %v4896_v4 = vld [vmem:[%s18639_s4 + $0x148] sm:$0xff] }
 0x463   :  { %v4782_v38 = vadd.f32 %v4781_v63, %v14792_v37  ;;  %v10072_v32 = vpop.f32.mrb[185].mxu1  ;;  %v5194_v37 = vld [vmem:[%s18639_s4 + $0xa98] sm:$0xff]  ;;  %10707 = vmatpush1.bf16.msra.mxu0 %v10706_v31  ;;  %v5285_v63 = vld [vmem:[%s18639_s4 + $0xd70] sm:$0xff] }
 0x464   :  { %v10492_v8 = vpack.c.bf16 %v5207_v23, %v5194_v37  ;;  %10709 = vmatprep.subr.bf16.mxu0 %v10708_v52  ;;  %v10800_v32 = vpack.c.bf16 %v4879_v58, %v4866_v0  ;;  %v4892_v52 = vld [vmem:[%s18639_s4 + $0x128] sm:$0xff]  ;;  %v4983_v58 = vld [vmem:[%s18639_s4 + $0x400] sm:$0xff] }
 0x465   :  { %4824 = vrot.lane.b32.xlu1 %v4782_v38, %s11782_s11 }
 0x466   :  { %v4786_v41 = vpop.f32.mrb[186].mxu1  ;;  %10493 = vmatprep.subr.bf16.mxu1 %v10492_v8 }
 0x467   :  { %v14918_v6 = vadd.f32 %v4786_v41, %v14795_v51  ;;  %v10075_v25 = vpop.f32.mrb[187].mxu1  ;;  %v5233_v51 = vld [vmem:[%s18639_s4 + $0xbd0] sm:$0xff]  ;;  %10495 = vmatpush1.bf16.msra.mxu1 %v10494_v39  ;;  %10711 = vmatpush1.bf16.msra.mxu0 %v10710_v35  ;;  %v10802_v35 = vpack.c.bf16 %v4878_v44, %v4865_v15  ;;  %v4995_v44 = vld [vmem:[%s18639_s4 + $0x460] sm:$0xff] }
 0x468   :  { %v10496_v46 = vpack.c.bf16 %v5233_v51, %v5220_v47  ;;  %10713 = vmatprep.subr.bf16.mxu0 %v10712_v48  ;;  %v5311_v25 = vld [vmem:[%s18639_s4 + $0xe40] sm:$0xff]  ;;  %v4905_v39 = vld [vmem:[%s18639_s4 + $0x190] sm:$0xff]  ;;  %v5310_v47 = vld [vmem:[%s18639_s4 + $0xe38] sm:$0xff] }
 0x469   :  { %v4891_v51 = vld [vmem:[%s18639_s4 + $0x120] sm:$0xff]  ;;  %v10804_v62 = vpack.c.bf16 %v4905_v39, %v4892_v52  ;;  %v5022_v39 = vld [vmem:[%s18639_s4 + $0x538] sm:$0xff] }
 0x46a   :  { %v4791_v12 = vpop.f32.mrb[188].mxu1  ;;  %10497 = vmatprep.subr.bf16.mxu1 %v10496_v46  ;;  %v4931_v48 = vld [vmem:[%s18639_s4 + $0x260] sm:$0xff]  ;;  %v10806_v29 = vpack.c.bf16 %v4904_v36, %v4891_v51  ;;  %v4974_v51 = vld [vmem:[%s18639_s4 + $0x3b8] sm:$0xff] }
 0x46b   :  { %v4792_v59 = vadd.f32 %v4791_v12, %v14798_v34  ;;  %v10078_v42 = vpop.f32.mrb[189].mxu1  ;;  %v5259_v34 = vld [vmem:[%s18639_s4 + $0xca0] sm:$0xff]  ;;  %10499 = vmatpush1.bf16.msra.mxu1 %v10498_v45  ;;  %10715 = vmatpush1.bf16.msra.mxu0 %v10714_v61  ;;  %v10510_v45 = vpack.c.bf16 %v5310_v47, %v5297_v3  ;;  %v4961_v47 = vld [vmem:[%s18639_s4 + $0x350] sm:$0xff] }
 0x46c   :  { %v10500_v30 = vpack.c.bf16 %v5259_v34, %v5246_v2  ;;  %10717 = vmatprep.subr.bf16.mxu0 %v10716_v40  ;;  %v4918_v42 = vld [vmem:[%s18639_s4 + $0x1f8] sm:$0xff]  ;;  %v4975_v52 = vld [vmem:[%s18639_s4 + $0x3c0] sm:$0xff] }
 0x46d   :  { %4835 = vst.msk [vmem:[#allocation2 + $0x8] sm:$0xff] %vm4815_vm6, %v4792_v59  ;;  %v4871_v59 = vld [vmem:[%s18639_s4 + $0x80] sm:$0xff]  ;;  %v10808_v2 = vpack.c.bf16 %v4931_v48, %v4918_v42  ;;  %v4870_v34 = vld [vmem:[%s18639_s4 + $0x78] sm:$0xff]  ;;  %v5001_v42 = vld [vmem:[%s18639_s4 + $0x490] sm:$0xff] }
 0x46e   :  { %v4796_v13 = vpop.f32.mrb[190].mxu1  ;;  %10501 = vmatprep.subr.bf16.mxu1 %v10500_v30  ;;  %v10512_v61 = vpack.c.bf16 %v4871_v59, %v4858_v53  ;;  %v4930_v30 = vld [vmem:[%s18639_s4 + $0x258] sm:$0xff]  ;;  %v10514_v40 = vpack.c.bf16 %v4870_v34, %v4857_v21  ;;  %v5035_v3 = vld [vmem:[%s18639_s4 + $0x5a0] sm:$0xff]  ;;  %v5021_v53 = vld [vmem:[%s18639_s4 + $0x530] sm:$0xff] }
 0x46f   :  { %v4797_v27 = vadd.f32 %v4796_v13, %v14801_v20  ;;  %v10081_v9 = vpop.f32.mrb[191].mxu1  ;;  %10503 = vmatpush1.bf16.msra.mxu1 %v10502_v28  ;;  %10719 = vmatpush1.bf16.msra.mxu0 %v10718_v7  ;;  %v10504_v20 = vpack.c.bf16 %v5285_v63, %v5272_v49  ;;  %v4957_v13 = vld [vmem:[%s18639_s4 + $0x330] sm:$0xff]  ;;  %v10810_v28 = vpack.c.bf16 %v4930_v30, %v4917_v33  ;;  %v4956_v7 = vld [vmem:[%s18639_s4 + $0x328] sm:$0xff]  ;;  %v4910_v49 = vld [vmem:[%s18639_s4 + $0x1b8] sm:$0xff] }
 0x470   :  { %10801 = vmatprep.subr.bf16.mxu0 %v10800_v32  ;;  %v10516_v9 = vpack.c.bf16 %v4897_v60, %v4884_v57  ;;  %v4923_v63 = vld [vmem:[%s18639_s4 + $0x220] sm:$0xff]  ;;  %v4909_v32 = vld [vmem:[%s18639_s4 + $0x1b0] sm:$0xff]  ;;  %v4988_v59 = vld [vmem:[%s18639_s4 + $0x428] sm:$0xff] }
 0x471   :  { %4837 = vrot.lane.b32.xlu0 %v4797_v27, %s11781_s2  ;;  %10505 = vmatprep.subr.bf16.mxu1 %v10504_v20  ;;  %s11783_s2 = smov 96   ;;  %v4943_v27 = vld [vmem:[%s18639_s4 + $0x2c0] sm:$0xff]  ;;  %v4970_v20 = vld [vmem:[%s18639_s4 + $0x398] sm:$0xff]  ;;  %v5048_v48 = vld [vmem:[%s18639_s4 + $0x608] sm:$0xff]  ;;  %v10532_v34 = vpack.c.bf16 %v5001_v42, %v4988_v59 }
 0x472   :  { %v4801_v50 = vpop.f32.mrb[192].mxu1  ;;  %v5047_v30 = vld [vmem:[%s18639_s4 + $0x600] sm:$0xff]  ;;  %v5060_v57 = vld [vmem:[%s18639_s4 + $0x668] sm:$0xff]  ;;  %v5014_v60 = vld [vmem:[%s18639_s4 + $0x4f8] sm:$0xff] }
 0x473   :  { %v4802_v19 = vadd.f32 %v4801_v50, %v14809_v17  ;;  %v10084_v38 = vpop.f32.mrb[193].mxu1  ;;  %v10812_v50 = vpack.c.bf16 %v4957_v13, %v4944_v18  ;;  %v5027_v18 = vld [vmem:[%s18639_s4 + $0x560] sm:$0xff]  ;;  %v5074_v13 = vld [vmem:[%s18639_s4 + $0x6d8] sm:$0xff]  ;;  %v5164_v59 = vld [vmem:[%s18639_s4 + $0x9a8] sm:$0xff] }
 0x474   :  { %v10814_v38 = vpack.c.bf16 %v4956_v7, %v4943_v27  ;;  %v5026_v27 = vld [vmem:[%s18639_s4 + $0x558] sm:$0xff] }
 0x475   :  { %4842 = vrot.lane.b32.xlu1 %v4802_v19, %s11782_s11  ;;  %v10518_v19 = vpack.c.bf16 %v4896_v4, %v4883_v5  ;;  %v10830_v5 = vpack.c.bf16 %v5060_v57, %v5047_v30  ;;  %v5013_v4 = vld [vmem:[%s18639_s4 + $0x4f0] sm:$0xff]  ;;  %v5118_v42 = vld [vmem:[%s18639_s4 + $0x838] sm:$0xff] }
 0x476   :  { %v4806_v24 = vpop.f32.mrb[194].mxu1  ;;  %v5177_v57 = vld [vmem:[%s18639_s4 + $0xa10] sm:$0xff] }
 0x477   :  { %v4807_v11 = vadd.f32 %v4806_v24, %v14823_v54  ;;  %v10087_v14 = vpop.f32.mrb[195].mxu1  ;;  %v4922_v24 = vld [vmem:[%s18639_s4 + $0x218] sm:$0xff] }
 0x478   :  { %v10816_v14 = vpack.c.bf16 %v4983_v58, %v4970_v20  ;;  %v5053_v20 = vld [vmem:[%s18639_s4 + $0x630] sm:$0xff]  ;;  %v5100_v58 = vld [vmem:[%s18639_s4 + $0x7a8] sm:$0xff] }
 0x479   :  { %4830 = vrot.lane.b32.xlu1 %v14918_v6, %s11783_s2  ;;  %4847 = vrot.lane.b32.xlu0 %v4807_v11, %s11783_s2  ;;  %v5298_v6 = vld [vmem:[%s18639_s4 + $0xdd8] sm:$0xff]  ;;  %v10520_v11 = vpack.c.bf16 %v4923_v63, %v4910_v49  ;;  %v5073_v49 = vld [vmem:[%s18639_s4 + $0x6d0] sm:$0xff] }
 0x47a   :  { %v4811_v56 = vpop.f32.mrb[196].mxu1  ;;  %v10508_v1 = vpack.c.bf16 %v5311_v25, %v5298_v6  ;;  %v5008_v6 = vld [vmem:[%s18639_s4 + $0x4c8] sm:$0xff]  ;;  %v4962_v25 = vld [vmem:[%s18639_s4 + $0x358] sm:$0xff] }
 0x47b   :  { %v4812_v31 = vadd.f32 %v4811_v56, %v14850_v55  ;;  %v10090_v37 = vpop.f32.mrb[197].mxu1  ;;  %v5271_v55 = vld [vmem:[%s18639_s4 + $0xd00] sm:$0xff]  ;;  %v4969_v56 = vld [vmem:[%s18639_s4 + $0x390] sm:$0xff]  ;;  %v10528_v36 = vpack.c.bf16 %v4975_v52, %v4962_v25  ;;  %v5086_v63 = vld [vmem:[%s18639_s4 + $0x738] sm:$0xff] }
 0x47c   :  { %v10506_v16 = vpack.c.bf16 %v5284_v10, %v5271_v55  ;;  %v4936_v37 = vld [vmem:[%s18639_s4 + $0x288] sm:$0xff]  ;;  %v5138_v25 = vld [vmem:[%s18639_s4 + $0x8d8] sm:$0xff] }
 0x47d   :  { %4851 = vst.msk [vmem:[#allocation2 + $0x10] sm:$0xff] %vm4815_vm6, %v4812_v31  ;;  %v4982_v31 = vld [vmem:[%s18639_s4 + $0x3f8] sm:$0xff]  ;;  %v4948_v55 = vld [vmem:[%s18639_s4 + $0x2e8] sm:$0xff] }
 0x47e   :  { %v5092_v52 = vld [vmem:[%s18639_s4 + $0x768] sm:$0xff] }
 0x484   :  { %v15096_v0 = vld [vmem:[#allocation2 + $0x10] sm:$0xff] }
 0x4d3   :  { %v4819_v17 = vpop.permute.xlu0 %4818 }
 0x4d4   :  { %4822 = vst.msk [vmem:[#allocation2] sm:$0xff] %vm4821_vm7, %v4819_v17  ;;  %v4949_v17 = vld [vmem:[%s18639_s4 + $0x2f0] sm:$0xff] }
 0x4d5   :  { %v10524_v10 = vpack.c.bf16 %v4949_v17, %v4936_v37  ;;  %v5112_v37 = vld [vmem:[%s18639_s4 + $0x808] sm:$0xff]  ;;  %v5066_v17 = vld [vmem:[%s18639_s4 + $0x698] sm:$0xff] }
 0x4d7   :  { %v4825_v23 = vpop.permute.xlu1 %4824 }
 0x4d8   :  { %4828 = vst.msk [vmem:[#allocation2] sm:$0xff] %vm4827_vm8, %v4825_v23  ;;  %v4996_v23 = vld [vmem:[%s18639_s4 + $0x468] sm:$0xff] }
 0x4e3   :  { %v4838_v43 = vpop.permute.xlu0 %4837 }
 0x4e4   :  { %4840 = vst.msk [vmem:[#allocation2 + $0x8] sm:$0xff] %vm4821_vm7, %v4838_v43  ;;  %v5009_v43 = vld [vmem:[%s18639_s4 + $0x4d0] sm:$0xff] }
 0x4e5   :  { %v10820_v15 = vpack.c.bf16 %v5009_v43, %v4996_v23  ;;  %v5079_v23 = vld [vmem:[%s18639_s4 + $0x700] sm:$0xff]  ;;  %v5126_v43 = vld [vmem:[%s18639_s4 + $0x878] sm:$0xff] }
 0x4e7   :  { %v4843_v54 = vpop.permute.xlu1 %4842 }
 0x4e8   :  { %4845 = vst.msk [vmem:[#allocation2 + $0x8] sm:$0xff] %vm4827_vm8, %v4843_v54  ;;  %v10522_v54 = vpack.c.bf16 %v4922_v24, %v4909_v32  ;;  %v10834_v32 = vpack.c.bf16 %v5086_v63, %v5073_v49  ;;  %v5039_v24 = vld [vmem:[%s18639_s4 + $0x5c0] sm:$0xff] }
 0x4e9   :  { %v5203_v63 = vld [vmem:[%s18639_s4 + $0xae0] sm:$0xff] }
 0x4eb   :  { %v4831_v41 = vpop.permute.xlu1 %4830  ;;  %v4848_v8 = vpop.permute.xlu0 %4847 }
 0x4ec   :  { %4834 = vst.msk [vmem:[#allocation2] sm:$0xff] %vm4833_vm9, %v4831_v41  ;;  %4850 = vst.msk [vmem:[#allocation2 + $0x8] sm:$0xff] %vm4833_vm9, %v4848_v8  ;;  %v10818_v41 = vpack.c.bf16 %v4982_v31, %v4969_v56  ;;  %v4935_v8 = vld [vmem:[%s18639_s4 + $0x280] sm:$0xff] }
 0x4ed   :  { %v5099_v31 = vld [vmem:[%s18639_s4 + $0x7a0] sm:$0xff] }
 0x4f3   :  { %v15032_v12 = vld [vmem:[#allocation2 + $0x8] sm:$0xff]  ;;  %v15034_v46 = vld [vmem:[#allocation2] sm:$0xff] }
 0x4f4   :  { %5459 = vmatprep.mubr.f32.mxu1 %v15032_v12  ;;  %5885 = vmatprep.mubr.f32.mxu0 %v15032_v12 }
 0x4f5   :  { %5460 = vmatmul.mubr.f32.vlgmr.msra.gmra.mrb[198].mxu1 %v15034_v46  ;;  %5886 = vmatmul.mubr.f32.vlgmr.msra.gmra.mrb[72].mxu0 %v15034_v46 }
 0x4f6   :  { %10507 = vmatpush1.bf16.msra.mxu1 %v10506_v16  ;;  %10803 = vmatpush1.bf16.msra.mxu0 %v10802_v35  ;;  %v10526_v16 = vpack.c.bf16 %v4948_v55, %v4935_v8  ;;  %v10822_v35 = vpack.c.bf16 %v5008_v6, %v4995_v44  ;;  %v10838_v8 = vpack.c.bf16 %v5112_v37, %v5099_v31  ;;  %v5065_v55 = vld [vmem:[%s18639_s4 + $0x690] sm:$0xff] }
 0x4f7   :  { %6169 = vmatprep.mubr.f32.mxu0 %v15032_v12  ;;  %10509 = vmatprep.subr.bf16.mxu1 %v10508_v1  ;;  %v10824_v1 = vpack.c.bf16 %v5035_v3, %v5022_v39  ;;  %v5125_v6 = vld [vmem:[%s18639_s4 + $0x870] sm:$0xff]  ;;  %v5152_v3 = vld [vmem:[%s18639_s4 + $0x948] sm:$0xff] }
 0x4f8   :  { %10805 = vmatprep.subr.bf16.mxu0 %v10804_v62  ;;  %5530 = vmatprep.mubr.f32.mxu1 %v11780_v26  ;;  %v5034_v62 = vld [vmem:[%s18639_s4 + $0x598] sm:$0xff]  ;;  %v5105_v39 = vld [vmem:[%s18639_s4 + $0x7d0] sm:$0xff] }
 0x4f9   :  { %v10826_v21 = vpack.c.bf16 %v5034_v62, %v5021_v53  ;;  %v5151_v62 = vld [vmem:[%s18639_s4 + $0x940] sm:$0xff]  ;;  %v5229_v37 = vld [vmem:[%s18639_s4 + $0xbb0] sm:$0xff] }
 0x4fa   :  { %10511 = vmatpush1.bf16.msra.mxu1 %v10510_v45  ;;  %10807 = vmatpush1.bf16.msra.mxu0 %v10806_v29  ;;  %v5061_v45 = vld [vmem:[%s18639_s4 + $0x670] sm:$0xff]  ;;  %v10530_v29 = vpack.c.bf16 %v4974_v51, %v4961_v47  ;;  %v10842_v47 = vpack.c.bf16 %v5138_v25, %v5125_v6  ;;  %v5091_v51 = vld [vmem:[%s18639_s4 + $0x760] sm:$0xff] }
 0x4fb   :  { %10513 = vmatprep.subr.bf16.mxu1 %v10512_v61  ;;  %10809 = vmatprep.subr.bf16.mxu0 %v10808_v2  ;;  %v4987_v61 = vld [vmem:[%s18639_s4 + $0x420] sm:$0xff]  ;;  %v5000_v2 = vld [vmem:[%s18639_s4 + $0x488] sm:$0xff]  ;;  %v10828_v33 = vpack.c.bf16 %v5061_v45, %v5048_v48  ;;  %v5178_v45 = vld [vmem:[%s18639_s4 + $0xa18] sm:$0xff] }
 0x4fc   :  { %v5131_v48 = vld [vmem:[%s18639_s4 + $0x8a0] sm:$0xff] }
 0x4fd   :  { %8566 = vmatmul.mubr.msk.f32.vlgmr.msra.gmra.mrb[198].mxu1 %vm4815_vm6, %v15096_v0  ;;  %v5255_v25 = vld [vmem:[%s18639_s4 + $0xc80] sm:$0xff] }
 0x4fe   :  { %10515 = vmatpush1.bf16.msra.mxu1 %v10514_v40  ;;  %10811 = vmatpush1.bf16.msra.mxu0 %v10810_v28  ;;  %v5087_v40 = vld [vmem:[%s18639_s4 + $0x740] sm:$0xff]  ;;  %v10534_v28 = vpack.c.bf16 %v5000_v2, %v4987_v61  ;;  %v10846_v61 = vpack.c.bf16 %v5164_v59, %v5151_v62  ;;  %v5117_v2 = vld [vmem:[%s18639_s4 + $0x830] sm:$0xff] }
 0x4ff   :  { %5601 = vmatprep.mubr.f32.mxu1 %v15032_v12  ;;  %10517 = vmatprep.subr.bf16.mxu1 %v10516_v9  ;;  %v10536_v9 = vpack.c.bf16 %v5027_v18, %v5014_v60  ;;  %v10832_v7 = vpack.c.bf16 %v5087_v40, %v5074_v13  ;;  %v5190_v60 = vld [vmem:[%s18639_s4 + $0xa78] sm:$0xff]  ;;  %v5144_v18 = vld [vmem:[%s18639_s4 + $0x908] sm:$0xff]  ;;  %v5157_v13 = vld [vmem:[%s18639_s4 + $0x970] sm:$0xff] }
 0x500   :  { %10813 = vmatprep.subr.bf16.mxu0 %v10812_v50  ;;  %v5040_v50 = vld [vmem:[%s18639_s4 + $0x5c8] sm:$0xff]  ;;  %v5281_v59 = vld [vmem:[%s18639_s4 + $0xd50] sm:$0xff] }
 0x501   :  { %v5204_v40 = vld [vmem:[%s18639_s4 + $0xae8] sm:$0xff] }
 0x502   :  { %10519 = vmatpush1.bf16.msra.mxu1 %v10518_v19  ;;  %10815 = vmatpush1.bf16.msra.mxu0 %v10814_v38  ;;  %v5113_v19 = vld [vmem:[%s18639_s4 + $0x810] sm:$0xff]  ;;  %v10538_v38 = vpack.c.bf16 %v5026_v27, %v5013_v4  ;;  %v10850_v4 = vpack.c.bf16 %v5190_v60, %v5177_v57  ;;  %v5143_v27 = vld [vmem:[%s18639_s4 + $0x900] sm:$0xff] }
 0x503   :  { %10521 = vmatprep.subr.bf16.mxu1 %v10520_v11  ;;  %10817 = vmatprep.subr.bf16.mxu0 %v10816_v14  ;;  %v5052_v11 = vld [vmem:[%s18639_s4 + $0x628] sm:$0xff]  ;;  %v10540_v14 = vpack.c.bf16 %v5053_v20, %v5040_v50  ;;  %v10836_v56 = vpack.c.bf16 %v5113_v19, %v5100_v58  ;;  %v5170_v20 = vld [vmem:[%s18639_s4 + $0x9d8] sm:$0xff]  ;;  %v5183_v58 = vld [vmem:[%s18639_s4 + $0xa40] sm:$0xff] }
 0x504   :  { %v5216_v50 = vld [vmem:[%s18639_s4 + $0xb48] sm:$0xff]  ;;  %v5230_v19 = vld [vmem:[%s18639_s4 + $0xbb8] sm:$0xff]  ;;  %v5307_v60 = vld [vmem:[%s18639_s4 + $0xe20] sm:$0xff] }
 0x506   :  { %10523 = vmatpush1.bf16.msra.mxu1 %v10522_v54  ;;  %10819 = vmatpush1.bf16.msra.mxu0 %v10818_v41  ;;  %v5139_v54 = vld [vmem:[%s18639_s4 + $0x8e0] sm:$0xff]  ;;  %v10542_v41 = vpack.c.bf16 %v5052_v11, %v5039_v24  ;;  %v10854_v24 = vpack.c.bf16 %v5216_v50, %v5203_v63  ;;  %v5169_v11 = vld [vmem:[%s18639_s4 + $0x9d0] sm:$0xff]  ;;  %v5300_v63 = vld [vmem:[%s18639_s4 + $0xde8] sm:$0xff] }
 0x507   :  { %10525 = vmatprep.subr.bf16.mxu1 %v10524_v10  ;;  %10821 = vmatprep.subr.bf16.mxu0 %v10820_v15  ;;  %v5078_v10 = vld [vmem:[%s18639_s4 + $0x6f8] sm:$0xff]  ;;  %v10544_v15 = vpack.c.bf16 %v5079_v23, %v5066_v17  ;;  %v10840_v44 = vpack.c.bf16 %v5139_v54, %v5126_v43  ;;  %v5196_v23 = vld [vmem:[%s18639_s4 + $0xaa8] sm:$0xff]  ;;  %v5209_v43 = vld [vmem:[%s18639_s4 + $0xb10] sm:$0xff] }
 0x508   :  { %v5242_v17 = vld [vmem:[%s18639_s4 + $0xc18] sm:$0xff]  ;;  %v5256_v54 = vld [vmem:[%s18639_s4 + $0xc88] sm:$0xff] }
 0x50a   :  { %10527 = vmatpush1.bf16.msra.mxu1 %v10526_v16  ;;  %10823 = vmatpush1.bf16.msra.mxu0 %v10822_v35  ;;  %v5165_v16 = vld [vmem:[%s18639_s4 + $0x9b0] sm:$0xff]  ;;  %v10546_v35 = vpack.c.bf16 %v5078_v10, %v5065_v55  ;;  %v10858_v55 = vpack.c.bf16 %v5242_v17, %v5229_v37  ;;  %v5195_v10 = vld [vmem:[%s18639_s4 + $0xaa0] sm:$0xff] }
 0x50b   :  { %10529 = vmatprep.subr.bf16.mxu1 %v10528_v36  ;;  %10825 = vmatprep.subr.bf16.mxu0 %v10824_v1  ;;  %v5104_v36 = vld [vmem:[%s18639_s4 + $0x7c8] sm:$0xff]  ;;  %v10548_v1 = vpack.c.bf16 %v5105_v39, %v5092_v52  ;;  %v10844_v53 = vpack.c.bf16 %v5165_v16, %v5152_v3  ;;  %v5222_v39 = vld [vmem:[%s18639_s4 + $0xb78] sm:$0xff]  ;;  %v5235_v3 = vld [vmem:[%s18639_s4 + $0xbe0] sm:$0xff] }
 0x50c   :  { %v5268_v52 = vld [vmem:[%s18639_s4 + $0xce8] sm:$0xff]  ;;  %v5282_v16 = vld [vmem:[%s18639_s4 + $0xd58] sm:$0xff]  ;;  %v4873_v17 = vld [vmem:[%s18639_s4 + $0x90] sm:$0xff] }
 0x50e   :  { %10531 = vmatpush1.bf16.msra.mxu1 %v10530_v29  ;;  %10827 = vmatpush1.bf16.msra.mxu0 %v10826_v21  ;;  %v5191_v29 = vld [vmem:[%s18639_s4 + $0xa80] sm:$0xff]  ;;  %v10550_v21 = vpack.c.bf16 %v5104_v36, %v5091_v51  ;;  %v10862_v51 = vpack.c.bf16 %v5268_v52, %v5255_v25  ;;  %v5221_v36 = vld [vmem:[%s18639_s4 + $0xb70] sm:$0xff] }
 0x50f   :  { %10533 = vmatprep.subr.bf16.mxu1 %v10532_v34  ;;  %10829 = vmatprep.subr.bf16.mxu0 %v10828_v33  ;;  %v5130_v34 = vld [vmem:[%s18639_s4 + $0x898] sm:$0xff]  ;;  %v10552_v33 = vpack.c.bf16 %v5131_v48, %v5118_v42  ;;  %v10848_v30 = vpack.c.bf16 %v5191_v29, %v5178_v45  ;;  %v5248_v48 = vld [vmem:[%s18639_s4 + $0xc48] sm:$0xff]  ;;  %v5261_v45 = vld [vmem:[%s18639_s4 + $0xcb0] sm:$0xff] }
 0x510   :  { %v5294_v42 = vld [vmem:[%s18639_s4 + $0xdb8] sm:$0xff]  ;;  %v5308_v29 = vld [vmem:[%s18639_s4 + $0xe28] sm:$0xff]  ;;  %v4899_v25 = vld [vmem:[%s18639_s4 + $0x160] sm:$0xff] }
 0x512   :  { %10535 = vmatpush1.bf16.msra.mxu1 %v10534_v28  ;;  %10831 = vmatpush1.bf16.msra.mxu0 %v10830_v5  ;;  %v5217_v28 = vld [vmem:[%s18639_s4 + $0xb50] sm:$0xff]  ;;  %v10554_v5 = vpack.c.bf16 %v5130_v34, %v5117_v2  ;;  %v10866_v2 = vpack.c.bf16 %v5294_v42, %v5281_v59  ;;  %v5247_v34 = vld [vmem:[%s18639_s4 + $0xc40] sm:$0xff] }
 0x513   :  { %10537 = vmatprep.subr.bf16.mxu1 %v10536_v9  ;;  %10833 = vmatprep.subr.bf16.mxu0 %v10832_v7  ;;  %v5156_v9 = vld [vmem:[%s18639_s4 + $0x968] sm:$0xff]  ;;  %v10556_v7 = vpack.c.bf16 %v5157_v13, %v5144_v18  ;;  %v10852_v49 = vpack.c.bf16 %v5217_v28, %v5204_v40  ;;  %v5274_v13 = vld [vmem:[%s18639_s4 + $0xd18] sm:$0xff]  ;;  %v5287_v40 = vld [vmem:[%s18639_s4 + $0xd80] sm:$0xff] }
 0x514   :  { %v5320_v18 = vld [vmem:[%s18639_s4 + $0xe88] sm:$0xff]  ;;  %v6403_v28 = vld [vmem:[%s18640_s6 + $0x18] sm:$0xff]  ;;  %v4925_v59 = vld [vmem:[%s18639_s4 + $0x230] sm:$0xff] }
 0x516   :  { %10539 = vmatpush1.bf16.msra.mxu1 %v10538_v38  ;;  %10835 = vmatpush1.bf16.msra.mxu0 %v10834_v32  ;;  %v5243_v38 = vld [vmem:[%s18639_s4 + $0xc20] sm:$0xff]  ;;  %v10558_v32 = vpack.c.bf16 %v5156_v9, %v5143_v27  ;;  %v10870_v27 = vpack.c.bf16 %v5320_v18, %v5307_v60  ;;  %v10576_v9 = vpack.c.bf16 %v5287_v40, %v5274_v13  ;;  %v6434_v60 = vld [vmem:[%s18640_s6 + $0x110] sm:$0xff]  ;;  %v6443_v13 = vld [vmem:[%s18640_s6 + $0x158] sm:$0xff] }
 0x517   :  { %10541 = vmatprep.subr.bf16.mxu1 %v10540_v14  ;;  %10837 = vmatprep.subr.bf16.mxu0 %v10836_v56  ;;  %v5182_v14 = vld [vmem:[%s18639_s4 + $0xa38] sm:$0xff]  ;;  %v10560_v56 = vpack.c.bf16 %v5183_v58, %v5170_v20  ;;  %v10856_v31 = vpack.c.bf16 %v5243_v38, %v5230_v19  ;;  %v5313_v20 = vld [vmem:[%s18639_s4 + $0xe50] sm:$0xff] }
 0x518   :  { %v6402_v58 = vld [vmem:[%s18640_s6 + $0x10] sm:$0xff]  ;;  %v6411_v38 = vld [vmem:[%s18640_s6 + $0x58] sm:$0xff] }
 0x519   :  { %v6406_v19 = vld [vmem:[%s18640_s6 + $0x30] sm:$0xff]  ;;  %v6447_v40 = vld [vmem:[%s18640_s6 + $0x178] sm:$0xff] }
 0x51a   :  { %10543 = vmatpush1.bf16.msra.mxu1 %v10542_v41  ;;  %10839 = vmatpush1.bf16.msra.mxu0 %v10838_v8  ;;  %v5269_v41 = vld [vmem:[%s18639_s4 + $0xcf0] sm:$0xff]  ;;  %v10562_v8 = vpack.c.bf16 %v5182_v14, %v5169_v11  ;;  %v10580_v11 = vpack.c.bf16 %v5313_v20, %v5300_v63  ;;  %v5299_v14 = vld [vmem:[%s18639_s4 + $0xde0] sm:$0xff]  ;;  %v11312_v37 = vpack.c.bf16 %v6406_v19, %v6402_v58  ;;  %v6451_v58 = vld [vmem:[%s18640_s6 + $0x198] sm:$0xff] }
 0x51b   :  { %10545 = vmatprep.subr.bf16.mxu1 %v10544_v15  ;;  %10841 = vmatprep.subr.bf16.mxu0 %v10840_v44  ;;  %v5208_v15 = vld [vmem:[%s18639_s4 + $0xb08] sm:$0xff]  ;;  %v10564_v44 = vpack.c.bf16 %v5209_v43, %v5196_v23  ;;  %v10860_v6 = vpack.c.bf16 %v5269_v41, %v5256_v54  ;;  %v6410_v43 = vld [vmem:[%s18640_s6 + $0x50] sm:$0xff]  ;;  %v6419_v41 = vld [vmem:[%s18640_s6 + $0x98] sm:$0xff]  ;;  %v11330_v63 = vpack.c.bf16 %v6447_v40, %v6443_v13 }
 0x51c   :  { %v6414_v54 = vld [vmem:[%s18640_s6 + $0x70] sm:$0xff]  ;;  %v6455_v19 = vld [vmem:[%s18640_s6 + $0x1b8] sm:$0xff] }
 0x51d   :  { %v6438_v18 = vld [vmem:[%s18640_s6 + $0x130] sm:$0xff] }
 0x51e   :  { %10547 = vmatpush1.bf16.msra.mxu1 %v10546_v35  ;;  %10843 = vmatpush1.bf16.msra.mxu0 %v10842_v47  ;;  %v5295_v35 = vld [vmem:[%s18639_s4 + $0xdc0] sm:$0xff]  ;;  %v10566_v47 = vpack.c.bf16 %v5208_v15, %v5195_v10  ;;  %v4872_v15 = vld [vmem:[%s18639_s4 + $0x88] sm:$0xff]  ;;  %v6446_v20 = vld [vmem:[%s18640_s6 + $0x170] sm:$0xff] }
 0x51f   :  { %10549 = vmatprep.subr.bf16.mxu1 %v10548_v1  ;;  %10845 = vmatprep.subr.bf16.mxu0 %v10844_v53  ;;  %v5234_v1 = vld [vmem:[%s18639_s4 + $0xbd8] sm:$0xff]  ;;  %v10568_v53 = vpack.c.bf16 %v5235_v3, %v5222_v39  ;;  %v10864_v62 = vpack.c.bf16 %v5295_v35, %v5282_v16  ;;  %v6418_v39 = vld [vmem:[%s18640_s6 + $0x90] sm:$0xff] }
 0x520   :  { %v6422_v3 = vld [vmem:[%s18640_s6 + $0xb0] sm:$0xff]  ;;  %v6427_v16 = vld [vmem:[%s18640_s6 + $0xd8] sm:$0xff] }
 0x521   :  { %v6431_v35 = vld [vmem:[%s18640_s6 + $0xf8] sm:$0xff] }
 0x522   :  { %10551 = vmatpush1.bf16.msra.mxu1 %v10550_v21  ;;  %10847 = vmatpush1.bf16.msra.mxu0 %v10846_v61  ;;  %v5321_v21 = vld [vmem:[%s18639_s4 + $0xe90] sm:$0xff]  ;;  %v10570_v61 = vpack.c.bf16 %v5234_v1, %v5221_v36  ;;  %v4898_v1 = vld [vmem:[%s18639_s4 + $0x158] sm:$0xff]  ;;  %v11322_v42 = vpack.c.bf16 %v6431_v35, %v6427_v16 }
 0x523   :  { %10553 = vmatprep.subr.bf16.mxu1 %v10552_v33  ;;  %10849 = vmatprep.subr.bf16.mxu0 %v10848_v30  ;;  %v5260_v33 = vld [vmem:[%s18639_s4 + $0xca8] sm:$0xff]  ;;  %v10572_v30 = vpack.c.bf16 %v5261_v45, %v5248_v48  ;;  %v10868_v57 = vpack.c.bf16 %v5321_v21, %v5308_v29  ;;  %v4885_v36 = vld [vmem:[%s18639_s4 + $0xf0] sm:$0xff]  ;;  %v6435_v29 = vld [vmem:[%s18640_s6 + $0x118] sm:$0xff] }
 0x524   :  { %v6426_v48 = vld [vmem:[%s18640_s6 + $0xd0] sm:$0xff]  ;;  %v6439_v21 = vld [vmem:[%s18640_s6 + $0x138] sm:$0xff] }
 0x525   :  { %v6430_v45 = vld [vmem:[%s18640_s6 + $0xf0] sm:$0xff] }
 0x526   :  { %10555 = vmatpush1.bf16.msra.mxu1 %v10554_v5  ;;  %10851 = vmatpush1.bf16.msra.mxu0 %v10850_v4  ;;  %v6407_v5 = vld [vmem:[%s18640_s6 + $0x38] sm:$0xff]  ;;  %v10574_v4 = vpack.c.bf16 %v5260_v33, %v5247_v34  ;;  %v4911_v34 = vld [vmem:[%s18639_s4 + $0x1c0] sm:$0xff] }
 0x527   :  { %10557 = vmatprep.subr.bf16.mxu1 %v10556_v7  ;;  %10853 = vmatprep.subr.bf16.mxu0 %v10852_v49  ;;  %v5273_v7 = vld [vmem:[%s18639_s4 + $0xd10] sm:$0xff]  ;;  %v5286_v49 = vld [vmem:[%s18639_s4 + $0xd78] sm:$0xff]  ;;  %v11310_v50 = vpack.c.bf16 %v6407_v5, %v6403_v28 }
 0x528   :  { %v4938_v33 = vld [vmem:[%s18639_s4 + $0x298] sm:$0xff] }
 0x52a   :  { %10559 = vmatpush1.bf16.msra.mxu1 %v10558_v32  ;;  %10855 = vmatpush1.bf16.msra.mxu0 %v10854_v24  ;;  %v6415_v32 = vld [vmem:[%s18640_s6 + $0x78] sm:$0xff]  ;;  %v10578_v24 = vpack.c.bf16 %v5286_v49, %v5273_v7  ;;  %v11328_v7 = vpack.c.bf16 %v6438_v18, %v6434_v60  ;;  %v4977_v49 = vld [vmem:[%s18639_s4 + $0x3d0] sm:$0xff] }
 0x52b   :  { %10561 = vmatprep.subr.bf16.mxu1 %v10560_v56  ;;  %10857 = vmatprep.subr.bf16.mxu0 %v10856_v31  ;;  %v5312_v56 = vld [vmem:[%s18639_s4 + $0xe48] sm:$0xff]  ;;  %v11314_v23 = vpack.c.bf16 %v6415_v32, %v6411_v38  ;;  %v6483_v60 = vld [vmem:[%s18640_s6 + $0x298] sm:$0xff] }
 0x52c   :  { %v4860_v31 = vld [vmem:[%s18639_s4 + $0x28] sm:$0xff]  ;;  %v6487_v18 = vld [vmem:[%s18640_s6 + $0x2b8] sm:$0xff] }
 0x52d   :  { %v10584_v10 = vpack.c.bf16 %v4873_v17, %v4860_v31  ;;  %v5003_v31 = vld [vmem:[%s18639_s4 + $0x4a0] sm:$0xff]  ;;  %v6450_v17 = vld [vmem:[%s18640_s6 + $0x190] sm:$0xff] }
 0x52e   :  { %10563 = vmatpush1.bf16.msra.mxu1 %v10562_v8  ;;  %10859 = vmatpush1.bf16.msra.mxu0 %v10858_v55  ;;  %v6423_v8 = vld [vmem:[%s18640_s6 + $0xb8] sm:$0xff]  ;;  %v10582_v55 = vpack.c.bf16 %v5312_v56, %v5299_v14 }
 0x52f   :  { %10565 = vmatprep.subr.bf16.mxu1 %v10564_v44  ;;  %10861 = vmatprep.subr.bf16.mxu0 %v10860_v6  ;;  %v4886_v44 = vld [vmem:[%s18639_s4 + $0xf8] sm:$0xff]  ;;  %v11316_v6 = vpack.c.bf16 %v6414_v54, %v6410_v43  ;;  %v11318_v52 = vpack.c.bf16 %v6423_v8, %v6419_v41 }
 0x530   :  { %v4990_v14 = vld [vmem:[%s18639_s4 + $0x438] sm:$0xff] }
 0x531   :  { %v6459_v43 = vld [vmem:[%s18640_s6 + $0x1d8] sm:$0xff]  ;;  %v10604_v8 = vpack.c.bf16 %v5003_v31, %v4990_v14  ;;  %v5133_v14 = vld [vmem:[%s18639_s4 + $0x8b0] sm:$0xff] }
 0x532   :  { %10567 = vmatpush1.bf16.msra.mxu1 %v10566_v47  ;;  %10863 = vmatpush1.bf16.msra.mxu0 %v10862_v51  ;;  %v10588_v51 = vpack.c.bf16 %v4899_v25, %v4886_v44  ;;  %v6463_v54 = vld [vmem:[%s18640_s6 + $0x1f8] sm:$0xff]  ;;  %v5029_v44 = vld [vmem:[%s18639_s4 + $0x570] sm:$0xff] }
 0x533   :  { %10569 = vmatprep.subr.bf16.mxu1 %v10568_v53  ;;  %10865 = vmatprep.subr.bf16.mxu0 %v10864_v62  ;;  %v4912_v53 = vld [vmem:[%s18639_s4 + $0x1c8] sm:$0xff]  ;;  %v11320_v62 = vpack.c.bf16 %v6422_v3, %v6418_v39  ;;  %v6458_v25 = vld [vmem:[%s18640_s6 + $0x1d0] sm:$0xff]  ;;  %v6467_v39 = vld [vmem:[%s18640_s6 + $0x218] sm:$0xff] }
 0x534   :  { %v6471_v3 = vld [vmem:[%s18640_s6 + $0x238] sm:$0xff]  ;;  %v6490_v31 = vld [vmem:[%s18640_s6 + $0x2d0] sm:$0xff] }
 0x535   :  { %6170 = vmatmul.mubr.f32.vlgmr.msra.gmra.mrb[74].mxu0 %v15034_v46 }
 0x536   :  { %10571 = vmatpush1.bf16.msra.mxu1 %v10570_v61  ;;  %10867 = vmatpush1.bf16.msra.mxu0 %v10866_v2  ;;  %v10590_v61 = vpack.c.bf16 %v4898_v1, %v4885_v36  ;;  %v10592_v2 = vpack.c.bf16 %v4925_v59, %v4912_v53  ;;  %v5042_v36 = vld [vmem:[%s18639_s4 + $0x5d8] sm:$0xff]  ;;  %v5055_v53 = vld [vmem:[%s18639_s4 + $0x640] sm:$0xff]  ;;  %v6466_v59 = vld [vmem:[%s18640_s6 + $0x210] sm:$0xff] }
 0x537   :  { %10573 = vmatprep.subr.bf16.mxu1 %v10572_v30  ;;  %10869 = vmatprep.subr.bf16.mxu0 %v10868_v57  ;;  %v11324_v30 = vpack.c.bf16 %v6430_v45, %v6426_v48  ;;  %v11326_v57 = vpack.c.bf16 %v6439_v21, %v6435_v29  ;;  %v6475_v48 = vld [vmem:[%s18640_s6 + $0x258] sm:$0xff]  ;;  %v10612_v21 = vpack.c.bf16 %v5055_v53, %v5042_v36  ;;  %v5185_v36 = vld [vmem:[%s18639_s4 + $0xa50] sm:$0xff] }
 0x538   :  { %6240 = vmatprep.mubr.f32.mxu0 %v11780_v26  ;;  %v6479_v45 = vld [vmem:[%s18640_s6 + $0x278] sm:$0xff]  ;;  %v6506_v53 = vld [vmem:[%s18640_s6 + $0x350] sm:$0xff] }
 0x53a   :  { %10575 = vmatpush1.bf16.msra.mxu1 %v10574_v4  ;;  %10871 = vmatpush1.bf16.msra.mxu0 %v10870_v27  ;;  %v4937_v4 = vld [vmem:[%s18639_s4 + $0x290] sm:$0xff]  ;;  %v4950_v27 = vld [vmem:[%s18639_s4 + $0x2f8] sm:$0xff] }
 0x53b   :  { %10577 = vmatprep.subr.bf16.mxu1 %v10576_v9  ;;  %11311 = vmatprep.subr.bf16.mxu0 %v11310_v50  ;;  %v4964_v9 = vld [vmem:[%s18639_s4 + $0x368] sm:$0xff]  ;;  %v6442_v50 = vld [vmem:[%s18640_s6 + $0x150] sm:$0xff]  ;;  %v10598_v38 = vpack.c.bf16 %v4950_v27, %v4937_v4  ;;  %v5094_v4 = vld [vmem:[%s18639_s4 + $0x778] sm:$0xff] }
 0x53c   :  { %v10600_v32 = vpack.c.bf16 %v4977_v49, %v4964_v9  ;;  %v11332_v56 = vpack.c.bf16 %v6446_v20, %v6442_v50  ;;  %v5107_v9 = vld [vmem:[%s18639_s4 + $0x7e0] sm:$0xff]  ;;  %v6482_v49 = vld [vmem:[%s18640_s6 + $0x290] sm:$0xff]  ;;  %v6491_v50 = vld [vmem:[%s18640_s6 + $0x2d8] sm:$0xff] }
 0x53d   :  { %5602 = vmatmul.mubr.f32.vlgmr.msra.gmra.mrb[200].mxu1 %v15034_v46  ;;  %8571 = vmatmul.mubr.msk.f32.vlgmr.msra.gmra.mrb[74].mxu0 %vm4815_vm6, %v15096_v0  ;;  %v4859_v46 = vld [vmem:[%s18639_s4 + $0x20] sm:$0xff]  ;;  %v6495_v20 = vld [vmem:[%s18640_s6 + $0x2f8] sm:$0xff] }
 0x53e   :  { %10579 = vmatpush1.bf16.msra.mxu1 %v10578_v24  ;;  %5672 = vmatprep.mubr.f32.mxu1 %v11780_v26  ;;  %v10586_v47 = vpack.c.bf16 %v4872_v15, %v4859_v46  ;;  %v4963_v24 = vld [vmem:[%s18639_s4 + $0x360] sm:$0xff]  ;;  %v5016_v46 = vld [vmem:[%s18639_s4 + $0x508] sm:$0xff] }
 0x53f   :  { %10581 = vmatprep.subr.bf16.mxu1 %v10580_v11  ;;  %11313 = vmatpush1.bf16.msra.mxu0 %v11312_v37  ;;  %v4976_v11 = vld [vmem:[%s18639_s4 + $0x3c8] sm:$0xff]  ;;  %v11334_v37 = vpack.c.bf16 %v6455_v19, %v6451_v58  ;;  %v10608_v35 = vpack.c.bf16 %v5029_v44, %v5016_v46  ;;  %v10620_v19 = vpack.c.bf16 %v5107_v9, %v5094_v4  ;;  %v5159_v46 = vld [vmem:[%s18639_s4 + $0x980] sm:$0xff]  ;;  %v6498_v44 = vld [vmem:[%s18640_s6 + $0x310] sm:$0xff] }
 0x540   :  { %11315 = vmatprep.subr.bf16.mxu0 %v11314_v23  ;;  %v6454_v23 = vld [vmem:[%s18640_s6 + $0x1b0] sm:$0xff]  ;;  %v10602_v41 = vpack.c.bf16 %v4976_v11, %v4963_v24  ;;  %v5120_v24 = vld [vmem:[%s18639_s4 + $0x848] sm:$0xff] }
 0x541   :  { %v11336_v15 = vpack.c.bf16 %v6454_v23, %v6450_v17  ;;  %v6499_v17 = vld [vmem:[%s18640_s6 + $0x318] sm:$0xff]  ;;  %v5237_v4 = vld [vmem:[%s18639_s4 + $0xbf0] sm:$0xff] }
 0x542   :  { %10583 = vmatpush1.bf16.msra.mxu1 %v10582_v55  ;;  %v4989_v55 = vld [vmem:[%s18639_s4 + $0x430] sm:$0xff]  ;;  %v6503_v23 = vld [vmem:[%s18640_s6 + $0x338] sm:$0xff] }
 0x543   :  { %10585 = vmatprep.subr.bf16.mxu1 %v10584_v10  ;;  %11317 = vmatpush1.bf16.msra.mxu0 %v11316_v6  ;;  %v5002_v10 = vld [vmem:[%s18639_s4 + $0x498] sm:$0xff]  ;;  %v11338_v6 = vpack.c.bf16 %v6463_v54, %v6459_v43  ;;  %v10624_v54 = vpack.c.bf16 %v5133_v14, %v5120_v24  ;;  %v6522_v9 = vld [vmem:[%s18640_s6 + $0x3d0] sm:$0xff]  ;;  %v5263_v24 = vld [vmem:[%s18639_s4 + $0xcc0] sm:$0xff] }
 0x544   :  { %11319 = vmatprep.subr.bf16.mxu0 %v11318_v52  ;;  %v6462_v52 = vld [vmem:[%s18640_s6 + $0x1f0] sm:$0xff]  ;;  %v10606_v16 = vpack.c.bf16 %v5002_v10, %v4989_v55  ;;  %v5146_v55 = vld [vmem:[%s18639_s4 + $0x918] sm:$0xff] }
 0x545   :  { %8567 = vmatmul.mubr.msk.f32.vlgmr.msra.gmra.mrb[200].mxu1 %vm4815_vm6, %v15096_v0  ;;  %v4924_v0 = vld [vmem:[%s18639_s4 + $0x228] sm:$0xff]  ;;  %v11340_v1 = vpack.c.bf16 %v6462_v52, %v6458_v25  ;;  %v6507_v25 = vld [vmem:[%s18640_s6 + $0x358] sm:$0xff] }
 0x546   :  { %10587 = vmatpush1.bf16.msra.mxu1 %v10586_v47  ;;  %5743 = vmatprep.mubr.f32.mxu1 %v15032_v12  ;;  %v4951_v12 = vld [vmem:[%s18639_s4 + $0x300] sm:$0xff]  ;;  %v10594_v28 = vpack.c.bf16 %v4924_v0, %v4911_v34  ;;  %v5068_v34 = vld [vmem:[%s18639_s4 + $0x6a8] sm:$0xff]  ;;  %v6511_v52 = vld [vmem:[%s18640_s6 + $0x378] sm:$0xff] }
 0x547   :  { %10589 = vmatprep.subr.bf16.mxu1 %v10588_v51  ;;  %11321 = vmatpush1.bf16.msra.mxu0 %v11320_v62  ;;  %v10596_v5 = vpack.c.bf16 %v4951_v12, %v4938_v33  ;;  %v5015_v47 = vld [vmem:[%s18639_s4 + $0x500] sm:$0xff]  ;;  %v5028_v51 = vld [vmem:[%s18639_s4 + $0x568] sm:$0xff]  ;;  %v11342_v62 = vpack.c.bf16 %v6471_v3, %v6467_v39  ;;  %v5081_v33 = vld [vmem:[%s18639_s4 + $0x710] sm:$0xff]  ;;  %v10628_v3 = vpack.c.bf16 %v5159_v46, %v5146_v55 }
 0x548   :  { %11323 = vmatprep.subr.bf16.mxu0 %v11322_v42  ;;  %v6470_v42 = vld [vmem:[%s18640_s6 + $0x230] sm:$0xff]  ;;  %v10610_v29 = vpack.c.bf16 %v5028_v51, %v5015_v47  ;;  %v10616_v40 = vpack.c.bf16 %v5081_v33, %v5068_v34  ;;  %v5172_v47 = vld [vmem:[%s18639_s4 + $0x9e8] sm:$0xff]  ;;  %v5211_v34 = vld [vmem:[%s18639_s4 + $0xb20] sm:$0xff] }
 0x549   :  { %v11344_v0 = vpack.c.bf16 %v6470_v42, %v6466_v59  ;;  %v6474_v12 = vld [vmem:[%s18640_s6 + $0x250] sm:$0xff]  ;;  %v6515_v59 = vld [vmem:[%s18640_s6 + $0x398] sm:$0xff] }
 0x54a   :  { %10591 = vmatpush1.bf16.msra.mxu1 %v10590_v61  ;;  %v5041_v61 = vld [vmem:[%s18639_s4 + $0x5d0] sm:$0xff]  ;;  %v6519_v42 = vld [vmem:[%s18640_s6 + $0x3b8] sm:$0xff] }
 0x54b   :  { %10593 = vmatprep.subr.bf16.mxu1 %v10592_v2  ;;  %11325 = vmatpush1.bf16.msra.mxu0 %v11324_v30  ;;  %v5054_v2 = vld [vmem:[%s18639_s4 + $0x638] sm:$0xff]  ;;  %v11346_v30 = vpack.c.bf16 %v6479_v45, %v6475_v48  ;;  %v10632_v45 = vpack.c.bf16 %v5185_v36, %v5172_v47  ;;  %v6514_v33 = vld [vmem:[%s18640_s6 + $0x390] sm:$0xff] }
 0x54c   :  { %11327 = vmatprep.subr.bf16.mxu0 %v11326_v57  ;;  %v6478_v57 = vld [vmem:[%s18640_s6 + $0x270] sm:$0xff]  ;;  %v10614_v13 = vpack.c.bf16 %v5054_v2, %v5041_v61  ;;  %v5198_v61 = vld [vmem:[%s18639_s4 + $0xab8] sm:$0xff] }
 0x54d   :  { %v11348_v27 = vpack.c.bf16 %v6478_v57, %v6474_v12  ;;  %v6523_v12 = vld [vmem:[%s18640_s6 + $0x3d8] sm:$0xff]  ;;  %v5317_v36 = vld [vmem:[%s18639_s4 + $0xe70] sm:$0xff] }
 0x54e   :  { %10595 = vmatpush1.bf16.msra.mxu1 %v10594_v28  ;;  %v5067_v28 = vld [vmem:[%s18639_s4 + $0x6a0] sm:$0xff]  ;;  %v6527_v57 = vld [vmem:[%s18640_s6 + $0x3f8] sm:$0xff] }
 0x54f   :  { %10597 = vmatprep.subr.bf16.mxu1 %v10596_v5  ;;  %11329 = vmatpush1.bf16.msra.mxu0 %v11328_v7  ;;  %v5080_v5 = vld [vmem:[%s18639_s4 + $0x708] sm:$0xff]  ;;  %v11350_v7 = vpack.c.bf16 %v6487_v18, %v6483_v60  ;;  %v10636_v18 = vpack.c.bf16 %v5211_v34, %v5198_v61  ;;  %v5302_v55 = vld [vmem:[%s18639_s4 + $0xdf8] sm:$0xff]  ;;  %v4863_v61 = vld [vmem:[%s18639_s4 + $0x40] sm:$0xff] }
 0x550   :  { %11331 = vmatprep.subr.bf16.mxu0 %v11330_v63  ;;  %v6486_v63 = vld [vmem:[%s18640_s6 + $0x2b0] sm:$0xff]  ;;  %v10618_v58 = vpack.c.bf16 %v5080_v5, %v5067_v28  ;;  %v5224_v28 = vld [vmem:[%s18639_s4 + $0xb88] sm:$0xff]  ;;  %v5290_v47 = vld [vmem:[%s18639_s4 + $0xd98] sm:$0xff] }
 0x551   :  { %v11352_v11 = vpack.c.bf16 %v6486_v63, %v6482_v49  ;;  %v6531_v49 = vld [vmem:[%s18640_s6 + $0x418] sm:$0xff] }
 0x552   :  { %10599 = vmatpush1.bf16.msra.mxu1 %v10598_v38  ;;  %v5093_v38 = vld [vmem:[%s18639_s4 + $0x770] sm:$0xff]  ;;  %v6535_v63 = vld [vmem:[%s18640_s6 + $0x438] sm:$0xff] }
 0x553   :  { %10601 = vmatprep.subr.bf16.mxu1 %v10600_v32  ;;  %11333 = vmatpush1.bf16.msra.mxu0 %v11332_v56  ;;  %v5106_v32 = vld [vmem:[%s18639_s4 + $0x7d8] sm:$0xff]  ;;  %v11354_v56 = vpack.c.bf16 %v6495_v20, %v6491_v50  ;;  %v10640_v20 = vpack.c.bf16 %v5237_v4, %v5224_v28  ;;  %v4928_v4 = vld [vmem:[%s18639_s4 + $0x248] sm:$0xff] }
 0x554   :  { %11335 = vmatprep.subr.bf16.mxu0 %v11334_v37  ;;  %v6494_v37 = vld [vmem:[%s18640_s6 + $0x2f0] sm:$0xff]  ;;  %v10622_v43 = vpack.c.bf16 %v5106_v32, %v5093_v38  ;;  %v5250_v32 = vld [vmem:[%s18639_s4 + $0xc58] sm:$0xff] }
 0x555   :  { %v11356_v10 = vpack.c.bf16 %v6494_v37, %v6490_v31  ;;  %v5249_v31 = vld [vmem:[%s18639_s4 + $0xc50] sm:$0xff]  ;;  %v5262_v37 = vld [vmem:[%s18639_s4 + $0xcb8] sm:$0xff] }
 0x556   :  { %10603 = vmatpush1.bf16.msra.mxu1 %v10602_v41  ;;  %v5119_v41 = vld [vmem:[%s18639_s4 + $0x840] sm:$0xff]  ;;  %v4890_v34 = vld [vmem:[%s18639_s4 + $0x118] sm:$0xff] }
 0x557   :  { %10605 = vmatprep.subr.bf16.mxu1 %v10604_v8  ;;  %11337 = vmatpush1.bf16.msra.mxu0 %v11336_v15  ;;  %v5132_v8 = vld [vmem:[%s18639_s4 + $0x8a8] sm:$0xff]  ;;  %v11358_v15 = vpack.c.bf16 %v6503_v23, %v6499_v17  ;;  %v5289_v23 = vld [vmem:[%s18639_s4 + $0xd90] sm:$0xff] }
 0x558   :  { %11339 = vmatprep.subr.bf16.mxu0 %v11338_v6  ;;  %v6502_v6 = vld [vmem:[%s18640_s6 + $0x330] sm:$0xff]  ;;  %v10626_v39 = vpack.c.bf16 %v5132_v8, %v5119_v41  ;;  %v5276_v17 = vld [vmem:[%s18639_s4 + $0xd28] sm:$0xff]  ;;  %v5275_v41 = vld [vmem:[%s18639_s4 + $0xd20] sm:$0xff] }
 0x559   :  { %v11360_v51 = vpack.c.bf16 %v6502_v6, %v6498_v44  ;;  %v5288_v8 = vld [vmem:[%s18639_s4 + $0xd88] sm:$0xff]  ;;  %v5301_v44 = vld [vmem:[%s18639_s4 + $0xdf0] sm:$0xff]  ;;  %v5314_v6 = vld [vmem:[%s18639_s4 + $0xe58] sm:$0xff] }
 0x55a   :  { %10607 = vmatpush1.bf16.msra.mxu1 %v10606_v16  ;;  %v5145_v16 = vld [vmem:[%s18639_s4 + $0x910] sm:$0xff]  ;;  %v10650_v46 = vpack.c.bf16 %v5288_v8, %v5275_v41  ;;  %v5019_v8 = vld [vmem:[%s18639_s4 + $0x520] sm:$0xff] }
 0x55b   :  { %10609 = vmatprep.subr.bf16.mxu1 %v10608_v35  ;;  %11341 = vmatpush1.bf16.msra.mxu0 %v11340_v1  ;;  %v5158_v35 = vld [vmem:[%s18639_s4 + $0x978] sm:$0xff]  ;;  %v11362_v1 = vpack.c.bf16 %v6511_v52, %v6507_v25  ;;  %v5291_v52 = vld [vmem:[%s18639_s4 + $0xda0] sm:$0xff] }
 0x55c   :  { %11343 = vmatprep.subr.bf16.mxu0 %v11342_v62  ;;  %v6510_v62 = vld [vmem:[%s18640_s6 + $0x370] sm:$0xff]  ;;  %v10630_v48 = vpack.c.bf16 %v5158_v35, %v5145_v16  ;;  %v5278_v25 = vld [vmem:[%s18639_s4 + $0xd38] sm:$0xff] }
 0x55d   :  { %v11364_v2 = vpack.c.bf16 %v6510_v62, %v6506_v53  ;;  %v10720_v16 = vpack.c.bf16 %v5291_v52, %v5278_v25  ;;  %v5277_v35 = vld [vmem:[%s18639_s4 + $0xd30] sm:$0xff]  ;;  %v5303_v62 = vld [vmem:[%s18639_s4 + $0xe00] sm:$0xff]  ;;  %v5058_v25 = vld [vmem:[%s18639_s4 + $0x658] sm:$0xff] }
 0x55e   :  { %10611 = vmatpush1.bf16.msra.mxu1 %v10610_v29  ;;  %v5171_v29 = vld [vmem:[%s18639_s4 + $0x9e0] sm:$0xff]  ;;  %v5072_v52 = vld [vmem:[%s18639_s4 + $0x6c8] sm:$0xff] }
 0x55f   :  { %10613 = vmatprep.subr.bf16.mxu1 %v10612_v21  ;;  %11345 = vmatpush1.bf16.msra.mxu0 %v11344_v0  ;;  %v5184_v21 = vld [vmem:[%s18639_s4 + $0xa48] sm:$0xff]  ;;  %v11366_v0 = vpack.c.bf16 %v6519_v42, %v6515_v59 }
 0x560   :  { %11347 = vmatprep.subr.bf16.mxu0 %v11346_v30  ;;  %v6518_v30 = vld [vmem:[%s18640_s6 + $0x3b0] sm:$0xff]  ;;  %v10634_v60 = vpack.c.bf16 %v5184_v21, %v5171_v29  ;;  %v5316_v59 = vld [vmem:[%s18639_s4 + $0xe68] sm:$0xff] }
 0x561   :  { %v11368_v5 = vpack.c.bf16 %v6518_v30, %v6514_v33  ;;  %v4864_v42 = vld [vmem:[%s18639_s4 + $0x48] sm:$0xff]  ;;  %v10726_v29 = vpack.c.bf16 %v5316_v59, %v5303_v62  ;;  %v5097_v59 = vld [vmem:[%s18639_s4 + $0x790] sm:$0xff] }
 0x562   :  { %10615 = vmatpush1.bf16.msra.mxu1 %v10614_v13  ;;  %v5197_v13 = vld [vmem:[%s18639_s4 + $0xab0] sm:$0xff] }
 0x563   :  { %10617 = vmatprep.subr.bf16.mxu1 %v10616_v40  ;;  %11349 = vmatpush1.bf16.msra.mxu0 %v11348_v27  ;;  %v5210_v40 = vld [vmem:[%s18639_s4 + $0xb18] sm:$0xff]  ;;  %v11370_v27 = vpack.c.bf16 %v6527_v57, %v6523_v12  ;;  %v4889_v12 = vld [vmem:[%s18639_s4 + $0x110] sm:$0xff] }
 0x564   :  { %11351 = vmatprep.subr.bf16.mxu0 %v11350_v7  ;;  %v6526_v7 = vld [vmem:[%s18640_s6 + $0x3f0] sm:$0xff]  ;;  %v10638_v50 = vpack.c.bf16 %v5210_v40, %v5197_v13  ;;  %v4902_v57 = vld [vmem:[%s18639_s4 + $0x178] sm:$0xff] }
 0x565   :  { %v11372_v38 = vpack.c.bf16 %v6526_v7, %v6522_v9  ;;  %v15943_v13 = vld [vmem:[#allocation2 + $0x8] sm:$0xff]  ;;  %v10734_v40 = vpack.c.bf16 %v4902_v57, %v4889_v12  ;;  %v4955_v9 = vld [vmem:[%s18639_s4 + $0x320] sm:$0xff] }
 0x566   :  { %10619 = vmatpush1.bf16.msra.mxu1 %v10618_v58  ;;  %v5223_v58 = vld [vmem:[%s18639_s4 + $0xb80] sm:$0xff]  ;;  %v5149_v57 = vld [vmem:[%s18639_s4 + $0x930] sm:$0xff] }
 0x567   :  { %10621 = vmatprep.subr.bf16.mxu1 %v10620_v19  ;;  %11353 = vmatpush1.bf16.msra.mxu0 %v11352_v11  ;;  %v5236_v19 = vld [vmem:[%s18639_s4 + $0xbe8] sm:$0xff]  ;;  %v11374_v11 = vpack.c.bf16 %v6535_v63, %v6531_v49  ;;  %v4941_v63 = vld [vmem:[%s18639_s4 + $0x2b0] sm:$0xff] }
 0x568   :  { %11355 = vmatprep.subr.bf16.mxu0 %v11354_v56  ;;  %v10642_v14 = vpack.c.bf16 %v5236_v19, %v5223_v58  ;;  %v10644_v56 = vpack.c.bf16 %v5263_v24, %v5250_v32  ;;  %v4981_v58 = vld [vmem:[%s18639_s4 + $0x3f0] sm:$0xff]  ;;  %v4967_v32 = vld [vmem:[%s18639_s4 + $0x380] sm:$0xff]  ;;  %v4980_v24 = vld [vmem:[%s18639_s4 + $0x3e8] sm:$0xff] }
 0x56a   :  { %10623 = vmatpush1.bf16.msra.mxu1 %v10622_v43  ;;  %v10646_v43 = vpack.c.bf16 %v5262_v37, %v5249_v31  ;;  %v4993_v37 = vld [vmem:[%s18639_s4 + $0x450] sm:$0xff] }
 0x56b   :  { %10625 = vmatprep.subr.bf16.mxu1 %v10624_v54  ;;  %11357 = vmatpush1.bf16.msra.mxu0 %v11356_v10  ;;  %v10648_v54 = vpack.c.bf16 %v5289_v23, %v5276_v17  ;;  %v5315_v10 = vld [vmem:[%s18639_s4 + $0xe60] sm:$0xff]  ;;  %v5006_v17 = vld [vmem:[%s18639_s4 + $0x4b8] sm:$0xff]  ;;  %v5020_v23 = vld [vmem:[%s18639_s4 + $0x528] sm:$0xff] }
 0x56c   :  { %11359 = vmatprep.subr.bf16.mxu0 %v11358_v15  ;;  %v10652_v15 = vpack.c.bf16 %v5315_v10, %v5302_v55  ;;  %v5032_v55 = vld [vmem:[%s18639_s4 + $0x588] sm:$0xff]  ;;  %v5046_v10 = vld [vmem:[%s18639_s4 + $0x5f8] sm:$0xff] }
 0x56e   :  { %10627 = vmatpush1.bf16.msra.mxu1 %v10626_v39  ;;  %v15884_v39 = vld [vmem:[#allocation2] sm:$0xff] }
 0x56f   :  { %10629 = vmatprep.subr.bf16.mxu1 %v10628_v3  ;;  %11361 = vmatpush1.bf16.msra.mxu0 %v11360_v51  ;;  %v10654_v3 = vpack.c.bf16 %v5314_v6, %v5301_v44  ;;  %v5304_v51 = vld [vmem:[%s18639_s4 + $0xe08] sm:$0xff]  ;;  %v5045_v6 = vld [vmem:[%s18639_s4 + $0x5f0] sm:$0xff] }
 0x570   :  { %11363 = vmatprep.subr.bf16.mxu0 %v11362_v1  ;;  %v10722_v1 = vpack.c.bf16 %v5290_v47, %v5277_v35  ;;  %v10724_v53 = vpack.c.bf16 %v5317_v36, %v5304_v51  ;;  %v5071_v47 = vld [vmem:[%s18639_s4 + $0x6c0] sm:$0xff]  ;;  %v5084_v51 = vld [vmem:[%s18639_s4 + $0x728] sm:$0xff]  ;;  %v5098_v36 = vld [vmem:[%s18639_s4 + $0x798] sm:$0xff] }
 0x572   :  { %10631 = vmatpush1.bf16.msra.mxu1 %v10630_v48  ;;  %v4877_v48 = vld [vmem:[%s18639_s4 + $0xb0] sm:$0xff] }
 0x573   :  { %10633 = vmatprep.subr.bf16.mxu1 %v10632_v45  ;;  %11365 = vmatpush1.bf16.msra.mxu0 %v11364_v2  ;;  %v15912_v45 = vld [vmem:[#allocation2 + $0x10] sm:$0xff]  ;;  %v10728_v21 = vpack.c.bf16 %v4877_v48, %v4864_v42  ;;  %v4876_v2 = vld [vmem:[%s18639_s4 + $0xa8] sm:$0xff] }
 0x574   :  { %11367 = vmatprep.subr.bf16.mxu0 %v11366_v0  ;;  %v4903_v0 = vld [vmem:[%s18639_s4 + $0x180] sm:$0xff]  ;;  %v10730_v33 = vpack.c.bf16 %v4876_v2, %v4863_v61  ;;  %v5110_v42 = vld [vmem:[%s18639_s4 + $0x7f8] sm:$0xff]  ;;  %v5124_v48 = vld [vmem:[%s18639_s4 + $0x868] sm:$0xff] }
 0x575   :  { %v10732_v30 = vpack.c.bf16 %v4903_v0, %v4890_v34  ;;  %v5123_v2 = vld [vmem:[%s18639_s4 + $0x860] sm:$0xff]  ;;  %v5136_v34 = vld [vmem:[%s18639_s4 + $0x8c8] sm:$0xff]  ;;  %v5150_v0 = vld [vmem:[%s18639_s4 + $0x938] sm:$0xff] }
 0x576   :  { %10635 = vmatpush1.bf16.msra.mxu1 %v10634_v60  ;;  %v4916_v60 = vld [vmem:[%s18639_s4 + $0x1e8] sm:$0xff] }
 0x577   :  { %10637 = vmatprep.subr.bf16.mxu1 %v10636_v18  ;;  %11369 = vmatpush1.bf16.msra.mxu0 %v11368_v5  ;;  %v4929_v18 = vld [vmem:[%s18639_s4 + $0x250] sm:$0xff]  ;;  %v4915_v5 = vld [vmem:[%s18639_s4 + $0x1e0] sm:$0xff] }
 0x578   :  { %11371 = vmatprep.subr.bf16.mxu0 %v11370_v27  ;;  %v10736_v28 = vpack.c.bf16 %v4929_v18, %v4916_v60  ;;  %v4942_v27 = vld [vmem:[%s18639_s4 + $0x2b8] sm:$0xff]  ;;  %v10738_v7 = vpack.c.bf16 %v4928_v4, %v4915_v5  ;;  %v5176_v18 = vld [vmem:[%s18639_s4 + $0xa08] sm:$0xff]  ;;  %v5175_v4 = vld [vmem:[%s18639_s4 + $0xa00] sm:$0xff] }
 0x579   :  { %v10740_v49 = vpack.c.bf16 %v4955_v9, %v4942_v27  ;;  %v5162_v60 = vld [vmem:[%s18639_s4 + $0x998] sm:$0xff]  ;;  %v5188_v27 = vld [vmem:[%s18639_s4 + $0xa68] sm:$0xff] }
 0x57a   :  { %10639 = vmatpush1.bf16.msra.mxu1 %v10638_v50  ;;  %v4954_v50 = vld [vmem:[%s18639_s4 + $0x318] sm:$0xff] }
 0x57b   :  { %10641 = vmatprep.subr.bf16.mxu1 %v10640_v20  ;;  %11373 = vmatpush1.bf16.msra.mxu0 %v11372_v38  ;;  %v4968_v20 = vld [vmem:[%s18639_s4 + $0x388] sm:$0xff]  ;;  %v10742_v19 = vpack.c.bf16 %v4954_v50, %v4941_v63  ;;  %v5202_v9 = vld [vmem:[%s18639_s4 + $0xad8] sm:$0xff]  ;;  %v5327_v63 = vlaneseq }
 0x57c   :  { %11375 = vmatprep.subr.bf16.mxu0 %v11374_v11  ;;  %v10744_v38 = vpack.c.bf16 %v4981_v58, %v4968_v20  ;;  %v4994_v11 = vld [vmem:[%s18639_s4 + $0x458] sm:$0xff]  ;;  %v5201_v20 = vld [vmem:[%s18639_s4 + $0xad0] sm:$0xff] }
 0x57d   :  { %v5214_v58 = vld [vmem:[%s18639_s4 + $0xb38] sm:$0xff] }
 0x57e   :  { %10643 = vmatpush1.bf16.msra.mxu1 %v10642_v14  ;;  %v5007_v14 = vld [vmem:[%s18639_s4 + $0x4c0] sm:$0xff] }
 0x57f   :  { %10645 = vmatprep.subr.bf16.mxu1 %v10644_v56  ;;  %v10746_v56 = vpack.c.bf16 %v4980_v24, %v4967_v32  ;;  %v10748_v31 = vpack.c.bf16 %v5007_v14, %v4994_v11  ;;  %v10782_v32 = vpack.c.bf16 %v5214_v58, %v5201_v20  ;;  %v16090_v24 = vshrl.u32 %v5327_v63, 7  ;;  %v5227_v14 = vld [vmem:[%s18639_s4 + $0xba0] sm:$0xff]  ;;  %v5114_v63 = vld [vmem:[%s18639_s4 + $0x818] sm:$0xff]  ;;  %v6546_v58 = vld [vmem:[%s18640_s6 + $0x490] sm:$0xff] }
 0x582   :  { %10647 = vmatpush1.bf16.msra.mxu1 %v10646_v43  ;;  %v5033_v43 = vld [vmem:[%s18639_s4 + $0x590] sm:$0xff] }
 0x583   :  { %10649 = vmatprep.subr.bf16.mxu1 %v10648_v54  ;;  %v10750_v54 = vpack.c.bf16 %v5006_v17, %v4993_v37  ;;  %v10752_v41 = vpack.c.bf16 %v5033_v43, %v5020_v23  ;;  %v5254_v37 = vld [vmem:[%s18639_s4 + $0xc78] sm:$0xff]  ;;  %v5267_v17 = vld [vmem:[%s18639_s4 + $0xce0] sm:$0xff]  ;;  %v16109_v43 = vsub.s32 0, %v16090_v24 }
 0x585   :  { %5744 = vmatmul.mubr.f32.vlgmr.msra.gmra.mrb[202].mxu1 %v15884_v39 }
 0x586   :  { %10651 = vmatpush1.bf16.msra.mxu1 %v10650_v46  ;;  %5814 = vmatprep.mubr.f32.mxu1 %v11780_v26  ;;  %v5059_v46 = vld [vmem:[%s18639_s4 + $0x660] sm:$0xff] }
 0x587   :  { %10653 = vmatprep.subr.bf16.mxu1 %v10652_v15  ;;  %v10754_v15 = vpack.c.bf16 %v5032_v55, %v5019_v8  ;;  %v10756_v44 = vpack.c.bf16 %v5059_v46, %v5046_v10  ;;  %v10788_v8 = vpack.c.bf16 %v5267_v17, %v5254_v37  ;;  %v5253_v55 = vld [vmem:[%s18639_s4 + $0xc70] sm:$0xff]  ;;  %v5266_v10 = vld [vmem:[%s18639_s4 + $0xcd8] sm:$0xff]  ;;  %v16123_v46 = vld [vmem:[%s18641_s5] sm:$0xff] }
 0x588   :  { %v4906_v37 = vld [vmem:[%s18639_s4 + $0x198] sm:$0xff]  ;;  %v5127_v17 = vld [vmem:[%s18639_s4 + $0x880] sm:$0xff] }
 0x58a   :  { %10655 = vmatpush1.bf16.msra.mxu1 %v10654_v3  ;;  %v5085_v3 = vld [vmem:[%s18639_s4 + $0x730] sm:$0xff] }
 0x58b   :  { %10721 = vmatprep.subr.bf16.mxu1 %v10720_v16  ;;  %v10758_v16 = vpack.c.bf16 %v5058_v25, %v5045_v6  ;;  %v10760_v35 = vpack.c.bf16 %v5085_v3, %v5072_v52  ;;  %v5330_v6 = vrot.slane %v16123_v46, %v16109_v43  ;;  %v10790_v52 = vpack.c.bf16 %v5266_v10, %v5253_v55  ;;  %v6554_v10 = vld [vmem:[%s18640_s6 + $0x4d0] sm:$0xff] }
 0x58d   :  { %8568 = vmatmul.mubr.msk.f32.vlgmr.msra.gmra.mrb[202].mxu1 %vm4815_vm6, %v15912_v45 }
 0x58e   :  { %10723 = vmatpush1.bf16.msra.mxu1 %v10722_v1  ;;  %5956 = vmatprep.mubr.f32.mxu1 %v11780_v26  ;;  %v5111_v1 = vld [vmem:[%s18639_s4 + $0x800] sm:$0xff] }
 0x58f   :  { %10725 = vmatprep.subr.bf16.mxu1 %v10724_v53  ;;  %v10762_v53 = vpack.c.bf16 %v5084_v51, %v5071_v47  ;;  %v10764_v62 = vpack.c.bf16 %v5111_v1, %v5098_v36  ;;  %v5306_v51 = vld [vmem:[%s18639_s4 + $0xe18] sm:$0xff]  ;;  %v5319_v36 = vld [vmem:[%s18639_s4 + $0xe80] sm:$0xff] }
 0x592   :  { %10727 = vmatpush1.bf16.msra.mxu1 %v10726_v29  ;;  %v5137_v29 = vld [vmem:[%s18639_s4 + $0x8d0] sm:$0xff] }
 0x593   :  { %10729 = vmatprep.subr.bf16.mxu1 %v10728_v21  ;;  %v10766_v21 = vpack.c.bf16 %v5110_v42, %v5097_v59  ;;  %v10768_v61 = vpack.c.bf16 %v5137_v29, %v5124_v48  ;;  %v6534_v59 = vld [vmem:[%s18640_s6 + $0x430] sm:$0xff]  ;;  %v6539_v29 = vld [vmem:[%s18640_s6 + $0x458] sm:$0xff] }
 0x595   :  { %8569 = vmatmul.mubr.msk.f32.vlgmr.msra.gmra.mrb[204].mxu1 %vm4815_vm6, %v15912_v45 }
 0x596   :  { %10731 = vmatpush1.bf16.msra.mxu1 %v10730_v33  ;;  %6027 = vmatprep.mubr.f32.mxu1 %v15943_v13  ;;  %v5163_v33 = vld [vmem:[%s18639_s4 + $0x9a0] sm:$0xff] }
 0x597   :  { %10733 = vmatprep.subr.bf16.mxu1 %v10732_v30  ;;  %v10770_v30 = vpack.c.bf16 %v5136_v34, %v5123_v2  ;;  %v10772_v12 = vpack.c.bf16 %v5163_v33, %v5150_v0  ;;  %v5305_v2 = vld [vmem:[%s18639_s4 + $0xe10] sm:$0xff]  ;;  %v5318_v34 = vld [vmem:[%s18639_s4 + $0xe78] sm:$0xff]  ;;  %v5075_v33 = vld [vmem:[%s18639_s4 + $0x6e0] sm:$0xff] }
 0x59a   :  { %10735 = vmatpush1.bf16.msra.mxu1 %v10734_v40  ;;  %v5189_v40 = vld [vmem:[%s18639_s4 + $0xa70] sm:$0xff] }
 0x59b   :  { %10737 = vmatprep.subr.bf16.mxu1 %v10736_v28  ;;  %v10774_v28 = vpack.c.bf16 %v5162_v60, %v5149_v57  ;;  %v10776_v5 = vpack.c.bf16 %v5189_v40, %v5176_v18  ;;  %v6538_v18 = vld [vmem:[%s18640_s6 + $0x450] sm:$0xff] }
 0x59c   :  { %v6542_v40 = vld [vmem:[%s18640_s6 + $0x470] sm:$0xff] }
 0x59e   :  { %10739 = vmatpush1.bf16.msra.mxu1 %v10738_v7  ;;  %v5215_v7 = vld [vmem:[%s18639_s4 + $0xb40] sm:$0xff] }
 0x59f   :  { %10741 = vmatprep.subr.bf16.mxu1 %v10740_v49  ;;  %v10778_v49 = vpack.c.bf16 %v5188_v27, %v5175_v4  ;;  %v10780_v50 = vpack.c.bf16 %v5215_v7, %v5202_v9  ;;  %v6551_v4 = vld [vmem:[%s18640_s6 + $0x4b8] sm:$0xff]  ;;  %v4867_v9 = vld [vmem:[%s18639_s4 + $0x60] sm:$0xff]  ;;  %v4880_v7 = vld [vmem:[%s18639_s4 + $0xc8] sm:$0xff] }
 0x5a2   :  { %10743 = vmatpush1.bf16.msra.mxu1 %v10742_v19  ;;  %v5228_v19 = vld [vmem:[%s18639_s4 + $0xba8] sm:$0xff] }
 0x5a3   :  { %10745 = vmatprep.subr.bf16.mxu1 %v10744_v38  ;;  %v5241_v38 = vld [vmem:[%s18639_s4 + $0xc10] sm:$0xff] }
 0x5a4   :  { %v10784_v11 = vpack.c.bf16 %v5241_v38, %v5228_v19  ;;  %v6550_v19 = vld [vmem:[%s18640_s6 + $0x4b0] sm:$0xff]  ;;  %v10874_v38 = vpack.c.bf16 %v4880_v7, %v4867_v9  ;;  %v5218_v7 = vld [vmem:[%s18639_s4 + $0xb58] sm:$0xff] }
 0x5a5   :  { %v5205_v9 = vld [vmem:[%s18639_s4 + $0xaf0] sm:$0xff] }
 0x5a6   :  { %10747 = vmatpush1.bf16.msra.mxu1 %v10746_v56  ;;  %v5240_v56 = vld [vmem:[%s18639_s4 + $0xc08] sm:$0xff] }
 0x5a7   :  { %10749 = vmatprep.subr.bf16.mxu1 %v10748_v31 }
 0x5aa   :  { %10751 = vmatpush1.bf16.msra.mxu1 %v10750_v54  ;;  %v10786_v54 = vpack.c.bf16 %v5240_v56, %v5227_v14  ;;  %v4893_v56 = vld [vmem:[%s18639_s4 + $0x130] sm:$0xff] }
 0x5ab   :  { %10753 = vmatprep.subr.bf16.mxu1 %v10752_v41  ;;  %v16112_v41 = vsub.s32 1, %v16090_v24 }
 0x5ad   :  { %v5334_v25 = vrot.slane %v16123_v46, %v16112_v41 }
 0x5ae   :  { %10755 = vmatpush1.bf16.msra.mxu1 %v10754_v15  ;;  %v5280_v15 = vld [vmem:[%s18639_s4 + $0xd48] sm:$0xff] }
 0x5af   :  { %10757 = vmatprep.subr.bf16.mxu1 %v10756_v44  ;;  %v5293_v44 = vld [vmem:[%s18639_s4 + $0xdb0] sm:$0xff] }
 0x5b0   :  { %v10792_v3 = vpack.c.bf16 %v5293_v44, %v5280_v15  ;;  %v6558_v15 = vld [vmem:[%s18640_s6 + $0x4f0] sm:$0xff]  ;;  %v10878_v44 = vpack.c.bf16 %v4906_v37, %v4893_v56  ;;  %v5231_v56 = vld [vmem:[%s18639_s4 + $0xbc0] sm:$0xff]  ;;  %v5244_v37 = vld [vmem:[%s18639_s4 + $0xc28] sm:$0xff] }
 0x5b2   :  { %10759 = vmatpush1.bf16.msra.mxu1 %v10758_v16  ;;  %v5279_v16 = vld [vmem:[%s18639_s4 + $0xd40] sm:$0xff] }
 0x5b3   :  { %10761 = vmatprep.subr.bf16.mxu1 %v10760_v35  ;;  %v5292_v35 = vld [vmem:[%s18639_s4 + $0xda8] sm:$0xff] }
 0x5b4   :  { %v10794_v48 = vpack.c.bf16 %v5292_v35, %v5279_v16  ;;  %v4932_v16 = vld [vmem:[%s18639_s4 + $0x268] sm:$0xff]  ;;  %v5166_v35 = vld [vmem:[%s18639_s4 + $0x9b8] sm:$0xff] }
 0x5b6   :  { %10763 = vmatpush1.bf16.msra.mxu1 %v10762_v53 }
 0x5b7   :  { %10765 = vmatprep.subr.bf16.mxu1 %v10764_v62  ;;  %v6530_v62 = vld [vmem:[%s18640_s6 + $0x410] sm:$0xff] }
 0x5ba   :  { %10767 = vmatpush1.bf16.msra.mxu1 %v10766_v21  ;;  %v6543_v21 = vld [vmem:[%s18640_s6 + $0x478] sm:$0xff] }
 0x5bb   :  { %10769 = vmatprep.subr.bf16.mxu1 %v10768_v61  ;;  %v10796_v61 = vpack.c.bf16 %v5319_v36, %v5306_v51  ;;  %v11378_v60 = vpack.c.bf16 %v6543_v21, %v6539_v29  ;;  %v6562_v36 = vld [vmem:[%s18640_s6 + $0x510] sm:$0xff] }
 0x5bc   :  { %v4945_v21 = vld [vmem:[%s18639_s4 + $0x2d0] sm:$0xff] }
 0x5be   :  { %10771 = vmatpush1.bf16.msra.mxu1 %v10770_v30  ;;  %v5088_v30 = vld [vmem:[%s18639_s4 + $0x748] sm:$0xff] }
 0x5bf   :  { %10773 = vmatprep.subr.bf16.mxu1 %v10772_v12  ;;  %v11376_v12 = vpack.c.bf16 %v6534_v59, %v6530_v62  ;;  %v10872_v27 = vpack.c.bf16 %v5088_v30, %v5075_v33  ;;  %v6571_v59 = vld [vmem:[%s18640_s6 + $0x558] sm:$0xff] }
 0x5c2   :  { %10775 = vmatpush1.bf16.msra.mxu1 %v10774_v28  ;;  %v10798_v28 = vpack.c.bf16 %v5318_v34, %v5305_v2  ;;  %v5179_v2 = vld [vmem:[%s18639_s4 + $0xa20] sm:$0xff]  ;;  %v5192_v34 = vld [vmem:[%s18639_s4 + $0xa88] sm:$0xff] }
 0x5c3   :  { %10777 = vmatprep.subr.bf16.mxu1 %v10776_v5  ;;  %v6547_v5 = vld [vmem:[%s18640_s6 + $0x498] sm:$0xff] }
 0x5c4   :  { %v11382_v20 = vpack.c.bf16 %v6551_v4, %v6547_v5  ;;  %v10888_v5 = vpack.c.bf16 %v5192_v34, %v5179_v2  ;;  %v4971_v4 = vld [vmem:[%s18639_s4 + $0x3a0] sm:$0xff]  ;;  %v6602_v2 = vld [vmem:[%s18640_s6 + $0x650] sm:$0xff] }
 0x5c5   :  { %v6606_v34 = vld [vmem:[%s18640_s6 + $0x670] sm:$0xff] }
 0x5c6   :  { %10779 = vmatpush1.bf16.msra.mxu1 %v10778_v49  ;;  %v5101_v49 = vld [vmem:[%s18639_s4 + $0x7b0] sm:$0xff] }
 0x5c7   :  { %10781 = vmatprep.subr.bf16.mxu1 %v10780_v50  ;;  %v11380_v50 = vpack.c.bf16 %v6542_v40, %v6538_v18  ;;  %v10876_v14 = vpack.c.bf16 %v5114_v63, %v5101_v49  ;;  %v6579_v40 = vld [vmem:[%s18640_s6 + $0x598] sm:$0xff] }
 0x5c8   :  { %v16098_v31 = vpop.f32.mrb[72].mxu0 }
 0x5c9   :  { %v16106_v23 = vpop.f32.mrb[73].mxu0 }
 0x5ca   :  { %10783 = vmatpush1.bf16.msra.mxu1 %v10782_v32  ;;  %v6555_v32 = vld [vmem:[%s18640_s6 + $0x4d8] sm:$0xff] }
 0x5cb   :  { %10785 = vmatprep.subr.bf16.mxu1 %v10784_v11  ;;  %v6559_v11 = vld [vmem:[%s18640_s6 + $0x4f8] sm:$0xff] }
 0x5cc   :  { %v11386_v55 = vpack.c.bf16 %v6559_v11, %v6555_v32  ;;  %v10892_v32 = vpack.c.bf16 %v5218_v7, %v5205_v9  ;;  %v4997_v11 = vld [vmem:[%s18639_s4 + $0x470] sm:$0xff]  ;;  %v6619_v9 = vld [vmem:[%s18640_s6 + $0x6d8] sm:$0xff] }
 0x5cd   :  { %v6623_v7 = vld [vmem:[%s18640_s6 + $0x6f8] sm:$0xff] }
 0x5ce   :  { %10787 = vmatpush1.bf16.msra.mxu1 %v10786_v54  ;;  %v5140_v54 = vld [vmem:[%s18639_s4 + $0x8e8] sm:$0xff] }
 0x5cf   :  { %10789 = vmatprep.subr.bf16.mxu1 %v10788_v8  ;;  %v11384_v8 = vpack.c.bf16 %v6550_v19, %v6546_v58  ;;  %v6587_v19 = vld [vmem:[%s18640_s6 + $0x5d8] sm:$0xff] }
 0x5d0   :  { %v5532_v47 = vpop.f32.mrb[198].mxu1 }
 0x5d1   :  { %v16147_v1 = vadd.f32 %v5532_v47, %v5330_v6  ;;  %v5534_v53 = vpop.f32.mrb[199].mxu1  ;;  %v6563_v6 = vld [vmem:[%s18640_s6 + $0x518] sm:$0xff]  ;;  %v11388_v47 = vpack.c.bf16 %v6558_v15, %v6554_v10 }
 0x5d2   :  { %v16155_v42 = vadd.f32 %v5534_v53, %v5334_v25  ;;  %10791 = vmatpush1.bf16.msra.mxu1 %v10790_v52  ;;  %v6567_v25 = vld [vmem:[%s18640_s6 + $0x538] sm:$0xff]  ;;  %v10880_v52 = vpack.c.bf16 %v5140_v54, %v5127_v17  ;;  %v6566_v53 = vld [vmem:[%s18640_s6 + $0x530] sm:$0xff] }
 0x5d3   :  { %10793 = vmatprep.subr.bf16.mxu1 %v10792_v3  ;;  %v6387_v57 = vmax.f32 %v16147_v1, 0.0  ;;  %v4919_v3 = vld [vmem:[%s18639_s4 + $0x200] sm:$0xff]  ;;  %v11390_v51 = vpack.c.bf16 %v6567_v25, %v6563_v6  ;;  %v11392_v33 = vpack.c.bf16 %v6566_v53, %v6562_v36  ;;  %v6595_v15 = vld [vmem:[%s18640_s6 + $0x618] sm:$0xff]  ;;  %v10896_v6 = vpack.c.bf16 %v5244_v37, %v5231_v56 }
 0x5d4   :  { %v6388_v0 = vmax.f32 %v16155_v42, 0.0  ;;  %v10882_v62 = vpack.c.bf16 %v4932_v16, %v4919_v3  ;;  %v5023_v25 = vld [vmem:[%s18639_s4 + $0x540] sm:$0xff]  ;;  %v5257_v3 = vld [vmem:[%s18639_s4 + $0xc90] sm:$0xff]  ;;  %v5270_v16 = vld [vmem:[%s18639_s4 + $0xcf8] sm:$0xff] }
 0x5d5   :  { %6028 = vmatmul.mubr.f32.vlgmr.msra.gmra.mrb[206].mxu1 %v15884_v39  ;;  %v6603_v53 = vld [vmem:[%s18640_s6 + $0x658] sm:$0xff]  ;;  %v6400_v37 = vld [vmem:[%s18640_s6] sm:$0xff] }
 0x5d6   :  { %10795 = vmatpush1.bf16.msra.mxu1 %v10794_v48  ;;  %7786 = vmatprep.mubr.f32.mxu0 %v6388_v0  ;;  %v6575_v48 = vld [vmem:[%s18640_s6 + $0x578] sm:$0xff]  ;;  %v6420_v42 = vld [vmem:[%s18640_s6 + $0xa0] sm:$0xff] }
 0x5d7   :  { %7787 = vmatmul.mubr.f32.vlgmr.msra.gmra.mrb[76].mxu0 %v6387_v57  ;;  %10797 = vmatprep.subr.bf16.mxu1 %v10796_v61  ;;  %v4958_v61 = vld [vmem:[%s18639_s4 + $0x338] sm:$0xff]  ;;  %v11394_v30 = vpack.c.bf16 %v6575_v48, %v6571_v59  ;;  %v10900_v59 = vpack.c.bf16 %v5270_v16, %v5257_v3  ;;  %v5049_v48 = vld [vmem:[%s18639_s4 + $0x610] sm:$0xff]  ;;  %v6408_v3 = vld [vmem:[%s18640_s6 + $0x40] sm:$0xff] }
 0x5d8   :  { %6098 = vmatprep.mubr.f32.mxu1 %v11780_v26  ;;  %11377 = vmatpush1.bf16.msra.mxu0 %v11376_v12  ;;  %v6570_v12 = vld [vmem:[%s18640_s6 + $0x550] sm:$0xff]  ;;  %v10886_v18 = vpack.c.bf16 %v4958_v61, %v4945_v21  ;;  %v6412_v16 = vld [vmem:[%s18640_s6 + $0x60] sm:$0xff]  ;;  %v6755_v1 = vld [vmem:[%s18640_s6 + $0xb18] sm:$0xff] }
 0x5d9   :  { %11379 = vmatprep.subr.bf16.mxu0 %v11378_v60  ;;  %v6574_v60 = vld [vmem:[%s18640_s6 + $0x570] sm:$0xff] }
 0x5da   :  { %10799 = vmatpush1.bf16.msra.mxu1 %v10798_v28  ;;  %v6583_v28 = vld [vmem:[%s18640_s6 + $0x5b8] sm:$0xff]  ;;  %v11396_v49 = vpack.c.bf16 %v6574_v60, %v6570_v12  ;;  %v5283_v60 = vld [vmem:[%s18639_s4 + $0xd60] sm:$0xff] }
 0x5db   :  { %10873 = vmatprep.subr.bf16.mxu1 %v10872_v27  ;;  %v4984_v27 = vld [vmem:[%s18639_s4 + $0x408] sm:$0xff]  ;;  %v11398_v63 = vpack.c.bf16 %v6583_v28, %v6579_v40  ;;  %v6615_v12 = vld [vmem:[%s18640_s6 + $0x6b8] sm:$0xff]  ;;  %v11412_v40 = vpack.c.bf16 %v6606_v34, %v6602_v2  ;;  %v6642_v34 = vld [vmem:[%s18640_s6 + $0x790] sm:$0xff] }
 0x5dc   :  { %11381 = vmatpush1.bf16.msra.mxu0 %v11380_v50  ;;  %v6578_v50 = vld [vmem:[%s18640_s6 + $0x590] sm:$0xff]  ;;  %v10890_v58 = vpack.c.bf16 %v4984_v27, %v4971_v4 }
 0x5dd   :  { %8570 = vmatmul.mubr.msk.f32.vlgmr.msra.gmra.mrb[206].mxu1 %vm4815_vm6, %v15912_v45  ;;  %11383 = vmatprep.subr.bf16.mxu0 %v11382_v20  ;;  %v6582_v20 = vld [vmem:[%s18640_s6 + $0x5b0] sm:$0xff] }
 0x5de   :  { %10875 = vmatpush3.bf16.msra.mxu1 %v10874_v38  ;;  %6311 = vmatprep.mubr.f32.mxu1 %v15943_v13  ;;  %v5153_v13 = vld [vmem:[%s18639_s4 + $0x950] sm:$0xff]  ;;  %v6591_v38 = vld [vmem:[%s18640_s6 + $0x5f8] sm:$0xff]  ;;  %v11400_v17 = vpack.c.bf16 %v6582_v20, %v6578_v50  ;;  %v6401_v50 = vld [vmem:[%s18640_s6 + $0x8] sm:$0xff] }
 0x5df   :  { %10877 = vmatprep.subr.bf16.mxu1 %v10876_v14  ;;  %v10884_v29 = vpack.c.bf16 %v5166_v35, %v5153_v13  ;;  %v5010_v14 = vld [vmem:[%s18639_s4 + $0x4d8] sm:$0xff]  ;;  %v11402_v54 = vpack.c.bf16 %v6591_v38, %v6587_v19  ;;  %v6614_v4 = vld [vmem:[%s18640_s6 + $0x6b0] sm:$0xff]  ;;  %v6405_v20 = vld [vmem:[%s18640_s6 + $0x28] sm:$0xff]  ;;  %v11418_v19 = vpack.c.bf16 %v6623_v7, %v6619_v9 }
 0x5e0   :  { %11385 = vmatpush1.bf16.msra.mxu0 %v11384_v8  ;;  %v6586_v8 = vld [vmem:[%s18640_s6 + $0x5d0] sm:$0xff]  ;;  %v10894_v10 = vpack.c.bf16 %v5010_v14, %v4997_v11  ;;  %v6627_v14 = vld [vmem:[%s18640_s6 + $0x718] sm:$0xff]  ;;  %v10910_v56 = vpack.c.bf16 %v6405_v20, %v6401_v50 }
 0x5e1   :  { %11387 = vmatprep.subr.bf16.mxu0 %v11386_v55  ;;  %v6590_v55 = vld [vmem:[%s18640_s6 + $0x5f0] sm:$0xff]  ;;  %v6659_v50 = vld [vmem:[%s18640_s6 + $0x818] sm:$0xff] }
 0x5e2   :  { %10879 = vmatpush3.bf16.msra.mxu1 %v10878_v44  ;;  %v6599_v44 = vld [vmem:[%s18640_s6 + $0x638] sm:$0xff]  ;;  %v11404_v13 = vpack.c.bf16 %v6590_v55, %v6586_v8  ;;  %v6618_v38 = vld [vmem:[%s18640_s6 + $0x6d0] sm:$0xff]  ;;  %v6413_v8 = vld [vmem:[%s18640_s6 + $0x68] sm:$0xff] }
 0x5e3   :  { %10881 = vmatprep.subr.bf16.mxu1 %v10880_v52  ;;  %v5036_v52 = vld [vmem:[%s18639_s4 + $0x5a8] sm:$0xff]  ;;  %v11406_v35 = vpack.c.bf16 %v6599_v44, %v6595_v15  ;;  %v6630_v15 = vld [vmem:[%s18640_s6 + $0x730] sm:$0xff]  ;;  %v6663_v20 = vld [vmem:[%s18640_s6 + $0x838] sm:$0xff] }
 0x5e4   :  { %11389 = vmatpush1.bf16.msra.mxu0 %v11388_v47  ;;  %v6594_v47 = vld [vmem:[%s18640_s6 + $0x610] sm:$0xff]  ;;  %v10898_v36 = vpack.c.bf16 %v5036_v52, %v5023_v25  ;;  %v6639_v25 = vld [vmem:[%s18640_s6 + $0x778] sm:$0xff] }
 0x5e5   :  { %11391 = vmatprep.subr.bf16.mxu0 %v11390_v51  ;;  %v6598_v51 = vld [vmem:[%s18640_s6 + $0x630] sm:$0xff] }
 0x5e6   :  { %10883 = vmatpush3.bf16.msra.mxu1 %v10882_v62  ;;  %v6607_v62 = vld [vmem:[%s18640_s6 + $0x678] sm:$0xff]  ;;  %v11408_v21 = vpack.c.bf16 %v6598_v51, %v6594_v47  ;;  %v6650_v7 = vld [vmem:[%s18640_s6 + $0x7d0] sm:$0xff] }
 0x5e7   :  { %10885 = vmatprep.subr.bf16.mxu1 %v10884_v29  ;;  %v5062_v29 = vld [vmem:[%s18639_s4 + $0x678] sm:$0xff]  ;;  %v11410_v61 = vpack.c.bf16 %v6607_v62, %v6603_v53  ;;  %v6638_v53 = vld [vmem:[%s18640_s6 + $0x770] sm:$0xff]  ;;  %v10916_v62 = vpack.c.bf16 %v6412_v16, %v6408_v3  ;;  %v6448_v16 = vld [vmem:[%s18640_s6 + $0x180] sm:$0xff] }
 0x5e8   :  { %11393 = vmatpush1.bf16.msra.mxu0 %v11392_v33  ;;  %v10902_v33 = vpack.c.bf16 %v5062_v29, %v5049_v48  ;;  %v6416_v29 = vld [vmem:[%s18640_s6 + $0x80] sm:$0xff] }
 0x5e9   :  { %11395 = vmatprep.subr.bf16.mxu0 %v11394_v30  ;;  %v6611_v30 = vld [vmem:[%s18640_s6 + $0x698] sm:$0xff] }
 0x5ea   :  { %10887 = vmatpush3.bf16.msra.mxu1 %v10886_v18  ;;  %v5296_v18 = vld [vmem:[%s18639_s4 + $0xdc8] sm:$0xff]  ;;  %v11414_v28 = vpack.c.bf16 %v6615_v12, %v6611_v30  ;;  %v10920_v30 = vpack.c.bf16 %v6420_v42, %v6416_v29  ;;  %v6651_v12 = vld [vmem:[%s18640_s6 + $0x7d8] sm:$0xff] }
 0x5eb   :  { %10889 = vmatprep.subr.bf16.mxu1 %v10888_v5  ;;  %v6610_v5 = vld [vmem:[%s18640_s6 + $0x690] sm:$0xff]  ;;  %v10905_v27 = vpack.c.bf16 %v5296_v18, %v5283_v60  ;;  %v6655_v60 = vld [vmem:[%s18640_s6 + $0x7f8] sm:$0xff] }
 0x5ec   :  { %11397 = vmatpush1.bf16.msra.mxu0 %v11396_v49  ;;  %v5309_v49 = vld [vmem:[%s18639_s4 + $0xe30] sm:$0xff]  ;;  %v11434_v9 = vpack.c.bf16 %v6655_v60, %v6651_v12  ;;  %v6671_v29 = vld [vmem:[%s18640_s6 + $0x878] sm:$0xff] }
 0x5ed   :  { %11399 = vmatprep.subr.bf16.mxu0 %v11398_v63  ;;  %v5322_v63 = vld [vmem:[%s18639_s4 + $0xe98] sm:$0xff]  ;;  %v6666_v60 = vld [vmem:[%s18640_s6 + $0x850] sm:$0xff] }
 0x5ee   :  { %10891 = vmatpush3.bf16.msra.mxu1 %v10890_v58  ;;  %v11416_v58 = vpack.c.bf16 %v6614_v4, %v6610_v5  ;;  %v10908_v11 = vpack.c.bf16 %v5322_v63, %v5309_v49  ;;  %v6433_v5 = vld [vmem:[%s18640_s6 + $0x108] sm:$0xff]  ;;  %v6654_v49 = vld [vmem:[%s18640_s6 + $0x7f0] sm:$0xff] }
 0x5ef   :  { %10893 = vmatprep.subr.bf16.mxu1 %v10892_v32  ;;  %v6622_v32 = vld [vmem:[%s18640_s6 + $0x6f0] sm:$0xff]  ;;  %v6437_v4 = vld [vmem:[%s18640_s6 + $0x128] sm:$0xff] }
 0x5f0   :  { %11401 = vmatpush1.bf16.msra.mxu0 %v11400_v17  ;;  %v6404_v17 = vld [vmem:[%s18640_s6 + $0x20] sm:$0xff]  ;;  %v11420_v55 = vpack.c.bf16 %v6622_v32, %v6618_v38 }
 0x5f1   :  { %11403 = vmatprep.subr.bf16.mxu0 %v11402_v54  ;;  %v6409_v54 = vld [vmem:[%s18640_s6 + $0x48] sm:$0xff]  ;;  %v10912_v44 = vpack.c.bf16 %v6404_v17, %v6400_v37  ;;  %v6436_v38 = vld [vmem:[%s18640_s6 + $0x120] sm:$0xff]  ;;  %v11438_v37 = vpack.c.bf16 %v6663_v20, %v6659_v50  ;;  %v6674_v20 = vld [vmem:[%s18640_s6 + $0x890] sm:$0xff] }
 0x5f2   :  { %10895 = vmatpush3.bf16.msra.mxu1 %v10894_v10  ;;  %v6626_v10 = vld [vmem:[%s18640_s6 + $0x710] sm:$0xff]  ;;  %v10914_v52 = vpack.c.bf16 %v6413_v8, %v6409_v54  ;;  %v16548_v54 = vsub.s32 2, %v16090_v24 }
 0x5f3   :  { %10897 = vmatprep.subr.bf16.mxu1 %v10896_v6  ;;  %v6635_v6 = vld [vmem:[%s18640_s6 + $0x758] sm:$0xff]  ;;  %v11424_v47 = vpack.c.bf16 %v6630_v15, %v6626_v10  ;;  %v16557_v10 = vsub.s32 3, %v16090_v24  ;;  %v6449_v15 = vld [vmem:[%s18640_s6 + $0x188] sm:$0xff] }
 0x5f4   :  { %11405 = vmatpush1.bf16.msra.mxu0 %v11404_v13  ;;  %v6417_v13 = vld [vmem:[%s18640_s6 + $0x88] sm:$0xff]  ;;  %v11426_v51 = vpack.c.bf16 %v6639_v25, %v6635_v6  ;;  %v5338_v6 = vrot.slane %v16123_v46, %v16548_v54 }
 0x5f5   :  { %11407 = vmatprep.subr.bf16.mxu0 %v11406_v35  ;;  %v6421_v35 = vld [vmem:[%s18640_s6 + $0xa8] sm:$0xff]  ;;  %v5342_v25 = vrot.slane %v16123_v46, %v16557_v10 }
 0x5f6   :  { %10899 = vmatpush3.bf16.msra.mxu1 %v10898_v36  ;;  %v6634_v36 = vld [vmem:[%s18640_s6 + $0x750] sm:$0xff]  ;;  %v10918_v48 = vpack.c.bf16 %v6421_v35, %v6417_v13  ;;  %v6452_v13 = vld [vmem:[%s18640_s6 + $0x1a0] sm:$0xff]  ;;  %v6461_v46 = vld [vmem:[%s18640_s6 + $0x1e8] sm:$0xff] }
 0x5f7   :  { %10901 = vmatprep.subr.bf16.mxu1 %v10900_v59  ;;  %v6643_v59 = vld [vmem:[%s18640_s6 + $0x798] sm:$0xff] }
 0x5f8   :  { %11409 = vmatpush1.bf16.msra.mxu0 %v11408_v21  ;;  %v6429_v21 = vld [vmem:[%s18640_s6 + $0xe8] sm:$0xff] }
 0x5f9   :  { %11411 = vmatprep.subr.bf16.mxu0 %v11410_v61  ;;  %v11428_v61 = vpack.c.bf16 %v6638_v53, %v6634_v36  ;;  %v6658_v53 = vld [vmem:[%s18640_s6 + $0x810] sm:$0xff] }
 0x5fa   :  { %10903 = vmatpush3.bf16.msra.mxu1 %v10902_v33  ;;  %v6646_v33 = vld [vmem:[%s18640_s6 + $0x7b0] sm:$0xff] }
 0x5fb   :  { %10904 = vmatprep.subr.bf16.mxu1 %v11778_v22 }
 0x5fc   :  { %11413 = vmatpush1.bf16.msra.mxu0 %v11412_v40  ;;  %v6424_v40 = vld [vmem:[%s18640_s6 + $0xc0] sm:$0xff] }
 0x5fd   :  { %6312 = vmatmul.mubr.f32.vlgmr.msra.gmra.mrb[208].mxu1 %v15884_v39  ;;  %11415 = vmatprep.subr.bf16.mxu0 %v11414_v28  ;;  %v6631_v39 = vld [vmem:[%s18640_s6 + $0x738] sm:$0xff]  ;;  %v6428_v28 = vld [vmem:[%s18640_s6 + $0xe0] sm:$0xff] }
 0x5fe   :  { %10906 = vmatpush3.bf16.msra.mxu1 %v10905_v27  ;;  %10099 = vmatprep.mubr.msk.f32.mxu1 %vm11779_vm4, %v11780_v26  ;;  %v11432_v27 = vpack.c.bf16 %v6646_v33, %v6642_v34  ;;  %v10924_v63 = vpack.c.bf16 %v6428_v28, %v6424_v40  ;;  %v6469_v34 = vld [vmem:[%s18640_s6 + $0x228] sm:$0xff]  ;;  %v6675_v28 = vld [vmem:[%s18640_s6 + $0x898] sm:$0xff] }
 0x5ff   :  { %10907 = vmatprep.subr.bf16.mxu1 %v11778_v22  ;;  %v11422_v22 = vpack.c.bf16 %v6631_v39, %v6627_v14  ;;  %v6445_v14 = vld [vmem:[%s18640_s6 + $0x168] sm:$0xff]  ;;  %v11436_v39 = vpack.c.bf16 %v6654_v49, %v6650_v7 }
 0x600   :  { %11417 = vmatpush1.bf16.msra.mxu0 %v11416_v58  ;;  %v10926_v58 = vpack.c.bf16 %v6437_v4, %v6433_v5  ;;  %v6679_v5 = vld [vmem:[%s18640_s6 + $0x8b8] sm:$0xff]  ;;  %v6473_v7 = vld [vmem:[%s18640_s6 + $0x248] sm:$0xff] }
 0x601   :  { %11419 = vmatprep.subr.bf16.mxu0 %v11418_v19  ;;  %v6432_v19 = vld [vmem:[%s18640_s6 + $0x100] sm:$0xff]  ;;  %v6477_v49 = vld [vmem:[%s18640_s6 + $0x268] sm:$0xff]  ;;  %v11446_v50 = vpack.c.bf16 %v6679_v5, %v6675_v28  ;;  %v6707_v28 = vld [vmem:[%s18640_s6 + $0x998] sm:$0xff] }
 0x602   :  { %10909 = vmatpush3.bf16.msra.mxu1 %v10908_v11  ;;  %v6441_v11 = vld [vmem:[%s18640_s6 + $0x148] sm:$0xff]  ;;  %v10928_v17 = vpack.c.bf16 %v6436_v38, %v6432_v19  ;;  %v6683_v38 = vld [vmem:[%s18640_s6 + $0x8d8] sm:$0xff] }
 0x603   :  { %10911 = vmatprep.subr.bf16.mxu1 %v10910_v56  ;;  %v10930_v8 = vpack.c.bf16 %v6445_v14, %v6441_v11  ;;  %v6687_v11 = vld [vmem:[%s18640_s6 + $0x8f8] sm:$0xff]  ;;  %v10946_v14 = vpack.c.bf16 %v6477_v49, %v6473_v7  ;;  %v6505_v7 = vld [vmem:[%s18640_s6 + $0x348] sm:$0xff] }
 0x604   :  { %11421 = vmatpush1.bf16.msra.mxu0 %v11420_v55  ;;  %v6440_v55 = vld [vmem:[%s18640_s6 + $0x140] sm:$0xff]  ;;  %v6711_v5 = vld [vmem:[%s18640_s6 + $0x9b8] sm:$0xff]  ;;  %v6509_v49 = vld [vmem:[%s18640_s6 + $0x368] sm:$0xff] }
 0x605   :  { %10100 = vmatmul.mubr.msk.f32.vlgmr.msra.gmra.mrb[210].mxu1 %vm4815_vm6, %v15912_v45  ;;  %11423 = vmatprep.subr.bf16.mxu0 %v11422_v22  ;;  %v6647_v45 = vld [vmem:[%s18640_s6 + $0x7b8] sm:$0xff]  ;;  %v6444_v22 = vld [vmem:[%s18640_s6 + $0x160] sm:$0xff] }
 0x606   :  { %10913 = vmatpush1.bf16.msra.mxu1 %v10912_v44  ;;  %7289 = vmatprep.mubr.f32.mxu1 %v6388_v0  ;;  %v6425_v0 = vld [vmem:[%s18640_s6 + $0xc8] sm:$0xff]  ;;  %v11430_v2 = vpack.c.bf16 %v6647_v45, %v6643_v59  ;;  %v10936_v45 = vpack.c.bf16 %v6452_v13, %v6448_v16  ;;  %v6480_v16 = vld [vmem:[%s18640_s6 + $0x280] sm:$0xff] }
 0x607   :  { %10915 = vmatprep.subr.bf16.mxu1 %v10914_v52  ;;  %v10922_v18 = vpack.c.bf16 %v6429_v21, %v6425_v0  ;;  %v6453_v44 = vld [vmem:[%s18640_s6 + $0x1a8] sm:$0xff]  ;;  %v10932_v52 = vpack.c.bf16 %v6444_v22, %v6440_v55  ;;  %v6456_v0 = vld [vmem:[%s18640_s6 + $0x1c0] sm:$0xff]  ;;  %v11450_v22 = vpack.c.bf16 %v6687_v11, %v6683_v38  ;;  %v6715_v38 = vld [vmem:[%s18640_s6 + $0x9d8] sm:$0xff] }
 0x608   :  { %11425 = vmatpush1.bf16.msra.mxu0 %v11424_v47  ;;  %v10934_v3 = vpack.c.bf16 %v6453_v44, %v6449_v15  ;;  %v6457_v47 = vld [vmem:[%s18640_s6 + $0x1c8] sm:$0xff]  ;;  %v6460_v21 = vld [vmem:[%s18640_s6 + $0x1e0] sm:$0xff]  ;;  %v6682_v15 = vld [vmem:[%s18640_s6 + $0x8d0] sm:$0xff] }
 0x609   :  { %11427 = vmatprep.subr.bf16.mxu0 %v11426_v51  ;;  %v10938_v42 = vpack.c.bf16 %v6461_v46, %v6457_v47  ;;  %v10940_v40 = vpack.c.bf16 %v6460_v21, %v6456_v0  ;;  %v6686_v44 = vld [vmem:[%s18640_s6 + $0x8f0] sm:$0xff]  ;;  %v6484_v13 = vld [vmem:[%s18640_s6 + $0x2a0] sm:$0xff]  ;;  %v6493_v47 = vld [vmem:[%s18640_s6 + $0x2e8] sm:$0xff] }
 0x60a   :  { %10917 = vmatpush1.bf16.msra.mxu1 %v10916_v62  ;;  %v6662_v62 = vld [vmem:[%s18640_s6 + $0x830] sm:$0xff]  ;;  %v11452_v46 = vpack.c.bf16 %v6686_v44, %v6682_v15  ;;  %v6488_v0 = vld [vmem:[%s18640_s6 + $0x2c0] sm:$0xff]  ;;  %v6719_v11 = vld [vmem:[%s18640_s6 + $0x9f8] sm:$0xff] }
 0x60b   :  { %10919 = vmatprep.subr.bf16.mxu1 %v10918_v48  ;;  %v6667_v48 = vld [vmem:[%s18640_s6 + $0x858] sm:$0xff]  ;;  %v11440_v33 = vpack.c.bf16 %v6662_v62, %v6658_v53  ;;  %v6690_v53 = vld [vmem:[%s18640_s6 + $0x910] sm:$0xff]  ;;  %v6492_v21 = vld [vmem:[%s18640_s6 + $0x2e0] sm:$0xff] }
 0x60c   :  { %11429 = vmatpush1.bf16.msra.mxu0 %v11428_v61  ;;  %v11442_v12 = vpack.c.bf16 %v6671_v29, %v6667_v48  ;;  %v6694_v62 = vld [vmem:[%s18640_s6 + $0x930] sm:$0xff]  ;;  %v6699_v48 = vld [vmem:[%s18640_s6 + $0x958] sm:$0xff] }
 0x60d   :  { %11431 = vmatprep.subr.bf16.mxu0 %v11430_v2  ;;  %v6465_v2 = vld [vmem:[%s18640_s6 + $0x208] sm:$0xff]  ;;  %v6703_v29 = vld [vmem:[%s18640_s6 + $0x978] sm:$0xff]  ;;  %v6714_v15 = vld [vmem:[%s18640_s6 + $0x9d0] sm:$0xff] }
 0x60e   :  { %10921 = vmatpush1.bf16.msra.mxu1 %v10920_v30  ;;  %v10942_v4 = vpack.c.bf16 %v6469_v34, %v6465_v2  ;;  %v6497_v2 = vld [vmem:[%s18640_s6 + $0x308] sm:$0xff]  ;;  %v6718_v44 = vld [vmem:[%s18640_s6 + $0x9f0] sm:$0xff] }
 0x60f   :  { %10923 = vmatprep.subr.bf16.mxu1 %v10922_v18  ;;  %v6670_v18 = vld [vmem:[%s18640_s6 + $0x870] sm:$0xff]  ;;  %v6501_v34 = vld [vmem:[%s18640_s6 + $0x328] sm:$0xff] }
 0x610   :  { %v16537_v32 = vpop.f32.mrb[74].mxu0  ;;  %11433 = vmatpush1.bf16.msra.mxu0 %v11432_v27  ;;  %v6464_v27 = vld [vmem:[%s18640_s6 + $0x200] sm:$0xff] }
 0x611   :  { %v16545_v56 = vpop.f32.mrb[75].mxu0  ;;  %11435 = vmatprep.subr.bf16.mxu0 %v11434_v9  ;;  %v6468_v9 = vld [vmem:[%s18640_s6 + $0x220] sm:$0xff] }
 0x612   :  { %10925 = vmatpush1.bf16.msra.mxu1 %v10924_v63  ;;  %v11444_v63 = vpack.c.bf16 %v6670_v18, %v6666_v60  ;;  %v10944_v19 = vpack.c.bf16 %v6468_v9, %v6464_v27  ;;  %v6698_v60 = vld [vmem:[%s18640_s6 + $0x950] sm:$0xff]  ;;  %v6496_v27 = vld [vmem:[%s18640_s6 + $0x300] sm:$0xff] }
 0x613   :  { %10927 = vmatprep.subr.bf16.mxu1 %v10926_v58  ;;  %v6678_v58 = vld [vmem:[%s18640_s6 + $0x8b0] sm:$0xff]  ;;  %v6500_v9 = vld [vmem:[%s18640_s6 + $0x320] sm:$0xff] }
 0x614   :  { %11437 = vmatpush1.bf16.msra.mxu0 %v11436_v39  ;;  %v6472_v39 = vld [vmem:[%s18640_s6 + $0x240] sm:$0xff]  ;;  %v11448_v55 = vpack.c.bf16 %v6678_v58, %v6674_v20  ;;  %v6702_v18 = vld [vmem:[%s18640_s6 + $0x970] sm:$0xff] }
 0x615   :  { %11439 = vmatprep.subr.bf16.mxu0 %v11438_v37  ;;  %v6476_v37 = vld [vmem:[%s18640_s6 + $0x260] sm:$0xff]  ;;  %v6706_v20 = vld [vmem:[%s18640_s6 + $0x990] sm:$0xff] }
 0x616   :  { %10929 = vmatpush1.bf16.msra.mxu1 %v10928_v17  ;;  %v6481_v17 = vld [vmem:[%s18640_s6 + $0x288] sm:$0xff]  ;;  %v6710_v58 = vld [vmem:[%s18640_s6 + $0x9b0] sm:$0xff] }
 0x617   :  { %10931 = vmatprep.subr.bf16.mxu1 %v10930_v8  ;;  %v6485_v8 = vld [vmem:[%s18640_s6 + $0x2a8] sm:$0xff] }
 0x618   :  { %v5674_v35 = vpop.f32.mrb[200].mxu1 }
 0x619   :  { %v16581_v51 = vadd.f32 %v5674_v35, %v5338_v6  ;;  %v5676_v36 = vpop.f32.mrb[201].mxu1  ;;  %v10948_v6 = vpack.c.bf16 %v6476_v37, %v6472_v39  ;;  %v6489_v35 = vld [vmem:[%s18640_s6 + $0x2c8] sm:$0xff]  ;;  %v6504_v39 = vld [vmem:[%s18640_s6 + $0x340] sm:$0xff] }
 0x61a   :  { %v16589_v59 = vadd.f32 %v5676_v36, %v5342_v25  ;;  %10933 = vmatpush1.bf16.msra.mxu1 %v10932_v52  ;;  %v6691_v25 = vld [vmem:[%s18640_s6 + $0x918] sm:$0xff]  ;;  %v6508_v37 = vld [vmem:[%s18640_s6 + $0x360] sm:$0xff] }
 0x61b   :  { %10935 = vmatprep.subr.bf16.mxu1 %v10934_v3  ;;  %v6389_v30 = vmax.f32 %v16581_v51, 0.0  ;;  %v6695_v52 = vld [vmem:[%s18640_s6 + $0x938] sm:$0xff]  ;;  %v10950_v3 = vpack.c.bf16 %v6485_v8, %v6481_v17  ;;  %v6513_v17 = vld [vmem:[%s18640_s6 + $0x388] sm:$0xff] }
 0x61c   :  { %v6390_v61 = vmax.f32 %v16589_v59, 0.0  ;;  %v11454_v36 = vpack.c.bf16 %v6695_v52, %v6691_v25  ;;  %v6517_v8 = vld [vmem:[%s18640_s6 + $0x3a8] sm:$0xff]  ;;  %v6723_v25 = vld [vmem:[%s18640_s6 + $0xa18] sm:$0xff]  ;;  %v6548_v59 = vld [vmem:[%s18640_s6 + $0x4a0] sm:$0xff] }
 0x61d   :  { %v6727_v52 = vld [vmem:[%s18640_s6 + $0xa38] sm:$0xff] }
 0x61e   :  { %10937 = vmatpush1.bf16.msra.mxu1 %v10936_v45  ;;  %7857 = vmatprep.mubr.f32.mxu0 %v6390_v61  ;;  %v10952_v45 = vpack.c.bf16 %v6484_v13, %v6480_v16  ;;  %v6512_v16 = vld [vmem:[%s18640_s6 + $0x380] sm:$0xff]  ;;  %v6867_v51 = vld [vmem:[%s18640_s6 + $0xe98] sm:$0xff] }
 0x61f   :  { %7858 = vmatmul.mubr.f32.vlgmr.msra.gmra.mrb[76].mxu0 %v6389_v30  ;;  %10939 = vmatprep.subr.bf16.mxu1 %v10938_v42  ;;  %v10954_v42 = vpack.c.bf16 %v6493_v47, %v6489_v35  ;;  %v6516_v13 = vld [vmem:[%s18640_s6 + $0x3a0] sm:$0xff]  ;;  %v6521_v35 = vld [vmem:[%s18640_s6 + $0x3c8] sm:$0xff] }
 0x620   :  { %11441 = vmatpush1.bf16.msra.mxu0 %v11440_v33  ;;  %v11456_v33 = vpack.c.bf16 %v6694_v62, %v6690_v53  ;;  %v6525_v47 = vld [vmem:[%s18640_s6 + $0x3e8] sm:$0xff]  ;;  %v6722_v53 = vld [vmem:[%s18640_s6 + $0xa10] sm:$0xff] }
 0x621   :  { %11443 = vmatprep.subr.bf16.mxu0 %v11442_v12  ;;  %v11458_v12 = vpack.c.bf16 %v6703_v29, %v6699_v48  ;;  %v6726_v62 = vld [vmem:[%s18640_s6 + $0xa30] sm:$0xff]  ;;  %v6731_v48 = vld [vmem:[%s18640_s6 + $0xa58] sm:$0xff] }
 0x622   :  { %10941 = vmatpush1.bf16.msra.mxu1 %v10940_v40  ;;  %v10956_v40 = vpack.c.bf16 %v6492_v21, %v6488_v0  ;;  %v6735_v29 = vld [vmem:[%s18640_s6 + $0xa78] sm:$0xff]  ;;  %v6520_v0 = vld [vmem:[%s18640_s6 + $0x3c0] sm:$0xff] }
 0x623   :  { %10943 = vmatprep.subr.bf16.mxu1 %v10942_v4  ;;  %v10958_v4 = vpack.c.bf16 %v6501_v34, %v6497_v2  ;;  %v6524_v21 = vld [vmem:[%s18640_s6 + $0x3e0] sm:$0xff]  ;;  %v6529_v2 = vld [vmem:[%s18640_s6 + $0x408] sm:$0xff] }
 0x624   :  { %11445 = vmatpush1.bf16.msra.mxu0 %v11444_v63  ;;  %v11460_v63 = vpack.c.bf16 %v6702_v18, %v6698_v60  ;;  %v6533_v34 = vld [vmem:[%s18640_s6 + $0x428] sm:$0xff]  ;;  %v6730_v60 = vld [vmem:[%s18640_s6 + $0xa50] sm:$0xff] }
 0x625   :  { %11447 = vmatprep.subr.bf16.mxu0 %v11446_v50  ;;  %v11462_v50 = vpack.c.bf16 %v6711_v5, %v6707_v28  ;;  %v6734_v18 = vld [vmem:[%s18640_s6 + $0xa70] sm:$0xff]  ;;  %v6739_v28 = vld [vmem:[%s18640_s6 + $0xa98] sm:$0xff] }
 0x626   :  { %10945 = vmatpush1.bf16.msra.mxu1 %v10944_v19  ;;  %v10960_v19 = vpack.c.bf16 %v6500_v9, %v6496_v27  ;;  %v6743_v5 = vld [vmem:[%s18640_s6 + $0xab8] sm:$0xff]  ;;  %v6528_v27 = vld [vmem:[%s18640_s6 + $0x400] sm:$0xff] }
 0x627   :  { %10947 = vmatprep.subr.bf16.mxu1 %v10946_v14  ;;  %v10962_v14 = vpack.c.bf16 %v6509_v49, %v6505_v7  ;;  %v6532_v9 = vld [vmem:[%s18640_s6 + $0x420] sm:$0xff]  ;;  %v6537_v7 = vld [vmem:[%s18640_s6 + $0x448] sm:$0xff] }
 0x628   :  { %11449 = vmatpush1.bf16.msra.mxu0 %v11448_v55  ;;  %v11464_v55 = vpack.c.bf16 %v6710_v58, %v6706_v20  ;;  %v6541_v49 = vld [vmem:[%s18640_s6 + $0x468] sm:$0xff]  ;;  %v6738_v20 = vld [vmem:[%s18640_s6 + $0xa90] sm:$0xff] }
 0x629   :  { %11451 = vmatprep.subr.bf16.mxu0 %v11450_v22  ;;  %v11466_v22 = vpack.c.bf16 %v6719_v11, %v6715_v38  ;;  %v6742_v58 = vld [vmem:[%s18640_s6 + $0xab0] sm:$0xff]  ;;  %v6747_v38 = vld [vmem:[%s18640_s6 + $0xad8] sm:$0xff] }
 0x62a   :  { %10949 = vmatpush1.bf16.msra.mxu1 %v10948_v6  ;;  %v10964_v6 = vpack.c.bf16 %v6508_v37, %v6504_v39  ;;  %v6751_v11 = vld [vmem:[%s18640_s6 + $0xaf8] sm:$0xff]  ;;  %v6536_v39 = vld [vmem:[%s18640_s6 + $0x440] sm:$0xff] }
 0x62b   :  { %10951 = vmatprep.subr.bf16.mxu1 %v10950_v3  ;;  %v10966_v3 = vpack.c.bf16 %v6517_v8, %v6513_v17  ;;  %v6540_v37 = vld [vmem:[%s18640_s6 + $0x460] sm:$0xff]  ;;  %v6545_v17 = vld [vmem:[%s18640_s6 + $0x488] sm:$0xff] }
 0x62c   :  { %11453 = vmatpush1.bf16.msra.mxu0 %v11452_v46  ;;  %v11468_v46 = vpack.c.bf16 %v6718_v44, %v6714_v15  ;;  %v6549_v8 = vld [vmem:[%s18640_s6 + $0x4a8] sm:$0xff]  ;;  %v6746_v15 = vld [vmem:[%s18640_s6 + $0xad0] sm:$0xff] }
 0x62d   :  { %11455 = vmatprep.subr.bf16.mxu0 %v11454_v36  ;;  %v11470_v36 = vpack.c.bf16 %v6727_v52, %v6723_v25  ;;  %v6750_v44 = vld [vmem:[%s18640_s6 + $0xaf0] sm:$0xff]  ;;  %v10982_v25 = vpack.c.bf16 %v6549_v8, %v6545_v17  ;;  %v6544_v52 = vld [vmem:[%s18640_s6 + $0x480] sm:$0xff] }
 0x62e   :  { %10953 = vmatpush1.bf16.msra.mxu1 %v10952_v45  ;;  %v10968_v45 = vpack.c.bf16 %v6516_v13, %v6512_v16  ;;  %v11484_v16 = vpack.c.bf16 %v6750_v44, %v6746_v15  ;;  %v6778_v17 = vld [vmem:[%s18640_s6 + $0xbd0] sm:$0xff]  ;;  %v6791_v15 = vld [vmem:[%s18640_s6 + $0xc38] sm:$0xff] }
 0x62f   :  { %10955 = vmatprep.subr.bf16.mxu1 %v10954_v42  ;;  %v10970_v42 = vpack.c.bf16 %v6525_v47, %v6521_v35  ;;  %v6754_v35 = vld [vmem:[%s18640_s6 + $0xb10] sm:$0xff] }
 0x630   :  { %11457 = vmatpush1.bf16.msra.mxu0 %v11456_v33  ;;  %v11472_v33 = vpack.c.bf16 %v6726_v62, %v6722_v53  ;;  %v6758_v47 = vld [vmem:[%s18640_s6 + $0xb30] sm:$0xff]  ;;  %v6767_v53 = vld [vmem:[%s18640_s6 + $0xb78] sm:$0xff] }
 0x631   :  { %11459 = vmatprep.subr.bf16.mxu0 %v11458_v12  ;;  %v11474_v12 = vpack.c.bf16 %v6735_v29, %v6731_v48  ;;  %v6556_v48 = vld [vmem:[%s18640_s6 + $0x4e0] sm:$0xff]  ;;  %v6561_v29 = vld [vmem:[%s18640_s6 + $0x508] sm:$0xff]  ;;  %v6782_v8 = vld [vmem:[%s18640_s6 + $0xbf0] sm:$0xff] }
 0x632   :  { %10957 = vmatpush1.bf16.msra.mxu1 %v10956_v40  ;;  %v10972_v40 = vpack.c.bf16 %v6524_v21, %v6520_v0  ;;  %v11488_v0 = vpack.c.bf16 %v6758_v47, %v6754_v35  ;;  %v6584_v35 = vld [vmem:[%s18640_s6 + $0x5c0] sm:$0xff] }
 0x633   :  { %10959 = vmatprep.subr.bf16.mxu1 %v10958_v4  ;;  %v10974_v4 = vpack.c.bf16 %v6533_v34, %v6529_v2  ;;  %v6762_v2 = vld [vmem:[%s18640_s6 + $0xb50] sm:$0xff]  ;;  %v6588_v47 = vld [vmem:[%s18640_s6 + $0x5e0] sm:$0xff] }
 0x634   :  { %11461 = vmatpush1.bf16.msra.mxu0 %v11460_v63  ;;  %v11476_v63 = vpack.c.bf16 %v6734_v18, %v6730_v60  ;;  %v6766_v34 = vld [vmem:[%s18640_s6 + $0xb70] sm:$0xff]  ;;  %v6775_v60 = vld [vmem:[%s18640_s6 + $0xbb8] sm:$0xff] }
 0x635   :  { %11463 = vmatprep.subr.bf16.mxu0 %v11462_v50  ;;  %v11478_v50 = vpack.c.bf16 %v6743_v5, %v6739_v28  ;;  %v6564_v28 = vld [vmem:[%s18640_s6 + $0x520] sm:$0xff]  ;;  %v6569_v5 = vld [vmem:[%s18640_s6 + $0x548] sm:$0xff] }
 0x636   :  { %10961 = vmatpush1.bf16.msra.mxu1 %v10960_v19  ;;  %v10976_v19 = vpack.c.bf16 %v6532_v9, %v6528_v27  ;;  %v11492_v27 = vpack.c.bf16 %v6766_v34, %v6762_v2  ;;  %v5357_v2 = vsub.s32 7, %v16090_v24 }
 0x637   :  { %10963 = vmatprep.subr.bf16.mxu1 %v10962_v14  ;;  %v10978_v14 = vpack.c.bf16 %v6541_v49, %v6537_v7  ;;  %v6770_v7 = vld [vmem:[%s18640_s6 + $0xb90] sm:$0xff] }
 0x638   :  { %11465 = vmatpush1.bf16.msra.mxu0 %v11464_v55  ;;  %v11480_v55 = vpack.c.bf16 %v6742_v58, %v6738_v20  ;;  %v6774_v49 = vld [vmem:[%s18640_s6 + $0xbb0] sm:$0xff]  ;;  %v6783_v20 = vld [vmem:[%s18640_s6 + $0xbf8] sm:$0xff] }
 0x639   :  { %11467 = vmatprep.subr.bf16.mxu0 %v11466_v22  ;;  %v11482_v22 = vpack.c.bf16 %v6751_v11, %v6747_v38  ;;  %v6572_v38 = vld [vmem:[%s18640_s6 + $0x560] sm:$0xff]  ;;  %v6577_v11 = vld [vmem:[%s18640_s6 + $0x588] sm:$0xff] }
 0x63a   :  { %10965 = vmatpush1.bf16.msra.mxu1 %v10964_v6  ;;  %v10980_v6 = vpack.c.bf16 %v6540_v37, %v6536_v39  ;;  %v11496_v39 = vpack.c.bf16 %v6774_v49, %v6770_v7 }
 0x63b   :  { %10967 = vmatprep.subr.bf16.mxu1 %v10966_v3  ;;  %v6557_v3 = vld [vmem:[%s18640_s6 + $0x4e8] sm:$0xff] }
 0x63c   :  { %11469 = vmatpush1.bf16.msra.mxu0 %v11468_v46  ;;  %v10984_v46 = vpack.c.bf16 %v6548_v59, %v6544_v52  ;;  %v11500_v52 = vpack.c.bf16 %v6782_v8, %v6778_v17  ;;  %v5345_v59 = vsub.s32 4, %v16090_v24  ;;  %v6798_v17 = vld [vmem:[%s18640_s6 + $0xc70] sm:$0xff] }
 0x63d   :  { %11471 = vmatprep.subr.bf16.mxu0 %v11470_v36  ;;  %v6763_v36 = vld [vmem:[%s18640_s6 + $0xb58] sm:$0xff] }
 0x63e   :  { %10969 = vmatpush1.bf16.msra.mxu1 %v10968_v45  ;;  %v6552_v45 = vld [vmem:[%s18640_s6 + $0x4c0] sm:$0xff]  ;;  %v11490_v21 = vpack.c.bf16 %v6767_v53, %v6763_v36  ;;  %v6597_v36 = vld [vmem:[%s18640_s6 + $0x628] sm:$0xff] }
 0x63f   :  { %10971 = vmatprep.subr.bf16.mxu1 %v10970_v42  ;;  %v6565_v42 = vld [vmem:[%s18640_s6 + $0x528] sm:$0xff]  ;;  %v11776_v53 = vld [vmem:[%s18641_s5] sm:$0xff] }
 0x640   :  { %11473 = vmatpush1.bf16.msra.mxu0 %v11472_v33  ;;  %v10988_v33 = vpack.c.bf16 %v6556_v48, %v6552_v45  ;;  %v10990_v18 = vpack.c.bf16 %v6565_v42, %v6561_v29  ;;  %v11004_v48 = vpack.c.bf16 %v6588_v47, %v6584_v35  ;;  %v5353_v29 = vsub.s32 6, %v16090_v24  ;;  %v6806_v35 = vld [vmem:[%s18640_s6 + $0xcb0] sm:$0xff] }
 0x641   :  { %11475 = vmatprep.subr.bf16.mxu0 %v11474_v12  ;;  %v6771_v12 = vld [vmem:[%s18640_s6 + $0xb98] sm:$0xff] }
 0x642   :  { %10973 = vmatpush1.bf16.msra.mxu1 %v10972_v40  ;;  %v6560_v40 = vld [vmem:[%s18640_s6 + $0x500] sm:$0xff]  ;;  %v11494_v9 = vpack.c.bf16 %v6775_v60, %v6771_v12  ;;  %v6605_v12 = vld [vmem:[%s18640_s6 + $0x668] sm:$0xff]  ;;  %v5354_v7 = vrot.slane %v11776_v53, %v5353_v29 }
 0x643   :  { %10975 = vmatprep.subr.bf16.mxu1 %v10974_v4  ;;  %v6573_v4 = vld [vmem:[%s18640_s6 + $0x568] sm:$0xff] }
 0x644   :  { %11477 = vmatpush1.bf16.msra.mxu0 %v11476_v63  ;;  %v10992_v63 = vpack.c.bf16 %v6564_v28, %v6560_v40  ;;  %v10994_v58 = vpack.c.bf16 %v6573_v4, %v6569_v5  ;;  %v6786_v40 = vld [vmem:[%s18640_s6 + $0xc10] sm:$0xff] }
 0x645   :  { %7290 = vmatmul.mubr.f32.vlgmr.msra.gmra.mrb[212].mxu1 %v6387_v57  ;;  %11479 = vmatprep.subr.bf16.mxu0 %v11478_v50  ;;  %v6759_v57 = vld [vmem:[%s18640_s6 + $0xb38] sm:$0xff]  ;;  %v6790_v28 = vld [vmem:[%s18640_s6 + $0xc30] sm:$0xff] }
 0x646   :  { %10977 = vmatpush1.bf16.msra.mxu1 %v10976_v19  ;;  %7360 = vmatprep.mubr.f32.mxu1 %v6390_v61  ;;  %v6553_v61 = vld [vmem:[%s18640_s6 + $0x4c8] sm:$0xff]  ;;  %v11486_v13 = vpack.c.bf16 %v6759_v57, %v6755_v1  ;;  %v6779_v50 = vld [vmem:[%s18640_s6 + $0xbd8] sm:$0xff]  ;;  %v6568_v19 = vld [vmem:[%s18640_s6 + $0x540] sm:$0xff] }
 0x647   :  { %10979 = vmatprep.subr.bf16.mxu1 %v10978_v14  ;;  %v10986_v62 = vpack.c.bf16 %v6557_v3, %v6553_v61  ;;  %v6581_v14 = vld [vmem:[%s18640_s6 + $0x5a8] sm:$0xff]  ;;  %v11498_v37 = vpack.c.bf16 %v6783_v20, %v6779_v50  ;;  %v6580_v1 = vld [vmem:[%s18640_s6 + $0x5a0] sm:$0xff]  ;;  %v5358_v20 = vrot.slane %v11776_v53, %v5357_v2 }
 0x648   :  { %11481 = vmatpush1.bf16.msra.mxu0 %v11480_v55  ;;  %v10996_v55 = vpack.c.bf16 %v6572_v38, %v6568_v19  ;;  %v10998_v44 = vpack.c.bf16 %v6581_v14, %v6577_v11  ;;  %v6585_v57 = vld [vmem:[%s18640_s6 + $0x5c8] sm:$0xff]  ;;  %v6604_v50 = vld [vmem:[%s18640_s6 + $0x660] sm:$0xff]  ;;  %v11504_v19 = vpack.c.bf16 %v6790_v28, %v6786_v40  ;;  %v6823_v40 = vld [vmem:[%s18640_s6 + $0xd38] sm:$0xff] }
 0x649   :  { %11483 = vmatprep.subr.bf16.mxu0 %v11482_v22  ;;  %v6787_v22 = vld [vmem:[%s18640_s6 + $0xc18] sm:$0xff]  ;;  %v6609_v38 = vld [vmem:[%s18640_s6 + $0x688] sm:$0xff] }
 0x64a   :  { %10981 = vmatpush1.bf16.msra.mxu1 %v10980_v6  ;;  %v6576_v6 = vld [vmem:[%s18640_s6 + $0x580] sm:$0xff]  ;;  %v11502_v61 = vpack.c.bf16 %v6791_v15, %v6787_v22  ;;  %v6613_v11 = vld [vmem:[%s18640_s6 + $0x6a8] sm:$0xff]  ;;  %v6807_v22 = vld [vmem:[%s18640_s6 + $0xcb8] sm:$0xff]  ;;  %v5888_v15 = vadd.f32 %v16098_v31, %v5354_v7 }
 0x64b   :  { %10983 = vmatprep.subr.bf16.mxu1 %v10982_v25  ;;  %v6589_v25 = vld [vmem:[%s18640_s6 + $0x5e8] sm:$0xff]  ;;  %v11000_v3 = vpack.c.bf16 %v6580_v1, %v6576_v6  ;;  %v6608_v6 = vld [vmem:[%s18640_s6 + $0x680] sm:$0xff] }
 0x64c   :  { %11485 = vmatpush1.bf16.msra.mxu0 %v11484_v16  ;;  %v5349_v16 = vsub.s32 5, %v16090_v24  ;;  %v6612_v1 = vld [vmem:[%s18640_s6 + $0x6a0] sm:$0xff]  ;;  %v6617_v31 = vld [vmem:[%s18640_s6 + $0x6c8] sm:$0xff] }
 0x64d   :  { %11487 = vmatprep.subr.bf16.mxu0 %v11486_v13  ;;  %v11002_v13 = vpack.c.bf16 %v6589_v25, %v6585_v57  ;;  %v5890_v57 = vadd.f32 %v16106_v23, %v5358_v20  ;;  %v6802_v23 = vld [vmem:[%s18640_s6 + $0xc90] sm:$0xff]  ;;  %v6633_v7 = vld [vmem:[%s18640_s6 + $0x748] sm:$0xff] }
 0x64e   :  { %10985 = vmatpush1.bf16.msra.mxu1 %v10984_v46  ;;  %v6593_v46 = vld [vmem:[%s18640_s6 + $0x608] sm:$0xff]  ;;  %v5350_v45 = vrot.slane %v11776_v53, %v5349_v16  ;;  %v6822_v20 = vld [vmem:[%s18640_s6 + $0xd30] sm:$0xff] }
 0x64f   :  { %10987 = vmatprep.subr.bf16.mxu1 %v10986_v62  ;;  %v5346_v62 = vrot.slane %v11776_v53, %v5345_v59  ;;  %v11006_v42 = vpack.c.bf16 %v6597_v36, %v6593_v46  ;;  %v11016_v46 = vpack.c.bf16 %v6612_v1, %v6608_v6  ;;  %v6811_v36 = vld [vmem:[%s18640_s6 + $0xcd8] sm:$0xff]  ;;  %v6830_v6 = vld [vmem:[%s18640_s6 + $0xd70] sm:$0xff]  ;;  %v6837_v24 = vld [vmem:[%s18640_s6 + $0xda8] sm:$0xff] }
 0x650   :  { %11489 = vmatpush1.bf16.msra.mxu0 %v11488_v0  ;;  %v6592_v0 = vld [vmem:[%s18640_s6 + $0x600] sm:$0xff]  ;;  %v6815_v53 = vld [vmem:[%s18640_s6 + $0xcf8] sm:$0xff] }
 0x651   :  { %11491 = vmatprep.subr.bf16.mxu0 %v11490_v21  ;;  %v6596_v21 = vld [vmem:[%s18640_s6 + $0x620] sm:$0xff]  ;;  %v11514_v2 = vpack.c.bf16 %v6815_v53, %v6811_v36  ;;  %v6838_v36 = vld [vmem:[%s18640_s6 + $0xdb0] sm:$0xff] }
 0x652   :  { %10989 = vmatpush1.bf16.msra.mxu1 %v10988_v33  ;;  %v6601_v33 = vld [vmem:[%s18640_s6 + $0x648] sm:$0xff]  ;;  %v11008_v4 = vpack.c.bf16 %v6596_v21, %v6592_v0 }
 0x653   :  { %10991 = vmatprep.subr.bf16.mxu1 %v10990_v18  ;;  %v11010_v49 = vpack.c.bf16 %v6605_v12, %v6601_v33  ;;  %v6625_v0 = vld [vmem:[%s18640_s6 + $0x708] sm:$0xff]  ;;  %v6814_v33 = vld [vmem:[%s18640_s6 + $0xcf0] sm:$0xff] }
 0x654   :  { %11493 = vmatpush1.bf16.msra.mxu0 %v11492_v27  ;;  %v6795_v27 = vld [vmem:[%s18640_s6 + $0xc58] sm:$0xff]  ;;  %v6629_v21 = vld [vmem:[%s18640_s6 + $0x728] sm:$0xff] }
 0x655   :  { %11495 = vmatprep.subr.bf16.mxu0 %v11494_v9  ;;  %v6799_v9 = vld [vmem:[%s18640_s6 + $0xc78] sm:$0xff]  ;;  %v11022_v28 = vpack.c.bf16 %v6629_v21, %v6625_v0  ;;  %v6652_v0 = vld [vmem:[%s18640_s6 + $0x7e0] sm:$0xff] }
 0x656   :  { %10993 = vmatpush1.bf16.msra.mxu1 %v10992_v63  ;;  %v6600_v63 = vld [vmem:[%s18640_s6 + $0x640] sm:$0xff] }
 0x657   :  { %10995 = vmatprep.subr.bf16.mxu1 %v10994_v58  ;;  %v11012_v8 = vpack.c.bf16 %v6604_v50, %v6600_v63  ;;  %v6818_v50 = vld [vmem:[%s18640_s6 + $0xd10] sm:$0xff] }
 0x658   :  { %11497 = vmatpush1.bf16.msra.mxu0 %v11496_v39  ;;  %v11506_v39 = vpack.c.bf16 %v6799_v9, %v6795_v27  ;;  %v6628_v27 = vld [vmem:[%s18640_s6 + $0x720] sm:$0xff] }
 0x659   :  { %11499 = vmatprep.subr.bf16.mxu0 %v11498_v37  ;;  %v6794_v37 = vld [vmem:[%s18640_s6 + $0xc50] sm:$0xff] }
 0x65a   :  { %10997 = vmatpush1.bf16.msra.mxu1 %v10996_v55  ;;  %v6803_v55 = vld [vmem:[%s18640_s6 + $0xc98] sm:$0xff] }
 0x65b   :  { %10999 = vmatprep.subr.bf16.mxu1 %v10998_v44  ;;  %v11014_v44 = vpack.c.bf16 %v6613_v11, %v6609_v38  ;;  %v6827_v38 = vld [vmem:[%s18640_s6 + $0xd58] sm:$0xff] }
 0x65c   :  { %11501 = vmatpush1.bf16.msra.mxu0 %v11500_v52  ;;  %v11508_v52 = vpack.c.bf16 %v6798_v17, %v6794_v37  ;;  %v6831_v11 = vld [vmem:[%s18640_s6 + $0xd78] sm:$0xff]  ;;  %v6632_v37 = vld [vmem:[%s18640_s6 + $0x740] sm:$0xff] }
 0x65d   :  { %11503 = vmatprep.subr.bf16.mxu0 %v11502_v61  ;;  %v6621_v61 = vld [vmem:[%s18640_s6 + $0x6e8] sm:$0xff]  ;;  %v6636_v17 = vld [vmem:[%s18640_s6 + $0x760] sm:$0xff] }
 0x65e   :  { %11001 = vmatpush1.bf16.msra.mxu1 %v11000_v3  ;;  %v11028_v1 = vpack.c.bf16 %v6636_v17, %v6632_v37  ;;  %v6863_v37 = vld [vmem:[%s18640_s6 + $0xe78] sm:$0xff] }
 0x65f   :  { %11003 = vmatprep.subr.bf16.mxu1 %v11002_v13  ;;  %v11510_v13 = vpack.c.bf16 %v6807_v22, %v6803_v55  ;;  %v6641_v55 = vld [vmem:[%s18640_s6 + $0x788] sm:$0xff] }
 0x660   :  { %v5816_v34 = vpop.f32.mrb[202].mxu1  ;;  %v6645_v22 = vld [vmem:[%s18640_s6 + $0x7a8] sm:$0xff] }
 0x661   :  { %v17012_v60 = vadd.f32 %v5816_v34, %v5346_v62  ;;  %v5818_v18 = vpop.f32.mrb[203].mxu1  ;;  %v11018_v62 = vpack.c.bf16 %v6621_v61, %v6617_v31  ;;  %v6810_v34 = vld [vmem:[%s18640_s6 + $0xcd0] sm:$0xff]  ;;  %v6640_v31 = vld [vmem:[%s18640_s6 + $0x780] sm:$0xff] }
 0x662   :  { %v17020_v5 = vadd.f32 %v5818_v18, %v5350_v45  ;;  %11005 = vmatpush1.bf16.msra.mxu1 %v11004_v48  ;;  %v6616_v45 = vld [vmem:[%s18640_s6 + $0x6c0] sm:$0xff]  ;;  %v6819_v18 = vld [vmem:[%s18640_s6 + $0xd18] sm:$0xff]  ;;  %v11516_v9 = vpack.c.bf16 %v6814_v33, %v6810_v34  ;;  %v6661_v34 = vld [vmem:[%s18640_s6 + $0x828] sm:$0xff] }
 0x663   :  { %11007 = vmatprep.subr.bf16.mxu1 %v11006_v42  ;;  %v6391_v14 = vmax.f32 %v17012_v60, 0.0  ;;  %v6620_v48 = vld [vmem:[%s18640_s6 + $0x6e0] sm:$0xff]  ;;  %v11512_v42 = vpack.c.bf16 %v6806_v35, %v6802_v23  ;;  %v11518_v63 = vpack.c.bf16 %v6823_v40, %v6819_v18  ;;  %v6653_v23 = vld [vmem:[%s18640_s6 + $0x7e8] sm:$0xff]  ;;  %v6846_v18 = vld [vmem:[%s18640_s6 + $0xdf0] sm:$0xff] }
 0x664   :  { %v6392_v58 = vmax.f32 %v17020_v5, 0.0  ;;  %v11020_v12 = vpack.c.bf16 %v6620_v48, %v6616_v45  ;;  %v6644_v61 = vld [vmem:[%s18640_s6 + $0x7a0] sm:$0xff]  ;;  %v6847_v45 = vld [vmem:[%s18640_s6 + $0xdf8] sm:$0xff] }
 0x665   :  { %v11032_v53 = vpack.c.bf16 %v6644_v61, %v6640_v31  ;;  %v6672_v31 = vld [vmem:[%s18640_s6 + $0x880] sm:$0xff]  ;;  %v6681_v61 = vld [vmem:[%s18640_s6 + $0x8c8] sm:$0xff]  ;;  %v6995_v60 = vld [vmem:[%s18640_s6 + $0x1298] sm:$0xff] }
 0x666   :  { %11009 = vmatpush1.bf16.msra.mxu1 %v11008_v4  ;;  %7928 = vmatprep.mubr.f32.mxu0 %v6392_v58  ;;  %v6624_v4 = vld [vmem:[%s18640_s6 + $0x700] sm:$0xff] }
 0x667   :  { %7929 = vmatmul.mubr.f32.vlgmr.msra.gmra.mrb[76].mxu0 %v6391_v14  ;;  %11011 = vmatprep.subr.bf16.mxu1 %v11010_v49  ;;  %v6637_v49 = vld [vmem:[%s18640_s6 + $0x768] sm:$0xff]  ;;  %v6676_v5 = vld [vmem:[%s18640_s6 + $0x8a0] sm:$0xff] }
 0x668   :  { %11505 = vmatpush1.bf16.msra.mxu0 %v11504_v19  ;;  %v5958_v25 = vpop.f32.mrb[204].mxu1  ;;  %v11024_v19 = vpack.c.bf16 %v6628_v27, %v6624_v4  ;;  %v6855_v4 = vld [vmem:[%s18640_s6 + $0xe38] sm:$0xff] }
 0x669   :  { %v17072_v3 = vadd.f32 %v5958_v25, %v5888_v15  ;;  %v5960_v16 = vpop.f32.mrb[205].mxu1  ;;  %11507 = vmatprep.subr.bf16.mxu0 %v11506_v39  ;;  %v11026_v39 = vpack.c.bf16 %v6637_v49, %v6633_v7  ;;  %v11522_v15 = vpack.c.bf16 %v6831_v11, %v6827_v38  ;;  %v6839_v25 = vld [vmem:[%s18640_s6 + $0xdb8] sm:$0xff]  ;;  %v6660_v7 = vld [vmem:[%s18640_s6 + $0x820] sm:$0xff]  ;;  %v6854_v38 = vld [vmem:[%s18640_s6 + $0xe30] sm:$0xff] }
 0x66a   :  { %v17080_v47 = vadd.f32 %v5960_v16, %v5890_v57  ;;  %11013 = vmatpush1.bf16.msra.mxu1 %v11012_v8  ;;  %v11520_v8 = vpack.c.bf16 %v6822_v20, %v6818_v50  ;;  %v6835_v57 = vld [vmem:[%s18640_s6 + $0xd98] sm:$0xff]  ;;  %v6669_v50 = vld [vmem:[%s18640_s6 + $0x868] sm:$0xff] }
 0x66b   :  { %11015 = vmatprep.subr.bf16.mxu1 %v11014_v44  ;;  %v6826_v44 = vld [vmem:[%s18640_s6 + $0xd50] sm:$0xff]  ;;  %v11526_v35 = vpack.c.bf16 %v6839_v25, %v6835_v57 }
 0x66c   :  { %v6394_v29 = vmax.f32 %v17080_v47, 0.0  ;;  %11509 = vmatpush1.bf16.msra.mxu0 %v11508_v52  ;;  %v11030_v52 = vpack.c.bf16 %v6645_v22, %v6641_v55  ;;  %v11524_v16 = vpack.c.bf16 %v6830_v6, %v6826_v44  ;;  %v6668_v55 = vld [vmem:[%s18640_s6 + $0x860] sm:$0xff]  ;;  %v6677_v44 = vld [vmem:[%s18640_s6 + $0x8a8] sm:$0xff]  ;;  %v6862_v57 = vld [vmem:[%s18640_s6 + $0xe70] sm:$0xff] }
 0x66d   :  { %11511 = vmatprep.subr.bf16.mxu0 %v11510_v13  ;;  %v6649_v13 = vld [vmem:[%s18640_s6 + $0x7c8] sm:$0xff]  ;;  %v6804_v47 = vld [vmem:[%s18640_s6 + $0xca0] sm:$0xff] }
 0x66e   :  { %11017 = vmatpush1.bf16.msra.mxu1 %v11016_v46  ;;  %7999 = vmatprep.mubr.f32.mxu0 %v6394_v29  ;;  %v6834_v46 = vld [vmem:[%s18640_s6 + $0xd90] sm:$0xff]  ;;  %v11034_v48 = vpack.c.bf16 %v6653_v23, %v6649_v13 }
 0x66f   :  { %11019 = vmatprep.subr.bf16.mxu1 %v11018_v62  ;;  %v6843_v62 = vld [vmem:[%s18640_s6 + $0xdd8] sm:$0xff]  ;;  %v11528_v21 = vpack.c.bf16 %v6838_v36, %v6834_v46  ;;  %v6866_v23 = vld [vmem:[%s18640_s6 + $0xe90] sm:$0xff]  ;;  %v11048_v46 = vpack.c.bf16 %v6676_v5, %v6672_v31  ;;  %v6713_v5 = vld [vmem:[%s18640_s6 + $0x9c8] sm:$0xff] }
 0x670   :  { %11513 = vmatpush1.bf16.msra.mxu0 %v11512_v42  ;;  %v6648_v42 = vld [vmem:[%s18640_s6 + $0x7c0] sm:$0xff]  ;;  %v11530_v33 = vpack.c.bf16 %v6847_v45, %v6843_v62  ;;  %v6875_v36 = vld [vmem:[%s18640_s6 + $0xed8] sm:$0xff] }
 0x671   :  { %11515 = vmatprep.subr.bf16.mxu0 %v11514_v2  ;;  %v6657_v2 = vld [vmem:[%s18640_s6 + $0x808] sm:$0xff]  ;;  %v11036_v40 = vpack.c.bf16 %v6652_v0, %v6648_v42  ;;  %v6680_v45 = vld [vmem:[%s18640_s6 + $0x8c0] sm:$0xff] }
 0x672   :  { %11021 = vmatpush1.bf16.msra.mxu1 %v11020_v12  ;;  %v6842_v12 = vld [vmem:[%s18640_s6 + $0xdd0] sm:$0xff]  ;;  %v11038_v27 = vpack.c.bf16 %v6661_v34, %v6657_v2  ;;  %v6689_v0 = vld [vmem:[%s18640_s6 + $0x908] sm:$0xff] }
 0x673   :  { %11023 = vmatprep.subr.bf16.mxu1 %v11022_v28  ;;  %v6851_v28 = vld [vmem:[%s18640_s6 + $0xe18] sm:$0xff]  ;;  %v11532_v49 = vpack.c.bf16 %v6846_v18, %v6842_v12  ;;  %v6874_v34 = vld [vmem:[%s18640_s6 + $0xed0] sm:$0xff] }
 0x674   :  { %11517 = vmatpush1.bf16.msra.mxu0 %v11516_v9  ;;  %v6656_v9 = vld [vmem:[%s18640_s6 + $0x800] sm:$0xff]  ;;  %v11534_v20 = vpack.c.bf16 %v6855_v4, %v6851_v28  ;;  %v6883_v18 = vld [vmem:[%s18640_s6 + $0xf18] sm:$0xff] }
 0x675   :  { %11519 = vmatprep.subr.bf16.mxu0 %v11518_v63  ;;  %v6665_v63 = vld [vmem:[%s18640_s6 + $0x848] sm:$0xff]  ;;  %v11040_v11 = vpack.c.bf16 %v6660_v7, %v6656_v9  ;;  %v6688_v4 = vld [vmem:[%s18640_s6 + $0x900] sm:$0xff] }
 0x676   :  { %11025 = vmatpush1.bf16.msra.mxu1 %v11024_v19  ;;  %v6850_v19 = vld [vmem:[%s18640_s6 + $0xe10] sm:$0xff]  ;;  %v11042_v17 = vpack.c.bf16 %v6669_v50, %v6665_v63  ;;  %v6697_v7 = vld [vmem:[%s18640_s6 + $0x948] sm:$0xff] }
 0x677   :  { %11027 = vmatprep.subr.bf16.mxu1 %v11026_v39  ;;  %v6859_v39 = vld [vmem:[%s18640_s6 + $0xe58] sm:$0xff]  ;;  %v11536_v22 = vpack.c.bf16 %v6854_v38, %v6850_v19  ;;  %v6882_v50 = vld [vmem:[%s18640_s6 + $0xf10] sm:$0xff] }
 0x678   :  { %11521 = vmatpush1.bf16.msra.mxu0 %v11520_v8  ;;  %v6664_v8 = vld [vmem:[%s18640_s6 + $0x840] sm:$0xff]  ;;  %v11538_v6 = vpack.c.bf16 %v6863_v37, %v6859_v39  ;;  %v6891_v38 = vld [vmem:[%s18640_s6 + $0xf58] sm:$0xff] }
 0x679   :  { %11523 = vmatprep.subr.bf16.mxu0 %v11522_v15  ;;  %v6673_v15 = vld [vmem:[%s18640_s6 + $0x888] sm:$0xff]  ;;  %v11044_v25 = vpack.c.bf16 %v6668_v55, %v6664_v8  ;;  %v6696_v37 = vld [vmem:[%s18640_s6 + $0x940] sm:$0xff] }
 0x67a   :  { %11029 = vmatpush1.bf16.msra.mxu1 %v11028_v1  ;;  %v6858_v1 = vld [vmem:[%s18640_s6 + $0xe50] sm:$0xff]  ;;  %v6705_v55 = vld [vmem:[%s18640_s6 + $0x988] sm:$0xff] }
 0x67b   :  { %11031 = vmatprep.subr.bf16.mxu1 %v11030_v52  ;;  %v11046_v52 = vpack.c.bf16 %v6677_v44, %v6673_v15  ;;  %v6890_v44 = vld [vmem:[%s18640_s6 + $0xf50] sm:$0xff] }
 0x67c   :  { %11525 = vmatpush1.bf16.msra.mxu0 %v11524_v16  ;;  %v6685_v16 = vld [vmem:[%s18640_s6 + $0x8e8] sm:$0xff] }
 0x67d   :  { %11527 = vmatprep.subr.bf16.mxu0 %v11526_v35  ;;  %v6870_v35 = vld [vmem:[%s18640_s6 + $0xeb0] sm:$0xff]  ;;  %v11050_v62 = vpack.c.bf16 %v6685_v16, %v6681_v61 }
 0x67e   :  { %11033 = vmatpush1.bf16.msra.mxu1 %v11032_v53  ;;  %v6879_v53 = vld [vmem:[%s18640_s6 + $0xef8] sm:$0xff]  ;;  %v11544_v42 = vpack.c.bf16 %v6870_v35, %v6866_v23  ;;  %v6898_v16 = vld [vmem:[%s18640_s6 + $0xf90] sm:$0xff] }
 0x67f   :  { %11035 = vmatprep.subr.bf16.mxu1 %v11034_v48  ;;  %v6684_v48 = vld [vmem:[%s18640_s6 + $0x8e0] sm:$0xff]  ;;  %v11546_v2 = vpack.c.bf16 %v6879_v53, %v6875_v36  ;;  %v6907_v35 = vld [vmem:[%s18640_s6 + $0xfd8] sm:$0xff] }
 0x680   :  { %11529 = vmatpush1.bf16.msra.mxu0 %v11528_v21  ;;  %v6693_v21 = vld [vmem:[%s18640_s6 + $0x928] sm:$0xff]  ;;  %v11052_v12 = vpack.c.bf16 %v6684_v48, %v6680_v45  ;;  %v6712_v53 = vld [vmem:[%s18640_s6 + $0x9c0] sm:$0xff] }
 0x681   :  { %11531 = vmatprep.subr.bf16.mxu0 %v11530_v33  ;;  %v6878_v33 = vld [vmem:[%s18640_s6 + $0xef0] sm:$0xff]  ;;  %v11054_v28 = vpack.c.bf16 %v6693_v21, %v6689_v0  ;;  %v6721_v48 = vld [vmem:[%s18640_s6 + $0xa08] sm:$0xff] }
 0x682   :  { %11037 = vmatpush1.bf16.msra.mxu1 %v11036_v40  ;;  %v6887_v40 = vld [vmem:[%s18640_s6 + $0xf38] sm:$0xff]  ;;  %v11548_v9 = vpack.c.bf16 %v6878_v33, %v6874_v34  ;;  %v6906_v21 = vld [vmem:[%s18640_s6 + $0xfd0] sm:$0xff] }
 0x683   :  { %11039 = vmatprep.subr.bf16.mxu1 %v11038_v27  ;;  %v6692_v27 = vld [vmem:[%s18640_s6 + $0x920] sm:$0xff]  ;;  %v11550_v63 = vpack.c.bf16 %v6887_v40, %v6883_v18  ;;  %v6915_v33 = vld [vmem:[%s18640_s6 + $0x1018] sm:$0xff] }
 0x684   :  { %11533 = vmatpush1.bf16.msra.mxu0 %v11532_v49  ;;  %v6701_v49 = vld [vmem:[%s18640_s6 + $0x968] sm:$0xff]  ;;  %v11056_v19 = vpack.c.bf16 %v6692_v27, %v6688_v4  ;;  %v6720_v40 = vld [vmem:[%s18640_s6 + $0xa00] sm:$0xff] }
 0x685   :  { %7361 = vmatmul.mubr.f32.vlgmr.msra.gmra.mrb[212].mxu1 %v6389_v30  ;;  %11535 = vmatprep.subr.bf16.mxu0 %v11534_v20  ;;  %v6871_v30 = vld [vmem:[%s18640_s6 + $0xeb8] sm:$0xff]  ;;  %v6886_v20 = vld [vmem:[%s18640_s6 + $0xf30] sm:$0xff]  ;;  %v11058_v39 = vpack.c.bf16 %v6701_v49, %v6697_v7  ;;  %v6729_v27 = vld [vmem:[%s18640_s6 + $0xa48] sm:$0xff] }
 0x686   :  { %11041 = vmatpush1.bf16.msra.mxu1 %v11040_v11  ;;  %7431 = vmatprep.mubr.f32.mxu1 %v6392_v58  ;;  %v11540_v58 = vpack.c.bf16 %v6862_v57, %v6858_v1  ;;  %v11542_v13 = vpack.c.bf16 %v6871_v30, %v6867_v51  ;;  %v6895_v11 = vld [vmem:[%s18640_s6 + $0xf78] sm:$0xff]  ;;  %v11552_v8 = vpack.c.bf16 %v6886_v20, %v6882_v50  ;;  %v6704_v30 = vld [vmem:[%s18640_s6 + $0x980] sm:$0xff]  ;;  %v6914_v49 = vld [vmem:[%s18640_s6 + $0x1010] sm:$0xff] }
 0x687   :  { %11043 = vmatprep.subr.bf16.mxu1 %v11042_v17  ;;  %v6700_v17 = vld [vmem:[%s18640_s6 + $0x960] sm:$0xff]  ;;  %v11554_v15 = vpack.c.bf16 %v6895_v11, %v6891_v38  ;;  %v6899_v57 = vld [vmem:[%s18640_s6 + $0xf98] sm:$0xff] }
 0x688   :  { %11537 = vmatpush1.bf16.msra.mxu0 %v11536_v22  ;;  %v6709_v22 = vld [vmem:[%s18640_s6 + $0x9a8] sm:$0xff]  ;;  %v11060_v1 = vpack.c.bf16 %v6700_v17, %v6696_v37  ;;  %v6923_v20 = vld [vmem:[%s18640_s6 + $0x1058] sm:$0xff]  ;;  %v6728_v11 = vld [vmem:[%s18640_s6 + $0xa40] sm:$0xff] }
 0x689   :  { %11539 = vmatprep.subr.bf16.mxu0 %v11538_v6  ;;  %v6894_v6 = vld [vmem:[%s18640_s6 + $0xf70] sm:$0xff]  ;;  %v11062_v51 = vpack.c.bf16 %v6709_v22, %v6705_v55  ;;  %v6737_v17 = vld [vmem:[%s18640_s6 + $0xa88] sm:$0xff]  ;;  %v6393_v55 = vmax.f32 %v17072_v3, 0.0  ;;  %v7123_v3 = vld [vmem:[%s18640_s6 + $0x1698] sm:$0xff] }
 0x68a   :  { %11045 = vmatpush1.bf16.msra.mxu1 %v11044_v25  ;;  %v6903_v25 = vld [vmem:[%s18640_s6 + $0xfb8] sm:$0xff]  ;;  %v11556_v31 = vpack.c.bf16 %v6894_v6, %v6890_v44  ;;  %v6926_v44 = vld [vmem:[%s18640_s6 + $0x1070] sm:$0xff] }
 0x68b   :  { %11047 = vmatprep.subr.bf16.mxu1 %v11046_v52  ;;  %v6708_v52 = vld [vmem:[%s18640_s6 + $0x9a0] sm:$0xff]  ;;  %v11558_v61 = vpack.c.bf16 %v6903_v25, %v6899_v57  ;;  %v6935_v57 = vld [vmem:[%s18640_s6 + $0x10b8] sm:$0xff] }
 0x68c   :  { %11541 = vmatpush1.bf16.msra.mxu0 %v11540_v58  ;;  %v6717_v58 = vld [vmem:[%s18640_s6 + $0x9e8] sm:$0xff]  ;;  %v11064_v23 = vpack.c.bf16 %v6708_v52, %v6704_v30  ;;  %v6740_v30 = vld [vmem:[%s18640_s6 + $0xaa0] sm:$0xff] }
 0x68d   :  { %11543 = vmatprep.subr.bf16.mxu0 %v11542_v13  ;;  %v6902_v13 = vld [vmem:[%s18640_s6 + $0xfb0] sm:$0xff]  ;;  %v11066_v36 = vpack.c.bf16 %v6717_v58, %v6713_v5  ;;  %v6749_v5 = vld [vmem:[%s18640_s6 + $0xae8] sm:$0xff] }
 0x68e   :  { %11049 = vmatpush1.bf16.msra.mxu1 %v11048_v46  ;;  %v6911_v46 = vld [vmem:[%s18640_s6 + $0xff8] sm:$0xff]  ;;  %v11560_v45 = vpack.c.bf16 %v6902_v13, %v6898_v16  ;;  %v6934_v16 = vld [vmem:[%s18640_s6 + $0x10b0] sm:$0xff] }
 0x68f   :  { %11051 = vmatprep.subr.bf16.mxu1 %v11050_v62  ;;  %v6716_v62 = vld [vmem:[%s18640_s6 + $0x9e0] sm:$0xff]  ;;  %v11562_v0 = vpack.c.bf16 %v6911_v46, %v6907_v35  ;;  %v6943_v35 = vld [vmem:[%s18640_s6 + $0x10f8] sm:$0xff] }
 0x690   :  { %11545 = vmatpush1.bf16.msra.mxu0 %v11544_v42  ;;  %v6725_v42 = vld [vmem:[%s18640_s6 + $0xa28] sm:$0xff]  ;;  %v11068_v34 = vpack.c.bf16 %v6716_v62, %v6712_v53  ;;  %v6748_v53 = vld [vmem:[%s18640_s6 + $0xae0] sm:$0xff] }
 0x691   :  { %11547 = vmatprep.subr.bf16.mxu0 %v11546_v2  ;;  %v6910_v2 = vld [vmem:[%s18640_s6 + $0xff0] sm:$0xff]  ;;  %v11070_v18 = vpack.c.bf16 %v6725_v42, %v6721_v48  ;;  %v6757_v48 = vld [vmem:[%s18640_s6 + $0xb28] sm:$0xff] }
 0x692   :  { %11053 = vmatpush1.bf16.msra.mxu1 %v11052_v12  ;;  %v6919_v12 = vld [vmem:[%s18640_s6 + $0x1038] sm:$0xff]  ;;  %v11564_v4 = vpack.c.bf16 %v6910_v2, %v6906_v21  ;;  %v17497_v42 = vld [vmem:[%s18641_s5 + $0x8] sm:$0x1f]  ;;  %v6938_v21 = vld [vmem:[%s18640_s6 + $0x10d0] sm:$0xff] }
 0x693   :  { %11055 = vmatprep.subr.bf16.mxu1 %v11054_v28  ;;  %v6724_v28 = vld [vmem:[%s18640_s6 + $0xa20] sm:$0xff]  ;;  %v11566_v7 = vpack.c.bf16 %v6919_v12, %v6915_v33  ;;  %v6942_v2 = vld [vmem:[%s18640_s6 + $0x10f0] sm:$0xff]  ;;  %v6947_v12 = vld [vmem:[%s18640_s6 + $0x1118] sm:$0xff] }
 0x694   :  { %11549 = vmatpush1.bf16.msra.mxu0 %v11548_v9  ;;  %v6733_v9 = vld [vmem:[%s18640_s6 + $0xa68] sm:$0xff]  ;;  %v11072_v50 = vpack.c.bf16 %v6724_v28, %v6720_v40  ;;  %v6752_v28 = vld [vmem:[%s18640_s6 + $0xb00] sm:$0xff] }
 0x695   :  { %11551 = vmatprep.subr.bf16.mxu0 %v11550_v63  ;;  %v6918_v63 = vld [vmem:[%s18640_s6 + $0x1030] sm:$0xff]  ;;  %v11074_v38 = vpack.c.bf16 %v6733_v9, %v6729_v27  ;;  %v11580_v9 = vpack.c.bf16 %v6942_v2, %v6938_v21  ;;  %v6780_v21 = vld [vmem:[%s18640_s6 + $0xbe0] sm:$0xff] }
 0x696   :  { %11057 = vmatpush1.bf16.msra.mxu1 %v11056_v19  ;;  %v6927_v19 = vld [vmem:[%s18640_s6 + $0x1078] sm:$0xff]  ;;  %v11568_v37 = vpack.c.bf16 %v6918_v63, %v6914_v49  ;;  %v6765_v49 = vld [vmem:[%s18640_s6 + $0xb68] sm:$0xff] }
 0x697   :  { %11059 = vmatprep.subr.bf16.mxu1 %v11058_v39  ;;  %v6732_v39 = vld [vmem:[%s18640_s6 + $0xa60] sm:$0xff]  ;;  %v11570_v22 = vpack.c.bf16 %v6927_v19, %v6923_v20  ;;  %v6946_v20 = vld [vmem:[%s18640_s6 + $0x1110] sm:$0xff] }
 0x698   :  { %11553 = vmatpush1.bf16.msra.mxu0 %v11552_v8  ;;  %v6741_v8 = vld [vmem:[%s18640_s6 + $0xaa8] sm:$0xff]  ;;  %v11076_v6 = vpack.c.bf16 %v6732_v39, %v6728_v11  ;;  %v6950_v19 = vld [vmem:[%s18640_s6 + $0x1130] sm:$0xff]  ;;  %v6955_v39 = vld [vmem:[%s18640_s6 + $0x1158] sm:$0xff] }
 0x699   :  { %11555 = vmatprep.subr.bf16.mxu0 %v11554_v15  ;;  %v6922_v15 = vld [vmem:[%s18640_s6 + $0x1050] sm:$0xff]  ;;  %v11078_v25 = vpack.c.bf16 %v6741_v8, %v6737_v17  ;;  %v6760_v8 = vld [vmem:[%s18640_s6 + $0xb40] sm:$0xff] }
 0x69a   :  { %11061 = vmatpush1.bf16.msra.mxu1 %v11060_v1  ;;  %v6931_v1 = vld [vmem:[%s18640_s6 + $0x1098] sm:$0xff]  ;;  %v11572_v52 = vpack.c.bf16 %v6926_v44, %v6922_v15  ;;  %v11584_v44 = vpack.c.bf16 %v6950_v19, %v6946_v20  ;;  %v6793_v20 = vld [vmem:[%s18640_s6 + $0xc48] sm:$0xff] }
 0x69b   :  { %11063 = vmatprep.subr.bf16.mxu1 %v11062_v51  ;;  %v6736_v51 = vld [vmem:[%s18640_s6 + $0xa80] sm:$0xff]  ;;  %v11574_v58 = vpack.c.bf16 %v6935_v57, %v6931_v1  ;;  %v6773_v1 = vld [vmem:[%s18640_s6 + $0xba8] sm:$0xff] }
 0x69c   :  { %11557 = vmatpush1.bf16.msra.mxu0 %v11556_v31  ;;  %v6745_v31 = vld [vmem:[%s18640_s6 + $0xac8] sm:$0xff]  ;;  %v11080_v13 = vpack.c.bf16 %v6740_v30, %v6736_v51  ;;  %v6958_v51 = vld [vmem:[%s18640_s6 + $0x1170] sm:$0xff] }
 0x69d   :  { %11559 = vmatprep.subr.bf16.mxu0 %v11558_v61  ;;  %v6930_v61 = vld [vmem:[%s18640_s6 + $0x1090] sm:$0xff]  ;;  %v11082_v46 = vpack.c.bf16 %v6749_v5, %v6745_v31  ;;  %v6967_v31 = vld [vmem:[%s18640_s6 + $0x11b8] sm:$0xff]  ;;  %v6797_v19 = vld [vmem:[%s18640_s6 + $0xc68] sm:$0xff] }
 0x69e   :  { %11065 = vmatpush1.bf16.msra.mxu1 %v11064_v23  ;;  %v6939_v23 = vld [vmem:[%s18640_s6 + $0x10d8] sm:$0xff]  ;;  %v11576_v62 = vpack.c.bf16 %v6934_v16, %v6930_v61  ;;  %v6772_v61 = vld [vmem:[%s18640_s6 + $0xba0] sm:$0xff] }
 0x69f   :  { %11067 = vmatprep.subr.bf16.mxu1 %v11066_v36  ;;  %v6744_v36 = vld [vmem:[%s18640_s6 + $0xac0] sm:$0xff] }
 0x6a0   :  { %11561 = vmatpush1.bf16.msra.mxu0 %v11560_v45  ;;  %v6753_v45 = vld [vmem:[%s18640_s6 + $0xb08] sm:$0xff]  ;;  %v11084_v33 = vpack.c.bf16 %v6748_v53, %v6744_v36  ;;  %v6966_v36 = vld [vmem:[%s18640_s6 + $0x11b0] sm:$0xff] }
 0x6a1   :  { %11563 = vmatprep.subr.bf16.mxu0 %v11562_v0  ;;  %v11578_v0 = vpack.c.bf16 %v6943_v35, %v6939_v23  ;;  %v11086_v40 = vpack.c.bf16 %v6757_v48, %v6753_v45  ;;  %v6781_v23 = vld [vmem:[%s18640_s6 + $0xbe8] sm:$0xff]  ;;  %v6975_v45 = vld [vmem:[%s18640_s6 + $0x11f8] sm:$0xff] }
 0x6a2   :  { %11069 = vmatpush1.bf16.msra.mxu1 %v11068_v34  ;;  %v5366_v34 = vrot.slane %v17497_v42, %v16112_v41 }
 0x6a3   :  { %11071 = vmatprep.subr.bf16.mxu1 %v11070_v18  ;;  %v6951_v18 = vld [vmem:[%s18640_s6 + $0x1138] sm:$0xff] }
 0x6a4   :  { %11565 = vmatpush1.bf16.msra.mxu0 %v11564_v4  ;;  %v6756_v4 = vld [vmem:[%s18640_s6 + $0xb20] sm:$0xff] }
 0x6a5   :  { %11567 = vmatprep.subr.bf16.mxu0 %v11566_v7  ;;  %v6761_v7 = vld [vmem:[%s18640_s6 + $0xb48] sm:$0xff]  ;;  %v11088_v11 = vpack.c.bf16 %v6756_v4, %v6752_v28  ;;  %v6979_v4 = vld [vmem:[%s18640_s6 + $0x1218] sm:$0xff] }
 0x6a6   :  { %11073 = vmatpush1.bf16.msra.mxu1 %v11072_v50  ;;  %v11582_v50 = vpack.c.bf16 %v6951_v18, %v6947_v12  ;;  %v11090_v17 = vpack.c.bf16 %v6765_v49, %v6761_v7  ;;  %v6970_v18 = vld [vmem:[%s18640_s6 + $0x11d0] sm:$0xff]  ;;  %v6784_v49 = vld [vmem:[%s18640_s6 + $0xc00] sm:$0xff] }
 0x6a7   :  { %8000 = vmatmul.mubr.f32.vlgmr.msra.gmra.mrb[76].mxu0 %v6393_v55  ;;  %11075 = vmatprep.subr.bf16.mxu1 %v11074_v38 }
 0x6a8   :  { %11569 = vmatpush1.bf16.msra.mxu0 %v11568_v37  ;;  %v6959_v37 = vld [vmem:[%s18640_s6 + $0x1178] sm:$0xff] }
 0x6a9   :  { %11571 = vmatprep.subr.bf16.mxu0 %v11570_v22  ;;  %v6764_v22 = vld [vmem:[%s18640_s6 + $0xb60] sm:$0xff]  ;;  %v11586_v57 = vpack.c.bf16 %v6959_v37, %v6955_v39  ;;  %v6978_v39 = vld [vmem:[%s18640_s6 + $0x1210] sm:$0xff] }
 0x6aa   :  { %11077 = vmatpush1.bf16.msra.mxu1 %v11076_v6  ;;  %v6769_v6 = vld [vmem:[%s18640_s6 + $0xb88] sm:$0xff]  ;;  %v11092_v30 = vpack.c.bf16 %v6764_v22, %v6760_v8  ;;  %v6982_v37 = vld [vmem:[%s18640_s6 + $0x1230] sm:$0xff]  ;;  %v6987_v8 = vld [vmem:[%s18640_s6 + $0x1258] sm:$0xff] }
 0x6ab   :  { %11079 = vmatprep.subr.bf16.mxu1 %v11078_v25  ;;  %v6954_v25 = vld [vmem:[%s18640_s6 + $0x1150] sm:$0xff]  ;;  %v11094_v5 = vpack.c.bf16 %v6773_v1, %v6769_v6  ;;  %v6991_v22 = vld [vmem:[%s18640_s6 + $0x1278] sm:$0xff]  ;;  %v6792_v6 = vld [vmem:[%s18640_s6 + $0xc40] sm:$0xff] }
 0x6ac   :  { %11573 = vmatpush1.bf16.msra.mxu0 %v11572_v52  ;;  %v6963_v52 = vld [vmem:[%s18640_s6 + $0x1198] sm:$0xff]  ;;  %v11588_v16 = vpack.c.bf16 %v6958_v51, %v6954_v25  ;;  %v6796_v1 = vld [vmem:[%s18640_s6 + $0xc60] sm:$0xff]  ;;  %v6801_v25 = vld [vmem:[%s18640_s6 + $0xc88] sm:$0xff] }
 0x6ad   :  { %11575 = vmatprep.subr.bf16.mxu0 %v11574_v58  ;;  %v6768_v58 = vld [vmem:[%s18640_s6 + $0xb80] sm:$0xff]  ;;  %v11590_v35 = vpack.c.bf16 %v6967_v31, %v6963_v52  ;;  %v6805_v51 = vld [vmem:[%s18640_s6 + $0xca8] sm:$0xff]  ;;  %v6986_v52 = vld [vmem:[%s18640_s6 + $0x1250] sm:$0xff] }
 0x6ae   :  { %11081 = vmatpush1.bf16.msra.mxu1 %v11080_v13  ;;  %v6777_v13 = vld [vmem:[%s18640_s6 + $0xbc8] sm:$0xff]  ;;  %v11096_v53 = vpack.c.bf16 %v6772_v61, %v6768_v58  ;;  %v6990_v31 = vld [vmem:[%s18640_s6 + $0x1270] sm:$0xff]  ;;  %v11110_v58 = vpack.c.bf16 %v6805_v51, %v6801_v25  ;;  %v6800_v61 = vld [vmem:[%s18640_s6 + $0xc80] sm:$0xff] }
 0x6af   :  { %11083 = vmatprep.subr.bf16.mxu1 %v11082_v46  ;;  %v6962_v46 = vld [vmem:[%s18640_s6 + $0x1190] sm:$0xff]  ;;  %v11098_v48 = vpack.c.bf16 %v6781_v23, %v6777_v13  ;;  %v6813_v13 = vld [vmem:[%s18640_s6 + $0xce8] sm:$0xff]  ;;  %v6824_v25 = vld [vmem:[%s18640_s6 + $0xd40] sm:$0xff] }
 0x6b0   :  { %11577 = vmatpush1.bf16.msra.mxu0 %v11576_v62  ;;  %v17519_v27 = vpop.f32.mrb[206].mxu1  ;;  %v6971_v62 = vld [vmem:[%s18640_s6 + $0x11d8] sm:$0xff]  ;;  %v11592_v2 = vpack.c.bf16 %v6966_v36, %v6962_v46  ;;  %v6998_v46 = vld [vmem:[%s18640_s6 + $0x12b0] sm:$0xff]  ;;  %v11112_v36 = vpack.c.bf16 %v6804_v47, %v6800_v61  ;;  %v6828_v51 = vld [vmem:[%s18640_s6 + $0xd60] sm:$0xff] }
 0x6b1   :  { %v6102_v63 = vpop.f32.mrb[207].mxu1  ;;  %11579 = vmatprep.subr.bf16.mxu0 %v11578_v0  ;;  %v6776_v0 = vld [vmem:[%s18640_s6 + $0xbc0] sm:$0xff]  ;;  %v11594_v12 = vpack.c.bf16 %v6975_v45, %v6971_v62  ;;  %v7007_v62 = vld [vmem:[%s18640_s6 + $0x12f8] sm:$0xff] }
 0x6b2   :  { %v17533_v38 = vadd.f32 %v6102_v63, %v5366_v34  ;;  %11085 = vmatpush1.bf16.msra.mxu1 %v11084_v33  ;;  %v6785_v34 = vld [vmem:[%s18640_s6 + $0xc08] sm:$0xff]  ;;  %v11100_v28 = vpack.c.bf16 %v6780_v21, %v6776_v0  ;;  %v6788_v63 = vld [vmem:[%s18640_s6 + $0xc20] sm:$0xff] }
 0x6b3   :  { %11087 = vmatprep.subr.bf16.mxu1 %v11086_v40  ;;  %v6789_v33 = vld [vmem:[%s18640_s6 + $0xc28] sm:$0xff]  ;;  %v6974_v40 = vld [vmem:[%s18640_s6 + $0x11f0] sm:$0xff]  ;;  %v6812_v0 = vld [vmem:[%s18640_s6 + $0xce0] sm:$0xff] }
 0x6b4   :  { %v6396_v15 = vmax.f32 %v17533_v38, 0.0  ;;  %11581 = vmatpush1.bf16.msra.mxu0 %v11580_v9  ;;  %v6983_v9 = vld [vmem:[%s18640_s6 + $0x1238] sm:$0xff]  ;;  %v11102_v7 = vpack.c.bf16 %v6789_v33, %v6785_v34  ;;  %v6821_v34 = vld [vmem:[%s18640_s6 + $0xd28] sm:$0xff]  ;;  %v6932_v38 = vld [vmem:[%s18640_s6 + $0x10a0] sm:$0xff] }
 0x6b5   :  { %11583 = vmatprep.subr.bf16.mxu0 %v11582_v50  ;;  %v11596_v50 = vpack.c.bf16 %v6974_v40, %v6970_v18  ;;  %v7006_v18 = vld [vmem:[%s18640_s6 + $0x12f0] sm:$0xff] }
 0x6b6   :  { %11089 = vmatpush1.bf16.msra.mxu1 %v11088_v11  ;;  %8070 = vmatprep.mubr.f32.mxu0 %v6396_v15  ;;  %v11598_v11 = vpack.c.bf16 %v6983_v9, %v6979_v4  ;;  %v7015_v4 = vld [vmem:[%s18640_s6 + $0x1338] sm:$0xff] }
 0x6b7   :  { %11091 = vmatprep.subr.bf16.mxu1 %v11090_v17  ;;  %v11104_v17 = vpack.c.bf16 %v6788_v63, %v6784_v49  ;;  %v6820_v49 = vld [vmem:[%s18640_s6 + $0xd20] sm:$0xff] }
 0x6b8   :  { %11585 = vmatpush1.bf16.msra.mxu0 %v11584_v44  ;;  %v11106_v44 = vpack.c.bf16 %v6797_v19, %v6793_v20  ;;  %v6825_v20 = vld [vmem:[%s18640_s6 + $0xd48] sm:$0xff] }
 0x6b9   :  { %11587 = vmatprep.subr.bf16.mxu0 %v11586_v57  ;;  %v11600_v57 = vpack.c.bf16 %v6982_v37, %v6978_v39  ;;  %v6829_v19 = vld [vmem:[%s18640_s6 + $0xd68] sm:$0xff]  ;;  %v7010_v37 = vld [vmem:[%s18640_s6 + $0x1310] sm:$0xff] }
 0x6ba   :  { %11093 = vmatpush1.bf16.msra.mxu1 %v11092_v30  ;;  %v11602_v30 = vpack.c.bf16 %v6991_v22, %v6987_v8 }
 0x6bb   :  { %11095 = vmatprep.subr.bf16.mxu1 %v11094_v5  ;;  %v11108_v5 = vpack.c.bf16 %v6796_v1, %v6792_v6  ;;  %v7023_v6 = vld [vmem:[%s18640_s6 + $0x1378] sm:$0xff]  ;;  %v5378_v1 = vrot.slane %v17497_v42, %v5345_v59 }
 0x6bc   :  { %11589 = vmatpush1.bf16.msra.mxu0 %v11588_v16  ;;  %v6809_v16 = vld [vmem:[%s18640_s6 + $0xcc8] sm:$0xff] }
 0x6bd   :  { %11591 = vmatprep.subr.bf16.mxu0 %v11590_v35  ;;  %v6994_v35 = vld [vmem:[%s18640_s6 + $0x1290] sm:$0xff]  ;;  %v11114_v45 = vpack.c.bf16 %v6813_v13, %v6809_v16  ;;  %v6836_v16 = vld [vmem:[%s18640_s6 + $0xda0] sm:$0xff] }
 0x6be   :  { %11097 = vmatpush1.bf16.msra.mxu1 %v11096_v53  ;;  %v7003_v53 = vld [vmem:[%s18640_s6 + $0x12d8] sm:$0xff]  ;;  %v11608_v21 = vpack.c.bf16 %v6998_v46, %v6994_v35  ;;  %v6841_v35 = vld [vmem:[%s18640_s6 + $0xdc8] sm:$0xff] }
 0x6bf   :  { %11099 = vmatprep.subr.bf16.mxu1 %v11098_v48  ;;  %v6808_v48 = vld [vmem:[%s18640_s6 + $0xcc0] sm:$0xff]  ;;  %v11610_v33 = vpack.c.bf16 %v7007_v62, %v7003_v53  ;;  %v6845_v46 = vld [vmem:[%s18640_s6 + $0xde8] sm:$0xff] }
 0x6c0   :  { %11593 = vmatpush1.bf16.msra.mxu0 %v11592_v2  ;;  %v6817_v2 = vld [vmem:[%s18640_s6 + $0xd08] sm:$0xff]  ;;  %v11116_v40 = vpack.c.bf16 %v6812_v0, %v6808_v48  ;;  %v7030_v48 = vld [vmem:[%s18640_s6 + $0x13b0] sm:$0xff] }
 0x6c1   :  { %11595 = vmatprep.subr.bf16.mxu0 %v11594_v12  ;;  %v7002_v12 = vld [vmem:[%s18640_s6 + $0x12d0] sm:$0xff]  ;;  %v11118_v9 = vpack.c.bf16 %v6821_v34, %v6817_v2  ;;  %v7039_v2 = vld [vmem:[%s18640_s6 + $0x13f8] sm:$0xff]  ;;  %v11130_v34 = vpack.c.bf16 %v6845_v46, %v6841_v35  ;;  %v6864_v35 = vld [vmem:[%s18640_s6 + $0xe80] sm:$0xff] }
 0x6c2   :  { %11101 = vmatpush1.bf16.msra.mxu1 %v11100_v28  ;;  %v7011_v28 = vld [vmem:[%s18640_s6 + $0x1318] sm:$0xff]  ;;  %v6868_v46 = vld [vmem:[%s18640_s6 + $0xea0] sm:$0xff] }
 0x6c3   :  { %11103 = vmatprep.subr.bf16.mxu1 %v11102_v7  ;;  %v6816_v7 = vld [vmem:[%s18640_s6 + $0xd00] sm:$0xff]  ;;  %v11614_v39 = vpack.c.bf16 %v7015_v4, %v7011_v28  ;;  %v6853_v28 = vld [vmem:[%s18640_s6 + $0xe28] sm:$0xff]  ;;  %v5362_v4 = vrot.slane %v17497_v42, %v16109_v43 }
 0x6c4   :  { %11597 = vmatpush1.bf16.msra.mxu0 %v11596_v50  ;;  %v11612_v50 = vpack.c.bf16 %v7006_v18, %v7002_v12  ;;  %v11120_v22 = vpack.c.bf16 %v6820_v49, %v6816_v7  ;;  %v6844_v12 = vld [vmem:[%s18640_s6 + $0xde0] sm:$0xff]  ;;  %v7034_v7 = vld [vmem:[%s18640_s6 + $0x13d0] sm:$0xff] }
 0x6c5   :  { %7432 = vmatmul.mubr.f32.vlgmr.msra.gmra.mrb[212].mxu1 %v6391_v14  ;;  %11599 = vmatprep.subr.bf16.mxu0 %v11598_v11  ;;  %v6999_v14 = vld [vmem:[%s18640_s6 + $0x12b8] sm:$0xff]  ;;  %v7038_v49 = vld [vmem:[%s18640_s6 + $0x13f0] sm:$0xff] }
 0x6c6   :  { %11105 = vmatpush1.bf16.msra.mxu1 %v11104_v17  ;;  %7502 = vmatprep.mubr.f32.mxu1 %v6394_v29  ;;  %v11604_v29 = vpack.c.bf16 %v6990_v31, %v6986_v52  ;;  %v11606_v23 = vpack.c.bf16 %v6999_v14, %v6995_v60  ;;  %v7014_v17 = vld [vmem:[%s18640_s6 + $0x1330] sm:$0xff]  ;;  %v6833_v52 = vld [vmem:[%s18640_s6 + $0xd88] sm:$0xff]  ;;  %v11124_v60 = vpack.c.bf16 %v6828_v51, %v6824_v25  ;;  %v7027_v14 = vld [vmem:[%s18640_s6 + $0x1398] sm:$0xff] }
 0x6c7   :  { %11107 = vmatprep.subr.bf16.mxu1 %v11106_v44  ;;  %v7019_v44 = vld [vmem:[%s18640_s6 + $0x1358] sm:$0xff]  ;;  %v7018_v31 = vld [vmem:[%s18640_s6 + $0x1350] sm:$0xff]  ;;  %v11126_v47 = vpack.c.bf16 %v6837_v24, %v6833_v52  ;;  %v6856_v24 = vld [vmem:[%s18640_s6 + $0xe40] sm:$0xff] }
 0x6c8   :  { %11601 = vmatpush1.bf16.msra.mxu0 %v11600_v57  ;;  %v11122_v57 = vpack.c.bf16 %v6829_v19, %v6825_v20  ;;  %v11618_v59 = vpack.c.bf16 %v7023_v6, %v7019_v44  ;;  %v7043_v20 = vld [vmem:[%s18640_s6 + $0x1418] sm:$0xff]  ;;  %v17834_v44 = vadd.f32 %v17519_v27, %v5362_v4  ;;  %v6881_v4 = vld [vmem:[%s18640_s6 + $0xf08] sm:$0xff] }
 0x6c9   :  { %11603 = vmatprep.subr.bf16.mxu0 %v11602_v30  ;;  %v11616_v30 = vpack.c.bf16 %v7014_v17, %v7010_v37  ;;  %v7047_v19 = vld [vmem:[%s18640_s6 + $0x1438] sm:$0xff]  ;;  %v6852_v37 = vld [vmem:[%s18640_s6 + $0xe20] sm:$0xff]  ;;  %v11628_v17 = vpack.c.bf16 %v7038_v49, %v7034_v7  ;;  %v7066_v49 = vld [vmem:[%s18640_s6 + $0x14d0] sm:$0xff] }
 0x6ca   :  { %11109 = vmatpush1.bf16.msra.mxu1 %v11108_v5  ;;  %v7022_v5 = vld [vmem:[%s18640_s6 + $0x1370] sm:$0xff]  ;;  %v11630_v6 = vpack.c.bf16 %v7047_v19, %v7043_v20  ;;  %v7051_v27 = vld [vmem:[%s18640_s6 + $0x1458] sm:$0xff] }
 0x6cb   :  { %11111 = vmatprep.subr.bf16.mxu1 %v11110_v58  ;;  %v7031_v58 = vld [vmem:[%s18640_s6 + $0x13b8] sm:$0xff] }
 0x6cc   :  { %11605 = vmatpush1.bf16.msra.mxu0 %v11604_v29  ;;  %v6832_v29 = vld [vmem:[%s18640_s6 + $0xd80] sm:$0xff]  ;;  %v11622_v62 = vpack.c.bf16 %v7031_v58, %v7027_v14  ;;  %v7050_v58 = vld [vmem:[%s18640_s6 + $0x1450] sm:$0xff]  ;;  %v7075_v20 = vld [vmem:[%s18640_s6 + $0x1518] sm:$0xff] }
 0x6cd   :  { %11607 = vmatprep.subr.bf16.mxu0 %v11606_v23  ;;  %v11620_v23 = vpack.c.bf16 %v7022_v5, %v7018_v31  ;;  %v11128_v0 = vpack.c.bf16 %v6836_v16, %v6832_v29  ;;  %v6865_v31 = vld [vmem:[%s18640_s6 + $0xe88] sm:$0xff]  ;;  %v7059_v16 = vld [vmem:[%s18640_s6 + $0x1498] sm:$0xff] }
 0x6ce   :  { %11113 = vmatpush1.bf16.msra.mxu1 %v11112_v36  ;;  %v6869_v5 = vld [vmem:[%s18640_s6 + $0xea8] sm:$0xff]  ;;  %v7079_v19 = vld [vmem:[%s18640_s6 + $0x1538] sm:$0xff] }
 0x6cf   :  { %11115 = vmatprep.subr.bf16.mxu1 %v11114_v45  ;;  %v7026_v45 = vld [vmem:[%s18640_s6 + $0x1390] sm:$0xff] }
 0x6d0   :  { %11609 = vmatpush1.bf16.msra.mxu0 %v11608_v21  ;;  %v9544_v63 = vpop.f32.mrb[208].mxu1  ;;  %v7035_v21 = vld [vmem:[%s18640_s6 + $0x13d8] sm:$0xff]  ;;  %v11624_v18 = vpack.c.bf16 %v7030_v48, %v7026_v45  ;;  %v6877_v45 = vld [vmem:[%s18640_s6 + $0xee8] sm:$0xff] }
 0x6d1   :  { %v9545_v11 = vpop.f32.mrb[209].mxu1  ;;  %11611 = vmatprep.subr.bf16.mxu0 %v11610_v33  ;;  %v6840_v33 = vld [vmem:[%s18640_s6 + $0xdc0] sm:$0xff] }
 0x6d2   :  { %v9546_v8 = vadd.f32 %v9545_v11, %v9544_v63  ;;  %11117 = vmatpush1.bf16.msra.mxu1 %v11116_v40  ;;  %v6849_v40 = vld [vmem:[%s18640_s6 + $0xe08] sm:$0xff]  ;;  %v5374_v63 = vrot.slane %v17497_v42, %v16557_v10 }
 0x6d3   :  { %11119 = vmatprep.subr.bf16.mxu1 %v11118_v9  ;;  %v11626_v9 = vpack.c.bf16 %v7039_v2, %v7035_v21  ;;  %v11134_v11 = vpack.c.bf16 %v6853_v28, %v6849_v40  ;;  %v7062_v21 = vld [vmem:[%s18640_s6 + $0x14b0] sm:$0xff]  ;;  %v11144_v2 = vpack.c.bf16 %v6868_v46, %v6864_v35  ;;  %v6876_v40 = vld [vmem:[%s18640_s6 + $0xee0] sm:$0xff] }
 0x6d4   :  { %11613 = vmatpush1.bf16.msra.mxu0 %v11612_v50  ;;  %v6314_v61 = vadd.f32 %v9546_v8, %v5378_v1  ;;  %v11132_v50 = vpack.c.bf16 %v6844_v12, %v6840_v33  ;;  %v6857_v8 = vld [vmem:[%s18640_s6 + $0xe48] sm:$0xff]  ;;  %v7042_v1 = vld [vmem:[%s18640_s6 + $0x1410] sm:$0xff]  ;;  %v17843_v25 = vadd.f32 %v16545_v56, %v5374_v63  ;;  %v6860_v56 = vld [vmem:[%s18640_s6 + $0xe60] sm:$0xff] }
 0x6d5   :  { %11615 = vmatprep.subr.bf16.mxu0 %v11614_v39  ;;  %v6848_v39 = vld [vmem:[%s18640_s6 + $0xe00] sm:$0xff]  ;;  %v11140_v29 = vpack.c.bf16 %v6860_v56, %v6856_v24  ;;  %v7071_v33 = vld [vmem:[%s18640_s6 + $0x14f8] sm:$0xff]  ;;  %v7070_v63 = vld [vmem:[%s18640_s6 + $0x14f0] sm:$0xff] }
 0x6d6   :  { %11121 = vmatpush1.bf16.msra.mxu1 %v11120_v22  ;;  %v6861_v22 = vld [vmem:[%s18640_s6 + $0xe68] sm:$0xff]  ;;  %v11136_v51 = vpack.c.bf16 %v6852_v37, %v6848_v39  ;;  %v6880_v39 = vld [vmem:[%s18640_s6 + $0xf00] sm:$0xff] }
 0x6d7   :  { %11123 = vmatprep.subr.bf16.mxu1 %v11122_v57  ;;  %v7046_v57 = vld [vmem:[%s18640_s6 + $0x1430] sm:$0xff]  ;;  %v11138_v52 = vpack.c.bf16 %v6861_v22, %v6857_v8  ;;  %v6884_v37 = vld [vmem:[%s18640_s6 + $0xf20] sm:$0xff]  ;;  %v6889_v8 = vld [vmem:[%s18640_s6 + $0xf48] sm:$0xff] }
 0x6d8   :  { %11617 = vmatpush1.bf16.msra.mxu0 %v11616_v30  ;;  %v6383_v13 = vpop.f32.mrb[210].mxu1  ;;  %v7055_v30 = vld [vmem:[%s18640_s6 + $0x1478] sm:$0xff]  ;;  %v6893_v22 = vld [vmem:[%s18640_s6 + $0xf68] sm:$0xff]  ;;  %v6888_v24 = vld [vmem:[%s18640_s6 + $0xf40] sm:$0xff] }
 0x6d9   :  { %v17779_v36 = vadd.f32 %v6383_v13, %v6314_v61  ;;  %v10101_v53 = vpop.f32.mrb[211].mxu1  ;;  %11619 = vmatprep.subr.bf16.mxu0 %v11618_v59  ;;  %v11632_v59 = vpack.c.bf16 %v7046_v57, %v7042_v1  ;;  %v11634_v14 = vpack.c.bf16 %v7055_v30, %v7051_v27  ;;  %v7054_v61 = vld [vmem:[%s18640_s6 + $0x1470] sm:$0xff]  ;;  %v7063_v13 = vld [vmem:[%s18640_s6 + $0x14b8] sm:$0xff]  ;;  %v6892_v56 = vld [vmem:[%s18640_s6 + $0xf60] sm:$0xff] }
 0x6da   :  { %11125 = vmatpush1.bf16.msra.mxu1 %v11124_v60  ;;  %v6395_v60 = vmax.f32 %v17834_v44, 0.0  ;;  %v11636_v53 = vpack.c.bf16 %v7054_v61, %v7050_v58  ;;  %v11638_v48 = vpack.c.bf16 %v7063_v13, %v7059_v16  ;;  %v7074_v1 = vld [vmem:[%s18640_s6 + $0x1510] sm:$0xff]  ;;  %v7083_v27 = vld [vmem:[%s18640_s6 + $0x1558] sm:$0xff]  ;;  %v6896_v35 = vld [vmem:[%s18640_s6 + $0xf80] sm:$0xff] }
 0x6db   :  { %11127 = vmatprep.subr.bf16.mxu1 %v11126_v47  ;;  %v6398_v47 = vmax.f32 %v17843_v25, 0.0  ;;  %v7078_v57 = vld [vmem:[%s18640_s6 + $0x1530] sm:$0xff]  ;;  %v7087_v30 = vld [vmem:[%s18640_s6 + $0x1578] sm:$0xff]  ;;  %v6900_v46 = vld [vmem:[%s18640_s6 + $0xfa0] sm:$0xff] }
 0x6dc   :  { %11621 = vmatpush1.bf16.msra.mxu0 %v11620_v23  ;;  %v11142_v23 = vpack.c.bf16 %v6869_v5, %v6865_v31  ;;  %v6897_v31 = vld [vmem:[%s18640_s6 + $0xf88] sm:$0xff]  ;;  %v7082_v58 = vld [vmem:[%s18640_s6 + $0x1550] sm:$0xff]  ;;  %v7091_v16 = vld [vmem:[%s18640_s6 + $0x1598] sm:$0xff] }
 0x6dd   :  { %11623 = vmatprep.subr.bf16.mxu0 %v11622_v62  ;;  %v6873_v62 = vld [vmem:[%s18640_s6 + $0xec8] sm:$0xff]  ;;  %v7086_v61 = vld [vmem:[%s18640_s6 + $0x1570] sm:$0xff]  ;;  %v7095_v13 = vld [vmem:[%s18640_s6 + $0x15b8] sm:$0xff] }
 0x6de   :  { %11129 = vmatpush1.bf16.msra.mxu1 %v11128_v0  ;;  %v7058_v0 = vld [vmem:[%s18640_s6 + $0x1490] sm:$0xff]  ;;  %v11146_v12 = vpack.c.bf16 %v6877_v45, %v6873_v62  ;;  %v6901_v5 = vld [vmem:[%s18640_s6 + $0xfa8] sm:$0xff] }
 0x6df   :  { %11131 = vmatprep.subr.bf16.mxu1 %v11130_v34  ;;  %v7067_v34 = vld [vmem:[%s18640_s6 + $0x14d8] sm:$0xff]  ;;  %v11640_v28 = vpack.c.bf16 %v7062_v21, %v7058_v0  ;;  %v6905_v62 = vld [vmem:[%s18640_s6 + $0xfc8] sm:$0xff]  ;;  %v7090_v0 = vld [vmem:[%s18640_s6 + $0x1590] sm:$0xff] }
 0x6e0   :  { %11625 = vmatpush1.bf16.msra.mxu0 %v11624_v18  ;;  %v6872_v18 = vld [vmem:[%s18640_s6 + $0xec0] sm:$0xff]  ;;  %v11642_v7 = vpack.c.bf16 %v7071_v33, %v7067_v34  ;;  %v6909_v45 = vld [vmem:[%s18640_s6 + $0xfe8] sm:$0xff]  ;;  %v7094_v21 = vld [vmem:[%s18640_s6 + $0x15b0] sm:$0xff] }
 0x6e1   :  { %11627 = vmatprep.subr.bf16.mxu0 %v11626_v9  ;;  %v6885_v9 = vld [vmem:[%s18640_s6 + $0xf28] sm:$0xff]  ;;  %v7099_v34 = vld [vmem:[%s18640_s6 + $0x15d8] sm:$0xff] }
 0x6e2   :  { %11133 = vmatpush1.bf16.msra.mxu1 %v11132_v50  ;;  %v11148_v50 = vpack.c.bf16 %v6876_v40, %v6872_v18  ;;  %v7103_v33 = vld [vmem:[%s18640_s6 + $0x15f8] sm:$0xff]  ;;  %v6904_v18 = vld [vmem:[%s18640_s6 + $0xfc0] sm:$0xff]  ;;  %v7065_v44 = vld [vmem:[%s18640_s6 + $0x14c8] sm:$0xff] }
 0x6e3   :  { %11135 = vmatprep.subr.bf16.mxu1 %v11134_v11  ;;  %v11150_v11 = vpack.c.bf16 %v6885_v9, %v6881_v4  ;;  %v6908_v40 = vld [vmem:[%s18640_s6 + $0xfe0] sm:$0xff]  ;;  %v6913_v4 = vld [vmem:[%s18640_s6 + $0x1008] sm:$0xff] }
 0x6e4   :  { %11629 = vmatpush1.bf16.msra.mxu0 %v11628_v17  ;;  %v11644_v17 = vpack.c.bf16 %v7070_v63, %v7066_v49  ;;  %v6917_v9 = vld [vmem:[%s18640_s6 + $0x1028] sm:$0xff]  ;;  %v7098_v49 = vld [vmem:[%s18640_s6 + $0x15d0] sm:$0xff] }
 0x6e5   :  { %11631 = vmatprep.subr.bf16.mxu0 %v11630_v6  ;;  %v11646_v6 = vpack.c.bf16 %v7079_v19, %v7075_v20  ;;  %v7102_v63 = vld [vmem:[%s18640_s6 + $0x15f0] sm:$0xff]  ;;  %v7107_v20 = vld [vmem:[%s18640_s6 + $0x1618] sm:$0xff]  ;;  %v7069_v25 = vld [vmem:[%s18640_s6 + $0x14e8] sm:$0xff] }
 0x6e6   :  { %11137 = vmatpush1.bf16.msra.mxu1 %v11136_v51  ;;  %v11152_v51 = vpack.c.bf16 %v6884_v37, %v6880_v39  ;;  %v7111_v19 = vld [vmem:[%s18640_s6 + $0x1638] sm:$0xff]  ;;  %v6912_v39 = vld [vmem:[%s18640_s6 + $0x1000] sm:$0xff] }
 0x6e7   :  { %8071 = vmatmul.mubr.f32.vlgmr.msra.gmra.mrb[76].mxu0 %v6395_v60  ;;  %11139 = vmatprep.subr.bf16.mxu1 %v11138_v52  ;;  %v11154_v52 = vpack.c.bf16 %v6893_v22, %v6889_v8  ;;  %v6916_v37 = vld [vmem:[%s18640_s6 + $0x1020] sm:$0xff]  ;;  %v6921_v8 = vld [vmem:[%s18640_s6 + $0x1048] sm:$0xff] }
 0x6e8   :  { %11633 = vmatpush1.bf16.msra.mxu0 %v11632_v59  ;;  %8141 = vmatprep.mubr.f32.mxu0 %v6398_v47  ;;  %v11648_v59 = vpack.c.bf16 %v7078_v57, %v7074_v1  ;;  %v6925_v22 = vld [vmem:[%s18640_s6 + $0x1068] sm:$0xff]  ;;  %v7106_v1 = vld [vmem:[%s18640_s6 + $0x1610] sm:$0xff] }
 0x6e9   :  { %11635 = vmatprep.subr.bf16.mxu0 %v11634_v14  ;;  %v11650_v14 = vpack.c.bf16 %v7087_v30, %v7083_v27  ;;  %v7110_v57 = vld [vmem:[%s18640_s6 + $0x1630] sm:$0xff]  ;;  %v7115_v27 = vld [vmem:[%s18640_s6 + $0x1658] sm:$0xff] }
 0x6ea   :  { %11141 = vmatpush1.bf16.msra.mxu1 %v11140_v29  ;;  %v11156_v29 = vpack.c.bf16 %v6892_v56, %v6888_v24  ;;  %v7119_v30 = vld [vmem:[%s18640_s6 + $0x1678] sm:$0xff]  ;;  %v6920_v24 = vld [vmem:[%s18640_s6 + $0x1040] sm:$0xff] }
 0x6eb   :  { %11143 = vmatprep.subr.bf16.mxu1 %v11142_v23  ;;  %v11158_v23 = vpack.c.bf16 %v6901_v5, %v6897_v31  ;;  %v6924_v56 = vld [vmem:[%s18640_s6 + $0x1060] sm:$0xff]  ;;  %v6929_v31 = vld [vmem:[%s18640_s6 + $0x1088] sm:$0xff] }
 0x6ec   :  { %11637 = vmatpush1.bf16.msra.mxu0 %v11636_v53  ;;  %v11652_v53 = vpack.c.bf16 %v7086_v61, %v7082_v58  ;;  %v6933_v5 = vld [vmem:[%s18640_s6 + $0x10a8] sm:$0xff]  ;;  %v7114_v58 = vld [vmem:[%s18640_s6 + $0x1650] sm:$0xff] }
 0x6ed   :  { %11639 = vmatprep.subr.bf16.mxu0 %v11638_v48  ;;  %v11654_v48 = vpack.c.bf16 %v7095_v13, %v7091_v16  ;;  %v7118_v61 = vld [vmem:[%s18640_s6 + $0x1670] sm:$0xff]  ;;  %v11174_v16 = vpack.c.bf16 %v6933_v5, %v6929_v31  ;;  %v6928_v13 = vld [vmem:[%s18640_s6 + $0x1080] sm:$0xff] }
 0x6ee   :  { %11145 = vmatpush1.bf16.msra.mxu1 %v11144_v2  ;;  %v11160_v2 = vpack.c.bf16 %v6900_v46, %v6896_v35  ;;  %v6941_v35 = vld [vmem:[%s18640_s6 + $0x10e8] sm:$0xff]  ;;  %v7150_v31 = vld [vmem:[%s18640_s6 + $0x1770] sm:$0xff] }
 0x6ef   :  { %11147 = vmatprep.subr.bf16.mxu1 %v11146_v12  ;;  %v11162_v12 = vpack.c.bf16 %v6909_v45, %v6905_v62  ;;  %v7126_v62 = vld [vmem:[%s18640_s6 + $0x16b0] sm:$0xff]  ;;  %v11176_v45 = vpack.c.bf16 %v6932_v38, %v6928_v13  ;;  %v6973_v13 = vld [vmem:[%s18640_s6 + $0x11e8] sm:$0xff] }
 0x6f0   :  { %11641 = vmatpush1.bf16.msra.mxu0 %v11640_v28  ;;  %v11656_v28 = vpack.c.bf16 %v7094_v21, %v7090_v0  ;;  %v7135_v0 = vld [vmem:[%s18640_s6 + $0x16f8] sm:$0xff] }
 0x6f1   :  { %11643 = vmatprep.subr.bf16.mxu0 %v11642_v7  ;;  %v11658_v7 = vpack.c.bf16 %v7103_v33, %v7099_v34  ;;  %v6940_v34 = vld [vmem:[%s18640_s6 + $0x10e0] sm:$0xff] }
 0x6f2   :  { %11149 = vmatpush1.bf16.msra.mxu1 %v11148_v50  ;;  %v11164_v50 = vpack.c.bf16 %v6908_v40, %v6904_v18  ;;  %v6949_v18 = vld [vmem:[%s18640_s6 + $0x1128] sm:$0xff] }
 0x6f3   :  { %11151 = vmatprep.subr.bf16.mxu1 %v11150_v11  ;;  %v11166_v11 = vpack.c.bf16 %v6917_v9, %v6913_v4  ;;  %v7134_v4 = vld [vmem:[%s18640_s6 + $0x16f0] sm:$0xff] }
 0x6f4   :  { %11645 = vmatpush1.bf16.msra.mxu0 %v11644_v17  ;;  %v11660_v17 = vpack.c.bf16 %v7102_v63, %v7098_v49  ;;  %v7143_v49 = vld [vmem:[%s18640_s6 + $0x1738] sm:$0xff] }
 0x6f5   :  { %11647 = vmatprep.subr.bf16.mxu0 %v11646_v6  ;;  %v11662_v6 = vpack.c.bf16 %v7111_v19, %v7107_v20  ;;  %v6948_v20 = vld [vmem:[%s18640_s6 + $0x1120] sm:$0xff] }
 0x6f6   :  { %11153 = vmatpush1.bf16.msra.mxu1 %v11152_v51  ;;  %v11168_v51 = vpack.c.bf16 %v6916_v37, %v6912_v39  ;;  %v6957_v39 = vld [vmem:[%s18640_s6 + $0x1168] sm:$0xff] }
 0x6f7   :  { %11155 = vmatprep.subr.bf16.mxu1 %v11154_v52  ;;  %v11170_v52 = vpack.c.bf16 %v6925_v22, %v6921_v8  ;;  %v7142_v8 = vld [vmem:[%s18640_s6 + $0x1730] sm:$0xff] }
 0x6f8   :  { %11649 = vmatpush1.bf16.msra.mxu0 %v11648_v59  ;;  %v11664_v59 = vpack.c.bf16 %v7110_v57, %v7106_v1  ;;  %v7151_v1 = vld [vmem:[%s18640_s6 + $0x1778] sm:$0xff] }
 0x6f9   :  { %11651 = vmatprep.subr.bf16.mxu0 %v11650_v14  ;;  %v11666_v14 = vpack.c.bf16 %v7119_v30, %v7115_v27  ;;  %v6956_v27 = vld [vmem:[%s18640_s6 + $0x1160] sm:$0xff] }
 0x6fa   :  { %11157 = vmatpush1.bf16.msra.mxu1 %v11156_v29  ;;  %v11172_v29 = vpack.c.bf16 %v6924_v56, %v6920_v24  ;;  %v6965_v24 = vld [vmem:[%s18640_s6 + $0x11a8] sm:$0xff] }
 0x6fb   :  { %11159 = vmatprep.subr.bf16.mxu1 %v11158_v23  ;;  %v6937_v23 = vld [vmem:[%s18640_s6 + $0x10c8] sm:$0xff] }
 0x6fc   :  { %11653 = vmatpush1.bf16.msra.mxu0 %v11652_v53  ;;  %v7122_v53 = vld [vmem:[%s18640_s6 + $0x1690] sm:$0xff]  ;;  %v11178_v21 = vpack.c.bf16 %v6941_v35, %v6937_v23 }
 0x6fd   :  { %11655 = vmatprep.subr.bf16.mxu0 %v11654_v48  ;;  %v7131_v48 = vld [vmem:[%s18640_s6 + $0x16d8] sm:$0xff]  ;;  %v11672_v33 = vpack.c.bf16 %v7126_v62, %v7122_v53  ;;  %v7158_v23 = vld [vmem:[%s18640_s6 + $0x17b0] sm:$0xff] }
 0x6fe   :  { %11161 = vmatpush1.bf16.msra.mxu1 %v11160_v2  ;;  %v6936_v2 = vld [vmem:[%s18640_s6 + $0x10c0] sm:$0xff]  ;;  %v11674_v40 = vpack.c.bf16 %v7135_v0, %v7131_v48  ;;  %v7167_v53 = vld [vmem:[%s18640_s6 + $0x17f8] sm:$0xff] }
 0x6ff   :  { %11163 = vmatprep.subr.bf16.mxu1 %v11162_v12  ;;  %v6945_v12 = vld [vmem:[%s18640_s6 + $0x1108] sm:$0xff]  ;;  %v11180_v9 = vpack.c.bf16 %v6940_v34, %v6936_v2  ;;  %v6972_v48 = vld [vmem:[%s18640_s6 + $0x11e0] sm:$0xff]  ;;  %v5370_v34 = vrot.slane %v17497_v42, %v16548_v54  ;;  %v7175_v42 = vld [vmem:[%s18640_s6 + $0x1838] sm:$0xff] }
 0x700   :  { %11657 = vmatpush1.bf16.msra.mxu0 %v11656_v28  ;;  %v7130_v28 = vld [vmem:[%s18640_s6 + $0x16d0] sm:$0xff]  ;;  %v11182_v63 = vpack.c.bf16 %v6949_v18, %v6945_v12  ;;  %v6981_v2 = vld [vmem:[%s18640_s6 + $0x1228] sm:$0xff] }
 0x701   :  { %11659 = vmatprep.subr.bf16.mxu0 %v11658_v7  ;;  %v7139_v7 = vld [vmem:[%s18640_s6 + $0x1718] sm:$0xff]  ;;  %v11676_v19 = vpack.c.bf16 %v7134_v4, %v7130_v28  ;;  %v7162_v12 = vld [vmem:[%s18640_s6 + $0x17d0] sm:$0xff] }
 0x702   :  { %11165 = vmatpush1.bf16.msra.mxu1 %v11164_v50  ;;  %v6944_v50 = vld [vmem:[%s18640_s6 + $0x1100] sm:$0xff]  ;;  %v11678_v37 = vpack.c.bf16 %v7143_v49, %v7139_v7  ;;  %v7166_v18 = vld [vmem:[%s18640_s6 + $0x17f0] sm:$0xff]  ;;  %v7171_v28 = vld [vmem:[%s18640_s6 + $0x1818] sm:$0xff] }
 0x703   :  { %11167 = vmatprep.subr.bf16.mxu1 %v11166_v11  ;;  %v6953_v11 = vld [vmem:[%s18640_s6 + $0x1148] sm:$0xff]  ;;  %v11184_v22 = vpack.c.bf16 %v6948_v20, %v6944_v50  ;;  %v6980_v7 = vld [vmem:[%s18640_s6 + $0x1220] sm:$0xff]  ;;  %v11692_v49 = vpack.c.bf16 %v7166_v18, %v7162_v12  ;;  %v18236_v20 = vadd.f32 %v16537_v32, %v5370_v34  ;;  %v7183_v32 = vld [vmem:[%s18640_s6 + $0x1878] sm:$0xff] }
 0x704   :  { %11661 = vmatpush1.bf16.msra.mxu0 %v11660_v17  ;;  %v7138_v17 = vld [vmem:[%s18640_s6 + $0x1710] sm:$0xff]  ;;  %v11186_v57 = vpack.c.bf16 %v6957_v39, %v6953_v11  ;;  %v6989_v50 = vld [vmem:[%s18640_s6 + $0x1268] sm:$0xff]  ;;  %v7008_v12 = vld [vmem:[%s18640_s6 + $0x1300] sm:$0xff] }
 0x705   :  { %7503 = vmatmul.mubr.f32.vlgmr.msra.gmra.mrb[212].mxu1 %v6393_v55  ;;  %11663 = vmatprep.subr.bf16.mxu0 %v11662_v6  ;;  %v7127_v55 = vld [vmem:[%s18640_s6 + $0x16b8] sm:$0xff]  ;;  %v11680_v30 = vpack.c.bf16 %v7142_v8, %v7138_v17  ;;  %v7170_v11 = vld [vmem:[%s18640_s6 + $0x1810] sm:$0xff]  ;;  %v7012_v18 = vld [vmem:[%s18640_s6 + $0x1320] sm:$0xff] }
 0x706   :  { %11169 = vmatpush1.bf16.msra.mxu1 %v11168_v51  ;;  %7573 = vmatprep.mubr.f32.mxu1 %v6396_v15  ;;  %v11668_v15 = vpack.c.bf16 %v7118_v61, %v7114_v58  ;;  %v11670_v46 = vpack.c.bf16 %v7127_v55, %v7123_v3  ;;  %v7147_v6 = vld [vmem:[%s18640_s6 + $0x1758] sm:$0xff]  ;;  %v6952_v51 = vld [vmem:[%s18640_s6 + $0x1140] sm:$0xff]  ;;  %v7174_v39 = vld [vmem:[%s18640_s6 + $0x1830] sm:$0xff] }
 0x707   :  { %11171 = vmatprep.subr.bf16.mxu1 %v11170_v52  ;;  %v6961_v52 = vld [vmem:[%s18640_s6 + $0x1188] sm:$0xff]  ;;  %v11682_v56 = vpack.c.bf16 %v7151_v1, %v7147_v6  ;;  %v11188_v5 = vpack.c.bf16 %v6956_v27, %v6952_v51  ;;  %v7159_v58 = vld [vmem:[%s18640_s6 + $0x17b8] sm:$0xff]  ;;  %v6964_v3 = vld [vmem:[%s18640_s6 + $0x11a0] sm:$0xff]  ;;  %v11696_v1 = vpack.c.bf16 %v7174_v39, %v7170_v11  ;;  %v6397_v27 = vmax.f32 %v18236_v20, 0.0 }
 0x708   :  { %11665 = vmatpush1.bf16.msra.mxu0 %v11664_v59  ;;  %v7146_v59 = vld [vmem:[%s18640_s6 + $0x1750] sm:$0xff]  ;;  %v11190_v61 = vpack.c.bf16 %v6965_v24, %v6961_v52  ;;  %v7179_v17 = vld [vmem:[%s18640_s6 + $0x1858] sm:$0xff]  ;;  %v6988_v6 = vld [vmem:[%s18640_s6 + $0x1260] sm:$0xff] }
 0x709   :  { %11667 = vmatprep.subr.bf16.mxu0 %v11666_v14  ;;  %v7155_v14 = vld [vmem:[%s18640_s6 + $0x1798] sm:$0xff]  ;;  %v11684_v55 = vpack.c.bf16 %v7150_v31, %v7146_v59  ;;  %v6997_v51 = vld [vmem:[%s18640_s6 + $0x12a8] sm:$0xff]  ;;  %v7178_v52 = vld [vmem:[%s18640_s6 + $0x1850] sm:$0xff] }
 0x70a   :  { %11173 = vmatpush1.bf16.msra.mxu1 %v11172_v29  ;;  %v6960_v29 = vld [vmem:[%s18640_s6 + $0x1180] sm:$0xff]  ;;  %v11686_v38 = vpack.c.bf16 %v7159_v58, %v7155_v14  ;;  %v7182_v24 = vld [vmem:[%s18640_s6 + $0x1870] sm:$0xff]  ;;  %v7187_v59 = vld [vmem:[%s18640_s6 + $0x1898] sm:$0xff] }
 0x70b   :  { %11175 = vmatprep.subr.bf16.mxu1 %v11174_v16  ;;  %v6969_v16 = vld [vmem:[%s18640_s6 + $0x11c8] sm:$0xff]  ;;  %v11192_v35 = vpack.c.bf16 %v6964_v3, %v6960_v29  ;;  %v7191_v31 = vld [vmem:[%s18640_s6 + $0x18b8] sm:$0xff]  ;;  %v6992_v14 = vld [vmem:[%s18640_s6 + $0x1280] sm:$0xff] }
 0x70c   :  { %11669 = vmatpush1.bf16.msra.mxu0 %v11668_v15  ;;  %v7154_v15 = vld [vmem:[%s18640_s6 + $0x1790] sm:$0xff]  ;;  %v11194_v62 = vpack.c.bf16 %v6973_v13, %v6969_v16  ;;  %v6996_v58 = vld [vmem:[%s18640_s6 + $0x12a0] sm:$0xff]  ;;  %v7001_v29 = vld [vmem:[%s18640_s6 + $0x12c8] sm:$0xff] }
 0x70d   :  { %11671 = vmatprep.subr.bf16.mxu0 %v11670_v46  ;;  %v7163_v46 = vld [vmem:[%s18640_s6 + $0x17d8] sm:$0xff]  ;;  %v11688_v0 = vpack.c.bf16 %v7158_v23, %v7154_v15  ;;  %v7005_v3 = vld [vmem:[%s18640_s6 + $0x12e8] sm:$0xff]  ;;  %v7186_v16 = vld [vmem:[%s18640_s6 + $0x1890] sm:$0xff] }
 0x70e   :  { %11177 = vmatpush1.bf16.msra.mxu1 %v11176_v45  ;;  %v6968_v45 = vld [vmem:[%s18640_s6 + $0x11c0] sm:$0xff]  ;;  %v7190_v13 = vld [vmem:[%s18640_s6 + $0x18b0] sm:$0xff]  ;;  %v7195_v15 = vld [vmem:[%s18640_s6 + $0x18d8] sm:$0xff] }
 0x70f   :  { %11179 = vmatprep.subr.bf16.mxu1 %v11178_v21  ;;  %v6977_v21 = vld [vmem:[%s18640_s6 + $0x1208] sm:$0xff]  ;;  %v7199_v23 = vld [vmem:[%s18640_s6 + $0x18f8] sm:$0xff] }
 0x710   :  { %11673 = vmatpush1.bf16.msra.mxu0 %v11672_v33  ;;  %v11690_v33 = vpack.c.bf16 %v7167_v53, %v7163_v46  ;;  %v11198_v4 = vpack.c.bf16 %v6981_v2, %v6977_v21  ;;  %v7000_v46 = vld [vmem:[%s18640_s6 + $0x12c0] sm:$0xff]  ;;  %v7194_v21 = vld [vmem:[%s18640_s6 + $0x18d0] sm:$0xff]  ;;  %v7197_v20 = vld [vmem:[%s18640_s6 + $0x18e8] sm:$0xff] }
 0x711   :  { %11675 = vmatprep.subr.bf16.mxu0 %v11674_v40  ;;  %v11196_v40 = vpack.c.bf16 %v6972_v48, %v6968_v45  ;;  %v7004_v53 = vld [vmem:[%s18640_s6 + $0x12e0] sm:$0xff]  ;;  %v7009_v45 = vld [vmem:[%s18640_s6 + $0x1308] sm:$0xff]  ;;  %v7198_v2 = vld [vmem:[%s18640_s6 + $0x18f0] sm:$0xff] }
 0x712   :  { %11181 = vmatpush1.bf16.msra.mxu1 %v11180_v9  ;;  %v6976_v9 = vld [vmem:[%s18640_s6 + $0x1200] sm:$0xff]  ;;  %v7013_v48 = vld [vmem:[%s18640_s6 + $0x1328] sm:$0xff]  ;;  %v11212_v34 = vpack.c.bf16 %v7004_v53, %v7000_v46 }
 0x713   :  { %11183 = vmatprep.subr.bf16.mxu1 %v11182_v63  ;;  %v6985_v63 = vld [vmem:[%s18640_s6 + $0x1248] sm:$0xff] }
 0x714   :  { %11677 = vmatpush1.bf16.msra.mxu0 %v11676_v19  ;;  %v11694_v19 = vpack.c.bf16 %v7175_v42, %v7171_v28  ;;  %v11202_v8 = vpack.c.bf16 %v6989_v50, %v6985_v63  ;;  %v7017_v28 = vld [vmem:[%s18640_s6 + $0x1348] sm:$0xff] }
 0x715   :  { %11679 = vmatprep.subr.bf16.mxu0 %v11678_v37  ;;  %v11200_v37 = vpack.c.bf16 %v6980_v7, %v6976_v9  ;;  %v7021_v42 = vld [vmem:[%s18640_s6 + $0x1368] sm:$0xff]  ;;  %v7016_v7 = vld [vmem:[%s18640_s6 + $0x1340] sm:$0xff] }
 0x716   :  { %11185 = vmatpush1.bf16.msra.mxu1 %v11184_v22  ;;  %v6984_v22 = vld [vmem:[%s18640_s6 + $0x1240] sm:$0xff]  ;;  %v11218_v9 = vpack.c.bf16 %v7021_v42, %v7017_v28  ;;  %v7025_v63 = vld [vmem:[%s18640_s6 + $0x1388] sm:$0xff] }
 0x717   :  { %11187 = vmatprep.subr.bf16.mxu1 %v11186_v57  ;;  %v6993_v57 = vld [vmem:[%s18640_s6 + $0x1288] sm:$0xff] }
 0x718   :  { %11681 = vmatpush1.bf16.msra.mxu0 %v11680_v30  ;;  %v11698_v30 = vpack.c.bf16 %v7183_v32, %v7179_v17  ;;  %v7029_v50 = vld [vmem:[%s18640_s6 + $0x13a8] sm:$0xff]  ;;  %v7028_v17 = vld [vmem:[%s18640_s6 + $0x13a0] sm:$0xff] }
 0x719   :  { %11683 = vmatprep.subr.bf16.mxu0 %v11682_v56  ;;  %v11204_v56 = vpack.c.bf16 %v6988_v6, %v6984_v22  ;;  %v11222_v39 = vpack.c.bf16 %v7029_v50, %v7025_v63  ;;  %v7033_v32 = vld [vmem:[%s18640_s6 + $0x13c8] sm:$0xff] }
 0x71a   :  { %11189 = vmatpush1.bf16.msra.mxu1 %v11188_v5  ;;  %v11206_v5 = vpack.c.bf16 %v6997_v51, %v6993_v57  ;;  %v7036_v57 = vld [vmem:[%s18640_s6 + $0x13e0] sm:$0xff]  ;;  %v7041_v51 = vld [vmem:[%s18640_s6 + $0x1408] sm:$0xff] }
 0x71b   :  { %11191 = vmatprep.subr.bf16.mxu1 %v11190_v61  ;;  %v11700_v61 = vpack.c.bf16 %v7182_v24, %v7178_v52  ;;  %v7073_v46 = vld [vmem:[%s18640_s6 + $0x1508] sm:$0xff] }
 0x71c   :  { %11685 = vmatpush1.bf16.msra.mxu0 %v11684_v55  ;;  %v11702_v55 = vpack.c.bf16 %v7191_v31, %v7187_v59  ;;  %v7044_v59 = vld [vmem:[%s18640_s6 + $0x1420] sm:$0xff]  ;;  %v7049_v31 = vld [vmem:[%s18640_s6 + $0x1448] sm:$0xff] }
 0x71d   :  { %11687 = vmatprep.subr.bf16.mxu0 %v11686_v38  ;;  %v11208_v38 = vpack.c.bf16 %v6996_v58, %v6992_v14  ;;  %v7077_v53 = vld [vmem:[%s18640_s6 + $0x1528] sm:$0xff] }
 0x71e   :  { %11193 = vmatpush1.bf16.msra.mxu1 %v11192_v35  ;;  %v11210_v35 = vpack.c.bf16 %v7005_v3, %v7001_v29  ;;  %v7052_v29 = vld [vmem:[%s18640_s6 + $0x1460] sm:$0xff]  ;;  %v7057_v3 = vld [vmem:[%s18640_s6 + $0x1488] sm:$0xff] }
 0x71f   :  { %11195 = vmatprep.subr.bf16.mxu1 %v11194_v62  ;;  %v11704_v62 = vpack.c.bf16 %v7190_v13, %v7186_v16  ;;  %v7093_v28 = vld [vmem:[%s18640_s6 + $0x15a8] sm:$0xff] }
 0x720   :  { %11689 = vmatpush1.bf16.msra.mxu0 %v11688_v0  ;;  %v11706_v0 = vpack.c.bf16 %v7199_v23, %v7195_v15  ;;  %v7060_v15 = vld [vmem:[%s18640_s6 + $0x14a0] sm:$0xff]  ;;  %v7101_v63 = vld [vmem:[%s18640_s6 + $0x15e8] sm:$0xff] }
 0x721   :  { %11691 = vmatprep.subr.bf16.mxu0 %v11690_v33  ;;  %v11214_v33 = vpack.c.bf16 %v7013_v48, %v7009_v45  ;;  %v7064_v23 = vld [vmem:[%s18640_s6 + $0x14c0] sm:$0xff]  ;;  %v11246_v45 = vpack.c.bf16 %v7077_v53, %v7073_v46  ;;  %v7149_v46 = vld [vmem:[%s18640_s6 + $0x1768] sm:$0xff] }
 0x722   :  { %11197 = vmatpush1.bf16.msra.mxu1 %v11196_v40  ;;  %v11708_v40 = vpack.c.bf16 %v7198_v2, %v7194_v21  ;;  %v7072_v48 = vld [vmem:[%s18640_s6 + $0x1500] sm:$0xff]  ;;  %v7081_v21 = vld [vmem:[%s18640_s6 + $0x1548] sm:$0xff] }
 0x723   :  { %11199 = vmatprep.subr.bf16.mxu1 %v11198_v4  ;;  %v11216_v4 = vpack.c.bf16 %v7012_v18, %v7008_v12  ;;  %v7085_v2 = vld [vmem:[%s18640_s6 + $0x1568] sm:$0xff]  ;;  %v7080_v12 = vld [vmem:[%s18640_s6 + $0x1540] sm:$0xff] }
 0x724   :  { %11693 = vmatpush1.bf16.msra.mxu0 %v11692_v49  ;;  %v7020_v49 = vld [vmem:[%s18640_s6 + $0x1360] sm:$0xff] }
 0x725   :  { %11695 = vmatprep.subr.bf16.mxu0 %v11694_v19  ;;  %v6399_v19 = vmax.f32 %v17779_v36, 0.0  ;;  %v11220_v11 = vpack.c.bf16 %v7020_v49, %v7016_v7  ;;  %v7084_v18 = vld [vmem:[%s18640_s6 + $0x1560] sm:$0xff]  ;;  %v7097_v49 = vld [vmem:[%s18640_s6 + $0x15c8] sm:$0xff] }
 0x726   :  { %11201 = vmatpush1.bf16.msra.mxu1 %v11200_v37  ;;  %v7024_v37 = vld [vmem:[%s18640_s6 + $0x1380] sm:$0xff]  ;;  %v11252_v42 = vpack.c.bf16 %v7084_v18, %v7080_v12  ;;  %v7161_v18 = vld [vmem:[%s18640_s6 + $0x17c8] sm:$0xff] }
 0x727   :  { %8142 = vmatmul.mubr.f32.vlgmr.msra.gmra.mrb[76].mxu0 %v6397_v27  ;;  %11203 = vmatprep.subr.bf16.mxu1 %v11202_v8  ;;  %v7037_v8 = vld [vmem:[%s18640_s6 + $0x13e8] sm:$0xff]  ;;  %v11224_v22 = vpack.c.bf16 %v7028_v17, %v7024_v37  ;;  %v7092_v7 = vld [vmem:[%s18640_s6 + $0x15a0] sm:$0xff] }
 0x728   :  { %11697 = vmatpush1.bf16.msra.mxu0 %v11696_v1  ;;  %8212 = vmatprep.mubr.f32.mxu0 %v11780_v26  ;;  %v11226_v6 = vpack.c.bf16 %v7037_v8, %v7033_v32  ;;  %v7032_v1 = vld [vmem:[%s18640_s6 + $0x13c0] sm:$0xff]  ;;  %v7105_v17 = vld [vmem:[%s18640_s6 + $0x1608] sm:$0xff] }
 0x729   :  { %11699 = vmatprep.subr.bf16.mxu0 %v11698_v30  ;;  %v7045_v30 = vld [vmem:[%s18640_s6 + $0x1428] sm:$0xff]  ;;  %v11228_v52 = vpack.c.bf16 %v7036_v57, %v7032_v1  ;;  %v7100_v37 = vld [vmem:[%s18640_s6 + $0x15e0] sm:$0xff] }
 0x72a   :  { %11205 = vmatpush1.bf16.msra.mxu1 %v11204_v56  ;;  %v11230_v24 = vpack.c.bf16 %v7045_v30, %v7041_v51  ;;  %v7040_v56 = vld [vmem:[%s18640_s6 + $0x1400] sm:$0xff]  ;;  %v7109_v32 = vld [vmem:[%s18640_s6 + $0x1628] sm:$0xff] }
 0x72b   :  { %11207 = vmatprep.subr.bf16.mxu1 %v11206_v5  ;;  %v7053_v5 = vld [vmem:[%s18640_s6 + $0x1468] sm:$0xff]  ;;  %v11232_v14 = vpack.c.bf16 %v7044_v59, %v7040_v56  ;;  %v7108_v1 = vld [vmem:[%s18640_s6 + $0x1620] sm:$0xff] }
 0x72c   :  { %11701 = vmatpush1.bf16.msra.mxu0 %v11700_v61  ;;  %v11234_v58 = vpack.c.bf16 %v7053_v5, %v7049_v31  ;;  %v7048_v61 = vld [vmem:[%s18640_s6 + $0x1440] sm:$0xff]  ;;  %v7113_v57 = vld [vmem:[%s18640_s6 + $0x1648] sm:$0xff] }
 0x72d   :  { %11703 = vmatprep.subr.bf16.mxu0 %v11702_v55  ;;  %v7061_v55 = vld [vmem:[%s18640_s6 + $0x14a8] sm:$0xff]  ;;  %v11236_v16 = vpack.c.bf16 %v7052_v29, %v7048_v61  ;;  %v7116_v56 = vld [vmem:[%s18640_s6 + $0x1660] sm:$0xff] }
 0x72e   :  { %11209 = vmatpush1.bf16.msra.mxu1 %v11208_v38  ;;  %v11238_v13 = vpack.c.bf16 %v7061_v55, %v7057_v3  ;;  %v7056_v38 = vld [vmem:[%s18640_s6 + $0x1480] sm:$0xff]  ;;  %v7117_v51 = vld [vmem:[%s18640_s6 + $0x1668] sm:$0xff] }
 0x72f   :  { %11211 = vmatprep.subr.bf16.mxu1 %v11210_v35  ;;  %v7068_v35 = vld [vmem:[%s18640_s6 + $0x14e0] sm:$0xff]  ;;  %v7121_v59 = vld [vmem:[%s18640_s6 + $0x1688] sm:$0xff] }
 0x730   :  { %11705 = vmatpush1.bf16.msra.mxu0 %v11704_v62  ;;  %v11244_v62 = vpack.c.bf16 %v7068_v35, %v7064_v23  ;;  %v7125_v31 = vld [vmem:[%s18640_s6 + $0x16a8] sm:$0xff]  ;;  %v7124_v61 = vld [vmem:[%s18640_s6 + $0x16a0] sm:$0xff] }
 0x731   :  { %11707 = vmatprep.subr.bf16.mxu0 %v11706_v0  ;;  %v7076_v0 = vld [vmem:[%s18640_s6 + $0x1520] sm:$0xff]  ;;  %v7129_v29 = vld [vmem:[%s18640_s6 + $0x16c8] sm:$0xff] }
 0x732   :  { %11213 = vmatpush1.bf16.msra.mxu1 %v11212_v34  ;;  %v11248_v34 = vpack.c.bf16 %v7076_v0, %v7072_v48  ;;  %v7133_v3 = vld [vmem:[%s18640_s6 + $0x16e8] sm:$0xff]  ;;  %v7140_v23 = vld [vmem:[%s18640_s6 + $0x1720] sm:$0xff] }
 0x733   :  { %11215 = vmatprep.subr.bf16.mxu1 %v11214_v33  ;;  %v11250_v33 = vpack.c.bf16 %v7085_v2, %v7081_v21  ;;  %v7145_v35 = vld [vmem:[%s18640_s6 + $0x1748] sm:$0xff]  ;;  %v7148_v48 = vld [vmem:[%s18640_s6 + $0x1760] sm:$0xff] }
 0x734   :  { %11709 = vmatpush1.bf16.msra.mxu0 %v11708_v40  ;;  %v7089_v40 = vld [vmem:[%s18640_s6 + $0x1588] sm:$0xff]  ;;  %v7156_v12 = vld [vmem:[%s18640_s6 + $0x17a0] sm:$0xff] }
 0x735   :  { %v7153_v0 = vld [vmem:[%s18640_s6 + $0x1788] sm:$0xff] }
 0x736   :  { %11217 = vmatpush1.bf16.msra.mxu1 %v11216_v4  ;;  %v11254_v4 = vpack.c.bf16 %v7093_v28, %v7089_v40  ;;  %v7157_v21 = vld [vmem:[%s18640_s6 + $0x17a8] sm:$0xff] }
 0x737   :  { %8574 = vmatmul.mubr.msk.f32.vlgmr.msra.gmra.mrb[76].mxu0 %vm3577_vm5, %v6399_v19  ;;  %11219 = vmatprep.subr.bf16.mxu1 %v11218_v9  ;;  %v7088_v9 = vld [vmem:[%s18640_s6 + $0x1580] sm:$0xff]  ;;  %v7165_v40 = vld [vmem:[%s18640_s6 + $0x17e8] sm:$0xff] }
 0x738   :  { %v11256_v50 = vpack.c.bf16 %v7092_v7, %v7088_v9  ;;  %v7164_v9 = vld [vmem:[%s18640_s6 + $0x17e0] sm:$0xff]  ;;  %v7169_v7 = vld [vmem:[%s18640_s6 + $0x1808] sm:$0xff] }
 0x73a   :  { %11221 = vmatpush1.bf16.msra.mxu1 %v11220_v11  ;;  %v11258_v11 = vpack.c.bf16 %v7101_v63, %v7097_v49  ;;  %v7173_v49 = vld [vmem:[%s18640_s6 + $0x1828] sm:$0xff] }
 0x73b   :  { %11223 = vmatprep.subr.bf16.mxu1 %v11222_v39  ;;  %v7096_v39 = vld [vmem:[%s18640_s6 + $0x15c0] sm:$0xff] }
 0x73c   :  { %v11260_v8 = vpack.c.bf16 %v7100_v37, %v7096_v39  ;;  %v7172_v39 = vld [vmem:[%s18640_s6 + $0x1820] sm:$0xff]  ;;  %v7177_v37 = vld [vmem:[%s18640_s6 + $0x1848] sm:$0xff] }
 0x73e   :  { %11225 = vmatpush1.bf16.msra.mxu1 %v11224_v22  ;;  %v11262_v22 = vpack.c.bf16 %v7109_v32, %v7105_v17  ;;  %v7181_v17 = vld [vmem:[%s18640_s6 + $0x1868] sm:$0xff] }
 0x73f   :  { %11227 = vmatprep.subr.bf16.mxu1 %v11226_v6  ;;  %v7104_v6 = vld [vmem:[%s18640_s6 + $0x1600] sm:$0xff] }
 0x740   :  { %v11264_v30 = vpack.c.bf16 %v7108_v1, %v7104_v6  ;;  %v7180_v6 = vld [vmem:[%s18640_s6 + $0x1860] sm:$0xff]  ;;  %v7185_v1 = vld [vmem:[%s18640_s6 + $0x1888] sm:$0xff] }
 0x742   :  { %11229 = vmatpush1.bf16.msra.mxu1 %v11228_v52  ;;  %v11266_v52 = vpack.c.bf16 %v7117_v51, %v7113_v57  ;;  %v7189_v57 = vld [vmem:[%s18640_s6 + $0x18a8] sm:$0xff] }
 0x743   :  { %11231 = vmatprep.subr.bf16.mxu1 %v11230_v24  ;;  %v7112_v24 = vld [vmem:[%s18640_s6 + $0x1640] sm:$0xff] }
 0x744   :  { %v11268_v5 = vpack.c.bf16 %v7116_v56, %v7112_v24  ;;  %v7188_v24 = vld [vmem:[%s18640_s6 + $0x18a0] sm:$0xff]  ;;  %v7193_v56 = vld [vmem:[%s18640_s6 + $0x18c8] sm:$0xff] }
 0x745   :  { %7574 = vmatmul.mubr.f32.vlgmr.msra.gmra.mrb[212].mxu1 %v6395_v60  ;;  %v11240_v60 = vpack.c.bf16 %v7060_v15, %v7056_v38  ;;  %v7132_v38 = vld [vmem:[%s18640_s6 + $0x16e0] sm:$0xff]  ;;  %v7137_v15 = vld [vmem:[%s18640_s6 + $0x1708] sm:$0xff] }
 0x746   :  { %11233 = vmatpush1.bf16.msra.mxu1 %v11232_v14  ;;  %7644 = vmatprep.mubr.f32.mxu1 %v6398_v47  ;;  %v11242_v47 = vpack.c.bf16 %v7069_v25, %v7065_v44  ;;  %v11270_v14 = vpack.c.bf16 %v7125_v31, %v7121_v59  ;;  %v7141_v44 = vld [vmem:[%s18640_s6 + $0x1728] sm:$0xff]  ;;  %v7192_v59 = vld [vmem:[%s18640_s6 + $0x18c0] sm:$0xff] }
 0x747   :  { %11235 = vmatprep.subr.bf16.mxu1 %v11234_v58  ;;  %v7120_v58 = vld [vmem:[%s18640_s6 + $0x1680] sm:$0xff] }
 0x748   :  { %v11272_v55 = vpack.c.bf16 %v7124_v61, %v7120_v58  ;;  %v7196_v31 = vld [vmem:[%s18640_s6 + $0x18e0] sm:$0xff] }
 0x74a   :  { %11237 = vmatpush1.bf16.msra.mxu1 %v11236_v16  ;;  %v11274_v16 = vpack.c.bf16 %v7133_v3, %v7129_v29 }
 0x74b   :  { %11239 = vmatprep.subr.bf16.mxu1 %v11238_v13  ;;  %v7128_v13 = vld [vmem:[%s18640_s6 + $0x16c0] sm:$0xff] }
 0x74c   :  { %v11276_v25 = vpack.c.bf16 %v7132_v38, %v7128_v13 }
 0x74e   :  { %11241 = vmatpush1.bf16.msra.mxu1 %v11240_v60  ;;  %v11278_v60 = vpack.c.bf16 %v7141_v44, %v7137_v15 }
 0x74f   :  { %11243 = vmatprep.subr.bf16.mxu1 %v11242_v47  ;;  %v7136_v47 = vld [vmem:[%s18640_s6 + $0x1700] sm:$0xff] }
 0x750   :  { %v11280_v53 = vpack.c.bf16 %v7140_v23, %v7136_v47 }
 0x752   :  { %11245 = vmatpush1.bf16.msra.mxu1 %v11244_v62  ;;  %v11282_v62 = vpack.c.bf16 %v7149_v46, %v7145_v35 }
 0x753   :  { %11247 = vmatprep.subr.bf16.mxu1 %v11246_v45  ;;  %v7144_v45 = vld [vmem:[%s18640_s6 + $0x1740] sm:$0xff] }
 0x754   :  { %v11284_v2 = vpack.c.bf16 %v7148_v48, %v7144_v45 }
 0x756   :  { %11249 = vmatpush1.bf16.msra.mxu1 %v11248_v34  ;;  %v11286_v34 = vpack.c.bf16 %v7157_v21, %v7153_v0 }
 0x757   :  { %11251 = vmatprep.subr.bf16.mxu1 %v11250_v33  ;;  %v7152_v33 = vld [vmem:[%s18640_s6 + $0x1780] sm:$0xff] }
 0x758   :  { %v11288_v28 = vpack.c.bf16 %v7156_v12, %v7152_v33 }
 0x75a   :  { %11253 = vmatpush1.bf16.msra.mxu1 %v11252_v42  ;;  %v11290_v42 = vpack.c.bf16 %v7165_v40, %v7161_v18 }
 0x75b   :  { %11255 = vmatprep.subr.bf16.mxu1 %v11254_v4  ;;  %v7160_v4 = vld [vmem:[%s18640_s6 + $0x17c0] sm:$0xff] }
 0x75c   :  { %v11292_v63 = vpack.c.bf16 %v7164_v9, %v7160_v4 }
 0x75e   :  { %11257 = vmatpush1.bf16.msra.mxu1 %v11256_v50  ;;  %v11294_v50 = vpack.c.bf16 %v7173_v49, %v7169_v7 }
 0x75f   :  { %11259 = vmatprep.subr.bf16.mxu1 %v11258_v11  ;;  %v7168_v11 = vld [vmem:[%s18640_s6 + $0x1800] sm:$0xff] }
 0x760   :  { %v11296_v32 = vpack.c.bf16 %v7172_v39, %v7168_v11 }
 0x762   :  { %11261 = vmatpush1.bf16.msra.mxu1 %v11260_v8  ;;  %v11298_v8 = vpack.c.bf16 %v7181_v17, %v7177_v37 }
 0x763   :  { %11263 = vmatprep.subr.bf16.mxu1 %v11262_v22  ;;  %v7176_v22 = vld [vmem:[%s18640_s6 + $0x1840] sm:$0xff] }
 0x764   :  { %v11300_v51 = vpack.c.bf16 %v7180_v6, %v7176_v22 }
 0x766   :  { %11265 = vmatpush1.bf16.msra.mxu1 %v11264_v30  ;;  %v11302_v30 = vpack.c.bf16 %v7189_v57, %v7185_v1 }
 0x767   :  { %11267 = vmatprep.subr.bf16.mxu1 %v11266_v52  ;;  %v7184_v52 = vld [vmem:[%s18640_s6 + $0x1880] sm:$0xff] }
 0x76a   :  { %11269 = vmatpush1.bf16.msra.mxu1 %v11268_v5  ;;  %v11308_v5 = vpack.c.bf16 %v7196_v31, %v7192_v59 }
 0x76b   :  { %11271 = vmatprep.subr.bf16.mxu1 %v11270_v14  ;;  %v7200_v14 = vld [vmem:[%s18642_s7] sm:$0xf] }
 0x76c   :  { %v7213_v58 = vrot.slane %v7200_v14, %v16548_v54  ;;  %v7217_v61 = vrot.slane %v7200_v14, %v16557_v10  ;;  %v7205_v36 = vrot.slane %v7200_v14, %v16109_v43 }
 0x76e   :  { %11273 = vmatpush1.bf16.msra.mxu1 %v11272_v55 }
 0x76f   :  { %11275 = vmatprep.subr.bf16.mxu1 %v11274_v16 }
 0x772   :  { %11277 = vmatpush1.bf16.msra.mxu1 %v11276_v25 }
 0x773   :  { %11279 = vmatprep.subr.bf16.mxu1 %v11278_v60 }
 0x776   :  { %11281 = vmatpush1.bf16.msra.mxu1 %v11280_v53 }
 0x777   :  { %11283 = vmatprep.subr.bf16.mxu1 %v11282_v62 }
 0x77a   :  { %11285 = vmatpush1.bf16.msra.mxu1 %v11284_v2 }
 0x77b   :  { %11287 = vmatprep.subr.bf16.mxu1 %v11286_v34 }
 0x77e   :  { %11289 = vmatpush1.bf16.msra.mxu1 %v11288_v28 }
 0x77f   :  { %11291 = vmatprep.subr.bf16.mxu1 %v11290_v42 }
 0x782   :  { %11293 = vmatpush1.bf16.msra.mxu1 %v11292_v63 }
 0x783   :  { %11295 = vmatprep.subr.bf16.mxu1 %v11294_v50 }
 0x785   :  { %7645 = vmatmul.mubr.f32.vlgmr.msra.gmra.mrb[212].mxu1 %v6397_v27  ;;  %v11306_v27 = vpack.c.bf16 %v7197_v20, %v7193_v56 }
 0x786   :  { %11297 = vmatpush1.bf16.msra.mxu1 %v11296_v32  ;;  %7715 = vmatprep.mubr.f32.mxu1 %v11780_v26  ;;  %v11304_v26 = vpack.c.bf16 %v7188_v24, %v7184_v52 }
 0x787   :  { %11299 = vmatprep.subr.bf16.mxu1 %v11298_v8 }
 0x78a   :  { %11301 = vmatpush1.bf16.msra.mxu1 %v11300_v51 }
 0x78b   :  { %11303 = vmatprep.subr.bf16.mxu1 %v11302_v30 }
 0x78e   :  { %11305 = vmatpush1.bf16.msra.mxu1 %v11304_v26 }
 0x78f   :  { %11307 = vmatprep.subr.bf16.mxu1 %v11306_v27 }
 0x792   :  { %11309 = vmatpush1.bf16.msra.mxu1 %v11308_v5 }
 0x795   :  { %8573 = vmatmul.mubr.msk.f32.vlgmr.msra.gmra.mrb[212].mxu1 %vm3577_vm5, %v6399_v19  ;;  %v7209_v19 = vrot.slane %v7200_v14, %v16112_v41 }
 0x80a   :  { %v8214_v29 = vpop.f32.mrb[76].mxu0 }
 0x80b   :  { %v11726_v3 = vadd.f32 %v8214_v29, %v7213_v58  ;;  %v8216_v55 = vpop.f32.mrb[77].mxu0 }
 0x80c   :  { %v11727_v16 = vadd.f32 %v8216_v55, %v7217_v61 }
 0x80d   :  { %8221 = vst [vmem:[%s18643_s8 + $0x10] sm:$0xff] %v11726_v3 }
 0x80e   :  { %8222 = vst [vmem:[%s18643_s8 + $0x18] sm:$0xff] %v11727_v16 }
 0x868   :  { %v7717_v13 = vpop.f32.mrb[212].mxu1 }
 0x869   :  { %v11724_v54 = vadd.f32 %v7717_v13, %v7205_v36  ;;  %v7719_v38 = vpop.f32.mrb[213].mxu1 }
 0x86a   :  { %v11725_v10 = vadd.f32 %v7719_v38, %v7209_v19 }
 0x86b   :  { %8219 = vst [vmem:[%s18643_s8] sm:$0xff] %v11724_v54 }
 0x86c   :  { %8220 = vst [vmem:[%s18643_s8 + $0x8] sm:$0xff] %v11725_v10 }

</bundles_post_ra>
